<compile_context>
chip_gen: v7x
topology: tpu7x:2x2x1
jax: 0.10.0
libtpu: 0.0.40
codegen_flags: <defaults>
</compile_context>

<pallas_src>
import functools
import math

import numpy as np

import jax
import jax.numpy as jnp
from jax.experimental import pallas as pl
from jax.experimental.pallas import tpu as pltpu

MATMUL_DTYPE = jnp.bfloat16      # MXU operand / weight-storage dtype (accumulation is f32)
LN_EPS = 1e-5
_BATCH_MASK = -1e30              # block-diagonal (cross-batch) additive score mask
_PAD_MASK = -1e9                 # key-padding additive score mask


# ----------------------------- in-kernel helpers (traced inside Pallas kernels) -----------------------------

def _proj(x, w_ref, b_ref):
    """x @ W + b with bf16 MXU operands and f32 accumulation."""
    return jnp.dot(x.astype(w_ref.dtype), w_ref[...],
                   preferred_element_type=jnp.float32) + b_ref[...]


def _layer_norm(x, g, b, eps):
    mu = jnp.mean(x, axis=-1, keepdims=True)
    var = jnp.mean(jnp.square(x - mu), axis=-1, keepdims=True)
    return (x - mu) * jax.lax.rsqrt(var + eps) * g + b


def _attend(q, k, v, head_mask, head_seg, head_cols, bias, num_heads):
    """All heads and all batch rows of one attention in two MXU matmuls.

    q, k, v   : (R, E) f32, R = N*S rows (batch folded into M).
    head_mask : (H*R, E) 0/1 const, head_mask[h*R + j, e] = (e // Dh == h).
    head_seg  : (H, H*R) 0/1 const, head_seg[h, h'*R + j] = (h == h').
    head_cols : (H, E)   0/1 const, head_cols[h, e]       = (e // Dh == h).
    bias      : (R, H*R) additive score bias (block-diag batch mask + optional key padding),
                column h*R + j is key row j for head h.
    """
    R, E = q.shape
    scale = 1.0 / math.sqrt(E // num_heads)                    # PyTorch's 1/sqrt(head_dim)
    # Row-tiled, head-masked K and V: row h*R + j carries key/value j restricted to head h's
    # feature columns (everything stays 128-lane dense; no per-head slicing).
    k_rep = jnp.concatenate([k] * num_heads, axis=0) * head_mask     # (H*R, E)
    v_rep = jnp.concatenate([v] * num_heads, axis=0) * head_mask     # (H*R, E)
    s = jax.lax.dot_general(q * scale, k_rep, (((1,), (1,)), ((), ())),
                            preferred_element_type=jnp.float32) + bias        # (R, H*R)
    # Row-global max is per-head-softmax invariant (same shift for every head of a row).
    s = s - jnp.max(s, axis=-1, keepdims=True)
    p = jnp.exp(s)                                                              # (R, H*R)
    o = jnp.dot(p, v_rep, preferred_element_type=jnp.float32)                  # (R, E) unnormalized
    denom = jax.lax.dot_general(p, head_seg, (((1,), (1,)), ((), ())),
                                preferred_element_type=jnp.float32)            # (R, H) per-head sums
    inv = pl.reciprocal(denom, approx=True)                                    # EUP slot, not VALU
    # broadcast per-head 1/denom back onto each head's feature columns
    return o * jnp.dot(inv, head_cols, preferred_element_type=jnp.float32)


# ----------------------------- fused stack kernels -----------------------------

def _encoder_stack_kernel(x_ref, hm_ref, hs_ref, hc_ref, bias_ref,
                          wq_ref, bq_ref, wk_ref, bk_ref, wv_ref, bv_ref, wo_ref, bo_ref,
                          ln1g_ref, ln1b_ref,
                          w1_ref, b1_ref, w2_ref, b2_ref,
                          ln2g_ref, ln2b_ref,
                          fng_ref, fnb_ref,
                          o_ref, h_ref, *, num_heads, eps):
    l = pl.program_id(0)

    @pl.when(l == 0)
    def _():
        h_ref[...] = x_ref[...]                       # load the stack input once

    x = h_ref[...]                                    # (R, E) carried activation (VMEM resident)
    a = _attend(_proj(x, wq_ref, bq_ref), _proj(x, wk_ref, bk_ref), _proj(x, wv_ref, bv_ref),
                hm_ref[...], hs_ref[...], hc_ref[...], bias_ref[...], num_heads)
    a = _proj(a, wo_ref, bo_ref)
    y = _layer_norm(x + a, ln1g_ref[...], ln1b_ref[...], eps)
    # feed-forward: the (R, 2048) hidden never leaves VMEM
    hidden = jnp.maximum(_proj(y, w1_ref, b1_ref), 0.0)
    f = _proj(hidden, w2_ref, b2_ref)
    out = _layer_norm(y + f, ln2g_ref[...], ln2b_ref[...], eps)
    h_ref[...] = out

    @pl.when(l == pl.num_programs(0) - 1)
    def _():                                          # fused final encoder LayerNorm epilogue
        o_ref[...] = _layer_norm(out, fng_ref[...], fnb_ref[...], eps).astype(o_ref.dtype)


def _decoder_stack_kernel(x_ref, mem_ref, hm_ref, hs_ref, hc_ref, bias_ref,
                          swq_ref, sbq_ref, swk_ref, sbk_ref, swv_ref, sbv_ref, swo_ref, sbo_ref,
                          ln1g_ref, ln1b_ref,
                          cwq_ref, cbq_ref, cwk_ref, cbk_ref, cwv_ref, cbv_ref, cwo_ref, cbo_ref,
                          ln2g_ref, ln2b_ref,
                          w1_ref, b1_ref, w2_ref, b2_ref,
                          ln3g_ref, ln3b_ref,
                          fng_ref, fnb_ref, fcw_ref, fcb_ref,
                          o_ref, h_ref, *, num_heads, eps):
    l = pl.program_id(0)

    @pl.when(l == 0)
    def _():
        h_ref[...] = x_ref[...]

    x = h_ref[...]                                    # (R, E) decoder state
    mem = mem_ref[...]                                # (R, E) encoder memory
    hm = hm_ref[...]
    hs = hs_ref[...]
    hc = hc_ref[...]
    bias = bias_ref[...]

    # self-attention
    a = _attend(_proj(x, swq_ref, sbq_ref), _proj(x, swk_ref, sbk_ref), _proj(x, swv_ref, sbv_ref),
                hm, hs, hc, bias, num_heads)
    a = _proj(a, swo_ref, sbo_ref)
    y = _layer_norm(x + a, ln1g_ref[...], ln1b_ref[...], eps)

    # cross-attention over encoder memory
    c = _attend(_proj(y, cwq_ref, cbq_ref), _proj(mem, cwk_ref, cbk_ref), _proj(mem, cwv_ref, cbv_ref),
                hm, hs, hc, bias, num_heads)
    c = _proj(c, cwo_ref, cbo_ref)
    z = _layer_norm(y + c, ln2g_ref[...], ln2b_ref[...], eps)

    # feed-forward
    hidden = jnp.maximum(_proj(z, w1_ref, b1_ref), 0.0)
    f = _proj(hidden, w2_ref, b2_ref)
    out = _layer_norm(z + f, ln3g_ref[...], ln3b_ref[...], eps)
    h_ref[...] = out

    @pl.when(l == pl.num_programs(0) - 1)
    def _():                                          # fused final LayerNorm + output FC epilogue
        yfin = _layer_norm(out, fng_ref[...], fnb_ref[...], eps)
        o_ref[...] = _proj(yfin, fcw_ref, fcb_ref).astype(o_ref.dtype)


# ----------------------------- pallas_call wrappers -----------------------------

def _const_spec(a):
    """Full-array 2D block, constant across the layer grid (fetched once)."""
    return pl.BlockSpec(a.shape, lambda l: (0, 0))


def _layer_spec(a):
    """Per-layer slice of an (L, d1, d2)-stacked tensor; leading dim squeezed in the kernel."""
    return pl.BlockSpec((None,) + a.shape[1:], lambda l: (l, 0, 0))


def _encoder_stack(x2d, bias, head_mask, head_seg, head_cols, ep, final_g, final_b,
                   *, num_heads, eps):
    R, E = x2d.shape
    L = ep["wq"].shape[0]
    consts = [x2d, head_mask, head_seg, head_cols, bias]
    layered = [ep["wq"], ep["bq"], ep["wk"], ep["bk"], ep["wv"], ep["bv"], ep["wo"], ep["bo"],
               ep["ln1_g"], ep["ln1_b"],
               ep["w1"], ep["b1"], ep["w2"], ep["b2"],
               ep["ln2_g"], ep["ln2_b"]]
    finals = [final_g, final_b]
    in_specs = ([_const_spec(a) for a in consts]
                + [_layer_spec(a) for a in layered]
                + [_const_spec(a) for a in finals])
    return pl.pallas_call(
        functools.partial(_encoder_stack_kernel, num_heads=num_heads, eps=eps),
        out_shape=jax.ShapeDtypeStruct((R, E), jnp.float32),
        grid=(L,),
        in_specs=in_specs,
        out_specs=pl.BlockSpec((R, E), lambda l: (0, 0)),
        scratch_shapes=[pltpu.VMEM((R, E), jnp.float32)],
        compiler_params=pltpu.CompilerParams(dimension_semantics=("arbitrary",)),
    )(*(consts + layered + finals))


def _decoder_stack(x2d, mem, bias, head_mask, head_seg, head_cols, dp,
                   final_g, final_b, fc_w, fc_b, *, num_heads, eps):
    R, E = x2d.shape
    O = fc_w.shape[-1]
    L = dp["s_wq"].shape[0]
    consts = [x2d, mem, head_mask, head_seg, head_cols, bias]
    layered = [dp["s_wq"], dp["s_bq"], dp["s_wk"], dp["s_bk"], dp["s_wv"], dp["s_bv"],
               dp["s_wo"], dp["s_bo"], dp["ln1_g"], dp["ln1_b"],
               dp["c_wq"], dp["c_bq"], dp["c_wk"], dp["c_bk"], dp["c_wv"], dp["c_bv"],
               dp["c_wo"], dp["c_bo"], dp["ln2_g"], dp["ln2_b"],
               dp["w1"], dp["b1"], dp["w2"], dp["b2"], dp["ln3_g"], dp["ln3_b"]]
    finals = [final_g, final_b, fc_w, fc_b]
    in_specs = ([_const_spec(a) for a in consts]
                + [_layer_spec(a) for a in layered]
                + [_const_spec(a) for a in finals])
    return pl.pallas_call(
        functools.partial(_decoder_stack_kernel, num_heads=num_heads, eps=eps),
        out_shape=jax.ShapeDtypeStruct((R, O), jnp.float32),
        grid=(L,),
        in_specs=in_specs,
        out_specs=pl.BlockSpec((R, O), lambda l: (0, 0)),
        scratch_shapes=[pltpu.VMEM((R, E), jnp.float32)],
        compiler_params=pltpu.CompilerParams(dimension_semantics=("arbitrary",)),
    )(*(consts + layered + finals))


# ----------------------------- forward pass -----------------------------

def transformer_generator_forward(params, x, mask=None, *, num_heads, eps=LN_EPS):
    """x: (S, N, E) float32.  mask: optional (N, S) bool, True = padded source key
    (src_key_padding_mask; applied to encoder self-attention only, as in nn.Transformer)."""
    S, N, E = x.shape
    H = num_heads
    assert E % H == 0
    Dh = E // H
    R = S * N
    # (S, N, E) -> (R, E) is a pure reshape (no transpose / extra HBM copy).
    # Row r = s*N + n, so the batch id of row (or key) r is r % N.
    x2d = x.reshape(R, E)

    # Static attention constants, built with numpy at trace time (baked into the program).
    rb = np.arange(R) % N                                              # batch id per row / key
    bd = np.where(rb[:, None] == rb[None, :], 0.0, _BATCH_MASK).astype(np.float32)   # (R, R)
    bd_big = np.tile(bd, (1, H))                                       # (R, H*R)
    head_of_key = np.repeat(np.arange(H), R)                           # (H*R,)
    head_of_col = np.arange(E) // Dh                                   # (E,)
    head_mask = jnp.asarray((head_of_key[:, None] == head_of_col[None, :]).astype(np.float32))
    head_seg = jnp.asarray((np.arange(H)[:, None] == head_of_key[None, :]).astype(np.float32))
    head_cols = jnp.asarray((np.arange(H)[:, None] == head_of_col[None, :]).astype(np.float32))

    dec_bias = jnp.asarray(bd_big)                                     # block-diag only
    enc_bias = dec_bias
    if mask is not None:
        pad = jnp.where(mask, _PAD_MASK, 0.0).astype(jnp.float32)      # (N, S)
        pad_rows = pad.T.reshape(R)                                    # key j = s*N + n
        enc_bias = dec_bias + jnp.tile(pad_rows, H)[None, :]

    mem = _encoder_stack(x2d, enc_bias, head_mask, head_seg, head_cols,
                         params["enc"], params["enc_norm_g"], params["enc_norm_b"],
                         num_heads=num_heads, eps=eps)
    out2d = _decoder_stack(x2d, mem, dec_bias, head_mask, head_seg, head_cols,
                           params["dec"], params["dec_norm_g"], params["dec_norm_b"],
                           params["fc_w"], params["fc_b"],
                           num_heads=num_heads, eps=eps)
    O = params["fc_w"].shape[-1]
    return out2d.reshape(S, N, O)                                      # back to (S, N, output_dim)


# ----------------------------- deterministic parameter init -----------------------------

class _KeyGen:
    def __init__(self, key):
        self._key = key

    def __call__(self):
        self._key, k = jax.random.split(self._key)
        return k


def _init_linear(kg, L, fan_in, fan_out):
    w = (jax.random.normal(kg(), (L, fan_in, fan_out), jnp.float32)
         / math.sqrt(fan_in)).astype(MATMUL_DTYPE)
    b = jax.random.normal(kg(), (L, 1, fan_out), jnp.float32) * 0.01
    return w, b


def _ln_stack(L, E):
    return jnp.ones((L, 1, E), jnp.float32), jnp.zeros((L, 1, E), jnp.float32)


def init_params(key, input_dim, output_dim, num_encoder_layers,
                num_decoder_layers=6, dim_feedforward=2048):
    kg = _KeyGen(key)
    E, F = input_dim, dim_feedforward
    Le, Ld = num_encoder_layers, num_decoder_layers

    enc = {}
    for nm in ("q", "k", "v", "o"):
        enc["w" + nm], enc["b" + nm] = _init_linear(kg, Le, E, E)
    enc["ln1_g"], enc["ln1_b"] = _ln_stack(Le, E)
    enc["w1"], enc["b1"] = _init_linear(kg, Le, E, F)
    enc["w2"], enc["b2"] = _init_linear(kg, Le, F, E)
    enc["ln2_g"], enc["ln2_b"] = _ln_stack(Le, E)

    dec = {}
    for nm in ("q", "k", "v", "o"):
        dec["s_w" + nm], dec["s_b" + nm] = _init_linear(kg, Ld, E, E)
    dec["ln1_g"], dec["ln1_b"] = _ln_stack(Ld, E)
    for nm in ("q", "k", "v", "o"):
        dec["c_w" + nm], dec["c_b" + nm] = _init_linear(kg, Ld, E, E)
    dec["ln2_g"], dec["ln2_b"] = _ln_stack(Ld, E)
    dec["w1"], dec["b1"] = _init_linear(kg, Ld, E, F)
    dec["w2"], dec["b2"] = _init_linear(kg, Ld, F, E)
    dec["ln3_g"], dec["ln3_b"] = _ln_stack(Ld, E)

    fc_w, fc_b = _init_linear(kg, 1, E, output_dim)
    return {"enc": enc, "dec": dec,
            "enc_norm_g": jnp.ones((1, E), jnp.float32),
            "enc_norm_b": jnp.zeros((1, E), jnp.float32),
            "dec_norm_g": jnp.ones((1, E), jnp.float32),
            "dec_norm_b": jnp.zeros((1, E), jnp.float32),
            "fc_w": fc_w[0], "fc_b": fc_b[0]}


# ----------------------------- main -----------------------------

if __name__ == "__main__":
    # TransformerGenerator(input_dim=32, output_dim=16, num_heads=8, num_layers=3)
    S, N = 8, 2                         # seq_len, batch
    input_dim, output_dim = 32, 16
    num_heads, num_layers = 8, 3        # num_layers -> encoder layers; decoder uses PyTorch default 6

    key = jax.random.PRNGKey(0)
    kx, kp = jax.random.split(key)
    x = jax.random.normal(kx, (S, N, input_dim), jnp.float32)           # (S, N, E)
    params = init_params(kp, input_dim, output_dim,
                         num_encoder_layers=num_layers,
                         num_decoder_layers=6, dim_feedforward=2048)

    # num_heads is a static Python int closed over (NOT part of the jitted params pytree).
    fwd = jax.jit(lambda p, xx: transformer_generator_forward(p, xx, None, num_heads=num_heads))
    y = jax.block_until_ready(fwd(params, x))

    assert y.shape == (S, N, output_dim)
    assert bool(jnp.all(jnp.isfinite(y)))
    # TODO(synk): dropout (p=0.1) inside nn.Transformer is omitted (eval-mode forward = identity).
    print("KERNEL_OK")
</pallas_src>

<mosaic_0001>
module attributes {stable_mosaic.version = 11 : i64} {
  func.func @_encoder_stack_kernel(%arg0: i32, %arg1: memref<16x32xf32, #tpu.memory_space<vmem>>, %arg2: memref<128x32xf32, #tpu.memory_space<vmem>>, %arg3: memref<8x128xf32, #tpu.memory_space<vmem>>, %arg4: memref<8x32xf32, #tpu.memory_space<vmem>>, %arg5: memref<16x128xf32, #tpu.memory_space<vmem>>, %arg6: memref<1x32x32xbf16, #tpu.memory_space<vmem>>, %arg7: memref<1x1x32xf32, #tpu.memory_space<vmem>>, %arg8: memref<1x32x32xbf16, #tpu.memory_space<vmem>>, %arg9: memref<1x1x32xf32, #tpu.memory_space<vmem>>, %arg10: memref<1x32x32xbf16, #tpu.memory_space<vmem>>, %arg11: memref<1x1x32xf32, #tpu.memory_space<vmem>>, %arg12: memref<1x32x32xbf16, #tpu.memory_space<vmem>>, %arg13: memref<1x1x32xf32, #tpu.memory_space<vmem>>, %arg14: memref<1x1x32xf32, #tpu.memory_space<vmem>>, %arg15: memref<1x1x32xf32, #tpu.memory_space<vmem>>, %arg16: memref<1x32x2048xbf16, #tpu.memory_space<vmem>>, %arg17: memref<1x1x2048xf32, #tpu.memory_space<vmem>>, %arg18: memref<1x2048x32xbf16, #tpu.memory_space<vmem>>, %arg19: memref<1x1x32xf32, #tpu.memory_space<vmem>>, %arg20: memref<1x1x32xf32, #tpu.memory_space<vmem>>, %arg21: memref<1x1x32xf32, #tpu.memory_space<vmem>>, %arg22: memref<1x32xf32, #tpu.memory_space<vmem>>, %arg23: memref<1x32xf32, #tpu.memory_space<vmem>>, %arg24: memref<16x32xf32, #tpu.memory_space<vmem>>, %arg25: memref<16x32xf32, #tpu.memory_space<vmem>>) attributes {dimension_semantics = [#tpu.dimension_semantics<arbitrary>], iteration_bounds = array<i64: 3>, scalar_prefetch = 0 : i64, scratch_operands = 1 : i64, tpu.core_type = #tpu.core_type<tc>, window_params = [{pipeline_mode = #tpu.pipeline_mode<synchronous>, transform_indices = @transform_0, window_bounds = array<i64: 16, 32>}, {pipeline_mode = #tpu.pipeline_mode<synchronous>, transform_indices = @transform_1, window_bounds = array<i64: 128, 32>}, {pipeline_mode = #tpu.pipeline_mode<synchronous>, transform_indices = @transform_2, window_bounds = array<i64: 8, 128>}, {pipeline_mode = #tpu.pipeline_mode<synchronous>, transform_indices = @transform_3, window_bounds = array<i64: 8, 32>}, {pipeline_mode = #tpu.pipeline_mode<synchronous>, transform_indices = @transform_4, window_bounds = array<i64: 16, 128>}, {transform_indices = @transform_5, window_bounds = array<i64: 1, 32, 32>}, {transform_indices = @transform_6, window_bounds = array<i64: 1, 1, 32>}, {transform_indices = @transform_7, window_bounds = array<i64: 1, 32, 32>}, {transform_indices = @transform_8, window_bounds = array<i64: 1, 1, 32>}, {transform_indices = @transform_9, window_bounds = array<i64: 1, 32, 32>}, {transform_indices = @transform_10, window_bounds = array<i64: 1, 1, 32>}, {transform_indices = @transform_11, window_bounds = array<i64: 1, 32, 32>}, {transform_indices = @transform_12, window_bounds = array<i64: 1, 1, 32>}, {transform_indices = @transform_13, window_bounds = array<i64: 1, 1, 32>}, {transform_indices = @transform_14, window_bounds = array<i64: 1, 1, 32>}, {transform_indices = @transform_15, window_bounds = array<i64: 1, 32, 2048>}, {transform_indices = @transform_16, window_bounds = array<i64: 1, 1, 2048>}, {transform_indices = @transform_17, window_bounds = array<i64: 1, 2048, 32>}, {transform_indices = @transform_18, window_bounds = array<i64: 1, 1, 32>}, {transform_indices = @transform_19, window_bounds = array<i64: 1, 1, 32>}, {transform_indices = @transform_20, window_bounds = array<i64: 1, 1, 32>}, {pipeline_mode = #tpu.pipeline_mode<synchronous>, transform_indices = @transform_21, window_bounds = array<i64: 1, 32>}, {pipeline_mode = #tpu.pipeline_mode<synchronous>, transform_indices = @transform_22, window_bounds = array<i64: 1, 32>}, {pipeline_mode = #tpu.pipeline_mode<synchronous>, transform_indices = @transform_23, window_bounds = array<i64: 16, 32>}]} {
    %c0_i32 = arith.constant 0 : i32
    %0 = arith.cmpi eq, %arg0, %c0_i32 : i32
    %1 = arith.extui %0 : i1 to i32
    %c0_i32_0 = arith.constant 0 : i32
    %2 = arith.cmpi ne, %1, %c0_i32_0 : i32
    scf.if %2 {
      %c0_83 = arith.constant 0 : index
      %c0_84 = arith.constant 0 : index
      %134 = vector.load %arg1[%c0_83, %c0_84] : memref<16x32xf32, #tpu.memory_space<vmem>>, vector<16x32xf32>
      %c0_85 = arith.constant 0 : index
      %c0_86 = arith.constant 0 : index
      %135 = vector.load %arg25[%c0_85, %c0_86] : memref<16x32xf32, #tpu.memory_space<vmem>>, vector<16x32xf32>
      tpu.vector_store %arg25[%c0_85, %c0_86], %134 {strides = array<i32>} : memref<16x32xf32, #tpu.memory_space<vmem>>, vector<16x32xf32>,
    } else {
    }
    %c0 = arith.constant 0 : index
    %c0_1 = arith.constant 0 : index
    %3 = vector.load %arg25[%c0, %c0_1] : memref<16x32xf32, #tpu.memory_space<vmem>>, vector<16x32xf32>
    %4 = arith.truncf %3 : vector<16x32xf32> to vector<16x32xbf16>
    %c0_2 = arith.constant 0 : index
    %c0_3 = arith.constant 0 : index
    %c0_4 = arith.constant 0 : index
    %5 = vector.load %arg6[%c0_2, %c0_3, %c0_4] : memref<1x32x32xbf16, #tpu.memory_space<vmem>>, vector<1x32x32xbf16>
    %6 = vector.shape_cast %5 : vector<1x32x32xbf16> to vector<32x32xbf16>
    %cst = arith.constant dense<0.000000e+00> : vector<16x32xf32>
    %7 = tpu.matmul %4, %6, %cst {dimension_numbers = #tpu.dot_dimension_numbers<[1], [0], [0], [1], [0, 0, 1, 1], [], []>} : vector<16x32xbf16>, vector<32x32xbf16>, vector<16x32xf32> -> vector<16x32xf32>
    %c0_5 = arith.constant 0 : index
    %c0_6 = arith.constant 0 : index
    %c0_7 = arith.constant 0 : index
    %8 = vector.load %arg7[%c0_5, %c0_6, %c0_7] : memref<1x1x32xf32, #tpu.memory_space<vmem>>, vector<1x1x32xf32>
    %9 = vector.shape_cast %8 : vector<1x1x32xf32> to vector<1x32xf32>
    %10 = vector.broadcast %9 : vector<1x32xf32> to vector<16x32xf32>
    %11 = arith.addf %7, %10 : vector<16x32xf32>
    %12 = arith.truncf %3 : vector<16x32xf32> to vector<16x32xbf16>
    %c0_8 = arith.constant 0 : index
    %c0_9 = arith.constant 0 : index
    %c0_10 = arith.constant 0 : index
    %13 = vector.load %arg8[%c0_8, %c0_9, %c0_10] : memref<1x32x32xbf16, #tpu.memory_space<vmem>>, vector<1x32x32xbf16>
    %14 = vector.shape_cast %13 : vector<1x32x32xbf16> to vector<32x32xbf16>
    %cst_11 = arith.constant dense<0.000000e+00> : vector<16x32xf32>
    %15 = tpu.matmul %12, %14, %cst_11 {dimension_numbers = #tpu.dot_dimension_numbers<[1], [0], [0], [1], [0, 0, 1, 1], [], []>} : vector<16x32xbf16>, vector<32x32xbf16>, vector<16x32xf32> -> vector<16x32xf32>
    %c0_12 = arith.constant 0 : index
    %c0_13 = arith.constant 0 : index
    %c0_14 = arith.constant 0 : index
    %16 = vector.load %arg9[%c0_12, %c0_13, %c0_14] : memref<1x1x32xf32, #tpu.memory_space<vmem>>, vector<1x1x32xf32>
    %17 = vector.shape_cast %16 : vector<1x1x32xf32> to vector<1x32xf32>
    %18 = vector.broadcast %17 : vector<1x32xf32> to vector<16x32xf32>
    %19 = arith.addf %15, %18 : vector<16x32xf32>
    %20 = arith.truncf %3 : vector<16x32xf32> to vector<16x32xbf16>
    %c0_15 = arith.constant 0 : index
    %c0_16 = arith.constant 0 : index
    %c0_17 = arith.constant 0 : index
    %21 = vector.load %arg10[%c0_15, %c0_16, %c0_17] : memref<1x32x32xbf16, #tpu.memory_space<vmem>>, vector<1x32x32xbf16>
    %22 = vector.shape_cast %21 : vector<1x32x32xbf16> to vector<32x32xbf16>
    %cst_18 = arith.constant dense<0.000000e+00> : vector<16x32xf32>
    %23 = tpu.matmul %20, %22, %cst_18 {dimension_numbers = #tpu.dot_dimension_numbers<[1], [0], [0], [1], [0, 0, 1, 1], [], []>} : vector<16x32xbf16>, vector<32x32xbf16>, vector<16x32xf32> -> vector<16x32xf32>
    %c0_19 = arith.constant 0 : index
    %c0_20 = arith.constant 0 : index
    %c0_21 = arith.constant 0 : index
    %24 = vector.load %arg11[%c0_19, %c0_20, %c0_21] : memref<1x1x32xf32, #tpu.memory_space<vmem>>, vector<1x1x32xf32>
    %25 = vector.shape_cast %24 : vector<1x1x32xf32> to vector<1x32xf32>
    %26 = vector.broadcast %25 : vector<1x32xf32> to vector<16x32xf32>
    %27 = arith.addf %23, %26 : vector<16x32xf32>
    %c0_22 = arith.constant 0 : index
    %c0_23 = arith.constant 0 : index
    %28 = vector.load %arg2[%c0_22, %c0_23] : memref<128x32xf32, #tpu.memory_space<vmem>>, vector<128x32xf32>
    %c0_24 = arith.constant 0 : index
    %c0_25 = arith.constant 0 : index
    %29 = vector.load %arg3[%c0_24, %c0_25] : memref<8x128xf32, #tpu.memory_space<vmem>>, vector<8x128xf32>
    %c0_26 = arith.constant 0 : index
    %c0_27 = arith.constant 0 : index
    %30 = vector.load %arg4[%c0_26, %c0_27] : memref<8x32xf32, #tpu.memory_space<vmem>>, vector<8x32xf32>
    %c0_28 = arith.constant 0 : index
    %c0_29 = arith.constant 0 : index
    %31 = vector.load %arg5[%c0_28, %c0_29] : memref<16x128xf32, #tpu.memory_space<vmem>>, vector<16x128xf32>
    %32 = tpu.concatenate %19, %19, %19, %19, %19, %19, %19, %19 in 0 : vector<16x32xf32>, vector<16x32xf32>, vector<16x32xf32>, vector<16x32xf32>, vector<16x32xf32>, vector<16x32xf32>, vector<16x32xf32>, vector<16x32xf32> -> vector<128x32xf32>
    %33 = arith.mulf %32, %28 : vector<128x32xf32>
    %34 = tpu.concatenate %27, %27, %27, %27, %27, %27, %27, %27 in 0 : vector<16x32xf32>, vector<16x32xf32>, vector<16x32xf32>, vector<16x32xf32>, vector<16x32xf32>, vector<16x32xf32>, vector<16x32xf32>, vector<16x32xf32> -> vector<128x32xf32>
    %35 = arith.mulf %34, %28 : vector<128x32xf32>
    %cst_30 = arith.constant 5.000000e-01 : f32
    %36 = vector.broadcast %cst_30 : f32 to vector<16x32xf32>
    %37 = arith.mulf %11, %36 : vector<16x32xf32>
    %cst_31 = arith.constant dense<0.000000e+00> : vector<16x128xf32>
    %38 = tpu.matmul %37, %33, %cst_31 {dimension_numbers = #tpu.dot_dimension_numbers<[1], [1], [0], [0], [0, 0, 1, 0], [], []>} : vector<16x32xf32>, vector<128x32xf32>, vector<16x128xf32> -> vector<16x128xf32>
    %39 = arith.addf %38, %31 : vector<16x128xf32>
    %cst_32 = arith.constant dense<0xFF800000> : vector<16xf32>
    %40 = vector.multi_reduction <maximumf>, %39, %cst_32 [1] : vector<16x128xf32> to vector<16xf32>
    %41 = vector.shape_cast %40 : vector<16xf32> to vector<16x1xf32>
    %42 = vector.broadcast %41 : vector<16x1xf32> to vector<16x128xf32>
    %43 = arith.subf %39, %42 : vector<16x128xf32>
    %44 = math.exp %43 : vector<16x128xf32>
    %cst_33 = arith.constant dense<0.000000e+00> : vector<16x32xf32>
    %45 = tpu.matmul %44, %35, %cst_33 {dimension_numbers = #tpu.dot_dimension_numbers<[1], [0], [0], [1], [0, 0, 1, 1], [], []>} : vector<16x128xf32>, vector<128x32xf32>, vector<16x32xf32> -> vector<16x32xf32>
    %cst_34 = arith.constant dense<0.000000e+00> : vector<16x8xf32>
    %46 = tpu.matmul %44, %29, %cst_34 {dimension_numbers = #tpu.dot_dimension_numbers<[1], [1], [0], [0], [0, 0, 1, 0], [], []>} : vector<16x128xf32>, vector<8x128xf32>, vector<16x8xf32> -> vector<16x8xf32>
    %47 = tpu.reciprocal %46 {approx = true} : vector<16x8xf32> -> vector<16x8xf32>
    %cst_35 = arith.constant dense<0.000000e+00> : vector<16x32xf32>
    %48 = tpu.matmul %47, %30, %cst_35 {dimension_numbers = #tpu.dot_dimension_numbers<[1], [0], [0], [1], [0, 0, 1, 1], [], []>} : vector<16x8xf32>, vector<8x32xf32>, vector<16x32xf32> -> vector<16x32xf32>
    %49 = arith.mulf %45, %48 : vector<16x32xf32>
    %50 = arith.truncf %49 : vector<16x32xf32> to vector<16x32xbf16>
    %c0_36 = arith.constant 0 : index
    %c0_37 = arith.constant 0 : index
    %c0_38 = arith.constant 0 : index
    %51 = vector.load %arg12[%c0_36, %c0_37, %c0_38] : memref<1x32x32xbf16, #tpu.memory_space<vmem>>, vector<1x32x32xbf16>
    %52 = vector.shape_cast %51 : vector<1x32x32xbf16> to vector<32x32xbf16>
    %cst_39 = arith.constant dense<0.000000e+00> : vector<16x32xf32>
    %53 = tpu.matmul %50, %52, %cst_39 {dimension_numbers = #tpu.dot_dimension_numbers<[1], [0], [0], [1], [0, 0, 1, 1], [], []>} : vector<16x32xbf16>, vector<32x32xbf16>, vector<16x32xf32> -> vector<16x32xf32>
    %c0_40 = arith.constant 0 : index
    %c0_41 = arith.constant 0 : index
    %c0_42 = arith.constant 0 : index
    %54 = vector.load %arg13[%c0_40, %c0_41, %c0_42] : memref<1x1x32xf32, #tpu.memory_space<vmem>>, vector<1x1x32xf32>
    %55 = vector.shape_cast %54 : vector<1x1x32xf32> to vector<1x32xf32>
    %56 = vector.broadcast %55 : vector<1x32xf32> to vector<16x32xf32>
    %57 = arith.addf %53, %56 : vector<16x32xf32>
    %58 = arith.addf %3, %57 : vector<16x32xf32>
    %c0_43 = arith.constant 0 : index
    %c0_44 = arith.constant 0 : index
    %c0_45 = arith.constant 0 : index
    %59 = vector.load %arg14[%c0_43, %c0_44, %c0_45] : memref<1x1x32xf32, #tpu.memory_space<vmem>>, vector<1x1x32xf32>
    %60 = vector.shape_cast %59 : vector<1x1x32xf32> to vector<1x32xf32>
    %c0_46 = arith.constant 0 : index
    %c0_47 = arith.constant 0 : index
    %c0_48 = arith.constant 0 : index
    %61 = vector.load %arg15[%c0_46, %c0_47, %c0_48] : memref<1x1x32xf32, #tpu.memory_space<vmem>>, vector<1x1x32xf32>
    %62 = vector.shape_cast %61 : vector<1x1x32xf32> to vector<1x32xf32>
    %cst_49 = arith.constant dense<0.000000e+00> : vector<16xf32>
    %63 = vector.multi_reduction <add>, %58, %cst_49 [1] : vector<16x32xf32> to vector<16xf32>
    %64 = vector.shape_cast %63 : vector<16xf32> to vector<16x1xf32>
    %cst_50 = arith.constant 3.200000e+01 : f32
    %65 = vector.broadcast %cst_50 : f32 to vector<16x1xf32>
    %66 = arith.divf %64, %65 : vector<16x1xf32>
    %67 = vector.broadcast %66 : vector<16x1xf32> to vector<16x32xf32>
    %68 = arith.subf %58, %67 : vector<16x32xf32>
    %69 = arith.mulf %68, %68 : vector<16x32xf32>
    %cst_51 = arith.constant dense<0.000000e+00> : vector<16xf32>
    %70 = vector.multi_reduction <add>, %69, %cst_51 [1] : vector<16x32xf32> to vector<16xf32>
    %71 = vector.shape_cast %70 : vector<16xf32> to vector<16x1xf32>
    %cst_52 = arith.constant 3.200000e+01 : f32
    %72 = vector.broadcast %cst_52 : f32 to vector<16x1xf32>
    %73 = arith.divf %71, %72 : vector<16x1xf32>
    %74 = vector.broadcast %66 : vector<16x1xf32> to vector<16x32xf32>
    %75 = arith.subf %58, %74 : vector<16x32xf32>
    %cst_53 = arith.constant 9.99999974E-6 : f32
    %76 = vector.broadcast %cst_53 : f32 to vector<16x1xf32>
    %77 = arith.addf %73, %76 : vector<16x1xf32>
    %78 = math.rsqrt %77 : vector<16x1xf32>
    %79 = vector.broadcast %78 : vector<16x1xf32> to vector<16x32xf32>
    %80 = arith.mulf %75, %79 : vector<16x32xf32>
    %81 = vector.broadcast %60 : vector<1x32xf32> to vector<16x32xf32>
    %82 = arith.mulf %80, %81 : vector<16x32xf32>
    %83 = vector.broadcast %62 : vector<1x32xf32> to vector<16x32xf32>
    %84 = arith.addf %82, %83 : vector<16x32xf32>
    %85 = arith.truncf %84 : vector<16x32xf32> to vector<16x32xbf16>
    %c0_54 = arith.constant 0 : index
    %c0_55 = arith.constant 0 : index
    %c0_56 = arith.constant 0 : index
    %86 = vector.load %arg16[%c0_54, %c0_55, %c0_56] : memref<1x32x2048xbf16, #tpu.memory_space<vmem>>, vector<1x32x2048xbf16>
    %87 = vector.shape_cast %86 : vector<1x32x2048xbf16> to vector<32x2048xbf16>
    %cst_57 = arith.constant dense<0.000000e+00> : vector<16x2048xf32>
    %88 = tpu.matmul %85, %87, %cst_57 {dimension_numbers = #tpu.dot_dimension_numbers<[1], [0], [0], [1], [0, 0, 1, 1], [], []>} : vector<16x32xbf16>, vector<32x2048xbf16>, vector<16x2048xf32> -> vector<16x2048xf32>
    %c0_58 = arith.constant 0 : index
    %c0_59 = arith.constant 0 : index
    %c0_60 = arith.constant 0 : index
    %89 = vector.load %arg17[%c0_58, %c0_59, %c0_60] : memref<1x1x2048xf32, #tpu.memory_space<vmem>>, vector<1x1x2048xf32>
    %90 = vector.shape_cast %89 : vector<1x1x2048xf32> to vector<1x2048xf32>
    %91 = vector.broadcast %90 : vector<1x2048xf32> to vector<16x2048xf32>
    %92 = arith.addf %88, %91 : vector<16x2048xf32>
    %cst_61 = arith.constant 0.000000e+00 : f32
    %93 = vector.broadcast %cst_61 : f32 to vector<16x2048xf32>
    %94 = arith.maximumf %92, %93 : vector<16x2048xf32>
    %95 = arith.truncf %94 : vector<16x2048xf32> to vector<16x2048xbf16>
    %c0_62 = arith.constant 0 : index
    %c0_63 = arith.constant 0 : index
    %c0_64 = arith.constant 0 : index
    %96 = vector.load %arg18[%c0_62, %c0_63, %c0_64] : memref<1x2048x32xbf16, #tpu.memory_space<vmem>>, vector<1x2048x32xbf16>
    %97 = vector.shape_cast %96 : vector<1x2048x32xbf16> to vector<2048x32xbf16>
    %cst_65 = arith.constant dense<0.000000e+00> : vector<16x32xf32>
    %98 = tpu.matmul %95, %97, %cst_65 {dimension_numbers = #tpu.dot_dimension_numbers<[1], [0], [0], [1], [0, 0, 1, 1], [], []>} : vector<16x2048xbf16>, vector<2048x32xbf16>, vector<16x32xf32> -> vector<16x32xf32>
    %c0_66 = arith.constant 0 : index
    %c0_67 = arith.constant 0 : index
    %c0_68 = arith.constant 0 : index
    %99 = vector.load %arg19[%c0_66, %c0_67, %c0_68] : memref<1x1x32xf32, #tpu.memory_space<vmem>>, vector<1x1x32xf32>
    %100 = vector.shape_cast %99 : vector<1x1x32xf32> to vector<1x32xf32>
    %101 = vector.broadcast %100 : vector<1x32xf32> to vector<16x32xf32>
    %102 = arith.addf %98, %101 : vector<16x32xf32>
    %103 = arith.addf %84, %102 : vector<16x32xf32>
    %c0_69 = arith.constant 0 : index
    %c0_70 = arith.constant 0 : index
    %c0_71 = arith.constant 0 : index
    %104 = vector.load %arg20[%c0_69, %c0_70, %c0_71] : memref<1x1x32xf32, #tpu.memory_space<vmem>>, vector<1x1x32xf32>
    %105 = vector.shape_cast %104 : vector<1x1x32xf32> to vector<1x32xf32>
    %c0_72 = arith.constant 0 : index
    %c0_73 = arith.constant 0 : index
    %c0_74 = arith.constant 0 : index
    %106 = vector.load %arg21[%c0_72, %c0_73, %c0_74] : memref<1x1x32xf32, #tpu.memory_space<vmem>>, vector<1x1x32xf32>
    %107 = vector.shape_cast %106 : vector<1x1x32xf32> to vector<1x32xf32>
    %cst_75 = arith.constant dense<0.000000e+00> : vector<16xf32>
    %108 = vector.multi_reduction <add>, %103, %cst_75 [1] : vector<16x32xf32> to vector<16xf32>
    %109 = vector.shape_cast %108 : vector<16xf32> to vector<16x1xf32>
    %cst_76 = arith.constant 3.200000e+01 : f32
    %110 = vector.broadcast %cst_76 : f32 to vector<16x1xf32>
    %111 = arith.divf %109, %110 : vector<16x1xf32>
    %112 = vector.broadcast %111 : vector<16x1xf32> to vector<16x32xf32>
    %113 = arith.subf %103, %112 : vector<16x32xf32>
    %114 = arith.mulf %113, %113 : vector<16x32xf32>
    %cst_77 = arith.constant dense<0.000000e+00> : vector<16xf32>
    %115 = vector.multi_reduction <add>, %114, %cst_77 [1] : vector<16x32xf32> to vector<16xf32>
    %116 = vector.shape_cast %115 : vector<16xf32> to vector<16x1xf32>
    %cst_78 = arith.constant 3.200000e+01 : f32
    %117 = vector.broadcast %cst_78 : f32 to vector<16x1xf32>
    %118 = arith.divf %116, %117 : vector<16x1xf32>
    %119 = vector.broadcast %111 : vector<16x1xf32> to vector<16x32xf32>
    %120 = arith.subf %103, %119 : vector<16x32xf32>
    %cst_79 = arith.constant 9.99999974E-6 : f32
    %121 = vector.broadcast %cst_79 : f32 to vector<16x1xf32>
    %122 = arith.addf %118, %121 : vector<16x1xf32>
    %123 = math.rsqrt %122 : vector<16x1xf32>
    %124 = vector.broadcast %123 : vector<16x1xf32> to vector<16x32xf32>
    %125 = arith.mulf %120, %124 : vector<16x32xf32>
    %126 = vector.broadcast %105 : vector<1x32xf32> to vector<16x32xf32>
    %127 = arith.mulf %125, %126 : vector<16x32xf32>
    %128 = vector.broadcast %107 : vector<1x32xf32> to vector<16x32xf32>
    %129 = arith.addf %127, %128 : vector<16x32xf32>
    %c0_80 = arith.constant 0 : index
    %c0_81 = arith.constant 0 : index
    %130 = vector.load %arg25[%c0_80, %c0_81] : memref<16x32xf32, #tpu.memory_space<vmem>>, vector<16x32xf32>
    tpu.vector_store %arg25[%c0_80, %c0_81], %129 {strides = array<i32>} : memref<16x32xf32, #tpu.memory_space<vmem>>, vector<16x32xf32>,
    %c2_i32 = arith.constant 2 : i32
    %131 = arith.cmpi eq, %arg0, %c2_i32 : i32
    %132 = arith.extui %131 : i1 to i32
    %c0_i32_82 = arith.constant 0 : i32
    %133 = arith.cmpi ne, %132, %c0_i32_82 : i32
    scf.if %133 {
      %c0_83 = arith.constant 0 : index
      %c0_84 = arith.constant 0 : index
      %134 = vector.load %arg22[%c0_83, %c0_84] : memref<1x32xf32, #tpu.memory_space<vmem>>, vector<1x32xf32>
      %c0_85 = arith.constant 0 : index
      %c0_86 = arith.constant 0 : index
      %135 = vector.load %arg23[%c0_85, %c0_86] : memref<1x32xf32, #tpu.memory_space<vmem>>, vector<1x32xf32>
      %cst_87 = arith.constant dense<0.000000e+00> : vector<16xf32>
      %136 = vector.multi_reduction <add>, %129, %cst_87 [1] : vector<16x32xf32> to vector<16xf32>
      %137 = vector.shape_cast %136 : vector<16xf32> to vector<16x1xf32>
      %cst_88 = arith.constant 3.200000e+01 : f32
      %138 = vector.broadcast %cst_88 : f32 to vector<16x1xf32>
      %139 = arith.divf %137, %138 : vector<16x1xf32>
      %140 = vector.broadcast %139 : vector<16x1xf32> to vector<16x32xf32>
      %141 = arith.subf %129, %140 : vector<16x32xf32>
      %142 = arith.mulf %141, %141 : vector<16x32xf32>
      %cst_89 = arith.constant dense<0.000000e+00> : vector<16xf32>
      %143 = vector.multi_reduction <add>, %142, %cst_89 [1] : vector<16x32xf32> to vector<16xf32>
      %144 = vector.shape_cast %143 : vector<16xf32> to vector<16x1xf32>
      %cst_90 = arith.constant 3.200000e+01 : f32
      %145 = vector.broadcast %cst_90 : f32 to vector<16x1xf32>
      %146 = arith.divf %144, %145 : vector<16x1xf32>
      %147 = vector.broadcast %139 : vector<16x1xf32> to vector<16x32xf32>
      %148 = arith.subf %129, %147 : vector<16x32xf32>
      %cst_91 = arith.constant 9.99999974E-6 : f32
      %149 = vector.broadcast %cst_91 : f32 to vector<16x1xf32>
      %150 = arith.addf %146, %149 : vector<16x1xf32>
      %151 = math.rsqrt %150 : vector<16x1xf32>
      %152 = vector.broadcast %151 : vector<16x1xf32> to vector<16x32xf32>
      %153 = arith.mulf %148, %152 : vector<16x32xf32>
      %154 = vector.broadcast %134 : vector<1x32xf32> to vector<16x32xf32>
      %155 = arith.mulf %153, %154 : vector<16x32xf32>
      %156 = vector.broadcast %135 : vector<1x32xf32> to vector<16x32xf32>
      %157 = arith.addf %155, %156 : vector<16x32xf32>
      %c0_92 = arith.constant 0 : index
      %c0_93 = arith.constant 0 : index
      %158 = vector.load %arg24[%c0_92, %c0_93] : memref<16x32xf32, #tpu.memory_space<vmem>>, vector<16x32xf32>
      tpu.vector_store %arg24[%c0_92, %c0_93], %157 {strides = array<i32>} : memref<16x32xf32, #tpu.memory_space<vmem>>, vector<16x32xf32>,
    } else {
    }
    return
  }
  func.func @transform_0(%arg0: i32) -> (i32, i32) {
    %c0_i32 = arith.constant 0 : i32
    %c0_i32_0 = arith.constant 0 : i32
    %c0_i32_1 = arith.constant 0 : i32
    return %c0_i32, %c0_i32_0 : i32, i32
  }
  func.func @transform_1(%arg0: i32) -> (i32, i32) {
    %c0_i32 = arith.constant 0 : i32
    %c0_i32_0 = arith.constant 0 : i32
    %c0_i32_1 = arith.constant 0 : i32
    return %c0_i32, %c0_i32_0 : i32, i32
  }
  func.func @transform_2(%arg0: i32) -> (i32, i32) {
    %c0_i32 = arith.constant 0 : i32
    %c0_i32_0 = arith.constant 0 : i32
    %c0_i32_1 = arith.constant 0 : i32
    return %c0_i32, %c0_i32_0 : i32, i32
  }
  func.func @transform_3(%arg0: i32) -> (i32, i32) {
    %c0_i32 = arith.constant 0 : i32
    %c0_i32_0 = arith.constant 0 : i32
    %c0_i32_1 = arith.constant 0 : i32
    return %c0_i32, %c0_i32_0 : i32, i32
  }
  func.func @transform_4(%arg0: i32) -> (i32, i32) {
    %c0_i32 = arith.constant 0 : i32
    %c0_i32_0 = arith.constant 0 : i32
    %c0_i32_1 = arith.constant 0 : i32
    return %c0_i32, %c0_i32_0 : i32, i32
  }
  func.func @transform_5(%arg0: i32) -> (i32, i32, i32) {
    %c0_i32 = arith.constant 0 : i32
    %c0_i32_0 = arith.constant 0 : i32
    %c0_i32_1 = arith.constant 0 : i32
    return %arg0, %c0_i32, %c0_i32_0 : i32, i32, i32
  }
  func.func @transform_6(%arg0: i32) -> (i32, i32, i32) {
    %c0_i32 = arith.constant 0 : i32
    %c0_i32_0 = arith.constant 0 : i32
    %c0_i32_1 = arith.constant 0 : i32
    return %arg0, %c0_i32, %c0_i32_0 : i32, i32, i32
  }
  func.func @transform_7(%arg0: i32) -> (i32, i32, i32) {
    %c0_i32 = arith.constant 0 : i32
    %c0_i32_0 = arith.constant 0 : i32
    %c0_i32_1 = arith.constant 0 : i32
    return %arg0, %c0_i32, %c0_i32_0 : i32, i32, i32
  }
  func.func @transform_8(%arg0: i32) -> (i32, i32, i32) {
    %c0_i32 = arith.constant 0 : i32
    %c0_i32_0 = arith.constant 0 : i32
    %c0_i32_1 = arith.constant 0 : i32
    return %arg0, %c0_i32, %c0_i32_0 : i32, i32, i32
  }
  func.func @transform_9(%arg0: i32) -> (i32, i32, i32) {
    %c0_i32 = arith.constant 0 : i32
    %c0_i32_0 = arith.constant 0 : i32
    %c0_i32_1 = arith.constant 0 : i32
    return %arg0, %c0_i32, %c0_i32_0 : i32, i32, i32
  }
  func.func @transform_10(%arg0: i32) -> (i32, i32, i32) {
    %c0_i32 = arith.constant 0 : i32
    %c0_i32_0 = arith.constant 0 : i32
    %c0_i32_1 = arith.constant 0 : i32
    return %arg0, %c0_i32, %c0_i32_0 : i32, i32, i32
  }
  func.func @transform_11(%arg0: i32) -> (i32, i32, i32) {
    %c0_i32 = arith.constant 0 : i32
    %c0_i32_0 = arith.constant 0 : i32
    %c0_i32_1 = arith.constant 0 : i32
    return %arg0, %c0_i32, %c0_i32_0 : i32, i32, i32
  }
  func.func @transform_12(%arg0: i32) -> (i32, i32, i32) {
    %c0_i32 = arith.constant 0 : i32
    %c0_i32_0 = arith.constant 0 : i32
    %c0_i32_1 = arith.constant 0 : i32
    return %arg0, %c0_i32, %c0_i32_0 : i32, i32, i32
  }
  func.func @transform_13(%arg0: i32) -> (i32, i32, i32) {
    %c0_i32 = arith.constant 0 : i32
    %c0_i32_0 = arith.constant 0 : i32
    %c0_i32_1 = arith.constant 0 : i32
    return %arg0, %c0_i32, %c0_i32_0 : i32, i32, i32
  }
  func.func @transform_14(%arg0: i32) -> (i32, i32, i32) {
    %c0_i32 = arith.constant 0 : i32
    %c0_i32_0 = arith.constant 0 : i32
    %c0_i32_1 = arith.constant 0 : i32
    return %arg0, %c0_i32, %c0_i32_0 : i32, i32, i32
  }
  func.func @transform_15(%arg0: i32) -> (i32, i32, i32) {
    %c0_i32 = arith.constant 0 : i32
    %c0_i32_0 = arith.constant 0 : i32
    %c0_i32_1 = arith.constant 0 : i32
    return %arg0, %c0_i32, %c0_i32_0 : i32, i32, i32
  }
  func.func @transform_16(%arg0: i32) -> (i32, i32, i32) {
    %c0_i32 = arith.constant 0 : i32
    %c0_i32_0 = arith.constant 0 : i32
    %c0_i32_1 = arith.constant 0 : i32
    return %arg0, %c0_i32, %c0_i32_0 : i32, i32, i32
  }
  func.func @transform_17(%arg0: i32) -> (i32, i32, i32) {
    %c0_i32 = arith.constant 0 : i32
    %c0_i32_0 = arith.constant 0 : i32
    %c0_i32_1 = arith.constant 0 : i32
    return %arg0, %c0_i32, %c0_i32_0 : i32, i32, i32
  }
  func.func @transform_18(%arg0: i32) -> (i32, i32, i32) {
    %c0_i32 = arith.constant 0 : i32
    %c0_i32_0 = arith.constant 0 : i32
    %c0_i32_1 = arith.constant 0 : i32
    return %arg0, %c0_i32, %c0_i32_0 : i32, i32, i32
  }
  func.func @transform_19(%arg0: i32) -> (i32, i32, i32) {
    %c0_i32 = arith.constant 0 : i32
    %c0_i32_0 = arith.constant 0 : i32
    %c0_i32_1 = arith.constant 0 : i32
    return %arg0, %c0_i32, %c0_i32_0 : i32, i32, i32
  }
  func.func @transform_20(%arg0: i32) -> (i32, i32, i32) {
    %c0_i32 = arith.constant 0 : i32
    %c0_i32_0 = arith.constant 0 : i32
    %c0_i32_1 = arith.constant 0 : i32
    return %arg0, %c0_i32, %c0_i32_0 : i32, i32, i32
  }
  func.func @transform_21(%arg0: i32) -> (i32, i32) {
    %c0_i32 = arith.constant 0 : i32
    %c0_i32_0 = arith.constant 0 : i32
    %c0_i32_1 = arith.constant 0 : i32
    return %c0_i32, %c0_i32_0 : i32, i32
  }
  func.func @transform_22(%arg0: i32) -> (i32, i32) {
    %c0_i32 = arith.constant 0 : i32
    %c0_i32_0 = arith.constant 0 : i32
    %c0_i32_1 = arith.constant 0 : i32
    return %c0_i32, %c0_i32_0 : i32, i32
  }
  func.func @transform_23(%arg0: i32) -> (i32, i32) {
    %c0_i32 = arith.constant 0 : i32
    %c0_i32_0 = arith.constant 0 : i32
    %c0_i32_1 = arith.constant 0 : i32
    return %c0_i32, %c0_i32_0 : i32, i32
  }
}

module attributes {stable_mosaic.version = 11 : i64} {
  func.func @_decoder_stack_kernel(%arg0: i32, %arg1: memref<16x32xf32, #tpu.memory_space<vmem>>, %arg2: memref<16x32xf32, #tpu.memory_space<vmem>>, %arg3: memref<128x32xf32, #tpu.memory_space<vmem>>, %arg4: memref<8x128xf32, #tpu.memory_space<vmem>>, %arg5: memref<8x32xf32, #tpu.memory_space<vmem>>, %arg6: memref<16x128xf32, #tpu.memory_space<vmem>>, %arg7: memref<1x32x32xbf16, #tpu.memory_space<vmem>>, %arg8: memref<1x1x32xf32, #tpu.memory_space<vmem>>, %arg9: memref<1x32x32xbf16, #tpu.memory_space<vmem>>, %arg10: memref<1x1x32xf32, #tpu.memory_space<vmem>>, %arg11: memref<1x32x32xbf16, #tpu.memory_space<vmem>>, %arg12: memref<1x1x32xf32, #tpu.memory_space<vmem>>, %arg13: memref<1x32x32xbf16, #tpu.memory_space<vmem>>, %arg14: memref<1x1x32xf32, #tpu.memory_space<vmem>>, %arg15: memref<1x1x32xf32, #tpu.memory_space<vmem>>, %arg16: memref<1x1x32xf32, #tpu.memory_space<vmem>>, %arg17: memref<1x32x32xbf16, #tpu.memory_space<vmem>>, %arg18: memref<1x1x32xf32, #tpu.memory_space<vmem>>, %arg19: memref<1x32x32xbf16, #tpu.memory_space<vmem>>, %arg20: memref<1x1x32xf32, #tpu.memory_space<vmem>>, %arg21: memref<1x32x32xbf16, #tpu.memory_space<vmem>>, %arg22: memref<1x1x32xf32, #tpu.memory_space<vmem>>, %arg23: memref<1x32x32xbf16, #tpu.memory_space<vmem>>, %arg24: memref<1x1x32xf32, #tpu.memory_space<vmem>>, %arg25: memref<1x1x32xf32, #tpu.memory_space<vmem>>, %arg26: memref<1x1x32xf32, #tpu.memory_space<vmem>>, %arg27: memref<1x32x2048xbf16, #tpu.memory_space<vmem>>, %arg28: memref<1x1x2048xf32, #tpu.memory_space<vmem>>, %arg29: memref<1x2048x32xbf16, #tpu.memory_space<vmem>>, %arg30: memref<1x1x32xf32, #tpu.memory_space<vmem>>, %arg31: memref<1x1x32xf32, #tpu.memory_space<vmem>>, %arg32: memref<1x1x32xf32, #tpu.memory_space<vmem>>, %arg33: memref<1x32xf32, #tpu.memory_space<vmem>>, %arg34: memref<1x32xf32, #tpu.memory_space<vmem>>, %arg35: memref<32x16xbf16, #tpu.memory_space<vmem>>, %arg36: memref<1x16xf32, #tpu.memory_space<vmem>>, %arg37: memref<16x16xf32, #tpu.memory_space<vmem>>, %arg38: memref<16x32xf32, #tpu.memory_space<vmem>>) attributes {dimension_semantics = [#tpu.dimension_semantics<arbitrary>], iteration_bounds = array<i64: 6>, scalar_prefetch = 0 : i64, scratch_operands = 1 : i64, tpu.core_type = #tpu.core_type<tc>, window_params = [{pipeline_mode = #tpu.pipeline_mode<synchronous>, transform_indices = @transform_0, window_bounds = array<i64: 16, 32>}, {pipeline_mode = #tpu.pipeline_mode<synchronous>, transform_indices = @transform_1, window_bounds = array<i64: 16, 32>}, {pipeline_mode = #tpu.pipeline_mode<synchronous>, transform_indices = @transform_2, window_bounds = array<i64: 128, 32>}, {pipeline_mode = #tpu.pipeline_mode<synchronous>, transform_indices = @transform_3, window_bounds = array<i64: 8, 128>}, {pipeline_mode = #tpu.pipeline_mode<synchronous>, transform_indices = @transform_4, window_bounds = array<i64: 8, 32>}, {pipeline_mode = #tpu.pipeline_mode<synchronous>, transform_indices = @transform_5, window_bounds = array<i64: 16, 128>}, {transform_indices = @transform_6, window_bounds = array<i64: 1, 32, 32>}, {transform_indices = @transform_7, window_bounds = array<i64: 1, 1, 32>}, {transform_indices = @transform_8, window_bounds = array<i64: 1, 32, 32>}, {transform_indices = @transform_9, window_bounds = array<i64: 1, 1, 32>}, {transform_indices = @transform_10, window_bounds = array<i64: 1, 32, 32>}, {transform_indices = @transform_11, window_bounds = array<i64: 1, 1, 32>}, {transform_indices = @transform_12, window_bounds = array<i64: 1, 32, 32>}, {transform_indices = @transform_13, window_bounds = array<i64: 1, 1, 32>}, {transform_indices = @transform_14, window_bounds = array<i64: 1, 1, 32>}, {transform_indices = @transform_15, window_bounds = array<i64: 1, 1, 32>}, {transform_indices = @transform_16, window_bounds = array<i64: 1, 32, 32>}, {transform_indices = @transform_17, window_bounds = array<i64: 1, 1, 32>}, {transform_indices = @transform_18, window_bounds = array<i64: 1, 32, 32>}, {transform_indices = @transform_19, window_bounds = array<i64: 1, 1, 32>}, {transform_indices = @transform_20, window_bounds = array<i64: 1, 32, 32>}, {transform_indices = @transform_21, window_bounds = array<i64: 1, 1, 32>}, {transform_indices = @transform_22, window_bounds = array<i64: 1, 32, 32>}, {transform_indices = @transform_23, window_bounds = array<i64: 1, 1, 32>}, {transform_indices = @transform_24, window_bounds = array<i64: 1, 1, 32>}, {transform_indices = @transform_25, window_bounds = array<i64: 1, 1, 32>}, {transform_indices = @transform_26, window_bounds = array<i64: 1, 32, 2048>}, {transform_indices = @transform_27, window_bounds = array<i64: 1, 1, 2048>}, {transform_indices = @transform_28, window_bounds = array<i64: 1, 2048, 32>}, {transform_indices = @transform_29, window_bounds = array<i64: 1, 1, 32>}, {transform_indices = @transform_30, window_bounds = array<i64: 1, 1, 32>}, {transform_indices = @transform_31, window_bounds = array<i64: 1, 1, 32>}, {pipeline_mode = #tpu.pipeline_mode<synchronous>, transform_indices = @transform_32, window_bounds = array<i64: 1, 32>}, {pipeline_mode = #tpu.pipeline_mode<synchronous>, transform_indices = @transform_33, window_bounds = array<i64: 1, 32>}, {pipeline_mode = #tpu.pipeline_mode<synchronous>, transform_indices = @transform_34, window_bounds = array<i64: 32, 16>}, {pipeline_mode = #tpu.pipeline_mode<synchronous>, transform_indices = @transform_35, window_bounds = array<i64: 1, 16>}, {pipeline_mode = #tpu.pipeline_mode<synchronous>, transform_indices = @transform_36, window_bounds = array<i64: 16, 16>}]} {
    %c0_i32 = arith.constant 0 : i32
    %0 = arith.cmpi eq, %arg0, %c0_i32 : i32
    %1 = arith.extui %0 : i1 to i32
    %c0_i32_0 = arith.constant 0 : i32
    %2 = arith.cmpi ne, %1, %c0_i32_0 : i32
    scf.if %2 {
      %c0_130 = arith.constant 0 : index
      %c0_131 = arith.constant 0 : index
      %212 = vector.load %arg1[%c0_130, %c0_131] : memref<16x32xf32, #tpu.memory_space<vmem>>, vector<16x32xf32>
      %c0_132 = arith.constant 0 : index
      %c0_133 = arith.constant 0 : index
      %213 = vector.load %arg38[%c0_132, %c0_133] : memref<16x32xf32, #tpu.memory_space<vmem>>, vector<16x32xf32>
      tpu.vector_store %arg38[%c0_132, %c0_133], %212 {strides = array<i32>} : memref<16x32xf32, #tpu.memory_space<vmem>>, vector<16x32xf32>,
    } else {
    }
    %c0 = arith.constant 0 : index
    %c0_1 = arith.constant 0 : index
    %3 = vector.load %arg38[%c0, %c0_1] : memref<16x32xf32, #tpu.memory_space<vmem>>, vector<16x32xf32>
    %c0_2 = arith.constant 0 : index
    %c0_3 = arith.constant 0 : index
    %4 = vector.load %arg2[%c0_2, %c0_3] : memref<16x32xf32, #tpu.memory_space<vmem>>, vector<16x32xf32>
    %c0_4 = arith.constant 0 : index
    %c0_5 = arith.constant 0 : index
    %5 = vector.load %arg3[%c0_4, %c0_5] : memref<128x32xf32, #tpu.memory_space<vmem>>, vector<128x32xf32>
    %c0_6 = arith.constant 0 : index
    %c0_7 = arith.constant 0 : index
    %6 = vector.load %arg4[%c0_6, %c0_7] : memref<8x128xf32, #tpu.memory_space<vmem>>, vector<8x128xf32>
    %c0_8 = arith.constant 0 : index
    %c0_9 = arith.constant 0 : index
    %7 = vector.load %arg5[%c0_8, %c0_9] : memref<8x32xf32, #tpu.memory_space<vmem>>, vector<8x32xf32>
    %c0_10 = arith.constant 0 : index
    %c0_11 = arith.constant 0 : index
    %8 = vector.load %arg6[%c0_10, %c0_11] : memref<16x128xf32, #tpu.memory_space<vmem>>, vector<16x128xf32>
    %9 = arith.truncf %3 : vector<16x32xf32> to vector<16x32xbf16>
    %c0_12 = arith.constant 0 : index
    %c0_13 = arith.constant 0 : index
    %c0_14 = arith.constant 0 : index
    %10 = vector.load %arg7[%c0_12, %c0_13, %c0_14] : memref<1x32x32xbf16, #tpu.memory_space<vmem>>, vector<1x32x32xbf16>
    %11 = vector.shape_cast %10 : vector<1x32x32xbf16> to vector<32x32xbf16>
    %cst = arith.constant dense<0.000000e+00> : vector<16x32xf32>
    %12 = tpu.matmul %9, %11, %cst {dimension_numbers = #tpu.dot_dimension_numbers<[1], [0], [0], [1], [0, 0, 1, 1], [], []>} : vector<16x32xbf16>, vector<32x32xbf16>, vector<16x32xf32> -> vector<16x32xf32>
    %c0_15 = arith.constant 0 : index
    %c0_16 = arith.constant 0 : index
    %c0_17 = arith.constant 0 : index
    %13 = vector.load %arg8[%c0_15, %c0_16, %c0_17] : memref<1x1x32xf32, #tpu.memory_space<vmem>>, vector<1x1x32xf32>
    %14 = vector.shape_cast %13 : vector<1x1x32xf32> to vector<1x32xf32>
    %15 = vector.broadcast %14 : vector<1x32xf32> to vector<16x32xf32>
    %16 = arith.addf %12, %15 : vector<16x32xf32>
    %17 = arith.truncf %3 : vector<16x32xf32> to vector<16x32xbf16>
    %c0_18 = arith.constant 0 : index
    %c0_19 = arith.constant 0 : index
    %c0_20 = arith.constant 0 : index
    %18 = vector.load %arg9[%c0_18, %c0_19, %c0_20] : memref<1x32x32xbf16, #tpu.memory_space<vmem>>, vector<1x32x32xbf16>
    %19 = vector.shape_cast %18 : vector<1x32x32xbf16> to vector<32x32xbf16>
    %cst_21 = arith.constant dense<0.000000e+00> : vector<16x32xf32>
    %20 = tpu.matmul %17, %19, %cst_21 {dimension_numbers = #tpu.dot_dimension_numbers<[1], [0], [0], [1], [0, 0, 1, 1], [], []>} : vector<16x32xbf16>, vector<32x32xbf16>, vector<16x32xf32> -> vector<16x32xf32>
    %c0_22 = arith.constant 0 : index
    %c0_23 = arith.constant 0 : index
    %c0_24 = arith.constant 0 : index
    %21 = vector.load %arg10[%c0_22, %c0_23, %c0_24] : memref<1x1x32xf32, #tpu.memory_space<vmem>>, vector<1x1x32xf32>
    %22 = vector.shape_cast %21 : vector<1x1x32xf32> to vector<1x32xf32>
    %23 = vector.broadcast %22 : vector<1x32xf32> to vector<16x32xf32>
    %24 = arith.addf %20, %23 : vector<16x32xf32>
    %25 = arith.truncf %3 : vector<16x32xf32> to vector<16x32xbf16>
    %c0_25 = arith.constant 0 : index
    %c0_26 = arith.constant 0 : index
    %c0_27 = arith.constant 0 : index
    %26 = vector.load %arg11[%c0_25, %c0_26, %c0_27] : memref<1x32x32xbf16, #tpu.memory_space<vmem>>, vector<1x32x32xbf16>
    %27 = vector.shape_cast %26 : vector<1x32x32xbf16> to vector<32x32xbf16>
    %cst_28 = arith.constant dense<0.000000e+00> : vector<16x32xf32>
    %28 = tpu.matmul %25, %27, %cst_28 {dimension_numbers = #tpu.dot_dimension_numbers<[1], [0], [0], [1], [0, 0, 1, 1], [], []>} : vector<16x32xbf16>, vector<32x32xbf16>, vector<16x32xf32> -> vector<16x32xf32>
    %c0_29 = arith.constant 0 : index
    %c0_30 = arith.constant 0 : index
    %c0_31 = arith.constant 0 : index
    %29 = vector.load %arg12[%c0_29, %c0_30, %c0_31] : memref<1x1x32xf32, #tpu.memory_space<vmem>>, vector<1x1x32xf32>
    %30 = vector.shape_cast %29 : vector<1x1x32xf32> to vector<1x32xf32>
    %31 = vector.broadcast %30 : vector<1x32xf32> to vector<16x32xf32>
    %32 = arith.addf %28, %31 : vector<16x32xf32>
    %33 = tpu.concatenate %24, %24, %24, %24, %24, %24, %24, %24 in 0 : vector<16x32xf32>, vector<16x32xf32>, vector<16x32xf32>, vector<16x32xf32>, vector<16x32xf32>, vector<16x32xf32>, vector<16x32xf32>, vector<16x32xf32> -> vector<128x32xf32>
    %34 = arith.mulf %33, %5 : vector<128x32xf32>
    %35 = tpu.concatenate %32, %32, %32, %32, %32, %32, %32, %32 in 0 : vector<16x32xf32>, vector<16x32xf32>, vector<16x32xf32>, vector<16x32xf32>, vector<16x32xf32>, vector<16x32xf32>, vector<16x32xf32>, vector<16x32xf32> -> vector<128x32xf32>
    %36 = arith.mulf %35, %5 : vector<128x32xf32>
    %cst_32 = arith.constant 5.000000e-01 : f32
    %37 = vector.broadcast %cst_32 : f32 to vector<16x32xf32>
    %38 = arith.mulf %16, %37 : vector<16x32xf32>
    %cst_33 = arith.constant dense<0.000000e+00> : vector<16x128xf32>
    %39 = tpu.matmul %38, %34, %cst_33 {dimension_numbers = #tpu.dot_dimension_numbers<[1], [1], [0], [0], [0, 0, 1, 0], [], []>} : vector<16x32xf32>, vector<128x32xf32>, vector<16x128xf32> -> vector<16x128xf32>
    %40 = arith.addf %39, %8 : vector<16x128xf32>
    %cst_34 = arith.constant dense<0xFF800000> : vector<16xf32>
    %41 = vector.multi_reduction <maximumf>, %40, %cst_34 [1] : vector<16x128xf32> to vector<16xf32>
    %42 = vector.shape_cast %41 : vector<16xf32> to vector<16x1xf32>
    %43 = vector.broadcast %42 : vector<16x1xf32> to vector<16x128xf32>
    %44 = arith.subf %40, %43 : vector<16x128xf32>
    %45 = math.exp %44 : vector<16x128xf32>
    %cst_35 = arith.constant dense<0.000000e+00> : vector<16x32xf32>
    %46 = tpu.matmul %45, %36, %cst_35 {dimension_numbers = #tpu.dot_dimension_numbers<[1], [0], [0], [1], [0, 0, 1, 1], [], []>} : vector<16x128xf32>, vector<128x32xf32>, vector<16x32xf32> -> vector<16x32xf32>
    %cst_36 = arith.constant dense<0.000000e+00> : vector<16x8xf32>
    %47 = tpu.matmul %45, %6, %cst_36 {dimension_numbers = #tpu.dot_dimension_numbers<[1], [1], [0], [0], [0, 0, 1, 0], [], []>} : vector<16x128xf32>, vector<8x128xf32>, vector<16x8xf32> -> vector<16x8xf32>
    %48 = tpu.reciprocal %47 {approx = true} : vector<16x8xf32> -> vector<16x8xf32>
    %cst_37 = arith.constant dense<0.000000e+00> : vector<16x32xf32>
    %49 = tpu.matmul %48, %7, %cst_37 {dimension_numbers = #tpu.dot_dimension_numbers<[1], [0], [0], [1], [0, 0, 1, 1], [], []>} : vector<16x8xf32>, vector<8x32xf32>, vector<16x32xf32> -> vector<16x32xf32>
    %50 = arith.mulf %46, %49 : vector<16x32xf32>
    %51 = arith.truncf %50 : vector<16x32xf32> to vector<16x32xbf16>
    %c0_38 = arith.constant 0 : index
    %c0_39 = arith.constant 0 : index
    %c0_40 = arith.constant 0 : index
    %52 = vector.load %arg13[%c0_38, %c0_39, %c0_40] : memref<1x32x32xbf16, #tpu.memory_space<vmem>>, vector<1x32x32xbf16>
    %53 = vector.shape_cast %52 : vector<1x32x32xbf16> to vector<32x32xbf16>
    %cst_41 = arith.constant dense<0.000000e+00> : vector<16x32xf32>
    %54 = tpu.matmul %51, %53, %cst_41 {dimension_numbers = #tpu.dot_dimension_numbers<[1], [0], [0], [1], [0, 0, 1, 1], [], []>} : vector<16x32xbf16>, vector<32x32xbf16>, vector<16x32xf32> -> vector<16x32xf32>
    %c0_42 = arith.constant 0 : index
    %c0_43 = arith.constant 0 : index
    %c0_44 = arith.constant 0 : index
    %55 = vector.load %arg14[%c0_42, %c0_43, %c0_44] : memref<1x1x32xf32, #tpu.memory_space<vmem>>, vector<1x1x32xf32>
    %56 = vector.shape_cast %55 : vector<1x1x32xf32> to vector<1x32xf32>
    %57 = vector.broadcast %56 : vector<1x32xf32> to vector<16x32xf32>
    %58 = arith.addf %54, %57 : vector<16x32xf32>
    %59 = arith.addf %3, %58 : vector<16x32xf32>
    %c0_45 = arith.constant 0 : index
    %c0_46 = arith.constant 0 : index
    %c0_47 = arith.constant 0 : index
    %60 = vector.load %arg15[%c0_45, %c0_46, %c0_47] : memref<1x1x32xf32, #tpu.memory_space<vmem>>, vector<1x1x32xf32>
    %61 = vector.shape_cast %60 : vector<1x1x32xf32> to vector<1x32xf32>
    %c0_48 = arith.constant 0 : index
    %c0_49 = arith.constant 0 : index
    %c0_50 = arith.constant 0 : index
    %62 = vector.load %arg16[%c0_48, %c0_49, %c0_50] : memref<1x1x32xf32, #tpu.memory_space<vmem>>, vector<1x1x32xf32>
    %63 = vector.shape_cast %62 : vector<1x1x32xf32> to vector<1x32xf32>
    %cst_51 = arith.constant dense<0.000000e+00> : vector<16xf32>
    %64 = vector.multi_reduction <add>, %59, %cst_51 [1] : vector<16x32xf32> to vector<16xf32>
    %65 = vector.shape_cast %64 : vector<16xf32> to vector<16x1xf32>
    %cst_52 = arith.constant 3.200000e+01 : f32
    %66 = vector.broadcast %cst_52 : f32 to vector<16x1xf32>
    %67 = arith.divf %65, %66 : vector<16x1xf32>
    %68 = vector.broadcast %67 : vector<16x1xf32> to vector<16x32xf32>
    %69 = arith.subf %59, %68 : vector<16x32xf32>
    %70 = arith.mulf %69, %69 : vector<16x32xf32>
    %cst_53 = arith.constant dense<0.000000e+00> : vector<16xf32>
    %71 = vector.multi_reduction <add>, %70, %cst_53 [1] : vector<16x32xf32> to vector<16xf32>
    %72 = vector.shape_cast %71 : vector<16xf32> to vector<16x1xf32>
    %cst_54 = arith.constant 3.200000e+01 : f32
    %73 = vector.broadcast %cst_54 : f32 to vector<16x1xf32>
    %74 = arith.divf %72, %73 : vector<16x1xf32>
    %75 = vector.broadcast %67 : vector<16x1xf32> to vector<16x32xf32>
    %76 = arith.subf %59, %75 : vector<16x32xf32>
    %cst_55 = arith.constant 9.99999974E-6 : f32
    %77 = vector.broadcast %cst_55 : f32 to vector<16x1xf32>
    %78 = arith.addf %74, %77 : vector<16x1xf32>
    %79 = math.rsqrt %78 : vector<16x1xf32>
    %80 = vector.broadcast %79 : vector<16x1xf32> to vector<16x32xf32>
    %81 = arith.mulf %76, %80 : vector<16x32xf32>
    %82 = vector.broadcast %61 : vector<1x32xf32> to vector<16x32xf32>
    %83 = arith.mulf %81, %82 : vector<16x32xf32>
    %84 = vector.broadcast %63 : vector<1x32xf32> to vector<16x32xf32>
    %85 = arith.addf %83, %84 : vector<16x32xf32>
    %86 = arith.truncf %85 : vector<16x32xf32> to vector<16x32xbf16>
    %c0_56 = arith.constant 0 : index
    %c0_57 = arith.constant 0 : index
    %c0_58 = arith.constant 0 : index
    %87 = vector.load %arg17[%c0_56, %c0_57, %c0_58] : memref<1x32x32xbf16, #tpu.memory_space<vmem>>, vector<1x32x32xbf16>
    %88 = vector.shape_cast %87 : vector<1x32x32xbf16> to vector<32x32xbf16>
    %cst_59 = arith.constant dense<0.000000e+00> : vector<16x32xf32>
    %89 = tpu.matmul %86, %88, %cst_59 {dimension_numbers = #tpu.dot_dimension_numbers<[1], [0], [0], [1], [0, 0, 1, 1], [], []>} : vector<16x32xbf16>, vector<32x32xbf16>, vector<16x32xf32> -> vector<16x32xf32>
    %c0_60 = arith.constant 0 : index
    %c0_61 = arith.constant 0 : index
    %c0_62 = arith.constant 0 : index
    %90 = vector.load %arg18[%c0_60, %c0_61, %c0_62] : memref<1x1x32xf32, #tpu.memory_space<vmem>>, vector<1x1x32xf32>
    %91 = vector.shape_cast %90 : vector<1x1x32xf32> to vector<1x32xf32>
    %92 = vector.broadcast %91 : vector<1x32xf32> to vector<16x32xf32>
    %93 = arith.addf %89, %92 : vector<16x32xf32>
    %94 = arith.truncf %4 : vector<16x32xf32> to vector<16x32xbf16>
    %c0_63 = arith.constant 0 : index
    %c0_64 = arith.constant 0 : index
    %c0_65 = arith.constant 0 : index
    %95 = vector.load %arg19[%c0_63, %c0_64, %c0_65] : memref<1x32x32xbf16, #tpu.memory_space<vmem>>, vector<1x32x32xbf16>
    %96 = vector.shape_cast %95 : vector<1x32x32xbf16> to vector<32x32xbf16>
    %cst_66 = arith.constant dense<0.000000e+00> : vector<16x32xf32>
    %97 = tpu.matmul %94, %96, %cst_66 {dimension_numbers = #tpu.dot_dimension_numbers<[1], [0], [0], [1], [0, 0, 1, 1], [], []>} : vector<16x32xbf16>, vector<32x32xbf16>, vector<16x32xf32> -> vector<16x32xf32>
    %c0_67 = arith.constant 0 : index
    %c0_68 = arith.constant 0 : index
    %c0_69 = arith.constant 0 : index
    %98 = vector.load %arg20[%c0_67, %c0_68, %c0_69] : memref<1x1x32xf32, #tpu.memory_space<vmem>>, vector<1x1x32xf32>
    %99 = vector.shape_cast %98 : vector<1x1x32xf32> to vector<1x32xf32>
    %100 = vector.broadcast %99 : vector<1x32xf32> to vector<16x32xf32>
    %101 = arith.addf %97, %100 : vector<16x32xf32>
    %102 = arith.truncf %4 : vector<16x32xf32> to vector<16x32xbf16>
    %c0_70 = arith.constant 0 : index
    %c0_71 = arith.constant 0 : index
    %c0_72 = arith.constant 0 : index
    %103 = vector.load %arg21[%c0_70, %c0_71, %c0_72] : memref<1x32x32xbf16, #tpu.memory_space<vmem>>, vector<1x32x32xbf16>
    %104 = vector.shape_cast %103 : vector<1x32x32xbf16> to vector<32x32xbf16>
    %cst_73 = arith.constant dense<0.000000e+00> : vector<16x32xf32>
    %105 = tpu.matmul %102, %104, %cst_73 {dimension_numbers = #tpu.dot_dimension_numbers<[1], [0], [0], [1], [0, 0, 1, 1], [], []>} : vector<16x32xbf16>, vector<32x32xbf16>, vector<16x32xf32> -> vector<16x32xf32>
    %c0_74 = arith.constant 0 : index
    %c0_75 = arith.constant 0 : index
    %c0_76 = arith.constant 0 : index
    %106 = vector.load %arg22[%c0_74, %c0_75, %c0_76] : memref<1x1x32xf32, #tpu.memory_space<vmem>>, vector<1x1x32xf32>
    %107 = vector.shape_cast %106 : vector<1x1x32xf32> to vector<1x32xf32>
    %108 = vector.broadcast %107 : vector<1x32xf32> to vector<16x32xf32>
    %109 = arith.addf %105, %108 : vector<16x32xf32>
    %110 = tpu.concatenate %101, %101, %101, %101, %101, %101, %101, %101 in 0 : vector<16x32xf32>, vector<16x32xf32>, vector<16x32xf32>, vector<16x32xf32>, vector<16x32xf32>, vector<16x32xf32>, vector<16x32xf32>, vector<16x32xf32> -> vector<128x32xf32>
    %111 = arith.mulf %110, %5 : vector<128x32xf32>
    %112 = tpu.concatenate %109, %109, %109, %109, %109, %109, %109, %109 in 0 : vector<16x32xf32>, vector<16x32xf32>, vector<16x32xf32>, vector<16x32xf32>, vector<16x32xf32>, vector<16x32xf32>, vector<16x32xf32>, vector<16x32xf32> -> vector<128x32xf32>
    %113 = arith.mulf %112, %5 : vector<128x32xf32>
    %cst_77 = arith.constant 5.000000e-01 : f32
    %114 = vector.broadcast %cst_77 : f32 to vector<16x32xf32>
    %115 = arith.mulf %93, %114 : vector<16x32xf32>
    %cst_78 = arith.constant dense<0.000000e+00> : vector<16x128xf32>
    %116 = tpu.matmul %115, %111, %cst_78 {dimension_numbers = #tpu.dot_dimension_numbers<[1], [1], [0], [0], [0, 0, 1, 0], [], []>} : vector<16x32xf32>, vector<128x32xf32>, vector<16x128xf32> -> vector<16x128xf32>
    %117 = arith.addf %116, %8 : vector<16x128xf32>
    %cst_79 = arith.constant dense<0xFF800000> : vector<16xf32>
    %118 = vector.multi_reduction <maximumf>, %117, %cst_79 [1] : vector<16x128xf32> to vector<16xf32>
    %119 = vector.shape_cast %118 : vector<16xf32> to vector<16x1xf32>
    %120 = vector.broadcast %119 : vector<16x1xf32> to vector<16x128xf32>
    %121 = arith.subf %117, %120 : vector<16x128xf32>
    %122 = math.exp %121 : vector<16x128xf32>
    %cst_80 = arith.constant dense<0.000000e+00> : vector<16x32xf32>
    %123 = tpu.matmul %122, %113, %cst_80 {dimension_numbers = #tpu.dot_dimension_numbers<[1], [0], [0], [1], [0, 0, 1, 1], [], []>} : vector<16x128xf32>, vector<128x32xf32>, vector<16x32xf32> -> vector<16x32xf32>
    %cst_81 = arith.constant dense<0.000000e+00> : vector<16x8xf32>
    %124 = tpu.matmul %122, %6, %cst_81 {dimension_numbers = #tpu.dot_dimension_numbers<[1], [1], [0], [0], [0, 0, 1, 0], [], []>} : vector<16x128xf32>, vector<8x128xf32>, vector<16x8xf32> -> vector<16x8xf32>
    %125 = tpu.reciprocal %124 {approx = true} : vector<16x8xf32> -> vector<16x8xf32>
    %cst_82 = arith.constant dense<0.000000e+00> : vector<16x32xf32>
    %126 = tpu.matmul %125, %7, %cst_82 {dimension_numbers = #tpu.dot_dimension_numbers<[1], [0], [0], [1], [0, 0, 1, 1], [], []>} : vector<16x8xf32>, vector<8x32xf32>, vector<16x32xf32> -> vector<16x32xf32>
    %127 = arith.mulf %123, %126 : vector<16x32xf32>
    %128 = arith.truncf %127 : vector<16x32xf32> to vector<16x32xbf16>
    %c0_83 = arith.constant 0 : index
    %c0_84 = arith.constant 0 : index
    %c0_85 = arith.constant 0 : index
    %129 = vector.load %arg23[%c0_83, %c0_84, %c0_85] : memref<1x32x32xbf16, #tpu.memory_space<vmem>>, vector<1x32x32xbf16>
    %130 = vector.shape_cast %129 : vector<1x32x32xbf16> to vector<32x32xbf16>
    %cst_86 = arith.constant dense<0.000000e+00> : vector<16x32xf32>
    %131 = tpu.matmul %128, %130, %cst_86 {dimension_numbers = #tpu.dot_dimension_numbers<[1], [0], [0], [1], [0, 0, 1, 1], [], []>} : vector<16x32xbf16>, vector<32x32xbf16>, vector<16x32xf32> -> vector<16x32xf32>
    %c0_87 = arith.constant 0 : index
    %c0_88 = arith.constant 0 : index
    %c0_89 = arith.constant 0 : index
    %132 = vector.load %arg24[%c0_87, %c0_88, %c0_89] : memref<1x1x32xf32, #tpu.memory_space<vmem>>, vector<1x1x32xf32>
    %133 = vector.shape_cast %132 : vector<1x1x32xf32> to vector<1x32xf32>
    %134 = vector.broadcast %133 : vector<1x32xf32> to vector<16x32xf32>
    %135 = arith.addf %131, %134 : vector<16x32xf32>
    %136 = arith.addf %85, %135 : vector<16x32xf32>
    %c0_90 = arith.constant 0 : index
    %c0_91 = arith.constant 0 : index
    %c0_92 = arith.constant 0 : index
    %137 = vector.load %arg25[%c0_90, %c0_91, %c0_92] : memref<1x1x32xf32, #tpu.memory_space<vmem>>, vector<1x1x32xf32>
    %138 = vector.shape_cast %137 : vector<1x1x32xf32> to vector<1x32xf32>
    %c0_93 = arith.constant 0 : index
    %c0_94 = arith.constant 0 : index
    %c0_95 = arith.constant 0 : index
    %139 = vector.load %arg26[%c0_93, %c0_94, %c0_95] : memref<1x1x32xf32, #tpu.memory_space<vmem>>, vector<1x1x32xf32>
    %140 = vector.shape_cast %139 : vector<1x1x32xf32> to vector<1x32xf32>
    %cst_96 = arith.constant dense<0.000000e+00> : vector<16xf32>
    %141 = vector.multi_reduction <add>, %136, %cst_96 [1] : vector<16x32xf32> to vector<16xf32>
    %142 = vector.shape_cast %141 : vector<16xf32> to vector<16x1xf32>
    %cst_97 = arith.constant 3.200000e+01 : f32
    %143 = vector.broadcast %cst_97 : f32 to vector<16x1xf32>
    %144 = arith.divf %142, %143 : vector<16x1xf32>
    %145 = vector.broadcast %144 : vector<16x1xf32> to vector<16x32xf32>
    %146 = arith.subf %136, %145 : vector<16x32xf32>
    %147 = arith.mulf %146, %146 : vector<16x32xf32>
    %cst_98 = arith.constant dense<0.000000e+00> : vector<16xf32>
    %148 = vector.multi_reduction <add>, %147, %cst_98 [1] : vector<16x32xf32> to vector<16xf32>
    %149 = vector.shape_cast %148 : vector<16xf32> to vector<16x1xf32>
    %cst_99 = arith.constant 3.200000e+01 : f32
    %150 = vector.broadcast %cst_99 : f32 to vector<16x1xf32>
    %151 = arith.divf %149, %150 : vector<16x1xf32>
    %152 = vector.broadcast %144 : vector<16x1xf32> to vector<16x32xf32>
    %153 = arith.subf %136, %152 : vector<16x32xf32>
    %cst_100 = arith.constant 9.99999974E-6 : f32
    %154 = vector.broadcast %cst_100 : f32 to vector<16x1xf32>
    %155 = arith.addf %151, %154 : vector<16x1xf32>
    %156 = math.rsqrt %155 : vector<16x1xf32>
    %157 = vector.broadcast %156 : vector<16x1xf32> to vector<16x32xf32>
    %158 = arith.mulf %153, %157 : vector<16x32xf32>
    %159 = vector.broadcast %138 : vector<1x32xf32> to vector<16x32xf32>
    %160 = arith.mulf %158, %159 : vector<16x32xf32>
    %161 = vector.broadcast %140 : vector<1x32xf32> to vector<16x32xf32>
    %162 = arith.addf %160, %161 : vector<16x32xf32>
    %163 = arith.truncf %162 : vector<16x32xf32> to vector<16x32xbf16>
    %c0_101 = arith.constant 0 : index
    %c0_102 = arith.constant 0 : index
    %c0_103 = arith.constant 0 : index
    %164 = vector.load %arg27[%c0_101, %c0_102, %c0_103] : memref<1x32x2048xbf16, #tpu.memory_space<vmem>>, vector<1x32x2048xbf16>
    %165 = vector.shape_cast %164 : vector<1x32x2048xbf16> to vector<32x2048xbf16>
    %cst_104 = arith.constant dense<0.000000e+00> : vector<16x2048xf32>
    %166 = tpu.matmul %163, %165, %cst_104 {dimension_numbers = #tpu.dot_dimension_numbers<[1], [0], [0], [1], [0, 0, 1, 1], [], []>} : vector<16x32xbf16>, vector<32x2048xbf16>, vector<16x2048xf32> -> vector<16x2048xf32>
    %c0_105 = arith.constant 0 : index
    %c0_106 = arith.constant 0 : index
    %c0_107 = arith.constant 0 : index
    %167 = vector.load %arg28[%c0_105, %c0_106, %c0_107] : memref<1x1x2048xf32, #tpu.memory_space<vmem>>, vector<1x1x2048xf32>
    %168 = vector.shape_cast %167 : vector<1x1x2048xf32> to vector<1x2048xf32>
    %169 = vector.broadcast %168 : vector<1x2048xf32> to vector<16x2048xf32>
    %170 = arith.addf %166, %169 : vector<16x2048xf32>
    %cst_108 = arith.constant 0.000000e+00 : f32
    %171 = vector.broadcast %cst_108 : f32 to vector<16x2048xf32>
    %172 = arith.maximumf %170, %171 : vector<16x2048xf32>
    %173 = arith.truncf %172 : vector<16x2048xf32> to vector<16x2048xbf16>
    %c0_109 = arith.constant 0 : index
    %c0_110 = arith.constant 0 : index
    %c0_111 = arith.constant 0 : index
    %174 = vector.load %arg29[%c0_109, %c0_110, %c0_111] : memref<1x2048x32xbf16, #tpu.memory_space<vmem>>, vector<1x2048x32xbf16>
    %175 = vector.shape_cast %174 : vector<1x2048x32xbf16> to vector<2048x32xbf16>
    %cst_112 = arith.constant dense<0.000000e+00> : vector<16x32xf32>
    %176 = tpu.matmul %173, %175, %cst_112 {dimension_numbers = #tpu.dot_dimension_numbers<[1], [0], [0], [1], [0, 0, 1, 1], [], []>} : vector<16x2048xbf16>, vector<2048x32xbf16>, vector<16x32xf32> -> vector<16x32xf32>
    %c0_113 = arith.constant 0 : index
    %c0_114 = arith.constant 0 : index
    %c0_115 = arith.constant 0 : index
    %177 = vector.load %arg30[%c0_113, %c0_114, %c0_115] : memref<1x1x32xf32, #tpu.memory_space<vmem>>, vector<1x1x32xf32>
    %178 = vector.shape_cast %177 : vector<1x1x32xf32> to vector<1x32xf32>
    %179 = vector.broadcast %178 : vector<1x32xf32> to vector<16x32xf32>
    %180 = arith.addf %176, %179 : vector<16x32xf32>
    %181 = arith.addf %162, %180 : vector<16x32xf32>
    %c0_116 = arith.constant 0 : index
    %c0_117 = arith.constant 0 : index
    %c0_118 = arith.constant 0 : index
    %182 = vector.load %arg31[%c0_116, %c0_117, %c0_118] : memref<1x1x32xf32, #tpu.memory_space<vmem>>, vector<1x1x32xf32>
    %183 = vector.shape_cast %182 : vector<1x1x32xf32> to vector<1x32xf32>
    %c0_119 = arith.constant 0 : index
    %c0_120 = arith.constant 0 : index
    %c0_121 = arith.constant 0 : index
    %184 = vector.load %arg32[%c0_119, %c0_120, %c0_121] : memref<1x1x32xf32, #tpu.memory_space<vmem>>, vector<1x1x32xf32>
    %185 = vector.shape_cast %184 : vector<1x1x32xf32> to vector<1x32xf32>
    %cst_122 = arith.constant dense<0.000000e+00> : vector<16xf32>
    %186 = vector.multi_reduction <add>, %181, %cst_122 [1] : vector<16x32xf32> to vector<16xf32>
    %187 = vector.shape_cast %186 : vector<16xf32> to vector<16x1xf32>
    %cst_123 = arith.constant 3.200000e+01 : f32
    %188 = vector.broadcast %cst_123 : f32 to vector<16x1xf32>
    %189 = arith.divf %187, %188 : vector<16x1xf32>
    %190 = vector.broadcast %189 : vector<16x1xf32> to vector<16x32xf32>
    %191 = arith.subf %181, %190 : vector<16x32xf32>
    %192 = arith.mulf %191, %191 : vector<16x32xf32>
    %cst_124 = arith.constant dense<0.000000e+00> : vector<16xf32>
    %193 = vector.multi_reduction <add>, %192, %cst_124 [1] : vector<16x32xf32> to vector<16xf32>
    %194 = vector.shape_cast %193 : vector<16xf32> to vector<16x1xf32>
    %cst_125 = arith.constant 3.200000e+01 : f32
    %195 = vector.broadcast %cst_125 : f32 to vector<16x1xf32>
    %196 = arith.divf %194, %195 : vector<16x1xf32>
    %197 = vector.broadcast %189 : vector<16x1xf32> to vector<16x32xf32>
    %198 = arith.subf %181, %197 : vector<16x32xf32>
    %cst_126 = arith.constant 9.99999974E-6 : f32
    %199 = vector.broadcast %cst_126 : f32 to vector<16x1xf32>
    %200 = arith.addf %196, %199 : vector<16x1xf32>
    %201 = math.rsqrt %200 : vector<16x1xf32>
    %202 = vector.broadcast %201 : vector<16x1xf32> to vector<16x32xf32>
    %203 = arith.mulf %198, %202 : vector<16x32xf32>
    %204 = vector.broadcast %183 : vector<1x32xf32> to vector<16x32xf32>
    %205 = arith.mulf %203, %204 : vector<16x32xf32>
    %206 = vector.broadcast %185 : vector<1x32xf32> to vector<16x32xf32>
    %207 = arith.addf %205, %206 : vector<16x32xf32>
    %c0_127 = arith.constant 0 : index
    %c0_128 = arith.constant 0 : index
    %208 = vector.load %arg38[%c0_127, %c0_128] : memref<16x32xf32, #tpu.memory_space<vmem>>, vector<16x32xf32>
    tpu.vector_store %arg38[%c0_127, %c0_128], %207 {strides = array<i32>} : memref<16x32xf32, #tpu.memory_space<vmem>>, vector<16x32xf32>,
    %c5_i32 = arith.constant 5 : i32
    %209 = arith.cmpi eq, %arg0, %c5_i32 : i32
    %210 = arith.extui %209 : i1 to i32
    %c0_i32_129 = arith.constant 0 : i32
    %211 = arith.cmpi ne, %210, %c0_i32_129 : i32
    scf.if %211 {
      %c0_130 = arith.constant 0 : index
      %c0_131 = arith.constant 0 : index
      %212 = vector.load %arg33[%c0_130, %c0_131] : memref<1x32xf32, #tpu.memory_space<vmem>>, vector<1x32xf32>
      %c0_132 = arith.constant 0 : index
      %c0_133 = arith.constant 0 : index
      %213 = vector.load %arg34[%c0_132, %c0_133] : memref<1x32xf32, #tpu.memory_space<vmem>>, vector<1x32xf32>
      %cst_134 = arith.constant dense<0.000000e+00> : vector<16xf32>
      %214 = vector.multi_reduction <add>, %207, %cst_134 [1] : vector<16x32xf32> to vector<16xf32>
      %215 = vector.shape_cast %214 : vector<16xf32> to vector<16x1xf32>
      %cst_135 = arith.constant 3.200000e+01 : f32
      %216 = vector.broadcast %cst_135 : f32 to vector<16x1xf32>
      %217 = arith.divf %215, %216 : vector<16x1xf32>
      %218 = vector.broadcast %217 : vector<16x1xf32> to vector<16x32xf32>
      %219 = arith.subf %207, %218 : vector<16x32xf32>
      %220 = arith.mulf %219, %219 : vector<16x32xf32>
      %cst_136 = arith.constant dense<0.000000e+00> : vector<16xf32>
      %221 = vector.multi_reduction <add>, %220, %cst_136 [1] : vector<16x32xf32> to vector<16xf32>
      %222 = vector.shape_cast %221 : vector<16xf32> to vector<16x1xf32>
      %cst_137 = arith.constant 3.200000e+01 : f32
      %223 = vector.broadcast %cst_137 : f32 to vector<16x1xf32>
      %224 = arith.divf %222, %223 : vector<16x1xf32>
      %225 = vector.broadcast %217 : vector<16x1xf32> to vector<16x32xf32>
      %226 = arith.subf %207, %225 : vector<16x32xf32>
      %cst_138 = arith.constant 9.99999974E-6 : f32
      %227 = vector.broadcast %cst_138 : f32 to vector<16x1xf32>
      %228 = arith.addf %224, %227 : vector<16x1xf32>
      %229 = math.rsqrt %228 : vector<16x1xf32>
      %230 = vector.broadcast %229 : vector<16x1xf32> to vector<16x32xf32>
      %231 = arith.mulf %226, %230 : vector<16x32xf32>
      %232 = vector.broadcast %212 : vector<1x32xf32> to vector<16x32xf32>
      %233 = arith.mulf %231, %232 : vector<16x32xf32>
      %234 = vector.broadcast %213 : vector<1x32xf32> to vector<16x32xf32>
      %235 = arith.addf %233, %234 : vector<16x32xf32>
      %236 = arith.truncf %235 : vector<16x32xf32> to vector<16x32xbf16>
      %c0_139 = arith.constant 0 : index
      %c0_140 = arith.constant 0 : index
      %237 = vector.load %arg35[%c0_139, %c0_140] : memref<32x16xbf16, #tpu.memory_space<vmem>>, vector<32x16xbf16>
      %cst_141 = arith.constant dense<0.000000e+00> : vector<16x16xf32>
      %238 = tpu.matmul %236, %237, %cst_141 {dimension_numbers = #tpu.dot_dimension_numbers<[1], [0], [0], [1], [0, 0, 1, 1], [], []>} : vector<16x32xbf16>, vector<32x16xbf16>, vector<16x16xf32> -> vector<16x16xf32>
      %c0_142 = arith.constant 0 : index
      %c0_143 = arith.constant 0 : index
      %239 = vector.load %arg36[%c0_142, %c0_143] : memref<1x16xf32, #tpu.memory_space<vmem>>, vector<1x16xf32>
      %240 = vector.broadcast %239 : vector<1x16xf32> to vector<16x16xf32>
      %241 = arith.addf %238, %240 : vector<16x16xf32>
      %c0_144 = arith.constant 0 : index
      %c0_145 = arith.constant 0 : index
      %242 = vector.load %arg37[%c0_144, %c0_145] : memref<16x16xf32, #tpu.memory_space<vmem>>, vector<16x16xf32>
      tpu.vector_store %arg37[%c0_144, %c0_145], %241 {strides = array<i32>} : memref<16x16xf32, #tpu.memory_space<vmem>>, vector<16x16xf32>,
    } else {
    }
    return
  }
  func.func @transform_0(%arg0: i32) -> (i32, i32) {
    %c0_i32 = arith.constant 0 : i32
    %c0_i32_0 = arith.constant 0 : i32
    %c0_i32_1 = arith.constant 0 : i32
    return %c0_i32, %c0_i32_0 : i32, i32
  }
  func.func @transform_1(%arg0: i32) -> (i32, i32) {
    %c0_i32 = arith.constant 0 : i32
    %c0_i32_0 = arith.constant 0 : i32
    %c0_i32_1 = arith.constant 0 : i32
    return %c0_i32, %c0_i32_0 : i32, i32
  }
  func.func @transform_2(%arg0: i32) -> (i32, i32) {
    %c0_i32 = arith.constant 0 : i32
    %c0_i32_0 = arith.constant 0 : i32
    %c0_i32_1 = arith.constant 0 : i32
    return %c0_i32, %c0_i32_0 : i32, i32
  }
  func.func @transform_3(%arg0: i32) -> (i32, i32) {
    %c0_i32 = arith.constant 0 : i32
    %c0_i32_0 = arith.constant 0 : i32
    %c0_i32_1 = arith.constant 0 : i32
    return %c0_i32, %c0_i32_0 : i32, i32
  }
  func.func @transform_4(%arg0: i32) -> (i32, i32) {
    %c0_i32 = arith.constant 0 : i32
    %c0_i32_0 = arith.constant 0 : i32
    %c0_i32_1 = arith.constant 0 : i32
    return %c0_i32, %c0_i32_0 : i32, i32
  }
  func.func @transform_5(%arg0: i32) -> (i32, i32) {
    %c0_i32 = arith.constant 0 : i32
    %c0_i32_0 = arith.constant 0 : i32
    %c0_i32_1 = arith.constant 0 : i32
    return %c0_i32, %c0_i32_0 : i32, i32
  }
  func.func @transform_6(%arg0: i32) -> (i32, i32, i32) {
    %c0_i32 = arith.constant 0 : i32
    %c0_i32_0 = arith.constant 0 : i32
    %c0_i32_1 = arith.constant 0 : i32
    return %arg0, %c0_i32, %c0_i32_0 : i32, i32, i32
  }
  func.func @transform_7(%arg0: i32) -> (i32, i32, i32) {
    %c0_i32 = arith.constant 0 : i32
    %c0_i32_0 = arith.constant 0 : i32
    %c0_i32_1 = arith.constant 0 : i32
    return %arg0, %c0_i32, %c0_i32_0 : i32, i32, i32
  }
  func.func @transform_8(%arg0: i32) -> (i32, i32, i32) {
    %c0_i32 = arith.constant 0 : i32
    %c0_i32_0 = arith.constant 0 : i32
    %c0_i32_1 = arith.constant 0 : i32
    return %arg0, %c0_i32, %c0_i32_0 : i32, i32, i32
  }
  func.func @transform_9(%arg0: i32) -> (i32, i32, i32) {
    %c0_i32 = arith.constant 0 : i32
    %c0_i32_0 = arith.constant 0 : i32
    %c0_i32_1 = arith.constant 0 : i32
    return %arg0, %c0_i32, %c0_i32_0 : i32, i32, i32
  }
  func.func @transform_10(%arg0: i32) -> (i32, i32, i32) {
    %c0_i32 = arith.constant 0 : i32
    %c0_i32_0 = arith.constant 0 : i32
    %c0_i32_1 = arith.constant 0 : i32
    return %arg0, %c0_i32, %c0_i32_0 : i32, i32, i32
  }
  func.func @transform_11(%arg0: i32) -> (i32, i32, i32) {
    %c0_i32 = arith.constant 0 : i32
    %c0_i32_0 = arith.constant 0 : i32
    %c0_i32_1 = arith.constant 0 : i32
    return %arg0, %c0_i32, %c0_i32_0 : i32, i32, i32
  }
  func.func @transform_12(%arg0: i32) -> (i32, i32, i32) {
    %c0_i32 = arith.constant 0 : i32
    %c0_i32_0 = arith.constant 0 : i32
    %c0_i32_1 = arith.constant 0 : i32
    return %arg0, %c0_i32, %c0_i32_0 : i32, i32, i32
  }
  func.func @transform_13(%arg0: i32) -> (i32, i32, i32) {
    %c0_i32 = arith.constant 0 : i32
    %c0_i32_0 = arith.constant 0 : i32
    %c0_i32_1 = arith.constant 0 : i32
    return %arg0, %c0_i32, %c0_i32_0 : i32, i32, i32
  }
  func.func @transform_14(%arg0: i32) -> (i32, i32, i32) {
    %c0_i32 = arith.constant 0 : i32
    %c0_i32_0 = arith.constant 0 : i32
    %c0_i32_1 = arith.constant 0 : i32
    return %arg0, %c0_i32, %c0_i32_0 : i32, i32, i32
  }
  func.func @transform_15(%arg0: i32) -> (i32, i32, i32) {
    %c0_i32 = arith.constant 0 : i32
    %c0_i32_0 = arith.constant 0 : i32
    %c0_i32_1 = arith.constant 0 : i32
    return %arg0, %c0_i32, %c0_i32_0 : i32, i32, i32
  }
  func.func @transform_16(%arg0: i32) -> (i32, i32, i32) {
    %c0_i32 = arith.constant 0 : i32
    %c0_i32_0 = arith.constant 0 : i32
    %c0_i32_1 = arith.constant 0 : i32
    return %arg0, %c0_i32, %c0_i32_0 : i32, i32, i32
  }
  func.func @transform_17(%arg0: i32) -> (i32, i32, i32) {
    %c0_i32 = arith.constant 0 : i32
    %c0_i32_0 = arith.constant 0 : i32
    %c0_i32_1 = arith.constant 0 : i32
    return %arg0, %c0_i32, %c0_i32_0 : i32, i32, i32
  }
  func.func @transform_18(%arg0: i32) -> (i32, i32, i32) {
    %c0_i32 = arith.constant 0 : i32
    %c0_i32_0 = arith.constant 0 : i32
    %c0_i32_1 = arith.constant 0 : i32
    return %arg0, %c0_i32, %c0_i32_0 : i32, i32, i32
  }
  func.func @transform_19(%arg0: i32) -> (i32, i32, i32) {
    %c0_i32 = arith.constant 0 : i32
    %c0_i32_0 = arith.constant 0 : i32
    %c0_i32_1 = arith.constant 0 : i32
    return %arg0, %c0_i32, %c0_i32_0 : i32, i32, i32
  }
  func.func @transform_20(%arg0: i32) -> (i32, i32, i32) {
    %c0_i32 = arith.constant 0 : i32
    %c0_i32_0 = arith.constant 0 : i32
    %c0_i32_1 = arith.constant 0 : i32
    return %arg0, %c0_i32, %c0_i32_0 : i32, i32, i32
  }
  func.func @transform_21(%arg0: i32) -> (i32, i32, i32) {
    %c0_i32 = arith.constant 0 : i32
    %c0_i32_0 = arith.constant 0 : i32
    %c0_i32_1 = arith.constant 0 : i32
    return %arg0, %c0_i32, %c0_i32_0 : i32, i32, i32
  }
  func.func @transform_22(%arg0: i32) -> (i32, i32, i32) {
    %c0_i32 = arith.constant 0 : i32
    %c0_i32_0 = arith.constant 0 : i32
    %c0_i32_1 = arith.constant 0 : i32
    return %arg0, %c0_i32, %c0_i32_0 : i32, i32, i32
  }
  func.func @transform_23(%arg0: i32) -> (i32, i32, i32) {
    %c0_i32 = arith.constant 0 : i32
    %c0_i32_0 = arith.constant 0 : i32
    %c0_i32_1 = arith.constant 0 : i32
    return %arg0, %c0_i32, %c0_i32_0 : i32, i32, i32
  }
  func.func @transform_24(%arg0: i32) -> (i32, i32, i32) {
    %c0_i32 = arith.constant 0 : i32
    %c0_i32_0 = arith.constant 0 : i32
    %c0_i32_1 = arith.constant 0 : i32
    return %arg0, %c0_i32, %c0_i32_0 : i32, i32, i32
  }
  func.func @transform_25(%arg0: i32) -> (i32, i32, i32) {
    %c0_i32 = arith.constant 0 : i32
    %c0_i32_0 = arith.constant 0 : i32
    %c0_i32_1 = arith.constant 0 : i32
    return %arg0, %c0_i32, %c0_i32_0 : i32, i32, i32
  }
  func.func @transform_26(%arg0: i32) -> (i32, i32, i32) {
    %c0_i32 = arith.constant 0 : i32
    %c0_i32_0 = arith.constant 0 : i32
    %c0_i32_1 = arith.constant 0 : i32
    return %arg0, %c0_i32, %c0_i32_0 : i32, i32, i32
  }
  func.func @transform_27(%arg0: i32) -> (i32, i32, i32) {
    %c0_i32 = arith.constant 0 : i32
    %c0_i32_0 = arith.constant 0 : i32
    %c0_i32_1 = arith.constant 0 : i32
    return %arg0, %c0_i32, %c0_i32_0 : i32, i32, i32
  }
  func.func @transform_28(%arg0: i32) -> (i32, i32, i32) {
    %c0_i32 = arith.constant 0 : i32
    %c0_i32_0 = arith.constant 0 : i32
    %c0_i32_1 = arith.constant 0 : i32
    return %arg0, %c0_i32, %c0_i32_0 : i32, i32, i32
  }
  func.func @transform_29(%arg0: i32) -> (i32, i32, i32) {
    %c0_i32 = arith.constant 0 : i32
    %c0_i32_0 = arith.constant 0 : i32
    %c0_i32_1 = arith.constant 0 : i32
    return %arg0, %c0_i32, %c0_i32_0 : i32, i32, i32
  }
  func.func @transform_30(%arg0: i32) -> (i32, i32, i32) {
    %c0_i32 = arith.constant 0 : i32
    %c0_i32_0 = arith.constant 0 : i32
    %c0_i32_1 = arith.constant 0 : i32
    return %arg0, %c0_i32, %c0_i32_0 : i32, i32, i32
  }
  func.func @transform_31(%arg0: i32) -> (i32, i32, i32) {
    %c0_i32 = arith.constant 0 : i32
    %c0_i32_0 = arith.constant 0 : i32
    %c0_i32_1 = arith.constant 0 : i32
    return %arg0, %c0_i32, %c0_i32_0 : i32, i32, i32
  }
  func.func @transform_32(%arg0: i32) -> (i32, i32) {
    %c0_i32 = arith.constant 0 : i32
    %c0_i32_0 = arith.constant 0 : i32
    %c0_i32_1 = arith.constant 0 : i32
    return %c0_i32, %c0_i32_0 : i32, i32
  }
  func.func @transform_33(%arg0: i32) -> (i32, i32) {
    %c0_i32 = arith.constant 0 : i32
    %c0_i32_0 = arith.constant 0 : i32
    %c0_i32_1 = arith.constant 0 : i32
    return %c0_i32, %c0_i32_0 : i32, i32
  }
  func.func @transform_34(%arg0: i32) -> (i32, i32) {
    %c0_i32 = arith.constant 0 : i32
    %c0_i32_0 = arith.constant 0 : i32
    %c0_i32_1 = arith.constant 0 : i32
    return %c0_i32, %c0_i32_0 : i32, i32
  }
  func.func @transform_35(%arg0: i32) -> (i32, i32) {
    %c0_i32 = arith.constant 0 : i32
    %c0_i32_0 = arith.constant 0 : i32
    %c0_i32_1 = arith.constant 0 : i32
    return %c0_i32, %c0_i32_0 : i32, i32
  }
  func.func @transform_36(%arg0: i32) -> (i32, i32) {
    %c0_i32 = arith.constant 0 : i32
    %c0_i32_0 = arith.constant 0 : i32
    %c0_i32_1 = arith.constant 0 : i32
    return %c0_i32, %c0_i32_0 : i32, i32
  }
}

</mosaic_0001>

<bundles_post_ra>
// kernel: _lambda_.2
= control target key start
LH: loop header
LB: loop body
LE: loop exit
PB: predicated region body
PF: predicated region fallthrough
CT: control target
= control target key end

     0   :  { %s7678_s0 = inlined_call_operand.hbm [shape: f32[16,32], index: 0, kind: input, shape index: {}]   ;;  %s7679_s1 = inlined_call_operand.hbm [shape: f32[128,32], index: 1, kind: input, shape index: {}]   ;;  %s7680_s2 = inlined_call_operand.hbm [shape: f32[8,128], index: 2, kind: input, shape index: {}]   ;;  %s7681_s3 = inlined_call_operand.hbm [shape: f32[8,32], index: 3, kind: input, shape index: {}]   ;;  %s7682_s4 = inlined_call_operand.hbm [shape: f32[16,128], index: 4, kind: input, shape index: {}]   ;;  %s7683_s5 = inlined_call_operand.hbm [shape: bf16[3,32,32], index: 5, kind: input, shape index: {}]   ;;  %s7684_s6 = inlined_call_operand.hbm [shape: f32[3,1,32], index: 6, kind: input, shape index: {}]   ;;  %s7685_s7 = inlined_call_operand.hbm [shape: bf16[3,32,32], index: 7, kind: input, shape index: {}]   ;;  %s7686_s8 = inlined_call_operand.hbm [shape: f32[3,1,32], index: 8, kind: input, shape index: {}]   ;;  %s7687_s9 = inlined_call_operand.hbm [shape: bf16[3,32,32], index: 9, kind: input, shape index: {}]   ;;  %s7688_s10 = inlined_call_operand.hbm [shape: f32[3,1,32], index: 10, kind: input, shape index: {}]   ;;  %s7689_s11 = inlined_call_operand.hbm [shape: bf16[3,32,32], index: 11, kind: input, shape index: {}]   ;;  %s7690_s12 = inlined_call_operand.hbm [shape: f32[3,1,32], index: 12, kind: input, shape index: {}]   ;;  %s7691_s13 = inlined_call_operand.hbm [shape: f32[3,1,32], index: 13, kind: input, shape index: {}]   ;;  %s7692_s14 = inlined_call_operand.hbm [shape: f32[3,1,32], index: 14, kind: input, shape index: {}]   ;;  %s7693_s15 = inlined_call_operand.hbm [shape: bf16[3,32,2048], index: 15, kind: input, shape index: {}]   ;;  %s7694_s16 = inlined_call_operand.hbm [shape: f32[3,1,2048], index: 16, kind: input, shape index: {}]   ;;  %s7695_s17 = inlined_call_operand.vmem [shape: bf16[3,2048,32], index: 17, kind: input, shape index: {}]   ;;  %s7696_s18 = inlined_call_operand.hbm [shape: f32[3,1,32], index: 18, kind: input, shape index: {}]   ;;  %s7697_s19 = inlined_call_operand.hbm [shape: f32[3,1,32], index: 19, kind: input, shape index: {}]   ;;  %s7698_s20 = inlined_call_operand.hbm [shape: f32[3,1,32], index: 20, kind: input, shape index: {}]   ;;  %s7699_s21 = inlined_call_operand.hbm [shape: f32[1,32], index: 21, kind: input, shape index: {}]   ;;  %s7700_s22 = inlined_call_operand.hbm [shape: f32[1,32], index: 22, kind: input, shape index: {}]   ;;  %s7701_s23 = inlined_call_operand.vmem [shape: f32[16,32], index: 23, kind: output, shape index: {}]  }
   0x1   :  { %7741 = sst [smem:[#allocation56_spill]] %s7678_s0 }
   0x2   :  { %7742 = sst [smem:[#allocation57_spill]] %s7679_s1 }
   0x3   :  { %7743 = sst [smem:[#allocation58_spill]] %s7680_s2 }
   0x4   :  { %7744 = sst [smem:[#allocation59_spill]] %s7681_s3 }
   0x5   :  { %7745 = sst [smem:[#allocation60_spill]] %s7682_s4 }
   0x6   :  { %7746 = sst [smem:[#allocation61_spill]] %s7683_s5 }
   0x7   :  { %7747 = sst [smem:[#allocation62_spill]] %s7684_s6 }
   0x8   :  { %7748 = sst [smem:[#allocation63_spill]] %s7685_s7 }
   0x9   :  { %7749 = sst [smem:[#allocation64_spill]] %s7687_s9 }
   0xa   :  { %7750 = sst [smem:[#allocation65_spill]] %s7690_s12 }
   0xb   :  { %7751 = sst [smem:[#allocation66_spill]] %s7692_s14 }
   0xc   :  { %7752 = sst [smem:[#allocation67_spill]] %s7694_s16 }
   0xd   :  { %7753 = sst [smem:[#allocation68_spill]] %s7695_s17 }
   0xe   :  { %7754 = sst [smem:[#allocation69_spill]] %s7697_s19 }
   0xf   :  { %7755 = sst [smem:[#allocation70_spill]] %s7698_s20 }
  0x10   :  { %7756 = sst [smem:[#allocation71_spill]] %s7701_s23 }
  0x11   :  { %28 = vsyncpa [#allocation4], 0 }
  0x12   :  { %29 = vsyncpa [#allocation6], 0 }
  0x13   :  { %30 = vsyncpa [#allocation9], 0 }
  0x14   :  { %31 = vsyncpa [#allocation12], 0 }
  0x15   :  { %33 = vsyncpa [#allocation12 + $0x1], 0 }
  0x16   :  { %34 = vsyncpa [#allocation15], 0 }
  0x17   :  { %36 = vsyncpa [#allocation15 + $0x1], 0 }
  0x18   :  { %37 = vsyncpa [#allocation18], 0 }
  0x19   :  { %39 = vsyncpa [#allocation18 + $0x1], 0 }
  0x1a   :  { %40 = vsyncpa [#allocation21], 0 }
  0x1b   :  { %42 = vsyncpa [#allocation21 + $0x1], 0 }
  0x1c   :  { %43 = vsyncpa [#allocation24], 0 }
  0x1d   :  { %45 = vsyncpa [#allocation24 + $0x1], 0 }
  0x1e   :  { %46 = vsyncpa [#allocation27], 0 }
  0x1f   :  { %48 = vsyncpa [#allocation27 + $0x1], 0 }
  0x20   :  { %49 = vsyncpa [#allocation30], 0 }
  0x21   :  { %51 = vsyncpa [#allocation30 + $0x1], 0 }
  0x22   :  { %52 = vsyncpa [#allocation33], 0 }
  0x23   :  { %54 = vsyncpa [#allocation33 + $0x1], 0 }
  0x24   :  { %55 = vsyncpa [#allocation36], 0  ;;  %s6433_s4 = smov 0   ;;  %s6435_s30 = smov 0  }
  0x25   :  { %s6437_s24 = smov 0   ;;  %s6439_s25 = smov 0  }
  0x26 LB: > { %7757 = sst [smem:[#allocation50_spill]] %s6273_s30  ;;  %s6452_s5 = sadd.s32 4294967295, %s6281_s25   ;;  %s6281_s25 = sphi %s6439_s25, %s7825_s25   ;;  %s6277_s24 = sphi %s6437_s24, %s7829_s24   ;;  %s6273_s30 = sphi %s6435_s30, %s7828_s30   ;;  %s6269_s4 = sphi %s6433_s4, %s7826_s4  }
  0x27   : > { %7758 = sst [smem:[#allocation51_spill]] %s6452_s5  ;;  %s6455_s1 = sadd.s32 1, %s6281_s25  }
  0x28   : > { %7759 = sst [smem:[#allocation52_spill]] %s6455_s1  ;;  %s170_s26 = ssub.s32 %s6281_s25, %s6455_s1 }
  0x29   : > { %s173_s2 = sadd.s32 1, %s6277_s24  ;;  %p171_p0 = scmp.eq.s32.totalorder %s170_s26, 0 }
  0x2a   : > { %p180_p1 = scmp.ne.s32.totalorder %s6277_s24, %s6273_s30  ;;  %p181_p2 = scmp.eq.s32.totalorder %s6281_s25, 0 }
  0x2b   : > { %p186_p3 = scmp.ne.s32.totalorder %s6273_s30, %s6269_s4  ;;  %p7718_p5 = scmp.eq.s32.totalorder %s6452_s5, 0 }
  0x2c   : > { %s6465_s6 = scalar_select %p171_p0, %s6277_s24, %s173_s2  }
  0x2d   : > { %p6467_p4 = por %p181_p2, %p180_p1  ;;  %p4590_p6 = scmp.ge.s32.totalorder %s6281_s25, 1 }
  0x2e   : > { %7760 = sst [smem:[#allocation53_spill]] %s6465_s6  ;;  %p650_p7 = scmp.lt.s32.totalorder %s6281_s25, 4 }
  0x2f   : > { %s7761_s27 = scalar_select %p6467_p4, 1, 0 }
  0x30   : > { %p6476_p8 = por %p7718_p5, %p186_p3  ;;  %p6481_p10 = pnand %p4590_p6, %p650_p7 }
  0x31   : > { %s6283_s29 = smov [#allocation5]   ;;  %s6284_s4 = smov [#allocation8]  }
  0x32   : > { %s7762_s7 = scalar_select %p6476_p8, 1, 0 }
  0x33   : > { %s7764_s28 = scalar_select %p6481_p10, 1, 0 }
  0x34   : > { %7763 = sst [smem:[#allocation54_spill]] %s7762_s7  ;;  %p5344_p11 = pneg %p6481_p10 }
  0x35   : > { %7765 = sst [smem:[#allocation55_spill]] %s7764_s28  ;;  %s675_s3 = sshll.u32 %s6283_s29, 4  ;;  %s6487_s3 = int_to_ptr.vmem [resolvable:$true] %s675_s3 }
  0x36   : > { %p6491_p12 = pnand %p5344_p11, %p7718_p5  ;;  %s700_s26 = sshll.u32 %s6284_s4, 4  ;;  %s6495_s26 = int_to_ptr.vmem [resolvable:$true] %s700_s26 }
  0x37   : > { %s6285_s2 = smov [#allocation3]   ;;  %s7767_s17 = sld [smem:[#allocation57_spill]] }
  0x38   : > { %s6497_s6 = sshll.u32 %s6285_s2, 4  ;;  %p6507_p0 = pneg %p6491_p12  ;;  %s663_s6 = int_to_ptr.vmem [resolvable:$true] %s6497_s6 }
  0x3d   : > { %s5583_s7 = scalar_lea.hbm %s7767_s17, 2048 }
  0x3e   : > { %p5584_p13 = scmp.ne.s32.totalorder %s7767_s17, %s5583_s7  ;;  %p5590_p3 = scmp.lt.u32.totalorder %s5583_s7, %s7767_s17 }
  0x40   : > { %p5586_p1 = pnand %p6507_p0, %p5584_p13 }
  0x42   : > { %p5587_p2 = pneg %p5586_p1 }
  0x44   : > { %p5592_p6 = pnand %p5590_p3, %p5587_p2 }
  0x46   : > { %5595 = shalt.err (!%p5592_p6)
}
  0x47   : > { %s5596_s23 = scalar_lea.vmem %s6487_s3, 2048  ;;  %p5604_p5 = scmp.lt.s32.totalorder %s6487_s3, %s6487_s3 }
  0x48   : > { %p5597_p7 = scmp.ne.s32.totalorder %s6487_s3, %s5596_s23  ;;  %p5605_p8 = scmp.lt.s32.totalorder %s5596_s23, %s5596_s23 }
  0x4a   : > { %p5599_p11 = pnand %p5597_p7, %p6507_p0  ;;  %p5606_p13 = por %p5605_p8, %p5604_p5 }
  0x4c   : > { %p5600_p9 = pneg %p5599_p11 }
  0x4e   : > { %p5607_p1 = pnand %p5606_p13, %p5600_p9 }
  0x50   : > { %5610 = shalt.err (!%p5607_p1)
}
  0x51   : > { %s6286_s30 = smov 128   ;;  %s6287_s1 = smov 8  }
  0x52   : > { %5350 = dma.hbm_to_vmem [thread:$0]  (!%p6491_p12), %s7767_s17, 2048, %s6487_s3, [#allocation6], %s6286_s30, %s6286_s30, %s6287_s1  }
  0x53   : > { %s7769_s28 = sld [smem:[#allocation59_spill]] }
  0x59   : > { %s5611_s23 = scalar_lea.hbm %s7769_s28, 128 }
  0x5a   : > { %p5612_p5 = scmp.ne.s32.totalorder %s7769_s28, %s5611_s23  ;;  %p5618_p2 = scmp.lt.u32.totalorder %s5611_s23, %s7769_s28 }
  0x5c   : > { %p5614_p8 = pnand %p5612_p5, %p6507_p0 }
  0x5e   : > { %p5615_p9 = pneg %p5614_p8 }
  0x60   : > { %p5620_p3 = pnand %p5618_p2, %p5615_p9 }
  0x62   : > { %5623 = shalt.err (!%p5620_p3)
}
  0x63   : > { %s5624_s3 = scalar_lea.vmem %s6495_s26, 128  ;;  %p5632_p13 = scmp.lt.s32.totalorder %s6495_s26, %s6495_s26 }
  0x64   : > { %p5625_p6 = scmp.ne.s32.totalorder %s6495_s26, %s5624_s3  ;;  %p5633_p1 = scmp.lt.s32.totalorder %s5624_s3, %s5624_s3 }
  0x66   : > { %p5627_p7 = pnand %p5625_p6, %p6507_p0  ;;  %p5634_p5 = por %p5633_p1, %p5632_p13 }
  0x68   : > { %p5628_p11 = pneg %p5627_p7 }
  0x6a   : > { %p5635_p8 = pnand %p5634_p5, %p5628_p11 }
  0x6c   : > { %5638 = shalt.err (!%p5635_p8)
}
  0x6d   : > { %5356 = dma.hbm_to_vmem [thread:$0]  (!%p6491_p12), %s7769_s28, 128, %s6495_s26, [#allocation9]  }
  0x6e   : > { %s7770_s7 = sld [smem:[#allocation56_spill]] }
  0x74   : > { %s5639_s29 = scalar_lea.hbm %s7770_s7, 256 }
  0x75   : > { %p5640_p9 = scmp.ne.s32.totalorder %s7770_s7, %s5639_s29  ;;  %p5646_p6 = scmp.lt.u32.totalorder %s5639_s29, %s7770_s7 }
  0x77   : > { %p5642_p2 = pnand %p5640_p9, %p6507_p0 }
  0x79   : > { %p5643_p3 = pneg %p5642_p2 }
  0x7b   : > { %p5648_p7 = pnand %p5646_p6, %p5643_p3 }
  0x7d   : > { %5651 = shalt.err (!%p5648_p7)
}
  0x7e   : > { %s5652_s14 = scalar_lea.vmem %s663_s6, 256  ;;  %p5660_p5 = scmp.lt.s32.totalorder %s663_s6, %s663_s6 }
  0x7f   : > { %p5653_p11 = scmp.ne.s32.totalorder %s663_s6, %s5652_s14  ;;  %p5661_p8 = scmp.lt.s32.totalorder %s5652_s14, %s5652_s14 }
  0x81   : > { %p5655_p13 = pnand %p5653_p11, %p6507_p0  ;;  %p5662_p10 = por %p5661_p8, %p5660_p5 }
  0x83   : > { %p5656_p1 = pneg %p5655_p13 }
  0x85   : > { %p5663_p4 = pnand %p5662_p10, %p5656_p1 }
  0x87   : > { %5666 = shalt.err (!%p5663_p4)
}
  0x88   : > { %5347 = dma.hbm_to_vmem [thread:$0]  (!%p6491_p12), %s7770_s7, 256, %s663_s6, [#allocation4], %s6286_s30, %s6286_s30, %s6287_s1  }
  0x89   : > { %s6288_s19 = smov [#allocation7]   ;;  %s6289_s29 = smov [#allocation10]  }
  0x8a   : > { %s689_s20 = sshll.u32 %s6288_s19, 4  ;;  %s710_s4 = sshll.u32 %s6289_s29, 4  ;;  %s690_s20 = int_to_ptr.vmem [resolvable:$true] %s689_s20  ;;  %s711_s4 = int_to_ptr.vmem [resolvable:$true] %s710_s4 }
  0x8b   : > { %s7771_s3 = sld [smem:[#allocation58_spill]] }
  0x91   : > { %s5667_s14 = scalar_lea.hbm %s7771_s3, 128 }
  0x92   : > { %p5668_p4 = scmp.ne.s32.totalorder %s7771_s3, %s5667_s14  ;;  %p5674_p2 = scmp.lt.u32.totalorder %s5667_s14, %s7771_s3 }
  0x94   : > { %p5670_p10 = pnand %p5668_p4, %p6507_p0 }
  0x96   : > { %p5671_p9 = pneg %p5670_p10 }
  0x98   : > { %p5676_p3 = pnand %p5674_p2, %p5671_p9 }
  0x9a   : > { %5679 = shalt.err (!%p5676_p3)
}
  0x9b   : > { %s5680_s6 = scalar_lea.vmem %s690_s20, 128  ;;  %p5688_p13 = scmp.lt.s32.totalorder %s690_s20, %s690_s20 }
  0x9c   : > { %p5681_p6 = scmp.ne.s32.totalorder %s690_s20, %s5680_s6  ;;  %p5689_p1 = scmp.lt.s32.totalorder %s5680_s6, %s5680_s6 }
  0x9e   : > { %p5683_p7 = pnand %p5681_p6, %p6507_p0  ;;  %p5690_p5 = por %p5689_p1, %p5688_p13 }
  0xa0   : > { %p5684_p11 = pneg %p5683_p7 }
  0xa2   : > { %p5691_p8 = pnand %p5690_p5, %p5684_p11 }
  0xa4   : > { %5694 = shalt.err (!%p5691_p8)
}
  0xa5   : > { %5353 = dma.hbm_to_vmem [thread:$0]  (!%p6491_p12), %s7771_s3, 128, %s690_s20, [#allocation6]  }
  0xa6   : > { %s7772_s19 = sld [smem:[#allocation60_spill]] }
  0xac   : > { %s5695_s29 = scalar_lea.hbm %s7772_s19, 256 }
  0xad   : > { %p5696_p4 = scmp.ne.s32.totalorder %s7772_s19, %s5695_s29  ;;  %p5702_p2 = scmp.lt.u32.totalorder %s5695_s29, %s7772_s19 }
  0xaf   : > { %p5698_p10 = pnand %p5696_p4, %p6507_p0 }
  0xb1   : > { %p5699_p9 = pneg %p5698_p10 }
  0xb3   : > { %p5704_p3 = pnand %p5702_p2, %p5699_p9 }
  0xb5   : > { %5707 = shalt.err (!%p5704_p3)
}
  0xb6   : > { %s5708_s6 = scalar_lea.vmem %s711_s4, 256  ;;  %p5716_p13 = scmp.lt.s32.totalorder %s711_s4, %s711_s4 }
  0xb7   : > { %p5709_p6 = scmp.ne.s32.totalorder %s711_s4, %s5708_s6  ;;  %p5717_p1 = scmp.lt.s32.totalorder %s5708_s6, %s5708_s6 }
  0xb9   : > { %p5711_p7 = pnand %p5709_p6, %p6507_p0  ;;  %p5718_p5 = por %p5717_p1, %p5716_p13 }
  0xbb   : > { %p5712_p11 = pneg %p5711_p7 }
  0xbd   : > { %p5719_p8 = pnand %p5718_p5, %p5712_p11 }
  0xbf   : > { %5722 = shalt.err (!%p5719_p8)
}
  0xc0   : > { %5359 = dma.hbm_to_vmem [thread:$0]  (!%p6491_p12), %s7772_s19, 256, %s711_s4, [#allocation9], %s6286_s30, %s6286_s30, %s6287_s1  }
  0xc1   : > { %s6290_s28 = smov [#allocation34]   ;;  %s6291_s16 = smov [#allocation35]  }
  0xc2   : > { %s724_s12 = sshll.u32 %s6290_s28, 4  ;;  %s735_s29 = sshll.u32 %s6291_s16, 4  ;;  %s725_s12 = int_to_ptr.vmem [resolvable:$true] %s724_s12  ;;  %s736_s29 = int_to_ptr.vmem [resolvable:$true] %s735_s29 }
  0xc3   : > { %s5723_s14 = scalar_lea.hbm %s7699_s21, 16 }
  0xc4   : > { %p5724_p4 = scmp.ne.s32.totalorder %s7699_s21, %s5723_s14  ;;  %p5730_p2 = scmp.lt.u32.totalorder %s5723_s14, %s7699_s21 }
  0xc6   : > { %p5726_p10 = pnand %p5724_p4, %p6507_p0 }
  0xc8   : > { %p5727_p9 = pneg %p5726_p10 }
  0xca   : > { %p5732_p3 = pnand %p5730_p2, %p5727_p9 }
  0xcc   : > { %5735 = shalt.err (!%p5732_p3)
}
  0xcd   : > { %s5736_s30 = scalar_lea.vmem %s725_s12, 16  ;;  %s5743_s1 = scalar_lea.vmem %s725_s12, 32 }
  0xce   : > { %p5737_p6 = scmp.ne.s32.totalorder %s725_s12, %s5736_s30  ;;  %p5744_p13 = scmp.lt.s32.totalorder %s725_s12, %s725_s12 }
  0xcf   : > { %p5745_p1 = scmp.lt.s32.totalorder %s5743_s1, %s5736_s30 }
  0xd0   : > { %p5739_p7 = pnand %p5737_p6, %p6507_p0 }
  0xd1   : > { %p5746_p5 = por %p5745_p1, %p5744_p13 }
  0xd2   : > { %p5740_p11 = pneg %p5739_p7 }
  0xd4   : > { %p5747_p8 = pnand %p5746_p5, %p5740_p11 }
  0xd6   : > { %5750 = shalt.err (!%p5747_p8)
}
  0xd7   : > { %5362 = dma.hbm_to_vmem [thread:$0]  (!%p6491_p12), %s7699_s21, 16, %s725_s12, [#allocation33]  }
  0xd8   : > { %s5751_s16 = scalar_lea.hbm %s7700_s22, 16 }
  0xd9   : > { %p5752_p4 = scmp.ne.s32.totalorder %s7700_s22, %s5751_s16  ;;  %p5758_p2 = scmp.lt.u32.totalorder %s5751_s16, %s7700_s22 }
  0xdb   : > { %p5754_p10 = pnand %p5752_p4, %p6507_p0 }
  0xdd   : > { %p5755_p9 = pneg %p5754_p10 }
  0xdf   : > { %p5760_p3 = pnand %p5758_p2, %p5755_p9 }
  0xe1   : > { %5763 = shalt.err (!%p5760_p3)
}
  0xe2   : > { %s5764_s6 = scalar_lea.vmem %s736_s29, 16  ;;  %s5771_s12 = scalar_lea.vmem %s736_s29, 32 }
  0xe3   : > { %p5765_p6 = scmp.ne.s32.totalorder %s736_s29, %s5764_s6  ;;  %p5772_p13 = scmp.lt.s32.totalorder %s736_s29, %s736_s29 }
  0xe4   : > { %p5773_p1 = scmp.lt.s32.totalorder %s5771_s12, %s5764_s6 }
  0xe5   : > { %p5767_p7 = pnand %p5765_p6, %p6507_p0 }
  0xe6   : > { %p5774_p5 = por %p5773_p1, %p5772_p13 }
  0xe7   : > { %p5768_p11 = pneg %p5767_p7 }
  0xe9   : > { %p5775_p8 = pnand %p5774_p5, %p5768_p11 }
  0xeb   : > { %5778 = shalt.err (!%p5775_p8)
}
  0xec   : > { %5365 = dma.hbm_to_vmem [thread:$0]  (!%p6491_p12), %s7700_s22, 16, %s736_s29, [#allocation36]  }
  0xed   : > { %p4598_p4 = scmp.ge.s32.totalorder %s6281_s25, 3 }
  0xee   : > { %s6653_s5 = sand.u32 (!%p4598_p4), 1, %s6281_s25   ;;  %s6656_s1 = sand.u32 (!%p4598_p4), 1, %s6277_s24  }
  0xef   : > { %742 = sbr.rel (%p4598_p4) target bundleno = 634 (0x27a), region = 44  ;;  %s6659_s4 = sshll.u32 (!%p4598_p4), %s6656_s1, 4 }
  0xf0   : > { %s6662_s0 = sshll.u32 (!%p4598_p4), %s6281_s25, 8  ;;  %s7773_s3 = sld [smem:[#allocation61_spill]] (!%p4598_p4) }
  0xf1   : > { %s750_s16 = scalar_lea.vmem (!%p4598_p4), [#allocation11], %s6659_s4  ;;  %s7734_s23 = scalar_lea.sflag (!%p4598_p4), [#allocation12], %s6653_s5 }
  0xf2   : > { %s757_s2 = sshll.u32 (!%p4598_p4), %s750_s16, 4  ;;  %p7774_p0 = scmp.ne.s32.totalorder (!%p4598_p4), %s7761_s27, 0  ;;  %s6671_s2 = int_to_ptr.vmem [resolvable:$true] %s757_s2 }
  0xf6   : > { %s6668_s28 = scalar_lea.hbm %s7773_s3, %s6662_s0  ;;  %s5783_s12 = scalar_lea.hbm %s7773_s3, 768 }
  0xf7   : > { %s5779_s14 = scalar_lea.hbm %s6668_s28, 256  ;;  %p5784_p2 = scmp.lt.u32.totalorder %s6668_s28, %s7773_s3 }
  0xf8   : > { %p5780_p12 = scmp.ne.s32.totalorder %s6668_s28, %s5779_s14  ;;  %p5785_p3 = scmp.lt.u32.totalorder %s5783_s12, %s5779_s14 }
  0xf9   : > { %p5787_p7 = scmp.lt.u32.totalorder %s5779_s14, %s6668_s28 }
  0xfa   : > { %p5781_p10 = pnand %p5780_p12, %p7774_p0  ;;  %p5786_p6 = por %p5785_p3, %p5784_p2 }
  0xfc   : > { %p5782_p9 = pneg %p5781_p10  ;;  %p5788_p11 = por %p5787_p7, %p5786_p6 }
  0xfe   : > { %p5789_p13 = pnand %p5788_p11, %p5782_p9 }
 0x100   : > { %5792 = shalt.err (!%p5789_p13)
}
 0x101   : > { %s5793_s29 = scalar_lea.vmem %s6671_s2, 256  ;;  %s6292_s17 = smov [#allocation11]  }
 0x102   : > { %p5794_p1 = scmp.ne.s32.totalorder %s6671_s2, %s5793_s29  ;;  %s5797_s16 = sshll.u32 %s6292_s17, 4  ;;  %s5798_s16 = int_to_ptr.vmem [resolvable:$false] %s5797_s16 }
 0x103   : > { %s5799_s26 = scalar_lea.vmem %s5798_s16, 512  ;;  %p5800_p4 = scmp.lt.s32.totalorder %s6671_s2, %s5798_s16 }
 0x104   : > { %p5795_p5 = pnand %p5794_p1, %p7774_p0  ;;  %p5801_p12 = scmp.lt.s32.totalorder %s5799_s26, %s5793_s29 }
 0x106   : > { %p5796_p8 = pneg %p5795_p5  ;;  %p5802_p10 = por %p5801_p12, %p5800_p4 }
 0x108   : > { %p5803_p2 = pnand %p5802_p10, %p5796_p8 }
 0x10a   : > { %5806 = shalt.err (!%p5803_p2)
}
 0x10b   : > { %s6293_s14 = smov 64   ;;  %s6294_s6 = smov 4  }
 0x10c   : > { %5300 = dma.hbm_to_vmem [thread:$0]  (%p7774_p0), %s6668_s28, 256, %s6671_s2, %s7734_s23, %s6293_s14, %s6293_s14, %s6294_s6  }
 0x10d   : > { %s7775_s30 = sld [smem:[#allocation63_spill]]  ;;  %s788_s16 = scalar_lea.vmem [#allocation14], %s6659_s4 }
 0x10e   : > { %s795_s26 = sshll.u32 %s788_s16, 4  ;;  %s7733_s3 = scalar_lea.sflag [#allocation15], %s6653_s5  ;;  %s6707_s26 = int_to_ptr.vmem [resolvable:$true] %s795_s26 }
 0x113   : > { %s7776_s29 = smov %s7775_s30  ;;  %s6704_s17 = scalar_lea.hbm %s7775_s30, %s6662_s0 }
 0x114   : > { %s5807_s7 = scalar_lea.hbm %s6704_s17, 256  ;;  %s5811_s12 = scalar_lea.hbm %s7776_s29, 768 }
 0x115   : > { %p5808_p9 = scmp.ne.s32.totalorder %s6704_s17, %s5807_s7  ;;  %p5812_p7 = scmp.lt.u32.totalorder %s6704_s17, %s7776_s29 }
 0x116   : > { %p5813_p11 = scmp.lt.u32.totalorder %s5811_s12, %s5807_s7  ;;  %p5815_p1 = scmp.lt.u32.totalorder %s5807_s7, %s6704_s17 }
 0x117   : > { %p5809_p3 = pnand %p5808_p9, %p7774_p0 }
 0x118   : > { %p5814_p13 = por %p5813_p11, %p5812_p7 }
 0x119   : > { %p5810_p6 = pneg %p5809_p3 }
 0x11a   : > { %p5816_p5 = por %p5815_p1, %p5814_p13 }
 0x11c   : > { %p5817_p8 = pnand %p5816_p5, %p5810_p6 }
 0x11e   : > { %5820 = shalt.err (!%p5817_p8)
}
 0x11f   : > { %s5821_s16 = scalar_lea.vmem %s6707_s26, 256  ;;  %s6295_s28 = smov [#allocation14]  }
 0x120   : > { %p5822_p4 = scmp.ne.s32.totalorder %s6707_s26, %s5821_s16  ;;  %s5825_s2 = sshll.u32 %s6295_s28, 4  ;;  %s5826_s2 = int_to_ptr.vmem [resolvable:$false] %s5825_s2 }
 0x121   : > { %s5827_s20 = scalar_lea.vmem %s5826_s2, 512  ;;  %p5828_p2 = scmp.lt.s32.totalorder %s6707_s26, %s5826_s2 }
 0x122   : > { %p5823_p12 = pnand %p5822_p4, %p7774_p0  ;;  %p5829_p9 = scmp.lt.s32.totalorder %s5827_s20, %s5821_s16 }
 0x124   : > { %p5824_p10 = pneg %p5823_p12  ;;  %p5830_p3 = por %p5829_p9, %p5828_p2 }
 0x126   : > { %p5831_p7 = pnand %p5830_p3, %p5824_p10 }
 0x128   : > { %5834 = shalt.err (!%p5831_p7)
}
 0x129   : > { %5302 = dma.hbm_to_vmem [thread:$0]  (%p7774_p0), %s6704_s17, 256, %s6707_s26, %s7733_s3, %s6293_s14, %s6293_s14, %s6294_s6  }
 0x12a   : > { %s7777_s9 = sld [smem:[#allocation64_spill]]  ;;  %s826_s16 = scalar_lea.vmem [#allocation17], %s6659_s4 }
 0x12b   : > { %s833_s28 = sshll.u32 %s826_s16, 4  ;;  %s7735_s2 = scalar_lea.sflag [#allocation18], %s6653_s5  ;;  %s6743_s28 = int_to_ptr.vmem [resolvable:$true] %s833_s28 }
 0x130   : > { %s6740_s30 = scalar_lea.hbm %s7777_s9, %s6662_s0  ;;  %s5839_s7 = scalar_lea.hbm %s7777_s9, 768 }
 0x131   : > { %s5835_s20 = scalar_lea.hbm %s6740_s30, 256  ;;  %p5840_p1 = scmp.lt.u32.totalorder %s6740_s30, %s7777_s9 }
 0x132   : > { %p5836_p6 = scmp.ne.s32.totalorder %s6740_s30, %s5835_s20  ;;  %p5841_p5 = scmp.lt.u32.totalorder %s5839_s7, %s5835_s20 }
 0x133   : > { %p5843_p4 = scmp.lt.u32.totalorder %s5835_s20, %s6740_s30 }
 0x134   : > { %p5837_p11 = pnand %p5836_p6, %p7774_p0  ;;  %p5842_p8 = por %p5841_p5, %p5840_p1 }
 0x136   : > { %p5838_p13 = pneg %p5837_p11  ;;  %p5844_p12 = por %p5843_p4, %p5842_p8 }
 0x138   : > { %p5845_p10 = pnand %p5844_p12, %p5838_p13 }
 0x13a   : > { %5848 = shalt.err (!%p5845_p10)
}
 0x13b   : > { %s5849_s16 = scalar_lea.vmem %s6743_s28, 256  ;;  %s6296_s17 = smov [#allocation17]  }
 0x13c   : > { %p5850_p2 = scmp.ne.s32.totalorder %s6743_s28, %s5849_s16  ;;  %s5853_s26 = sshll.u32 %s6296_s17, 4  ;;  %s5854_s26 = int_to_ptr.vmem [resolvable:$false] %s5853_s26 }
 0x13d   : > { %s5855_s3 = scalar_lea.vmem %s5854_s26, 512  ;;  %p5856_p7 = scmp.lt.s32.totalorder %s6743_s28, %s5854_s26 }
 0x13e   : > { %p5851_p9 = pnand %p5850_p2, %p7774_p0  ;;  %p5857_p6 = scmp.lt.s32.totalorder %s5855_s3, %s5849_s16 }
 0x140   : > { %p5852_p3 = pneg %p5851_p9  ;;  %p5858_p11 = por %p5857_p6, %p5856_p7 }
 0x142   : > { %p5859_p1 = pnand %p5858_p11, %p5852_p3 }
 0x144   : > { %5862 = shalt.err (!%p5859_p1)
}
 0x145   : > { %5304 = dma.hbm_to_vmem [thread:$0]  (%p7774_p0), %s6740_s30, 256, %s6743_s28, %s7735_s2, %s6293_s14, %s6293_s14, %s6294_s6  }
 0x146   : > { %s6776_s12 = scalar_lea.hbm %s7689_s11, %s6662_s0  ;;  %s864_s16 = scalar_lea.vmem [#allocation20], %s6659_s4 }
 0x147   : > { %s871_s17 = sshll.u32 %s864_s16, 4  ;;  %s6780_s26 = sshll.u32 %s6281_s25, 4  ;;  %s6782_s17 = int_to_ptr.vmem [resolvable:$true] %s871_s17 }
 0x148   : > { %s7736_s3 = scalar_lea.sflag [#allocation21], %s6653_s5  ;;  %s5863_s23 = scalar_lea.hbm %s6776_s12, 256 }
 0x149   : > { %p5864_p13 = scmp.ne.s32.totalorder %s6776_s12, %s5863_s23  ;;  %s5867_s20 = scalar_lea.hbm %s7689_s11, 768 }
 0x14a   : > { %p5868_p4 = scmp.lt.u32.totalorder %s6776_s12, %s7689_s11  ;;  %p5869_p12 = scmp.lt.u32.totalorder %s5867_s20, %s5863_s23 }
 0x14b   : > { %p5865_p5 = pnand %p5864_p13, %p7774_p0  ;;  %p5871_p2 = scmp.lt.u32.totalorder %s5863_s23, %s6776_s12 }
 0x14c   : > { %p5870_p10 = por %p5869_p12, %p5868_p4 }
 0x14d   : > { %p5866_p8 = pneg %p5865_p5 }
 0x14e   : > { %p5872_p9 = por %p5871_p2, %p5870_p10 }
 0x150   : > { %p5873_p3 = pnand %p5872_p9, %p5866_p8 }
 0x152   : > { %5876 = shalt.err (!%p5873_p3)
}
 0x153   : > { %s5877_s16 = scalar_lea.vmem %s6782_s17, 256  ;;  %s6297_s30 = smov [#allocation20]  }
 0x154   : > { %p5878_p7 = scmp.ne.s32.totalorder %s6782_s17, %s5877_s16  ;;  %s5881_s28 = sshll.u32 %s6297_s30, 4  ;;  %s5882_s28 = int_to_ptr.vmem [resolvable:$false] %s5881_s28 }
 0x155   : > { %s5883_s2 = scalar_lea.vmem %s5882_s28, 512  ;;  %p5884_p1 = scmp.lt.s32.totalorder %s6782_s17, %s5882_s28 }
 0x156   : > { %p5879_p6 = pnand %p5878_p7, %p7774_p0  ;;  %p5885_p13 = scmp.lt.s32.totalorder %s5883_s2, %s5877_s16 }
 0x158   : > { %p5880_p11 = pneg %p5879_p6  ;;  %p5886_p5 = por %p5885_p13, %p5884_p1 }
 0x15a   : > { %p5887_p4 = pnand %p5886_p5, %p5880_p11 }
 0x15c   : > { %5890 = shalt.err (!%p5887_p4)
}
 0x15d   : > { %5306 = dma.hbm_to_vmem [thread:$0]  (%p7774_p0), %s6776_s12, 256, %s6782_s17, %s7736_s3, %s6293_s14, %s6293_s14, %s6294_s6  }
 0x15e   : > { %s6815_s7 = scalar_lea.hbm %s7691_s13, %s6780_s26  ;;  %s901_s16 = scalar_lea.vmem [#allocation23], %s6656_s1 }
 0x15f   : > { %s908_s30 = sshll.u32 %s901_s16, 4  ;;  %s4617_s28 = sshll.u32 %s6656_s1, 8  ;;  %s6818_s30 = int_to_ptr.vmem [resolvable:$true] %s908_s30 }
 0x160   : > { %s7739_s2 = scalar_lea.sflag [#allocation24], %s6653_s5  ;;  %s5891_s9 = scalar_lea.hbm %s6815_s7, 16 }
 0x161   : > { %p5892_p8 = scmp.ne.s32.totalorder %s6815_s7, %s5891_s9  ;;  %s5895_s17 = scalar_lea.hbm %s7691_s13, 48 }
 0x162   : > { %p5896_p2 = scmp.lt.u32.totalorder %s6815_s7, %s7691_s13  ;;  %p5897_p9 = scmp.lt.u32.totalorder %s5895_s17, %s5891_s9 }
 0x163   : > { %p5893_p12 = pnand %p5892_p8, %p7774_p0  ;;  %p5899_p7 = scmp.lt.u32.totalorder %s5891_s9, %s6815_s7 }
 0x164   : > { %p5898_p3 = por %p5897_p9, %p5896_p2 }
 0x165   : > { %p5894_p10 = pneg %p5893_p12 }
 0x166   : > { %p5900_p6 = por %p5899_p7, %p5898_p3 }
 0x168   : > { %p5901_p11 = pnand %p5900_p6, %p5894_p10 }
 0x16a   : > { %5904 = shalt.err (!%p5901_p11)
}
 0x16b   : > { %s5905_s16 = scalar_lea.vmem %s6818_s30, 16  ;;  %s6298_s6 = smov [#allocation23]  }
 0x16c   : > { %p5906_p1 = scmp.ne.s32.totalorder %s6818_s30, %s5905_s16  ;;  %s5909_s12 = sshll.u32 %s6298_s6, 4  ;;  %s5910_s12 = int_to_ptr.vmem [resolvable:$false] %s5909_s12 }
 0x16d   : > { %s5911_s23 = scalar_lea.vmem %s5910_s12, 32  ;;  %p5912_p4 = scmp.lt.s32.totalorder %s6818_s30, %s5910_s12 }
 0x16e   : > { %p5907_p13 = pnand %p5906_p1, %p7774_p0  ;;  %p5913_p8 = scmp.lt.s32.totalorder %s5911_s23, %s5905_s16 }
 0x170   : > { %p5908_p5 = pneg %p5907_p13  ;;  %p5914_p12 = por %p5913_p8, %p5912_p4 }
 0x172   : > { %p5915_p2 = pnand %p5914_p12, %p5908_p5 }
 0x174   : > { %5918 = shalt.err (!%p5915_p2)
}
 0x175   : > { %5308 = dma.hbm_to_vmem [thread:$0]  (%p7774_p0), %s6815_s7, 16, %s6818_s30, %s7739_s2  }
 0x176   : > { %s4861_s9 = sshll.u32 %s6281_s25, 12  ;;  %s936_s16 = scalar_lea.vmem [#allocation26], %s4617_s28 }
 0x177   : > { %s6849_s6 = scalar_lea.hbm %s7693_s15, %s4861_s9  ;;  %s943_s12 = sshll.u32 %s936_s16, 4  ;;  %s6853_s12 = int_to_ptr.vmem [resolvable:$true] %s943_s12 }
 0x178   : > { %s7738_s23 = scalar_lea.sflag [#allocation27], %s6653_s5  ;;  %s5919_s3 = scalar_lea.hbm %s6849_s6, 4096 }
 0x179   : > { %p5920_p10 = scmp.ne.s32.totalorder %s6849_s6, %s5919_s3  ;;  %s5923_s30 = scalar_lea.hbm %s7693_s15, 12288 }
 0x17a   : > { %p5924_p7 = scmp.lt.u32.totalorder %s6849_s6, %s7693_s15  ;;  %p5925_p6 = scmp.lt.u32.totalorder %s5923_s30, %s5919_s3 }
 0x17b   : > { %p5921_p9 = pnand %p5920_p10, %p7774_p0  ;;  %p5927_p1 = scmp.lt.u32.totalorder %s5919_s3, %s6849_s6 }
 0x17c   : > { %p5926_p11 = por %p5925_p6, %p5924_p7 }
 0x17d   : > { %p5922_p3 = pneg %p5921_p9 }
 0x17e   : > { %p5928_p13 = por %p5927_p1, %p5926_p11 }
 0x180   : > { %p5929_p5 = pnand %p5928_p13, %p5922_p3 }
 0x182   : > { %5932 = shalt.err (!%p5929_p5)
}
 0x183   : > { %s5933_s28 = scalar_lea.vmem %s6853_s12, 4096  ;;  %s6299_s20 = smov [#allocation26]  }
 0x184   : > { %p5934_p4 = scmp.ne.s32.totalorder %s6853_s12, %s5933_s28  ;;  %s5937_s16 = sshll.u32 %s6299_s20, 4  ;;  %s5938_s16 = int_to_ptr.vmem [resolvable:$false] %s5937_s16 }
 0x185   : > { %s5939_s25 = scalar_lea.vmem %s5938_s16, 8192  ;;  %p5940_p2 = scmp.lt.s32.totalorder %s6853_s12, %s5938_s16 }
 0x186   : > { %p5935_p8 = pnand %p5934_p4, %p7774_p0  ;;  %p5941_p10 = scmp.lt.s32.totalorder %s5939_s25, %s5933_s28 }
 0x188   : > { %p5936_p12 = pneg %p5935_p8  ;;  %p5942_p9 = por %p5941_p10, %p5940_p2 }
 0x18a   : > { %p5943_p7 = pnand %p5942_p9, %p5936_p12 }
 0x18c   : > { %5946 = shalt.err (!%p5943_p7)
}
 0x18d   : > { %s6300_s3 = smov 1024   ;;  %s6884_s9 = scalar_lea.hbm %s7696_s18, %s6780_s26 }
 0x18e   : > { %5310 = dma.hbm_to_vmem [thread:$0]  (%p7774_p0), %s6849_s6, 4096, %s6853_s12, %s7738_s23, %s6300_s3, %s6300_s3, %s6293_s14  }
 0x18f   : > { %s983_s17 = scalar_lea.vmem [#allocation29], %s6656_s1  ;;  %s7737_s20 = scalar_lea.sflag [#allocation30], %s6653_s5 }
 0x190   : > { %s990_s28 = sshll.u32 %s983_s17, 4  ;;  %s5947_s16 = scalar_lea.hbm %s6884_s9, 16  ;;  %s991_s28 = int_to_ptr.vmem [resolvable:$true] %s990_s28 }
 0x191   : > { %p5948_p3 = scmp.ne.s32.totalorder %s6884_s9, %s5947_s16  ;;  %s5951_s6 = scalar_lea.hbm %s7696_s18, 48 }
 0x192   : > { %p5952_p1 = scmp.lt.u32.totalorder %s6884_s9, %s7696_s18  ;;  %p5953_p13 = scmp.lt.u32.totalorder %s5951_s6, %s5947_s16 }
 0x193   : > { %p5949_p6 = pnand %p5948_p3, %p7774_p0  ;;  %p5955_p4 = scmp.lt.u32.totalorder %s5947_s16, %s6884_s9 }
 0x194   : > { %p5954_p5 = por %p5953_p13, %p5952_p1 }
 0x195   : > { %p5950_p11 = pneg %p5949_p6 }
 0x196   : > { %p5956_p8 = por %p5955_p4, %p5954_p5 }
 0x198   : > { %p5957_p12 = pnand %p5956_p8, %p5950_p11 }
 0x19a   : > { %5960 = shalt.err (!%p5957_p12)
}
 0x19b   : > { %s5961_s7 = scalar_lea.vmem %s991_s28, 16  ;;  %s6301_s30 = smov [#allocation29]  }
 0x19c   : > { %p5962_p2 = scmp.ne.s32.totalorder %s991_s28, %s5961_s7  ;;  %s5965_s17 = sshll.u32 %s6301_s30, 4  ;;  %s5966_s17 = int_to_ptr.vmem [resolvable:$false] %s5965_s17 }
 0x19d   : > { %s5967_s25 = scalar_lea.vmem %s5966_s17, 32  ;;  %p5968_p7 = scmp.lt.s32.totalorder %s991_s28, %s5966_s17 }
 0x19e   : > { %p5963_p10 = pnand %p5962_p2, %p7774_p0  ;;  %p5969_p3 = scmp.lt.s32.totalorder %s5967_s25, %s5961_s7 }
 0x1a0   : > { %p5964_p9 = pneg %p5963_p10  ;;  %p5970_p6 = por %p5969_p3, %p5968_p7 }
 0x1a2   : > { %p5971_p1 = pnand %p5970_p6, %p5964_p9 }
 0x1a4   : > { %5974 = shalt.err (!%p5971_p1)
}
 0x1a5   : > { %5312 = dma.hbm_to_vmem [thread:$0]  (%p7774_p0), %s6884_s9, 16, %s991_s28, %s7737_s20  }
 0x1a6   : > { %s7778_s6 = sld [smem:[#allocation62_spill]]  ;;  %s770_s3 = scalar_lea.vmem [#allocation13], %s6656_s1 }
 0x1a7   : > { %s777_s7 = sshll.u32 %s770_s3, 4  ;;  %s778_s7 = int_to_ptr.vmem [resolvable:$true] %s777_s7 }
 0x1ac   : > { %s6911_s12 = scalar_lea.hbm %s7778_s6, %s6780_s26  ;;  %s5979_s9 = scalar_lea.hbm %s7778_s6, 48 }
 0x1ad   : > { %s5975_s30 = scalar_lea.hbm %s6911_s12, 16  ;;  %p5980_p4 = scmp.lt.u32.totalorder %s6911_s12, %s7778_s6 }
 0x1ae   : > { %p5976_p11 = scmp.ne.s32.totalorder %s6911_s12, %s5975_s30  ;;  %p5981_p8 = scmp.lt.u32.totalorder %s5979_s9, %s5975_s30 }
 0x1af   : > { %p5983_p2 = scmp.lt.u32.totalorder %s5975_s30, %s6911_s12 }
 0x1b0   : > { %p5977_p13 = pnand %p5976_p11, %p7774_p0  ;;  %p5982_p12 = por %p5981_p8, %p5980_p4 }
 0x1b2   : > { %p5978_p5 = pneg %p5977_p13  ;;  %p5984_p10 = por %p5983_p2, %p5982_p12 }
 0x1b4   : > { %p5985_p9 = pnand %p5984_p10, %p5978_p5 }
 0x1b6   : > { %5988 = shalt.err (!%p5985_p9)
}
 0x1b7   : > { %s5989_s14 = scalar_lea.vmem %s778_s7, 16  ;;  %s6302_s3 = smov [#allocation13]  }
 0x1b8   : > { %p5990_p7 = scmp.ne.s32.totalorder %s778_s7, %s5989_s14  ;;  %s5993_s20 = sshll.u32 %s6302_s3, 4  ;;  %s5994_s20 = int_to_ptr.vmem [resolvable:$false] %s5993_s20 }
 0x1b9   : > { %s5995_s17 = scalar_lea.vmem %s5994_s20, 32  ;;  %p5996_p1 = scmp.lt.s32.totalorder %s778_s7, %s5994_s20 }
 0x1ba   : > { %p5991_p3 = pnand %p5990_p7, %p7774_p0  ;;  %p5997_p11 = scmp.lt.s32.totalorder %s5995_s17, %s5989_s14 }
 0x1bc   : > { %p5992_p6 = pneg %p5991_p3  ;;  %p5998_p13 = por %p5997_p11, %p5996_p1 }
 0x1be   : > { %p5999_p4 = pnand %p5998_p13, %p5992_p6 }
 0x1c0   : > { %6002 = shalt.err (!%p5999_p4)
}
 0x1c1   : > { %s7779_s30 = scalar_lea.sflag [#allocation12], %s6653_s5  ;;  %s6937_s28 = scalar_lea.hbm %s7686_s8, %s6780_s26 }
 0x1c2   : > { %5301 = dma.hbm_to_vmem [thread:$0]  (%p7774_p0), %s6911_s12, 16, %s778_s7, %s7779_s30  }
 0x1c3   : > { %s808_s20 = scalar_lea.vmem [#allocation16], %s6656_s1  ;;  %s6003_s14 = scalar_lea.hbm %s6937_s28, 16 }
 0x1c4   : > { %s815_s16 = sshll.u32 %s808_s20, 4  ;;  %p6004_p5 = scmp.ne.s32.totalorder %s6937_s28, %s6003_s14  ;;  %s816_s16 = int_to_ptr.vmem [resolvable:$true] %s815_s16 }
 0x1c5   : > { %s6007_s12 = scalar_lea.hbm %s7686_s8, 48  ;;  %p6008_p2 = scmp.lt.u32.totalorder %s6937_s28, %s7686_s8 }
 0x1c6   : > { %p6005_p8 = pnand %p6004_p5, %p7774_p0  ;;  %p6009_p10 = scmp.lt.u32.totalorder %s6007_s12, %s6003_s14 }
 0x1c7   : > { %p6011_p7 = scmp.lt.u32.totalorder %s6003_s14, %s6937_s28 }
 0x1c8   : > { %p6006_p12 = pneg %p6005_p8  ;;  %p6010_p9 = por %p6009_p10, %p6008_p2 }
 0x1ca   : > { %p6012_p3 = por %p6011_p7, %p6010_p9 }
 0x1cc   : > { %p6013_p6 = pnand %p6012_p3, %p6006_p12 }
 0x1ce   : > { %6016 = shalt.err (!%p6013_p6)
}
 0x1cf   : > { %s6017_s25 = scalar_lea.vmem %s816_s16, 16  ;;  %s6303_s9 = smov [#allocation16]  }
 0x1d0   : > { %p6018_p1 = scmp.ne.s32.totalorder %s816_s16, %s6017_s25  ;;  %s6021_s20 = sshll.u32 %s6303_s9, 4  ;;  %s6022_s20 = int_to_ptr.vmem [resolvable:$false] %s6021_s20 }
 0x1d1   : > { %s6023_s3 = scalar_lea.vmem %s6022_s20, 32  ;;  %p6024_p4 = scmp.lt.s32.totalorder %s816_s16, %s6022_s20 }
 0x1d2   : > { %p6019_p11 = pnand %p6018_p1, %p7774_p0  ;;  %p6025_p5 = scmp.lt.s32.totalorder %s6023_s3, %s6017_s25 }
 0x1d4   : > { %p6020_p13 = pneg %p6019_p11  ;;  %p6026_p8 = por %p6025_p5, %p6024_p4 }
 0x1d6   : > { %p6027_p2 = pnand %p6026_p8, %p6020_p13 }
 0x1d8   : > { %6030 = shalt.err (!%p6027_p2)
}
 0x1d9   : > { %s7780_s14 = scalar_lea.sflag [#allocation15], %s6653_s5  ;;  %s6963_s7 = scalar_lea.hbm %s7688_s10, %s6780_s26 }
 0x1da   : > { %5303 = dma.hbm_to_vmem [thread:$0]  (%p7774_p0), %s6937_s28, 16, %s816_s16, %s7780_s14  }
 0x1db   : > { %s846_s30 = scalar_lea.vmem [#allocation19], %s6656_s1  ;;  %s6031_s9 = scalar_lea.hbm %s6963_s7, 16 }
 0x1dc   : > { %s853_s25 = sshll.u32 %s846_s30, 4  ;;  %p6032_p12 = scmp.ne.s32.totalorder %s6963_s7, %s6031_s9  ;;  %s854_s25 = int_to_ptr.vmem [resolvable:$true] %s853_s25 }
 0x1dd   : > { %s6035_s28 = scalar_lea.hbm %s7688_s10, 48  ;;  %p6036_p7 = scmp.lt.u32.totalorder %s6963_s7, %s7688_s10 }
 0x1de   : > { %p6033_p10 = pnand %p6032_p12, %p7774_p0  ;;  %p6037_p3 = scmp.lt.u32.totalorder %s6035_s28, %s6031_s9 }
 0x1df   : > { %p6039_p1 = scmp.lt.u32.totalorder %s6031_s9, %s6963_s7 }
 0x1e0   : > { %p6034_p9 = pneg %p6033_p10  ;;  %p6038_p6 = por %p6037_p3, %p6036_p7 }
 0x1e2   : > { %p6040_p11 = por %p6039_p1, %p6038_p6 }
 0x1e4   : > { %p6041_p13 = pnand %p6040_p11, %p6034_p9 }
 0x1e6   : > { %6044 = shalt.err (!%p6041_p13)
}
 0x1e7   : > { %s6045_s17 = scalar_lea.vmem %s854_s25, 16  ;;  %s6304_s12 = smov [#allocation19]  }
 0x1e8   : > { %p6046_p4 = scmp.ne.s32.totalorder %s854_s25, %s6045_s17  ;;  %s6049_s30 = sshll.u32 %s6304_s12, 4  ;;  %s6050_s30 = int_to_ptr.vmem [resolvable:$false] %s6049_s30 }
 0x1e9   : > { %s6051_s20 = scalar_lea.vmem %s6050_s30, 32  ;;  %p6052_p2 = scmp.lt.s32.totalorder %s854_s25, %s6050_s30 }
 0x1ea   : > { %p6047_p5 = pnand %p6046_p4, %p7774_p0  ;;  %p6053_p12 = scmp.lt.s32.totalorder %s6051_s20, %s6045_s17 }
 0x1ec   : > { %p6048_p8 = pneg %p6047_p5  ;;  %p6054_p10 = por %p6053_p12, %p6052_p2 }
 0x1ee   : > { %p6055_p3 = pnand %p6054_p10, %p6048_p8 }
 0x1f0   : > { %6058 = shalt.err (!%p6055_p3)
}
 0x1f1   : > { %s7781_s9 = scalar_lea.sflag [#allocation18], %s6653_s5  ;;  %s7782_s16 = sld [smem:[#allocation65_spill]] }
 0x1f2   : > { %5305 = dma.hbm_to_vmem [thread:$0]  (%p7774_p0), %s6963_s7, 16, %s854_s25, %s7781_s9  }
 0x1f3   : > { %s884_s17 = scalar_lea.vmem [#allocation22], %s6656_s1 }
 0x1f4   : > { %s891_s12 = sshll.u32 %s884_s17, 4  ;;  %s892_s12 = int_to_ptr.vmem [resolvable:$true] %s891_s12 }
 0x1f7   : > { %s6989_s14 = scalar_lea.hbm %s7782_s16, %s6780_s26  ;;  %s6063_s7 = scalar_lea.hbm %s7782_s16, 48 }
 0x1f8   : > { %s6059_s30 = scalar_lea.hbm %s6989_s14, 16  ;;  %p6064_p1 = scmp.lt.u32.totalorder %s6989_s14, %s7782_s16 }
 0x1f9   : > { %p6060_p9 = scmp.ne.s32.totalorder %s6989_s14, %s6059_s30  ;;  %p6065_p11 = scmp.lt.u32.totalorder %s6063_s7, %s6059_s30 }
 0x1fa   : > { %p6067_p4 = scmp.lt.u32.totalorder %s6059_s30, %s6989_s14 }
 0x1fb   : > { %p6061_p7 = pnand %p6060_p9, %p7774_p0  ;;  %p6066_p13 = por %p6065_p11, %p6064_p1 }
 0x1fd   : > { %p6062_p6 = pneg %p6061_p7  ;;  %p6068_p5 = por %p6067_p4, %p6066_p13 }
 0x1ff   : > { %p6069_p8 = pnand %p6068_p5, %p6062_p6 }
 0x201   : > { %6072 = shalt.err (!%p6069_p8)
}
 0x202   : > { %s6073_s3 = scalar_lea.vmem %s892_s12, 16  ;;  %s6305_s28 = smov [#allocation22]  }
 0x203   : > { %p6074_p2 = scmp.ne.s32.totalorder %s892_s12, %s6073_s3  ;;  %s6077_s17 = sshll.u32 %s6305_s28, 4  ;;  %s6078_s17 = int_to_ptr.vmem [resolvable:$false] %s6077_s17 }
 0x204   : > { %s6079_s23 = scalar_lea.vmem %s6078_s17, 32  ;;  %p6080_p3 = scmp.lt.s32.totalorder %s892_s12, %s6078_s17 }
 0x205   : > { %p6075_p12 = pnand %p6074_p2, %p7774_p0  ;;  %p6081_p9 = scmp.lt.s32.totalorder %s6079_s23, %s6073_s3 }
 0x207   : > { %p6076_p10 = pneg %p6075_p12  ;;  %p6082_p7 = por %p6081_p9, %p6080_p3 }
 0x209   : > { %p6083_p1 = pnand %p6082_p7, %p6076_p10 }
 0x20b   : > { %6086 = shalt.err (!%p6083_p1)
}
 0x20c   : > { %s7783_s30 = scalar_lea.sflag [#allocation21], %s6653_s5  ;;  %s7784_s25 = sld [smem:[#allocation66_spill]] }
 0x20d   : > { %5307 = dma.hbm_to_vmem [thread:$0]  (%p7774_p0), %s6989_s14, 16, %s892_s12, %s7783_s30  }
 0x20e   : > { %s918_s3 = scalar_lea.vmem [#allocation25], %s6656_s1 }
 0x20f   : > { %s925_s17 = sshll.u32 %s918_s3, 4  ;;  %s926_s17 = int_to_ptr.vmem [resolvable:$true] %s925_s17 }
 0x212   : > { %s7785_s9 = smov %s7784_s25  ;;  %s7015_s28 = scalar_lea.hbm %s7784_s25, %s6780_s26 }
 0x213   : > { %s6087_s23 = scalar_lea.hbm %s7015_s28, 16  ;;  %s6091_s14 = scalar_lea.hbm %s7785_s9, 48 }
 0x214   : > { %p6088_p6 = scmp.ne.s32.totalorder %s7015_s28, %s6087_s23  ;;  %p6092_p4 = scmp.lt.u32.totalorder %s7015_s28, %s7785_s9 }
 0x215   : > { %p6093_p5 = scmp.lt.u32.totalorder %s6091_s14, %s6087_s23  ;;  %p6095_p2 = scmp.lt.u32.totalorder %s6087_s23, %s7015_s28 }
 0x216   : > { %p6089_p11 = pnand %p6088_p6, %p7774_p0 }
 0x217   : > { %p6094_p8 = por %p6093_p5, %p6092_p4 }
 0x218   : > { %p6090_p13 = pneg %p6089_p11 }
 0x219   : > { %p6096_p12 = por %p6095_p2, %p6094_p8 }
 0x21b   : > { %p6097_p10 = pnand %p6096_p12, %p6090_p13 }
 0x21d   : > { %6100 = shalt.err (!%p6097_p10)
}
 0x21e   : > { %s6101_s20 = scalar_lea.vmem %s926_s17, 16  ;;  %s6306_s7 = smov [#allocation25]  }
 0x21f   : > { %p6102_p3 = scmp.ne.s32.totalorder %s926_s17, %s6101_s20  ;;  %s6105_s25 = sshll.u32 %s6306_s7, 4  ;;  %s6106_s25 = int_to_ptr.vmem [resolvable:$false] %s6105_s25 }
 0x220   : > { %s6107_s2 = scalar_lea.vmem %s6106_s25, 32  ;;  %p6108_p1 = scmp.lt.s32.totalorder %s926_s17, %s6106_s25 }
 0x221   : > { %p6103_p9 = pnand %p6102_p3, %p7774_p0  ;;  %p6109_p6 = scmp.lt.s32.totalorder %s6107_s2, %s6101_s20 }
 0x223   : > { %p6104_p7 = pneg %p6103_p9  ;;  %p6110_p11 = por %p6109_p6, %p6108_p1 }
 0x225   : > { %p6111_p4 = pnand %p6110_p11, %p6104_p7 }
 0x227   : > { %6114 = shalt.err (!%p6111_p4)
}
 0x228   : > { %s7786_s6 = scalar_lea.sflag [#allocation24], %s6653_s5  ;;  %s7787_s14 = sld [smem:[#allocation67_spill]] }
 0x229   : > { %5309 = dma.hbm_to_vmem [thread:$0]  (%p7774_p0), %s7015_s28, 16, %s926_s17, %s7786_s6  }
 0x22a   : > { %s957_s30 = scalar_lea.vmem [#allocation28], %s6659_s4 }
 0x22b   : > { %s965_s20 = sshll.u32 %s957_s30, 4  ;;  %s966_s20 = int_to_ptr.vmem [resolvable:$true] %s965_s20 }
 0x22e   : > { %s7041_s12 = scalar_lea.hbm %s7787_s14, %s6662_s0  ;;  %s6119_s28 = scalar_lea.hbm %s7787_s14, 768 }
 0x22f   : > { %s6115_s7 = scalar_lea.hbm %s7041_s12, 256  ;;  %p6120_p2 = scmp.lt.u32.totalorder %s7041_s12, %s7787_s14 }
 0x230   : > { %p6116_p13 = scmp.ne.s32.totalorder %s7041_s12, %s6115_s7  ;;  %p6121_p12 = scmp.lt.u32.totalorder %s6119_s28, %s6115_s7 }
 0x231   : > { %p6123_p3 = scmp.lt.u32.totalorder %s6115_s7, %s7041_s12 }
 0x232   : > { %p6117_p5 = pnand %p6116_p13, %p7774_p0  ;;  %p6122_p10 = por %p6121_p12, %p6120_p2 }
 0x234   : > { %p6118_p8 = pneg %p6117_p5  ;;  %p6124_p9 = por %p6123_p3, %p6122_p10 }
 0x236   : > { %p6125_p7 = pnand %p6124_p9, %p6118_p8 }
 0x238   : > { %6128 = shalt.err (!%p6125_p7)
}
 0x239   : > { %s6129_s4 = scalar_lea.vmem %s966_s20, 256  ;;  %s6307_s0 = smov [#allocation28]  }
 0x23a   : > { %p6130_p1 = scmp.ne.s32.totalorder %s966_s20, %s6129_s4  ;;  %s6133_s3 = sshll.u32 %s6307_s0, 4  ;;  %s6134_s3 = int_to_ptr.vmem [resolvable:$false] %s6133_s3 }
 0x23b   : > { %s6135_s23 = scalar_lea.vmem %s6134_s3, 512  ;;  %p6136_p4 = scmp.lt.s32.totalorder %s966_s20, %s6134_s3 }
 0x23c   : > { %p6131_p6 = pnand %p6130_p1, %p7774_p0  ;;  %p6137_p13 = scmp.lt.s32.totalorder %s6135_s23, %s6129_s4 }
 0x23e   : > { %p6132_p11 = pneg %p6131_p6  ;;  %p6138_p5 = por %p6137_p13, %p6136_p4 }
 0x240   : > { %p6139_p2 = pnand %p6138_p5, %p6132_p11 }
 0x242   : > { %6142 = shalt.err (!%p6139_p2)
}
 0x243   : > { %s7788_s30 = scalar_lea.sflag [#allocation27], %s6653_s5  ;;  %s7789_s2 = sld [smem:[#allocation69_spill]] }
 0x244   : > { %5311 = dma.hbm_to_vmem [thread:$0]  (%p7774_p0), %s7041_s12, 256, %s966_s20, %s7788_s30  }
 0x245   : > { %s1000_s17 = scalar_lea.vmem [#allocation31], %s6656_s1 }
 0x246   : > { %s1007_s6 = sshll.u32 %s1000_s17, 4  ;;  %s1008_s6 = int_to_ptr.vmem [resolvable:$true] %s1007_s6 }
 0x249   : > { %s7067_s28 = scalar_lea.hbm %s7789_s2, %s6780_s26  ;;  %s6147_s12 = scalar_lea.hbm %s7789_s2, 48 }
 0x24a   : > { %s6143_s4 = scalar_lea.hbm %s7067_s28, 16  ;;  %p6148_p3 = scmp.lt.u32.totalorder %s7067_s28, %s7789_s2 }
 0x24b   : > { %p6144_p8 = scmp.ne.s32.totalorder %s7067_s28, %s6143_s4  ;;  %p6149_p9 = scmp.lt.u32.totalorder %s6147_s12, %s6143_s4 }
 0x24c   : > { %p6151_p1 = scmp.lt.u32.totalorder %s6143_s4, %s7067_s28 }
 0x24d   : > { %p6145_p12 = pnand %p6144_p8, %p7774_p0  ;;  %p6150_p7 = por %p6149_p9, %p6148_p3 }
 0x24f   : > { %p6146_p10 = pneg %p6145_p12  ;;  %p6152_p6 = por %p6151_p1, %p6150_p7 }
 0x251   : > { %p6153_p11 = pnand %p6152_p6, %p6146_p10 }
 0x253   : > { %6156 = shalt.err (!%p6153_p11)
}
 0x254   : > { %s6157_s30 = scalar_lea.vmem %s1008_s6, 16  ;;  %s6308_s7 = smov [#allocation31]  }
 0x255   : > { %p6158_p4 = scmp.ne.s32.totalorder %s1008_s6, %s6157_s30  ;;  %s6161_s25 = sshll.u32 %s6308_s7, 4  ;;  %s6162_s25 = int_to_ptr.vmem [resolvable:$false] %s6161_s25 }
 0x256   : > { %s6163_s17 = scalar_lea.vmem %s6162_s25, 32  ;;  %p6164_p2 = scmp.lt.s32.totalorder %s1008_s6, %s6162_s25 }
 0x257   : > { %p6159_p13 = pnand %p6158_p4, %p7774_p0  ;;  %p6165_p8 = scmp.lt.s32.totalorder %s6163_s17, %s6157_s30 }
 0x259   : > { %p6160_p5 = pneg %p6159_p13  ;;  %p6166_p12 = por %p6165_p8, %p6164_p2 }
 0x25b   : > { %p6167_p3 = pnand %p6166_p12, %p6160_p5 }
 0x25d   : > { %6170 = shalt.err (!%p6167_p3)
}
 0x25e   : > { %s7790_s4 = scalar_lea.sflag [#allocation30], %s6653_s5  ;;  %s7791_s12 = sld [smem:[#allocation70_spill]] }
 0x25f   : > { %5313 = dma.hbm_to_vmem [thread:$0]  (%p7774_p0), %s7067_s28, 16, %s1008_s6, %s7790_s4  }
 0x260   : > { %s1017_s23 = scalar_lea.vmem [#allocation32], %s6656_s1  ;;  %s1015_s7 = scalar_lea.sflag [#allocation33], %s6653_s5 }
 0x261   : > { %s1024_s30 = sshll.u32 %s1017_s23, 4  ;;  %s1025_s30 = int_to_ptr.vmem [resolvable:$true] %s1024_s30 }
 0x264   : > { %s7093_s20 = scalar_lea.hbm %s7791_s12, %s6780_s26  ;;  %s6175_s6 = scalar_lea.hbm %s7791_s12, 48 }
 0x265   : > { %s6171_s25 = scalar_lea.hbm %s7093_s20, 16  ;;  %p6176_p1 = scmp.lt.u32.totalorder %s7093_s20, %s7791_s12 }
 0x266   : > { %p6172_p10 = scmp.ne.s32.totalorder %s7093_s20, %s6171_s25  ;;  %p6177_p6 = scmp.lt.u32.totalorder %s6175_s6, %s6171_s25 }
 0x267   : > { %p6179_p4 = scmp.lt.u32.totalorder %s6171_s25, %s7093_s20 }
 0x268   : > { %p6173_p9 = pnand %p6172_p10, %p7774_p0  ;;  %p6178_p11 = por %p6177_p6, %p6176_p1 }
 0x26a   : > { %p6174_p7 = pneg %p6173_p9  ;;  %p6180_p13 = por %p6179_p4, %p6178_p11 }
 0x26c   : > { %p6181_p5 = pnand %p6180_p13, %p6174_p7 }
 0x26e   : > { %6184 = shalt.err (!%p6181_p5)
}
 0x26f   : > { %s6185_s5 = scalar_lea.vmem %s1025_s30, 16  ;;  %s6309_s1 = smov [#allocation32]  }
 0x270   : > { %p6186_p2 = scmp.ne.s32.totalorder %s1025_s30, %s6185_s5  ;;  %s6189_s0 = sshll.u32 %s6309_s1, 4  ;;  %s6190_s0 = int_to_ptr.vmem [resolvable:$false] %s6189_s0 }
 0x271   : > { %s6191_s3 = scalar_lea.vmem %s6190_s0, 32  ;;  %p6192_p3 = scmp.lt.s32.totalorder %s1025_s30, %s6190_s0 }
 0x272   : > { %p6187_p8 = pnand %p6186_p2, %p7774_p0  ;;  %p6193_p10 = scmp.lt.s32.totalorder %s6191_s3, %s6185_s5 }
 0x274   : > { %p6188_p12 = pneg %p6187_p8  ;;  %p6194_p9 = por %p6193_p10, %p6192_p3 }
 0x276   : > { %p6195_p1 = pnand %p6194_p9, %p6188_p12 }
 0x278   : > { %6198 = shalt.err (!%p6195_p1)
}
 0x279   : > { %5314 = dma.hbm_to_vmem [thread:$0]  (%p7774_p0), %s7093_s20, 16, %s1025_s30, %s1015_s7  }
 0x27a PF: > { %s7792_s23 = sld [smem:[#allocation55_spill]] }
 0x280   : > { %p7793_p7 = scmp.ne.s32.totalorder %s7792_s23, 0 }
 0x281   : > { %s7794_s25 = sld [smem:[#allocation51_spill]] (!%p7793_p7) }
 0x282   : > { %1033 = sbr.rel (%p7793_p7) target bundleno = 3520 (0xdc0), region = 112 }
 0x287   : > { %p7795_p6 = scmp.eq.s32.totalorder (!%p7793_p7), %s7794_s25, 0 }
 0x289   : > { %6216 = dma.done.wait (%p7795_p6), [#allocation4], 256   ;;  %p7796_p11 = pmov %p7795_p6 }
 0x28a   : > { %p7797_p4 = pmov %p7795_p6 }
 0x28b   : > { %6218 = vsyncadd (%p7796_p11), [#allocation4], 4294967040 }
 0x28c   : > { %6220 = dma.done.wait (%p7797_p4), [#allocation6], 2176   ;;  %p7798_p13 = pmov %p7797_p4 }
 0x28d   : > { %p7799_p5 = pmov %p7797_p4 }
 0x28e   : > { %6222 = vsyncadd (%p7798_p13), [#allocation6], 4294965120 }
 0x28f   : > { %6224 = dma.done.wait (%p7799_p5), [#allocation9], 384   ;;  %p7800_p0 = pmov %p7797_p4 }
 0x290   : > { %s7801_s27 = sld [smem:[#allocation50_spill]]  ;;  %s7802_s20 = sld [smem:[#allocation54_spill]] }
 0x291   : > { %6226 = vsyncadd (%p7800_p0), [#allocation9], 4294966912  ;;  %s7129_s30 = sand.u32 1, %s7794_s25  }
 0x292   : > { %s1056_s28 = scalar_lea.sflag [#allocation12], %s7129_s30 }
 0x296   : > { %s7132_s7 = sand.u32 1, %s7801_s27   ;;  %p7803_p2 = scmp.ne.s32.totalorder %s7802_s20, 0 }
 0x297   : > { %s7135_s17 = sshll.u32 %s7132_s7, 4 }
 0x298   : > { %s1059_s6 = scalar_lea.vmem [#allocation11], %s7135_s17 }
 0x299   : > { %6228 = dma.done.wait (%p7803_p2), %s1056_s28, 272  }
 0x29a   : > { %6230 = vsyncadd (%p7803_p2), %s1056_s28, 4294967024  ;;  %s1073_s26 = scalar_lea.sflag [#allocation15], %s7129_s30  ;;  %s1076_s5 = scalar_lea.vmem [#allocation14], %s7135_s17 }
 0x29b   : > { %6232 = dma.done.wait (%p7803_p2), %s1073_s26, 272  }
 0x29c   : > { %6234 = vsyncadd (%p7803_p2), %s1073_s26, 4294967024  ;;  %s1090_s0 = scalar_lea.sflag [#allocation18], %s7129_s30 }
 0x29d   : > { %6236 = dma.done.wait (%p7803_p2), %s1090_s0, 272  }
 0x29e   : > { %6238 = vsyncadd (%p7803_p2), %s1090_s0, 4294967024  ;;  %s1107_s27 = scalar_lea.sflag [#allocation21], %s7129_s30 }
 0x29f   : > { %6240 = dma.done.wait (%p7803_p2), %s1107_s27, 272  }
 0x2a0   : > { %6242 = vsyncadd (%p7803_p2), %s1107_s27, 4294967024  ;;  %s1124_s4 = scalar_lea.sflag [#allocation24], %s7129_s30 }
 0x2a1   : > { %6244 = dma.done.wait (%p7803_p2), %s1124_s4, 32  }
 0x2a2   : > { %6246 = vsyncadd (%p7803_p2), %s1124_s4, 4294967264  ;;  %s4636_s0 = sshll.u32 %s7132_s7, 8  ;;  %s1140_s23 = scalar_lea.sflag [#allocation27], %s7129_s30 }
 0x2a3   : > { %s7174_s27 = scalar_lea.vmem [#allocation26], %s4636_s0 }
 0x2a4   : > { %6248 = dma.done.wait (%p7803_p2), %s1140_s23, 4352  }
 0x2a5   : > { %6250 = vsyncadd (%p7803_p2), %s1140_s23, 4294962944  ;;  %s1152_s1 = scalar_lea.vmem [#allocation28], %s7135_s17  ;;  %s1158_s4 = scalar_lea.sflag [#allocation30], %s7129_s30 }
 0x2a6   : > { %s1160_s26 = scalar_lea.vmem [#allocation29], %s7132_s7 }
 0x2a7   : > { %6252 = dma.done.wait (%p7803_p2), %s1158_s4, 32  }
 0x2a8   : > { %6254 = vsyncadd (%p7803_p2), %s1158_s4, 4294967264  ;;  %s1168_s0 = scalar_lea.vmem [#allocation31], %s7132_s7  ;;  %s1174_s28 = scalar_lea.sflag [#allocation33], %s7129_s30 }
 0x2a9   : > { %6256 = dma.done.wait (%p7803_p2), %s1174_s28, 16  }
 0x2aa   : > { %6258 = vsyncadd (%p7803_p2), %s1174_s28, 4294967280  ;;  %p7804_p8 = pmov %p7800_p0 }
 0x2ab   : > { %p7805_p12 = pmov %p7800_p0 }
 0x2ac   : > { %6260 = dma.done.wait (%p7804_p8), [#allocation33], 16  }
 0x2ad   : > { %6262 = vsyncadd (%p7805_p12), [#allocation33], 4294967280  ;;  %p7806_p3 = pmov %p7800_p0 }
 0x2ae   : > { %p7807_p10 = pmov %p7800_p0 }
 0x2af   : > { %6264 = dma.done.wait (%p7806_p3), [#allocation36], 16  }
 0x2b0   : > { %6266 = vsyncadd (%p7807_p10), [#allocation36], 4294967280  ;;  %p1308_p9 = scmp.lt.s32.totalorder %s7794_s25, 2  ;;  %s7808_s28 = sld [smem:[#allocation68_spill]] }
 0x2b1   : > { %p7809_p1 = scmp.ne.s32.totalorder %s7794_s25, 0 }
 0x2b2   : > { %s1309_s30 = scalar_select %p1308_p9, %s7794_s25, 2 }
 0x2b3   : > { %1317 = sbr.rel (%p7809_p1) target bundleno = 698 (0x2ba), region = 204  ;;  %v1318_v0 = vld [vmem:[#allocation3] sm:$0xff] (!%p7809_p1)  ;;  %vm1320_vm0 = vcmask (!%p7809_p1), 261120   ;;  %v1319_v1 = vld [vmem:[#allocation3 + $0x8] sm:$0xff] (!%p7809_p1) }
 0x2b4   : > { %s4863_s23 = sshll.u32 %s1309_s30, 10  ;;  %1321 = vst.msk [vmem:[#allocation2] sm:$0xff] (!%p7809_p1), %vm1320_vm0, %v1318_v0  ;;  %1322 = vst.msk [vmem:[#allocation2 + $0x8] sm:$0xff] (!%p7809_p1), %vm1320_vm0, %v1319_v1 }
 0x2b6   : > { %s7207_s3 = scalar_lea.vmem %s7808_s28, %s4863_s23 }
 0x2ba PF: > { %v5427_v2 = vld [vmem:[%s1076_s5] sm:$0xff]   ;;  %v6310_v3 = vmov 0.0   ;;  %v5428_v4 = vld [vmem:[%s1076_s5 + $0x8] sm:$0xff]   ;;  %vm6311_vm1 = vmmov 0   ;;  %vm1349_vm2 = vcmask 261120   ;;  %s7810_s25 = scalar_lea.vmem [#allocation17], %s7135_s17 }
 0x2bb   : > { %5102 = vmatprep.subr.bf16.mxu1 %v6310_v3  ;;  %5094 = vmatprep.subr.bf16.mxu0 %v6310_v3  ;;  %v7219_v5 = vld [vmem:[#allocation2] sm:$0xff]  ;;  %v7221_v6 = vld [vmem:[#allocation2 + $0x8] sm:$0xff]  ;;  %s7812_s5 = scalar_lea.vmem [#allocation16], %s7132_s7  ;;  %v7248_v14 = vld [vmem:[#allocation5 + $0x10] sm:$0xff]  ;;  %s7815_s30 = scalar_lea.vmem [#allocation13], %s7132_s7  ;;  %vm1867_vm4 = vcmask 64512  }
 0x2bc   : > { %5103 = vmatpush3.bf16.msra.mxu1 %v5427_v2  ;;  %5106 = vmatprep.mubr.msk.bf16.mxu1 %vm6311_vm1, %v6310_v3  ;;  %v5429_v7 = vld [vmem:[%s1059_s6] sm:$0xff]   ;;  %v5430_v8 = vld [vmem:[%s1059_s6 + $0x8] sm:$0xff]   ;;  %v1325_v9 = vpack.c.bf16 %v7221_v6, %v7219_v5  ;;  %s7811_s6 = smov %s7810_s25  ;;  %vm7291_vm3 = vmpackc.low %vm1349_vm2, %vm1349_vm2  ;;  %s7816_s23 = scalar_lea.vmem [#allocation19], %s7132_s7 }
 0x2bd   : > { %5104 = vmatprep.subr.bf16.mxu1 %v6310_v3  ;;  %5098 = vmatprep.mubr.msk.bf16.mxu0 %vm6311_vm1, %v6310_v3  ;;  %v5431_v10 = vld [vmem:[%s7810_s25] sm:$0xff]   ;;  %v4647_v12 = vld [vmem:[%s7812_s5] ss:$0 sm:$0xff]  ;;  %s7817_s4 = scalar_lea.vmem [#allocation20], %s7135_s17  ;;  %s7819_s28 = scalar_lea.vmem [#allocation22], %s7132_s7 }
 0x2be   : > { %5095 = vmatpush3.bf16.msra.mxu0 %v5429_v7  ;;  %v5432_v11 = vld [vmem:[%s7811_s6 + $0x8] sm:$0xff]   ;;  %v7246_v13 = vld [vmem:[#allocation5] sm:$0xff]  ;;  %v7254_v18 = vld [vmem:[#allocation5 + $0x30] sm:$0xff]  ;;  %s7818_s20 = smov %s7817_s4  ;;  %s7820_s25 = scalar_lea.vmem [#allocation23], %s7132_s7 }
 0x2bf   : > { %5096 = vmatprep.subr.bf16.mxu0 %v6310_v3  ;;  %v7250_v15 = vld [vmem:[#allocation5 + $0x20] sm:$0xff]  ;;  %v7252_v17 = vld [vmem:[#allocation5 + $0x8] sm:$0xff]  ;;  %v7258_v22 = vld [vmem:[#allocation5 + $0x18] sm:$0xff]  ;;  %s7821_s6 = scalar_lea.vmem [#allocation25], %s7132_s7  ;;  %s7822_s17 = scalar_lea.vmem [#allocation32], %s7132_s7 }
 0x2c0   : > { %5105 = vmatpush3.bf16.msra.mxu1 %v5428_v4  ;;  %v7256_v19 = vld [vmem:[#allocation5 + $0x40] sm:$0xff]  ;;  %v7260_v23 = vld [vmem:[#allocation5 + $0x50] sm:$0xff]  ;;  %v7264_v26 = vld [vmem:[#allocation5 + $0x28] sm:$0xff] }
 0x2c1   : > { %v7262_v24 = vld [vmem:[#allocation5 + $0x60] sm:$0xff]  ;;  %v7266_v27 = vld [vmem:[#allocation5 + $0x38] sm:$0xff]  ;;  %v7268_v28 = vld [vmem:[#allocation5 + $0x48] sm:$0xff] }
 0x2c2   : > { %5097 = vmatpush3.bf16.msra.mxu0 %v5430_v8  ;;  %v7273_v34 = vld [vmem:[#allocation5 + $0x58] sm:$0xff]  ;;  %v7275_v35 = vld [vmem:[#allocation5 + $0x68] sm:$0xff]  ;;  %v7277_v36 = vld [vmem:[#allocation5 + $0x70] sm:$0xff] }
 0x2c3   : > { %5107 = vmatmul.mubr.msk.bf16.vlgmr.msra.gmra.mrb[0].mxu1 %vm1349_vm2, %v1325_v9  ;;  %5110 = vmatprep.subr.bf16.mxu0 %v6310_v3  ;;  %v7287_v47 = vld [vmem:[#allocation5 + $0x78] sm:$0xff]  ;;  %v4643_v54 = vld [vmem:[%s7815_s30] ss:$0 sm:$0xff] }
 0x2c4   : > { %v4651_v8 = vld [vmem:[%s7816_s23] ss:$0 sm:$0xff] }
 0x2c5   : > { %5099 = vmatmul.mubr.msk.bf16.vlgmr.msra.gmra.mrb[0].mxu0 %vm1349_vm2, %v1325_v9 }
 0x2c6   : > { %5114 = vmatprep.mubr.msk.bf16.mxu0 %vm6311_vm1, %v6310_v3  ;;  %5111 = vmatpush3.bf16.msra.mxu0 %v5431_v10 }
 0x2c7   : > { %5112 = vmatprep.subr.bf16.mxu0 %v6310_v3 }
 0x2ca   : > { %5113 = vmatpush3.bf16.msra.mxu0 %v5432_v11 }
 0x2cd   : > { %5115 = vmatmul.mubr.msk.bf16.vlgmr.msra.gmra.mrb[4].mxu0 %vm1349_vm2, %v1325_v9 }
 0x396   : > { %v1451_v16 = vpop.f32.mrb[0].mxu1 }
 0x397   : > { %v1452_v20 = vadd.f32 %v4647_v12, %v1451_v16  ;;  %v5108_v21 = vpop.f32.mrb[1].mxu1 }
 0x398   : > { %v1454_v25 = vpop.f32.mrb[2].mxu1  ;;  %v1387_v37 = vpop.f32.mrb[0].mxu0 }
 0x399   : > { %v1455_v29 = vadd.f32 %v4647_v12, %v1454_v25  ;;  %v5109_v30 = vpop.f32.mrb[3].mxu1  ;;  %v1542_v31 = vmul.f32 %v7246_v13, %v1452_v20  ;;  %v1544_v32 = vmul.f32 %v7248_v14, %v1452_v20  ;;  %v1546_v33 = vmul.f32 %v7250_v15, %v1452_v20  ;;  %v5100_v42 = vpop.f32.mrb[1].mxu0 }
 0x39a   : > { %v1548_v38 = vmul.f32 %v7254_v18, %v1452_v20  ;;  %v1550_v39 = vmul.f32 %v7256_v19, %v1452_v20  ;;  %v1552_v40 = vmul.f32 %v7260_v23, %v1452_v20  ;;  %v1554_v41 = vmul.f32 %v7262_v24, %v1452_v20  ;;  %v1390_v48 = vpop.f32.mrb[2].mxu0 }
 0x39b   : > { %v1543_v43 = vmul.f32 %v7252_v17, %v1455_v29  ;;  %v1545_v44 = vmul.f32 %v7258_v22, %v1455_v29  ;;  %v1547_v45 = vmul.f32 %v7264_v26, %v1455_v29  ;;  %v1549_v46 = vmul.f32 %v7266_v27, %v1455_v29  ;;  %v5101_v55 = vpop.f32.mrb[3].mxu0 }
 0x39c   : > { %v1551_v50 = vmul.f32 %v7268_v28, %v1455_v29  ;;  %v1553_v51 = vmul.f32 %v7273_v34, %v1455_v29  ;;  %v1555_v52 = vmul.f32 %v7275_v35, %v1455_v29  ;;  %v1556_v53 = vmul.f32 %v7277_v36, %v1452_v20 }
 0x39d   : > { %v5206_v56 = vpack.c.bf16 %v1543_v43, %v1542_v31  ;;  %v5212_v57 = vpack.c.bf16 %v1545_v44, %v1544_v32  ;;  %v5218_v58 = vpack.c.bf16 %v1547_v45, %v1546_v33  ;;  %v5224_v59 = vpack.c.bf16 %v1549_v46, %v1548_v38 }
 0x39e   : > { %v5230_v60 = vpack.c.bf16 %v1551_v50, %v1550_v39  ;;  %v5236_v61 = vpack.c.bf16 %v1553_v51, %v1552_v40  ;;  %v5242_v62 = vpack.c.bf16 %v1555_v52, %v1554_v41  ;;  %v1557_v63 = vmul.f32 %v7287_v47, %v1455_v29 }
 0x39f   : > { %5208 = vmatprep.subr.msk.bf16.mxu1 %vm7291_vm3, %v5206_v56  ;;  %v1388_v0 = vadd.f32 %v4643_v54, %v1387_v37  ;;  %v1391_v4 = vadd.f32 %v4643_v54, %v1390_v48  ;;  %v1539_v54 = vld [vmem:[#allocation8] sm:$0xff] }
 0x3a0   : > { %5211 = vmatpush3.bf16.xpose.msk.msra.mxu1 %vm7291_vm3, %v5206_v56  ;;  %v5248_v1 = vpack.c.bf16 %v1557_v63, %v1556_v53  ;;  %v1515_v9 = vpop.f32.mrb[4].mxu0 }
 0x3a1   : > { %5214 = vmatprep.subr.msk.bf16.mxu1 %vm7291_vm3, %v5212_v57  ;;  %v1574_v2 = vmul.f32 0.5, %v1388_v0  ;;  %v1575_v7 = vmul.f32 0.5, %v1391_v4  ;;  %v1516_v10 = vadd.f32 %v4651_v8, %v1515_v9  ;;  %v5116_v11 = vpop.f32.mrb[5].mxu0 }
 0x3a2   : > { %v1518_v12 = vpop.f32.mrb[6].mxu0 }
 0x3a3   : > { %5150 = vmatprep.mubr.msk.f32.mxu1 %vm1349_vm2, %v1574_v2  ;;  %v1519_v16 = vadd.f32 %v4651_v8, %v1518_v12  ;;  %v1558_v20 = vmul.f32 %v7246_v13, %v1516_v10  ;;  %v1560_v21 = vmul.f32 %v7248_v14, %v1516_v10  ;;  %v5117_v25 = vpop.f32.mrb[7].mxu0  ;;  %v1562_v33 = vmul.f32 %v7250_v15, %v1516_v10  ;;  %v1540_v13 = vld [vmem:[#allocation10] sm:$0xff] }
 0x3a4   : > { %v1564_v41 = vmul.f32 %v7254_v18, %v1516_v10  ;;  %v1566_v42 = vmul.f32 %v7256_v19, %v1516_v10  ;;  %v1568_v45 = vmul.f32 %v7260_v23, %v1516_v10  ;;  %v1570_v49 = vmul.f32 %v7262_v24, %v1516_v10 }
 0x3a5   : > { %v1559_v29 = vmul.f32 %v7252_v17, %v1519_v16  ;;  %v1561_v30 = vmul.f32 %v7258_v22, %v1519_v16  ;;  %v1563_v37 = vmul.f32 %v7264_v26, %v1519_v16  ;;  %v1541_v17 = vld [vmem:[#allocation10 + $0x8] sm:$0xff]  ;;  %v1565_v15 = vmul.f32 %v7266_v27, %v1519_v16  ;;  %v1538_v27 = vld [vmem:[#allocation7] sm:$0xff] }
 0x3a6   : > { %v1567_v43 = vmul.f32 %v7268_v28, %v1519_v16  ;;  %v1569_v46 = vmul.f32 %v7273_v34, %v1519_v16  ;;  %v1571_v18 = vmul.f32 %v7275_v35, %v1519_v16  ;;  %v1572_v50 = vmul.f32 %v7277_v36, %v1516_v10 }
 0x3a7   : > { %v5254_v31 = vpack.c.bf16 %v1559_v29, %v1558_v20  ;;  %v5258_v32 = vpack.c.bf16 %v1561_v30, %v1560_v21  ;;  %v5262_v38 = vpack.c.bf16 %v1563_v37, %v1562_v33  ;;  %v5266_v26 = vpack.c.bf16 %v1565_v15, %v1564_v41 }
 0x3a8   : > { %5217 = vmatpush3.bf16.xpose.msk.msra.mxu1 %vm7291_vm3, %v5212_v57  ;;  %v5270_v44 = vpack.c.bf16 %v1567_v43, %v1566_v42  ;;  %v5274_v48 = vpack.c.bf16 %v1569_v46, %v1568_v45  ;;  %v1573_v19 = vmul.f32 %v7287_v47, %v1519_v16  ;;  %v5278_v28 = vpack.c.bf16 %v1571_v18, %v1570_v49  ;;  %v2083_v42 = vld [vmem:[%s7174_s27 + $0x80] sm:$0xff]  ;;  %v2093_v46 = vld [vmem:[%s7174_s27 + $0xd0] sm:$0xff] }
 0x3a9   : > { %5220 = vmatprep.subr.msk.bf16.mxu1 %vm7291_vm3, %v5218_v58  ;;  %5255 = vmatprep.subr.bf16.mxu0 %v5254_v31  ;;  %v2091_v43 = vld [vmem:[%s7174_s27 + $0xc0] sm:$0xff] }
 0x3aa   : > { %5257 = vmatpush3.bf16.msra.mxu0 %v5254_v31  ;;  %v5282_v23 = vpack.c.bf16 %v1573_v19, %v1572_v50  ;;  %v4698_v45 = vcombine.high %v2083_v42, %v2091_v43  ;;  %v2076_v50 = vld [vmem:[%s7174_s27 + $0x48] sm:$0xff]  ;;  %v6312_v19 = vmov 0  }
 0x3ab   : > { %5259 = vmatprep.subr.bf16.mxu0 %v5258_v32 }
 0x3ae   : > { %5261 = vmatpush3.bf16.msra.mxu0 %v5258_v32 }
 0x3af   : > { %5263 = vmatprep.subr.bf16.mxu0 %v5262_v38 }
 0x3b0   : > { %5223 = vmatpush3.bf16.xpose.msk.msra.mxu1 %vm7291_vm3, %v5218_v58 }
 0x3b1   : > { %5226 = vmatprep.subr.msk.bf16.mxu1 %vm7291_vm3, %v5224_v59 }
 0x3b2   : > { %5265 = vmatpush3.bf16.msra.mxu0 %v5262_v38 }
 0x3b3   : > { %5267 = vmatprep.subr.bf16.mxu0 %v5266_v26 }
 0x3b6   : > { %5269 = vmatpush3.bf16.msra.mxu0 %v5266_v26 }
 0x3b7   : > { %5271 = vmatprep.subr.bf16.mxu0 %v5270_v44 }
 0x3b8   : > { %5229 = vmatpush3.bf16.xpose.msk.msra.mxu1 %vm7291_vm3, %v5224_v59  ;;  %v5433_v59 = vld [vmem:[%s7817_s4] sm:$0xff]  }
 0x3b9   : > { %5232 = vmatprep.subr.msk.bf16.mxu1 %vm7291_vm3, %v5230_v60 }
 0x3ba   : > { %5273 = vmatpush3.bf16.msra.mxu0 %v5270_v44  ;;  %v2085_v44 = vld [vmem:[%s7174_s27 + $0x90] sm:$0xff] }
 0x3bb   : > { %5275 = vmatprep.subr.bf16.mxu0 %v5274_v48  ;;  %v4701_v49 = vcombine.low %v2085_v44, %v2093_v46  ;;  %v4702_v18 = vcombine.high %v2085_v44, %v2093_v46  ;;  %v5436_v44 = vld [vmem:[%s7207_s3] sm:$0xff]  }
 0x3bc   : > { %v2082_v46 = vld [vmem:[%s7174_s27 + $0x78] sm:$0xff] }
 0x3be   : > { %5277 = vmatpush3.bf16.msra.mxu0 %v5274_v48  ;;  %v4697_v48 = vcombine.low %v2083_v42, %v2091_v43 }
 0x3bf   : > { %5279 = vmatprep.subr.bf16.mxu0 %v5278_v28 }
 0x3c0   : > { %5235 = vmatpush3.bf16.xpose.msk.msra.mxu1 %vm7291_vm3, %v5230_v60 }
 0x3c1   : > { %5238 = vmatprep.subr.msk.bf16.mxu1 %vm7291_vm3, %v5236_v61 }
 0x3c2   : > { %5281 = vmatpush3.bf16.msra.mxu0 %v5278_v28 }
 0x3c3   : > { %5283 = vmatprep.subr.bf16.mxu0 %v5282_v23 }
 0x3c6   : > { %5285 = vmatpush3.bf16.msra.mxu0 %v5282_v23 }
 0x3c7   : > { %5193 = vmatprep.subr.mxu0 %v1539_v54 }
 0x3c8   : > { %5241 = vmatpush3.bf16.xpose.msk.msra.mxu1 %vm7291_vm3, %v5236_v61 }
 0x3c9   : > { %5244 = vmatprep.subr.msk.bf16.mxu1 %vm7291_vm3, %v5242_v62 }
 0x3d0   : > { %5247 = vmatpush3.bf16.xpose.msk.msra.mxu1 %vm7291_vm3, %v5242_v62  ;;  %v5434_v62 = vld [vmem:[%s7818_s20 + $0x8] sm:$0xff]  }
 0x3d1   : > { %5250 = vmatprep.subr.msk.bf16.mxu1 %vm7291_vm3, %v5248_v1 }
 0x3d8   : > { %5253 = vmatpush3.bf16.xpose.msk.msra.mxu1 %vm7291_vm3, %v5248_v1 }
 0x3d9   : > { %5188 = vmatprep.subr.mxu1 %v1538_v27 }
 0x3df   : > { %5151 = vmatmul.mubr.msk.f32.vlgmr.msra.gmra.mrb[4].mxu1 %vm1349_vm2, %v1575_v7  ;;  %v4675_v7 = vld [vmem:[%s7819_s28] ss:$0 sm:$0xff] }
 0x3e0   : > { %5189 = vmatpush3.xpose.msra.mxu1 %v1538_v27  ;;  %v2068_v27 = vld [vmem:[%s7174_s27 + $0x8] sm:$0xff] }
 0x3e1   : > { %v4683_v28 = vcombine.low %v2068_v27, %v2076_v50  ;;  %v4684_v23 = vcombine.high %v2068_v27, %v2076_v50  ;;  %v5438_v27 = vld [vmem:[%s7207_s3 + $0x8] sm:$0xff]  }
 0x3e2   : > { %v2090_v50 = vld [vmem:[%s7174_s27 + $0xb8] sm:$0xff] }
 0x4b2   : > { %v5152_v14 = vpop.f32.mrb[4].mxu1 }
 0x4b3   : > { %v1696_v39 = vpop.f32.mrb[5].mxu1  ;;  %v1702_v22 = vadd.f32 %v5152_v14, %v1541_v17  ;;  %v2067_v14 = vld [vmem:[%s7174_s27] sm:$0xff] }
 0x4b4   : > { %v1697_v40 = vadd.f32 %v1696_v39, %v1540_v13  ;;  %v2075_v39 = vld [vmem:[%s7174_s27 + $0x40] sm:$0xff] }
 0x4b5   : > { %v4682_v17 = vcombine.high %v2067_v14, %v2075_v39  ;;  %v4681_v41 = vcombine.low %v2067_v14, %v2075_v39  ;;  %v2072_v14 = vld [vmem:[%s7174_s27 + $0x28] sm:$0xff] }
 0x4b6   : > { %1705 = vmax.xlane.f32.xlu0 %v1697_v40  ;;  %v2080_v39 = vld [vmem:[%s7174_s27 + $0x68] sm:$0xff] }
 0x4b7   : > { %v4691_v42 = vcombine.low %v2072_v14, %v2080_v39 }
 0x4ba   : > { %1707 = vmax.xlane.f32.xlu0 %v1702_v22 }
 0x543   : > { %v1706_v34 = vpop.xlane.xlu0 %1705 }
 0x544   : > { %v1709_v51 = vsub.f32 %v1697_v40, %v1706_v34  ;;  %v2069_v40 = vld [vmem:[%s7174_s27 + $0x10] sm:$0xff]  ;;  %v2071_v34 = vld [vmem:[%s7174_s27 + $0x20] sm:$0xff] }
 0x546   : > { %v1711_v24 = vmul.f32 1.442695, %v1709_v51  ;;  %v2079_v51 = vld [vmem:[%s7174_s27 + $0x60] sm:$0xff] }
 0x547   : > { %v1708_v52 = vpop.xlane.xlu0 %1707 }
 0x548   : > { %5563 = vpow2.f32 %v1711_v24  ;;  %v1710_v35 = vsub.f32 %v1702_v22, %v1708_v52  ;;  %v2077_v22 = vld [vmem:[%s7174_s27 + $0x50] sm:$0xff]  ;;  %v4689_v24 = vcombine.low %v2071_v34, %v2079_v51  ;;  %v4690_v52 = vcombine.high %v2071_v34, %v2079_v51 }
 0x549   : > { %v4685_v15 = vcombine.low %v2069_v40, %v2077_v22  ;;  %v4686_v26 = vcombine.high %v2069_v40, %v2077_v22  ;;  %v4692_v22 = vcombine.high %v2072_v14, %v2080_v39 }
 0x54a   : > { %v1713_v53 = vmul.f32 1.442695, %v1710_v35 }
 0x54b   : > { %2432 = vmatprep.subr.bf16.mxu1 %v4686_v26  ;;  %v2096_v26 = vld [vmem:[%s7174_s27 + $0xe8] sm:$0xff] }
 0x54c   : > { %5565 = vpow2.f32 %v1713_v53 }
 0x552   : > { %v5564_v36 = vpop.eup %5563 }
 0x553   : > { %5185 = vmatprep.mubr.f32.mxu0 %v5564_v36  ;;  %5190 = vmatprep.mubr.f32.mxu1 %v5564_v36 }
 0x556   : > { %v5566_v47 = vpop.eup %5565 }
 0x557   : > { %5186 = vmatmul.mubr.f32.vlgmr.msra.gmra.mrb[8].mxu0 %v5566_v47  ;;  %5191 = vmatmul.mubr.f32.vlgmr.msra.gmra.mrb[6].mxu1 %v5566_v47 }
 0x558   : > { %5194 = vmatpush3.msra.mxu0 %v1539_v54  ;;  %2433 = vmatpush1.bf16.msra.mxu1 %v4685_v15  ;;  %v2088_v15 = vld [vmem:[%s7174_s27 + $0xa8] sm:$0xff] }
 0x559   : > { %5198 = vmatprep.subr.bf16.mxu0 %v6310_v3  ;;  %2434 = vmatprep.subr.bf16.mxu1 %v4702_v18  ;;  %v4708_v43 = vcombine.high %v2088_v15, %v2096_v26 }
 0x55a   : > { %2464 = vmatprep.mubr.bf16.mxu1 %v6312_v19 }
 0x55c   : > { %2435 = vmatpush1.bf16.msra.mxu1 %v4701_v49  ;;  %v4707_v49 = vcombine.low %v2088_v15, %v2096_v26 }
 0x55d   : > { %2518 = vmatprep.subr.bf16.mxu1 %v4690_v52  ;;  %v5443_v52 = vld [vmem:[%s7207_s3 + $0x58] sm:$0xff]  }
 0x62a   : > { %v5187_v55 = vpop.f32.mrb[8].mxu0  ;;  %v5192_v56 = vpop.f32.mrb[6].mxu1 }
 0x62b   : > { %v1781_v57 = vpop.f32.mrb[9].mxu0  ;;  %v1856_v58 = vpop.f32.mrb[7].mxu1 }
 0x62c   : > { %5567 = vrcp.f32 %v1856_v58  ;;  %v4679_v58 = vld [vmem:[%s7820_s25] ss:$0 sm:$0xff] }
 0x62d   : > { %5569 = vrcp.f32 %v5192_v56 }
 0x636   : > { %v5568_v60 = vpop.eup %5567 }
 0x637   : > { %v5570_v61 = vpop.eup %5569  ;;  %5195 = vmatprep.mubr.msk.f32.mxu0 %vm1867_vm4, %v5568_v60 }
 0x638   : > { %5196 = vmatmul.mubr.msk.f32.vlgmr.msra.gmra.mrb[10].mxu0 %vm1867_vm4, %v5570_v61 }
 0x639   : > { %5199 = vmatpush3.bf16.msra.mxu0 %v5433_v59  ;;  %5202 = vmatprep.mubr.msk.bf16.mxu0 %vm6311_vm1, %v6310_v3 }
 0x63a   : > { %5200 = vmatprep.subr.bf16.mxu0 %v6310_v3 }
 0x63d   : > { %5201 = vmatpush3.bf16.msra.mxu0 %v5434_v62  ;;  %v4680_v62 = vld [vmem:[%s7821_s6] ss:$0 sm:$0xff] }
 0x63e   : > { %2346 = vmatprep.subr.bf16.mxu0 %v4682_v17 }
 0x70b   : > { %v5197_v63 = vpop.f32.mrb[10].mxu0 }
 0x70c   : > { %v1950_v0 = vmul.f32 %v5197_v63, %v5187_v55  ;;  %v1940_v1 = vpop.f32.mrb[11].mxu0 }
 0x70d   : > { %v1949_v2 = vmul.f32 %v1940_v1, %v1781_v57  ;;  %v2092_v1 = vld [vmem:[%s7174_s27 + $0xc8] sm:$0xff] }
 0x70f   : > { %v1951_v4 = vpack.c.bf16 %v1950_v0, %v1949_v2  ;;  %v2084_v0 = vld [vmem:[%s7174_s27 + $0x88] sm:$0xff]  ;;  %v2087_v2 = vld [vmem:[%s7174_s27 + $0xa0] sm:$0xff] }
 0x711   : > { %5203 = vmatmul.mubr.msk.bf16.vlgmr.msra.gmra.mrb[12].mxu0 %vm1349_vm2, %v1951_v4  ;;  %v2095_v4 = vld [vmem:[%s7174_s27 + $0xe0] sm:$0xff] }
 0x712   : > { %2347 = vmatpush1.bf16.msra.mxu0 %v4681_v41  ;;  %2378 = vmatprep.mubr.bf16.mxu0 %v6312_v19  ;;  %v5435_v41 = vld [vmem:[%s7207_s3 + $0x40] sm:$0xff]  }
 0x713   : > { %2348 = vmatprep.subr.bf16.mxu0 %v4698_v45  ;;  %v2074_v45 = vld [vmem:[%s7174_s27 + $0x38] sm:$0xff] }
 0x714   : > { %v4696_v18 = vcombine.high %v2074_v45, %v2082_v46  ;;  %v4695_v34 = vcombine.low %v2074_v45, %v2082_v46 }
 0x716   : > { %2349 = vmatpush1.bf16.msra.mxu0 %v4697_v48  ;;  %v5437_v48 = vld [vmem:[%s7207_s3 + $0x48] sm:$0xff]  }
 0x717   : > { %2389 = vmatprep.subr.bf16.mxu0 %v4684_v23  ;;  %v5439_v23 = vld [vmem:[%s7207_s3 + $0x50] sm:$0xff]  }
 0x7e4   : > { %v2012_v8 = vpop.f32.mrb[12].mxu0 }
 0x7e5   : > { %v2013_v9 = vadd.f32 %v4675_v7, %v2012_v8  ;;  %v5204_v10 = vpop.f32.mrb[13].mxu0 }
 0x7e6   : > { %v2015_v11 = vpop.f32.mrb[14].mxu0  ;;  %v4700_v10 = vcombine.high %v2084_v0, %v2092_v1 }
 0x7e7   : > { %v2016_v12 = vadd.f32 %v4675_v7, %v2015_v11  ;;  %v5205_v16 = vpop.f32.mrb[15].mxu0  ;;  %v2019_v3 = vadd.f32 %v2013_v9, %v7219_v5  ;;  %v4706_v11 = vcombine.high %v2087_v2, %v2095_v4 }
 0x7e8   : > { %v2078_v16 = vld [vmem:[%s7174_s27 + $0x58] sm:$0xff] }
 0x7e9   : > { %v2023_v20 = vsel %vm1349_vm2, %v2019_v3, 0.0  ;;  %v2020_v21 = vadd.f32 %v2016_v12, %v7221_v6  ;;  %v2070_v12 = vld [vmem:[%s7174_s27 + $0x18] sm:$0xff] }
 0x7ea   : > { %2024 = vadd.xlane.f32.xlu1 %v2023_v20  ;;  %v2081_v20 = vld [vmem:[%s7174_s27 + $0x70] sm:$0xff] }
 0x7eb   : > { %v2026_v25 = vsel %vm1349_vm2, %v2020_v21, 0.0 }
 0x7ee   : > { %2027 = vadd.xlane.f32.xlu1 %v2026_v25  ;;  %v4705_v25 = vcombine.low %v2087_v2, %v2095_v4  ;;  %v5458_v2 = vld [vmem:[%s7207_s3 + $0xa0] sm:$0xff]   ;;  %v5459_v4 = vld [vmem:[%s7207_s3 + $0x78] sm:$0xff]  }
 0x877   : > { %v2025_v29 = vpop.xlane.xlu1 %2024 }
 0x878   : > { %v2030_v30 = vmul.f32 0.03125, %v2025_v29  ;;  %v4688_v29 = vcombine.high %v2070_v12, %v2078_v16 }
 0x87a   : > { %v2032_v31 = vsub.f32 %v2019_v3, %v2030_v30  ;;  %v2073_v3 = vld [vmem:[%s7174_s27 + $0x30] sm:$0xff] }
 0x87b   : > { %v2028_v32 = vpop.xlane.xlu1 %2027  ;;  %v4694_v30 = vcombine.high %v2073_v3, %v2081_v20 }
 0x87c   : > { %v2031_v33 = vmul.f32 0.03125, %v2028_v32  ;;  %v2034_v37 = vmul.f32 %v2032_v31, %v2032_v31  ;;  %v2094_v32 = vld [vmem:[%s7174_s27 + $0xd8] sm:$0xff] }
 0x87e   : > { %v2033_v38 = vsub.f32 %v2020_v21, %v2031_v33  ;;  %v2036_v5 = vsel %vm1349_vm2, %v2034_v37, 0.0  ;;  %v4699_v21 = vcombine.low %v2084_v0, %v2092_v1  ;;  %v2089_v33 = vld [vmem:[%s7174_s27 + $0xb0] sm:$0xff]  ;;  %v5457_v1 = vld [vmem:[%s7207_s3 + $0x30] sm:$0xff]  }
 0x87f   : > { %2037 = vadd.xlane.f32.xlu0 %v2036_v5  ;;  %v2097_v37 = vld [vmem:[%s7174_s27 + $0xf0] sm:$0xff]  ;;  %v4693_v5 = vcombine.low %v2073_v3, %v2081_v20  ;;  %v5465_v3 = vld [vmem:[%s7207_s3 + $0xb0] sm:$0xff]  }
 0x880   : > { %v2035_v6 = vmul.f32 %v2033_v38, %v2033_v38  ;;  %v4709_v17 = vcombine.low %v2089_v33, %v2097_v37  ;;  %v5456_v0 = vld [vmem:[%s7207_s3 + $0xe0] sm:$0xff]   ;;  %v5467_v20 = vld [vmem:[%s7207_s3 + $0xf8] sm:$0xff]  }
 0x882   : > { %v2039_v13 = vsel %vm1349_vm2, %v2035_v6, 0.0 }
 0x883   : > { %2040 = vadd.xlane.f32.xlu1 %v2039_v13  ;;  %v4710_v13 = vcombine.high %v2089_v33, %v2097_v37 }
 0x90c   : > { %v2038_v35 = vpop.xlane.xlu0 %2037 }
 0x90d   : > { %v2042_v53 = vmul.f32 0.03125, %v2038_v35 }
 0x90f   : > { %v2044_v36 = vadd.f32 1e-05, %v2042_v53  ;;  %v5440_v53 = vld [vmem:[%s7207_s3 + $0xc0] sm:$0xff]  }
 0x910   : > { %v2041_v47 = vpop.xlane.xlu1 %2040 }
 0x911   : > { %5571 = vrsqrt.f32 %v2044_v36  ;;  %v2043_v54 = vmul.f32 0.03125, %v2041_v47  ;;  %v5445_v36 = vld [vmem:[%s7207_s3 + $0x18] sm:$0xff]   ;;  %v5447_v47 = vld [vmem:[%s7207_s3 + $0x60] sm:$0xff]  }
 0x913   : > { %v2045_v55 = vadd.f32 1e-05, %v2043_v54  ;;  %v5442_v54 = vld [vmem:[%s7207_s3 + $0x80] sm:$0xff]  }
 0x915   : > { %5573 = vrsqrt.f32 %v2045_v55  ;;  %v5444_v55 = vld [vmem:[%s7207_s3 + $0xc8] sm:$0xff]  }
 0x91b   : > { %v5572_v56 = vpop.eup %5571 }
 0x91c   : > { %v2048_v57 = vmul.f32 %v5572_v56, %v2032_v31  ;;  %v2086_v31 = vld [vmem:[%s7174_s27 + $0x98] sm:$0xff] }
 0x91d   : > { %v4704_v6 = vcombine.high %v2086_v31, %v2094_v32  ;;  %v4703_v40 = vcombine.low %v2086_v31, %v2094_v32  ;;  %v5449_v56 = vld [vmem:[%s7207_s3 + $0x20] sm:$0xff]  }
 0x91e   : > { %v2056_v60 = vmul.f32 %v4679_v58, %v2048_v57  ;;  %v5446_v57 = vld [vmem:[%s7207_s3 + $0x88] sm:$0xff]  }
 0x91f   : > { %v5574_v59 = vpop.eup %5573  ;;  %v7478_v32 = vld [vmem:[%s1152_s1 + $0x8] sm:$0xff] }
 0x920   : > { %v2049_v61 = vmul.f32 %v5574_v59, %v2033_v38  ;;  %v7393_v7 = vadd.f32 %v4680_v62, %v2056_v60  ;;  %v4687_v38 = vcombine.low %v2070_v12, %v2078_v16  ;;  %v5453_v59 = vld [vmem:[%s7207_s3 + $0x28] sm:$0xff]   ;;  %v5450_v60 = vld [vmem:[%s7207_s3 + $0x90] sm:$0xff]   ;;  %v5464_v16 = vld [vmem:[%s7207_s3 + $0x140] sm:$0xff]  }
 0x921   : > { %v5463_v12 = vld [vmem:[%s7207_s3 + $0xf0] sm:$0xff]  }
 0x922   : > { %v2057_v63 = vmul.f32 %v4679_v58, %v2049_v61  ;;  %v5448_v58 = vld [vmem:[%s7207_s3 + $0xd0] sm:$0xff]   ;;  %v5452_v61 = vld [vmem:[%s7207_s3 + $0xd8] sm:$0xff]  }
 0x924   : > { %v7395_v8 = vadd.f32 %v4680_v62, %v2057_v63  ;;  %v5454_v62 = vld [vmem:[%s7207_s3 + $0x98] sm:$0xff]   ;;  %v5455_v63 = vld [vmem:[%s7207_s3 + $0x70] sm:$0xff]  }
 0x926   : > { %v7399_v9 = vpack.c.bf16 %v7395_v8, %v7393_v7 }
 0x928   : > { %4713 = vmatmul.mubr.msk.bf16.vlgmr.msra.gmra.mrb[16].mxu0 %vm1349_vm2, %v7399_v9  ;;  %4715 = vmatmul.mubr.msk.bf16.vlgmr.msra.gmra.mrb[8].mxu1 %vm1349_vm2, %v7399_v9 }
 0x929   : > { %2390 = vmatpush1.bf16.msra.mxu0 %v4683_v28  ;;  %2519 = vmatpush1.bf16.msra.mxu1 %v4689_v24  ;;  %v2098_v28 = vld [vmem:[%s7174_s27 + $0xf8] sm:$0xff]  ;;  %v5441_v24 = vld [vmem:[%s7207_s3 + $0x10] sm:$0xff]  }
 0x92a   : > { %2391 = vmatprep.subr.bf16.mxu0 %v4700_v10  ;;  %2520 = vmatprep.subr.bf16.mxu1 %v4706_v11  ;;  %v4712_v51 = vcombine.high %v2090_v50, %v2098_v28  ;;  %v4711_v35 = vcombine.low %v2090_v50, %v2098_v28  ;;  %v5461_v10 = vld [vmem:[%s7207_s3 + $0x38] sm:$0xff]   ;;  %v5462_v11 = vld [vmem:[%s7207_s3 + $0xa8] sm:$0xff]  }
 0x92b   : > { %2421 = vmatprep.mubr.bf16.mxu0 %v6312_v19  ;;  %2550 = vmatprep.mubr.bf16.mxu1 %v6312_v19 }
 0x92d   : > { %2392 = vmatpush1.bf16.msra.mxu0 %v4699_v21  ;;  %2521 = vmatpush1.bf16.msra.mxu1 %v4705_v25  ;;  %v5469_v21 = vld [vmem:[%s7207_s3 + $0xb8] sm:$0xff]   ;;  %v5472_v25 = vld [vmem:[%s7207_s3 + $0x1c0] sm:$0xff]  }
 0x92e   : > { %2475 = vmatprep.subr.bf16.mxu0 %v4688_v29  ;;  %2604 = vmatprep.subr.bf16.mxu1 %v4694_v30  ;;  %v2103_v29 = vlaneseq }
 0x930   : > { %4714 = vmatmul.mubr.msk.bf16.vlgmr.msra.gmra.mrb[20].mxu0 %vm1349_vm2, %v7399_v9  ;;  %4717 = vmatmul.mubr.msk.bf16.vlgmr.msra.gmra.mrb[12].mxu1 %vm1349_vm2, %v7399_v9  ;;  %v7473_v30 = vshrl.u32 %v2103_v29, 7 }
 0x931   : > { %2476 = vmatpush1.bf16.msra.mxu0 %v4687_v38  ;;  %2605 = vmatpush1.bf16.msra.mxu1 %v4693_v5  ;;  %v2099_v5 = vld [vmem:[%s1152_s1] sm:$0xff]  ;;  %s7823_s1 = sld [smem:[#allocation51_spill]] }
 0x932   : > { %2477 = vmatprep.subr.bf16.mxu0 %v4704_v6  ;;  %2606 = vmatprep.subr.bf16.mxu1 %v4710_v13  ;;  %v2129_v31 = vsub.s32 6, %v7473_v30  ;;  %v2105_v37 = vsub.s32 0, %v7473_v30  ;;  %v2121_v38 = vsub.s32 4, %v7473_v30  ;;  %v2109_v6 = vsub.s32 1, %v7473_v30 }
 0x933   : > { %2507 = vmatprep.mubr.bf16.mxu0 %v6312_v19  ;;  %2636 = vmatprep.mubr.bf16.mxu1 %v6312_v19  ;;  %v2125_v13 = vsub.s32 5, %v7473_v30  ;;  %v2117_v26 = vsub.s32 3, %v7473_v30 }
 0x934   : > { %v7481_v33 = vrot.slane %v7478_v32, %v2129_v31  ;;  %v2106_v14 = vrot.slane %v2099_v5, %v2105_v37  ;;  %v2122_v39 = vrot.slane %v2099_v5, %v2121_v38 }
 0x935   : > { %2478 = vmatpush1.bf16.msra.mxu0 %v4703_v40  ;;  %2607 = vmatpush1.bf16.msra.mxu1 %v4709_v17  ;;  %v2110_v40 = vrot.slane %v2099_v5, %v2109_v6  ;;  %v2126_v17 = vrot.slane %v2099_v5, %v2125_v13 }
 0x936   : > { %2561 = vmatprep.subr.bf16.mxu0 %v4692_v22  ;;  %4918 = vmatprep.subr.bf16.mxu1 %v5435_v41  ;;  %v2113_v22 = vsub.s32 2, %v7473_v30 }
 0x937   : > { %p4852_p7 = scmp.ne.s32.totalorder %s7823_s1, 2 }
 0x938   : > { %4716 = vmatmul.mubr.msk.bf16.vlgmr.msra.gmra.mrb[24].mxu0 %vm1349_vm2, %v7399_v9  ;;  %4719 = vmatmul.mubr.msk.bf16.vlgmr.msra.gmra.mrb[16].mxu1 %vm1349_vm2, %v7399_v9 }
 0x939   : > { %2562 = vmatpush1.bf16.msra.mxu0 %v4691_v42  ;;  %2593 = vmatprep.mubr.bf16.mxu0 %v6312_v19 }
 0x93a   : > { %2563 = vmatprep.subr.bf16.mxu0 %v4708_v43  ;;  %4919 = vmatpush3.bf16.msra.mxu1 %v5436_v44 }
 0x93b   : > { %4920 = vmatprep.subr.bf16.mxu1 %v5437_v48 }
 0x93d   : > { %2564 = vmatpush1.bf16.msra.mxu0 %v4707_v49 }
 0x93e   : > { %2647 = vmatprep.subr.bf16.mxu0 %v4696_v18  ;;  %4921 = vmatpush3.bf16.msra.mxu1 %v5438_v27 }
 0x93f   : > { %4922 = vmatprep.subr.bf16.mxu1 %v5439_v23 }
 0x940   : > { %4718 = vmatmul.mubr.msk.bf16.vlgmr.msra.gmra.mrb[28].mxu0 %vm1349_vm2, %v7399_v9 }
 0x941   : > { %2648 = vmatpush1.bf16.msra.mxu0 %v4695_v34  ;;  %2679 = vmatprep.mubr.bf16.mxu0 %v6312_v19  ;;  %v5451_v19 = vld [vmem:[%s7207_s3 + $0x68] sm:$0xff]   ;;  %v2114_v34 = vrot.slane %v2099_v5, %v2113_v22 }
 0x942   : > { %2649 = vmatprep.subr.bf16.mxu0 %v4712_v51  ;;  %4923 = vmatpush3.bf16.msra.mxu1 %v5441_v24  ;;  %v2138_v51 = vrot.slane %v7478_v32, %v2105_v37 }
 0x943   : > { %4924 = vmatprep.subr.bf16.mxu1 %v5443_v52 }
 0x945   : > { %2650 = vmatpush1.bf16.msra.mxu0 %v4711_v35  ;;  %v2118_v35 = vrot.slane %v2099_v5, %v2117_v26 }
 0x946   : > { %4940 = vmatprep.subr.bf16.mxu0 %v5440_v53  ;;  %4925 = vmatpush3.bf16.msra.mxu1 %v5445_v36  ;;  %v2142_v53 = vrot.slane %v7478_v32, %v2109_v6 }
 0x947   : > { %4926 = vmatprep.subr.bf16.mxu1 %v5447_v47 }
 0x948   : > { %4720 = vmatmul.mubr.msk.bf16.vlgmr.msra.gmra.mrb[32].mxu0 %vm1349_vm2, %v7399_v9  ;;  %v5460_v9 = vld [vmem:[%s7207_s3 + $0xe8] sm:$0xff]  }
 0x949   : > { %4941 = vmatpush3.bf16.msra.mxu0 %v5442_v54 }
 0x94a   : > { %4942 = vmatprep.subr.bf16.mxu0 %v5444_v55  ;;  %4927 = vmatpush3.bf16.msra.mxu1 %v5449_v56 }
 0x94b   : > { %4928 = vmatprep.subr.bf16.mxu1 %v5451_v19 }
 0x94d   : > { %4943 = vmatpush3.bf16.msra.mxu0 %v5446_v57 }
 0x94e   : > { %4944 = vmatprep.subr.bf16.mxu0 %v5448_v58  ;;  %4929 = vmatpush3.bf16.msra.mxu1 %v5453_v59 }
 0x94f   : > { %4930 = vmatprep.subr.bf16.mxu1 %v5455_v63 }
 0x951   : > { %4945 = vmatpush3.bf16.msra.mxu0 %v5450_v60 }
 0x952   : > { %4946 = vmatprep.subr.bf16.mxu0 %v5452_v61  ;;  %4931 = vmatpush3.bf16.msra.mxu1 %v5457_v1  ;;  %v2133_v61 = vsub.s32 7, %v7473_v30  ;;  %v5492_v30 = vld [vmem:[%s7207_s3 + $0x1e8] sm:$0xff]  }
 0x953   : > { %4932 = vmatprep.subr.bf16.mxu1 %v5459_v4 }
 0x955   : > { %4947 = vmatpush3.bf16.msra.mxu0 %v5454_v62 }
 0x956   : > { %4948 = vmatprep.subr.bf16.mxu0 %v5456_v0  ;;  %4933 = vmatpush3.bf16.msra.mxu1 %v5461_v10 }
 0x957   : > { %4962 = vmatprep.subr.bf16.mxu1 %v5464_v16 }
 0x959   : > { %4949 = vmatpush3.bf16.msra.mxu0 %v5458_v2  ;;  %v5466_v2 = vld [vmem:[%s7207_s3 + $0x100] sm:$0xff]  }
 0x95a   : > { %4950 = vmatprep.subr.bf16.mxu0 %v5460_v9 }
 0x95d   : > { %4951 = vmatpush3.bf16.msra.mxu0 %v5462_v11 }
 0x95e   : > { %4952 = vmatprep.subr.bf16.mxu0 %v5463_v12  ;;  %v5468_v12 = vld [vmem:[%s7207_s3 + $0x148] sm:$0xff]  }
 0x961   : > { %4953 = vmatpush3.bf16.msra.mxu0 %v5465_v3 }
 0x962   : > { %4954 = vmatprep.subr.bf16.mxu0 %v5467_v20 }
 0x965   : > { %4955 = vmatpush3.bf16.msra.mxu0 %v5469_v21 }
 0x966   : > { %4984 = vmatprep.subr.bf16.mxu0 %v5472_v25  ;;  %v2130_v25 = vrot.slane %v2099_v5, %v2129_v31  ;;  %v2158_v31 = vrot.slane %v7478_v32, %v2125_v13 }
 0x9fb   : > { %v2380_v41 = vpop.f32.mrb[16].mxu0  ;;  %v2466_v15 = vpop.f32.mrb[8].mxu1 }
 0x9fc   : > { %v2381_v42 = vadd.f32 %v2380_v41, %v2106_v14  ;;  %v2467_v43 = vadd.f32 %v2466_v15, %v2122_v39  ;;  %v2382_v44 = vpop.f32.mrb[17].mxu0  ;;  %v2468_v45 = vpop.f32.mrb[9].mxu1  ;;  %v5470_v15 = vld [vmem:[%s7207_s3 + $0x108] sm:$0xff]  }
 0x9fd   : > { %v2383_v46 = vadd.f32 %v2382_v44, %v2110_v40  ;;  %v2469_v48 = vadd.f32 %v2468_v45, %v2126_v17  ;;  %v2384_v49 = vpop.f32.mrb[18].mxu0  ;;  %v2470_v18 = vpop.f32.mrb[10].mxu1 }
 0x9fe   : > { %v2385_v27 = vadd.f32 %v2384_v49, %v2106_v14  ;;  %v2471_v50 = vadd.f32 %v2470_v18, %v2122_v39  ;;  %v2386_v28 = vpop.f32.mrb[19].mxu0  ;;  %v2472_v23 = vpop.f32.mrb[11].mxu1  ;;  %v2690_v36 = vmax.f32 %v2381_v42, 0.0  ;;  %v2694_v47 = vmax.f32 %v2467_v43, 0.0 }
 0x9ff   : > { %v2387_v24 = vadd.f32 %v2386_v28, %v2110_v40  ;;  %v2473_v52 = vadd.f32 %v2472_v23, %v2126_v17  ;;  %v2691_v56 = vmax.f32 %v2383_v46, 0.0  ;;  %v2695_v19 = vmax.f32 %v2469_v48, 0.0 }
 0xa00   : > { %v2706_v54 = vmax.f32 %v2385_v27, 0.0  ;;  %v2710_v55 = vmax.f32 %v2471_v50, 0.0  ;;  %v2154_v39 = vrot.slane %v7478_v32, %v2121_v38  ;;  %v2134_v40 = vrot.slane %v2099_v5, %v2133_v61  ;;  %v5471_v38 = vld [vmem:[%s7207_s3 + $0x150] sm:$0xff]  }
 0xa01   : > { %v2707_v57 = vmax.f32 %v2387_v24, 0.0  ;;  %v2711_v58 = vmax.f32 %v2473_v52, 0.0 }
 0xa02   : > { %v2722_v59 = vpack.c.bf16 %v2706_v54, %v2690_v36  ;;  %v7499_v60 = vpack.c.bf16 %v2710_v55, %v2694_v47  ;;  %v5475_v36 = vld [vmem:[%s7207_s3 + $0x158] sm:$0xff]   ;;  %v5476_v47 = vld [vmem:[%s7207_s3 + $0x1c8] sm:$0xff]  }
 0xa03   : > { %v2723_v62 = vpack.c.bf16 %v2707_v57, %v2691_v56  ;;  %v2727_v63 = vpack.c.bf16 %v2711_v58, %v2695_v19  ;;  %v2423_v0 = vpop.f32.mrb[20].mxu0  ;;  %v2552_v1 = vpop.f32.mrb[12].mxu1 }
 0xa04   : > { %v2424_v4 = vadd.f32 %v2423_v0, %v2114_v34  ;;  %v2553_v9 = vadd.f32 %v2552_v1, %v2138_v51  ;;  %v2425_v10 = vpop.f32.mrb[21].mxu0  ;;  %v2554_v11 = vpop.f32.mrb[13].mxu1 }
 0xa05   : > { %v2426_v16 = vadd.f32 %v2425_v10, %v2118_v35  ;;  %v2555_v3 = vadd.f32 %v2554_v11, %v2142_v53  ;;  %v2427_v20 = vpop.f32.mrb[22].mxu0  ;;  %v2556_v21 = vpop.f32.mrb[14].mxu1  ;;  %3801 = vmatprep.mubr.bf16.mxu1 %v2723_v62 }
 0xa06   : > { %v2428_v29 = vadd.f32 %v2427_v20, %v2114_v34  ;;  %v2557_v37 = vadd.f32 %v2556_v21, %v2138_v51  ;;  %v2429_v6 = vpop.f32.mrb[23].mxu0  ;;  %v2558_v14 = vpop.f32.mrb[15].mxu1  ;;  %3802 = vmatmul.mubr.bf16.vlgmr.msra.gmra.mrb[20].mxu1 %v2722_v59  ;;  %v2692_v42 = vmax.f32 %v2424_v4, 0.0  ;;  %v2698_v43 = vmax.f32 %v2553_v9, 0.0  ;;  %v5473_v34 = vld [vmem:[%s7207_s3 + $0x110] sm:$0xff]   ;;  %v5474_v51 = vld [vmem:[%s7207_s3 + $0x180] sm:$0xff]  }
 0xa07   : > { %v2430_v17 = vadd.f32 %v2429_v6, %v2118_v35  ;;  %v2559_v41 = vadd.f32 %v2558_v14, %v2142_v53  ;;  %4963 = vmatpush3.bf16.msra.mxu1 %v5466_v2  ;;  %3883 = vmatprep.mubr.bf16.mxu1 %v2727_v63  ;;  %v2693_v46 = vmax.f32 %v2426_v16, 0.0  ;;  %v2699_v48 = vmax.f32 %v2555_v3, 0.0  ;;  %v5477_v2 = vld [vmem:[%s7207_s3 + $0x118] sm:$0xff]   ;;  %v5478_v4 = vld [vmem:[%s7207_s3 + $0x188] sm:$0xff]   ;;  %v5479_v3 = vld [vmem:[%s7207_s3 + $0x160] sm:$0xff]  }
 0xa08   : > { %v2708_v44 = vmax.f32 %v2428_v29, 0.0  ;;  %v2714_v45 = vmax.f32 %v2557_v37, 0.0  ;;  %4964 = vmatprep.subr.bf16.mxu1 %v5468_v12  ;;  %v2146_v63 = vrot.slane %v7478_v32, %v2113_v22  ;;  %v2150_v9 = vrot.slane %v7478_v32, %v2117_v26  ;;  %v5480_v22 = vld [vmem:[%s7207_s3 + $0x1d0] sm:$0xff]  }
 0xa09   : > { %v2709_v5 = vmax.f32 %v2430_v17, 0.0  ;;  %v2715_v49 = vmax.f32 %v2559_v41, 0.0  ;;  %v5482_v17 = vld [vmem:[%s7207_s3 + $0x190] sm:$0xff]  }
 0xa0a   : > { %v2724_v18 = vpack.c.bf16 %v2708_v44, %v2692_v42  ;;  %v7512_v27 = vpack.c.bf16 %v2714_v45, %v2698_v43  ;;  %v5484_v42 = vld [vmem:[%s7207_s3 + $0x1d8] sm:$0xff]  }
 0xa0b   : > { %v2725_v50 = vpack.c.bf16 %v2709_v5, %v2693_v46  ;;  %v7514_v28 = vpack.c.bf16 %v2715_v49, %v2699_v48  ;;  %4965 = vmatpush3.bf16.msra.mxu1 %v5470_v15  ;;  %v2509_v13 = vpop.f32.mrb[24].mxu0  ;;  %v2638_v23 = vpop.f32.mrb[16].mxu1  ;;  %v5485_v48 = vld [vmem:[%s7207_s3 + $0x128] sm:$0xff]   ;;  %v5486_v5 = vld [vmem:[%s7207_s3 + $0x198] sm:$0xff]  }
 0xa0c   : > { %v2510_v24 = vadd.f32 %v2509_v13, %v2130_v25  ;;  %v2639_v52 = vadd.f32 %v2638_v23, %v2154_v39  ;;  %v2511_v35 = vpop.f32.mrb[25].mxu0  ;;  %v2640_v53 = vpop.f32.mrb[17].mxu1  ;;  %4966 = vmatprep.subr.bf16.mxu1 %v5471_v38  ;;  %v5488_v13 = vld [vmem:[%s7207_s3 + $0x1e0] sm:$0xff]  }
 0xa0d   : > { %v2512_v54 = vadd.f32 %v2511_v35, %v2134_v40  ;;  %v2641_v55 = vadd.f32 %v2640_v53, %v2158_v31  ;;  %v2513_v56 = vpop.f32.mrb[26].mxu0  ;;  %v2642_v19 = vpop.f32.mrb[18].mxu1  ;;  %3842 = vmatprep.mubr.bf16.mxu0 %v2725_v50  ;;  %v5487_v50 = vld [vmem:[%s7207_s3 + $0x170] sm:$0xff]  }
 0xa0e   : > { %v2514_v57 = vadd.f32 %v2513_v56, %v2130_v25  ;;  %v2643_v58 = vadd.f32 %v2642_v19, %v2154_v39  ;;  %v2515_v59 = vpop.f32.mrb[27].mxu0  ;;  %v2644_v62 = vpop.f32.mrb[19].mxu1  ;;  %3843 = vmatmul.mubr.bf16.vlgmr.msra.gmra.mrb[36].mxu0 %v2724_v18  ;;  %v2696_v10 = vmax.f32 %v2510_v24, 0.0  ;;  %v2702_v11 = vmax.f32 %v2639_v52, 0.0  ;;  %v5489_v53 = vld [vmem:[%s7207_s3 + $0x130] sm:$0xff]  }
 0xa0f   : > { %v2516_v0 = vadd.f32 %v2515_v59, %v2134_v40  ;;  %v2645_v1 = vadd.f32 %v2644_v62, %v2158_v31  ;;  %4967 = vmatpush3.bf16.msra.mxu1 %v5473_v34  ;;  %4985 = vmatpush3.bf16.msra.mxu0 %v5474_v51  ;;  %v2697_v20 = vmax.f32 %v2512_v54, 0.0  ;;  %v2703_v21 = vmax.f32 %v2641_v55, 0.0  ;;  %v5481_v40 = vld [vmem:[%s7207_s3 + $0x120] sm:$0xff]   ;;  %v5483_v31 = vld [vmem:[%s7207_s3 + $0x168] sm:$0xff]   ;;  %v5491_v55 = vld [vmem:[%s7207_s3 + $0x178] sm:$0xff]  }
 0xa10   : > { %v2712_v12 = vmax.f32 %v2514_v57, 0.0  ;;  %v2718_v16 = vmax.f32 %v2643_v58, 0.0  ;;  %4968 = vmatprep.subr.bf16.mxu1 %v5475_v36  ;;  %4986 = vmatprep.subr.bf16.mxu0 %v5476_v47  ;;  %v2166_v51 = vrot.slane %v7478_v32, %v2133_v61  ;;  %v5490_v36 = vld [vmem:[%s7207_s3 + $0x1a0] sm:$0xff]   ;;  %v5493_v58 = vld [vmem:[%s7207_s3 + $0x138] sm:$0xff]   ;;  %v5494_v59 = vld [vmem:[%s7207_s3 + $0x1a8] sm:$0xff]  }
 0xa11   : > { %v2713_v25 = vmax.f32 %v2516_v0, 0.0  ;;  %v2719_v29 = vmax.f32 %v2645_v1, 0.0  ;;  %v5495_v0 = vld [vmem:[%s7207_s3 + $0x1f0] sm:$0xff]   ;;  %v5496_v1 = vld [vmem:[%s7207_s3 + $0x240] sm:$0xff]  }
 0xa12   : > { %v7530_v37 = vpack.c.bf16 %v2712_v12, %v2696_v10  ;;  %v7532_v6 = vpack.c.bf16 %v2718_v16, %v2702_v11  ;;  %v5497_v10 = vld [vmem:[%s7207_s3 + $0x1b0] sm:$0xff]   ;;  %v5498_v11 = vld [vmem:[%s7207_s3 + $0x200] sm:$0xff]   ;;  %v5499_v12 = vld [vmem:[%s7207_s3 + $0x1f8] sm:$0xff]  }
 0xa13   : > { %v2729_v26 = vpack.c.bf16 %v2713_v25, %v2697_v20  ;;  %v7534_v14 = vpack.c.bf16 %v2719_v29, %v2703_v21  ;;  %4969 = vmatpush3.bf16.msra.mxu1 %v5477_v2  ;;  %4987 = vmatpush3.bf16.msra.mxu0 %v5478_v4  ;;  %v2595_v39 = vpop.f32.mrb[28].mxu0  ;;  %v5500_v16 = vld [vmem:[%s7207_s3 + $0x248] sm:$0xff]   ;;  %v5503_v20 = vld [vmem:[%s7207_s3 + $0x250] sm:$0xff]   ;;  %v5504_v21 = vld [vmem:[%s7207_s3 + $0x2c0] sm:$0xff]  }
 0xa14   : > { %v2596_v41 = vadd.f32 %v2595_v39, %v2146_v63  ;;  %v2597_v15 = vpop.f32.mrb[29].mxu0  ;;  %4970 = vmatprep.subr.bf16.mxu1 %v5479_v3  ;;  %4988 = vmatprep.subr.bf16.mxu0 %v5480_v22  ;;  %v5501_v3 = vld [vmem:[%s7207_s3 + $0x1b8] sm:$0xff]   ;;  %v5502_v22 = vld [vmem:[%s7207_s3 + $0x208] sm:$0xff]   ;;  %v5505_v25 = vld [vmem:[%s7207_s3 + $0x210] sm:$0xff]  }
 0xa15   : > { %v2598_v43 = vadd.f32 %v2597_v15, %v2150_v9  ;;  %v2599_v44 = vpop.f32.mrb[30].mxu0  ;;  %3924 = vmatprep.mubr.bf16.mxu0 %v2729_v26  ;;  %v5507_v29 = vld [vmem:[%s7207_s3 + $0x258] sm:$0xff]   ;;  %v5508_v26 = vld [vmem:[%s7207_s3 + $0x2c8] sm:$0xff]  }
 0xa16   : > { %v2600_v45 = vadd.f32 %v2599_v44, %v2146_v63  ;;  %v2601_v38 = vpop.f32.mrb[31].mxu0  ;;  %v2700_v49 = vmax.f32 %v2596_v41, 0.0  ;;  %v5510_v39 = vld [vmem:[%s7207_s3 + $0x288] sm:$0xff]   ;;  %v5513_v41 = vld [vmem:[%s7207_s3 + $0x220] sm:$0xff]   ;;  %v5519_v44 = vld [vmem:[%s7207_s3 + $0x270] sm:$0xff]  }
 0xa17   : > { %v2602_v46 = vadd.f32 %v2601_v38, %v2150_v9  ;;  %4971 = vmatpush3.bf16.msra.mxu1 %v5481_v40  ;;  %4989 = vmatpush3.bf16.msra.mxu0 %v5482_v17  ;;  %v2701_v23 = vmax.f32 %v2598_v43, 0.0  ;;  %v5511_v40 = vld [vmem:[%s7207_s3 + $0x260] sm:$0xff]   ;;  %v5512_v17 = vld [vmem:[%s7207_s3 + $0x2d0] sm:$0xff]   ;;  %v5515_v15 = vld [vmem:[%s7207_s3 + $0x268] sm:$0xff]  }
 0xa18   : > { %v2716_v18 = vmax.f32 %v2600_v45, 0.0  ;;  %4972 = vmatprep.subr.bf16.mxu1 %v5483_v31  ;;  %4990 = vmatprep.subr.bf16.mxu0 %v5484_v42  ;;  %v5516_v31 = vld [vmem:[%s7207_s3 + $0x2d8] sm:$0xff]   ;;  %v5517_v42 = vld [vmem:[%s7207_s3 + $0x228] sm:$0xff]   ;;  %v5520_v45 = vld [vmem:[%s7207_s3 + $0x2e0] sm:$0xff]  }
 0xa19   : > { %v2717_v34 = vmax.f32 %v2602_v46, 0.0  ;;  %v5518_v43 = vld [vmem:[%s7207_s3 + $0x298] sm:$0xff]   ;;  %v5521_v38 = vld [vmem:[%s7207_s3 + $0x230] sm:$0xff]   ;;  %v5522_v46 = vld [vmem:[%s7207_s3 + $0x2a0] sm:$0xff]  }
 0xa1a   : > { %v7547_v24 = vpack.c.bf16 %v2716_v18, %v2700_v49  ;;  %v5525_v49 = vld [vmem:[%s7207_s3 + $0x238] sm:$0xff]   ;;  %v5526_v18 = vld [vmem:[%s7207_s3 + $0x2a8] sm:$0xff]  }
 0xa1b   : > { %v2733_v52 = vpack.c.bf16 %v2717_v34, %v2701_v23  ;;  %4973 = vmatpush3.bf16.msra.mxu1 %v5485_v48  ;;  %4991 = vmatpush3.bf16.msra.mxu0 %v5486_v5  ;;  %v2681_v35 = vpop.f32.mrb[32].mxu0  ;;  %v5523_v48 = vld [vmem:[%s7207_s3 + $0x278] sm:$0xff]   ;;  %v5524_v5 = vld [vmem:[%s7207_s3 + $0x2e8] sm:$0xff]   ;;  %v5529_v23 = vld [vmem:[%s7207_s3 + $0x2b0] sm:$0xff]  }
 0xa1c   : > { %v2682_v47 = vadd.f32 %v2681_v35, %v7481_v33  ;;  %v2683_v54 = vpop.f32.mrb[33].mxu0  ;;  %4974 = vmatprep.subr.bf16.mxu1 %v5487_v50  ;;  %4992 = vmatprep.subr.bf16.mxu0 %v5488_v13  ;;  %v5527_v50 = vld [vmem:[%s7207_s3 + $0x2f0] sm:$0xff]   ;;  %v5528_v13 = vld [vmem:[%s7207_s3 + $0x340] sm:$0xff]   ;;  %v5533_v35 = vld [vmem:[%s7207_s3 + $0x2b8] sm:$0xff]  }
 0xa1d   : > { %v2684_v32 = vadd.f32 %v2683_v54, %v2166_v51  ;;  %v2685_v61 = vpop.f32.mrb[34].mxu0  ;;  %v5530_v34 = vld [vmem:[%s7207_s3 + $0x300] sm:$0xff]   ;;  %v5537_v54 = vld [vmem:[%s7207_s3 + $0x310] sm:$0xff]  }
 0xa1e   : > { %v2686_v56 = vadd.f32 %v2685_v61, %v7481_v33  ;;  %v2687_v19 = vpop.f32.mrb[35].mxu0  ;;  %v2704_v62 = vmax.f32 %v2682_v47, 0.0  ;;  %v5536_v47 = vld [vmem:[%s7207_s3 + $0x3c0] sm:$0xff]  }
 0xa1f   : > { %v2688_v57 = vadd.f32 %v2687_v19, %v2166_v51  ;;  %4975 = vmatpush3.bf16.msra.mxu1 %v5489_v53  ;;  %4993 = vmatpush3.bf16.msra.mxu0 %v5490_v36  ;;  %v2705_v2 = vmax.f32 %v2684_v32, 0.0  ;;  %v5531_v51 = vld [vmem:[%s7207_s3 + $0x2f8] sm:$0xff]   ;;  %v5534_v53 = vld [vmem:[%s7207_s3 + $0x308] sm:$0xff]   ;;  %v5535_v36 = vld [vmem:[%s7207_s3 + $0x350] sm:$0xff]  }
 0xa20   : > { %v2720_v63 = vmax.f32 %v2686_v56, 0.0  ;;  %4976 = vmatprep.subr.bf16.mxu1 %v5491_v55  ;;  %4994 = vmatprep.subr.bf16.mxu0 %v5492_v30  ;;  %v5539_v55 = vld [vmem:[%s7207_s3 + $0x358] sm:$0xff]   ;;  %v5540_v30 = vld [vmem:[%s7207_s3 + $0x3c8] sm:$0xff]   ;;  %v5543_v61 = vld [vmem:[%s7207_s3 + $0x360] sm:$0xff]  }
 0xa21   : > { %v2721_v33 = vmax.f32 %v2688_v57, 0.0  ;;  %v5542_v32 = vld [vmem:[%s7207_s3 + $0x388] sm:$0xff]   ;;  %v5544_v56 = vld [vmem:[%s7207_s3 + $0x3d0] sm:$0xff]   ;;  %v5545_v19 = vld [vmem:[%s7207_s3 + $0x320] sm:$0xff]  }
 0xa22   : > { %v7559_v4 = vpack.c.bf16 %v2720_v63, %v2704_v62  ;;  %v5547_v57 = vld [vmem:[%s7207_s3 + $0x368] sm:$0xff]   ;;  %v5550_v62 = vld [vmem:[%s7207_s3 + $0x398] sm:$0xff]   ;;  %v5551_v63 = vld [vmem:[%s7207_s3 + $0x370] sm:$0xff]  }
 0xa23   : > { %v7561_v9 = vpack.c.bf16 %v2721_v33, %v2705_v2  ;;  %4977 = vmatpush3.bf16.msra.mxu1 %v5493_v58  ;;  %4995 = vmatpush3.bf16.msra.mxu0 %v5494_v59  ;;  %v5548_v58 = vld [vmem:[%s7207_s3 + $0x3d8] sm:$0xff]   ;;  %v5549_v59 = vld [vmem:[%s7207_s3 + $0x328] sm:$0xff]   ;;  %v5554_v2 = vld [vmem:[%s7207_s3 + $0x3a0] sm:$0xff]  }
 0xa24   : > { %4996 = vmatprep.subr.bf16.mxu0 %v5495_v0  ;;  %5006 = vmatprep.subr.bf16.mxu1 %v5496_v1  ;;  %v5552_v0 = vld [vmem:[%s7207_s3 + $0x3e0] sm:$0xff]   ;;  %v5553_v1 = vld [vmem:[%s7207_s3 + $0x330] sm:$0xff]   ;;  %v5555_v33 = vld [vmem:[%s7207_s3 + $0x378] sm:$0xff]  }
 0xa26   : > { %3884 = vmatmul.mubr.bf16.vlgmr.msra.gmra.mrb[24].mxu1 %v7499_v60  ;;  %v5506_v60 = vld [vmem:[%s7207_s3 + $0x280] sm:$0xff]  }
 0xa27   : > { %4997 = vmatpush3.bf16.msra.mxu0 %v5497_v10  ;;  %5007 = vmatpush3.bf16.msra.mxu1 %v5498_v11  ;;  %v5557_v10 = vld [vmem:[%s7207_s3 + $0x338] sm:$0xff]   ;;  %v5558_v11 = vld [vmem:[%s7207_s3 + $0x3a8] sm:$0xff]  }
 0xa28   : > { %3965 = vmatprep.mubr.bf16.mxu1 %v7514_v28  ;;  %4998 = vmatprep.subr.bf16.mxu0 %v5499_v12  ;;  %v5509_v28 = vld [vmem:[%s7207_s3 + $0x218] sm:$0xff]   ;;  %v5559_v12 = vld [vmem:[%s7207_s3 + $0x3f0] sm:$0xff]  }
 0xa29   : > { %5008 = vmatprep.subr.bf16.mxu1 %v5500_v16  ;;  %v5560_v16 = vld [vmem:[%s7207_s3 + $0x3b0] sm:$0xff]  }
 0xa2b   : > { %4999 = vmatpush3.bf16.msra.mxu0 %v5501_v3  ;;  %5009 = vmatpush3.bf16.msra.mxu1 %v5502_v22  ;;  %v5561_v3 = vld [vmem:[%s7207_s3 + $0x3f8] sm:$0xff]  }
 0xa2c   : > { %5010 = vmatprep.subr.bf16.mxu1 %v5503_v20  ;;  %5028 = vmatprep.subr.bf16.mxu0 %v5504_v21  ;;  %v5562_v22 = vld [vmem:[%s7207_s3 + $0x3b8] sm:$0xff]  }
 0xa2e   : > { %3925 = vmatmul.mubr.bf16.vlgmr.msra.gmra.mrb[40].mxu0 %v7530_v37  ;;  %v5514_v37 = vld [vmem:[%s7207_s3 + $0x290] sm:$0xff]  }
 0xa2f   : > { %5011 = vmatpush3.bf16.msra.mxu1 %v5505_v25  ;;  %5029 = vmatpush3.bf16.msra.mxu0 %v5506_v60 }
 0xa30   : > { %4006 = vmatprep.mubr.bf16.mxu0 %v2733_v52  ;;  %5012 = vmatprep.subr.bf16.mxu1 %v5507_v29  ;;  %v5532_v52 = vld [vmem:[%s7207_s3 + $0x348] sm:$0xff]  }
 0xa31   : > { %5030 = vmatprep.subr.bf16.mxu0 %v5508_v26 }
 0xa33   : > { %5013 = vmatpush3.bf16.msra.mxu1 %v5509_v28  ;;  %5031 = vmatpush3.bf16.msra.mxu0 %v5510_v39  ;;  %v4721_v28 = vld [vmem:[%s1160_s26] ss:$0 sm:$0xff]  ;;  %s7824_s26 = sld [smem:[#allocation71_spill]] (!%p4852_p7) }
 0xa34   : > { %5014 = vmatprep.subr.bf16.mxu1 %v5511_v40  ;;  %5032 = vmatprep.subr.bf16.mxu0 %v5512_v17 }
 0xa37   : > { %5015 = vmatpush3.bf16.msra.mxu1 %v5513_v41  ;;  %5033 = vmatpush3.bf16.msra.mxu0 %v5514_v37 }
 0xa38   : > { %5016 = vmatprep.subr.bf16.mxu1 %v5515_v15  ;;  %5034 = vmatprep.subr.bf16.mxu0 %v5516_v31 }
 0xa3b   : > { %5017 = vmatpush3.bf16.msra.mxu1 %v5517_v42  ;;  %5035 = vmatpush3.bf16.msra.mxu0 %v5518_v43 }
 0xa3c   : > { %5018 = vmatprep.subr.bf16.mxu1 %v5519_v44  ;;  %5036 = vmatprep.subr.bf16.mxu0 %v5520_v45 }
 0xa3f   : > { %5019 = vmatpush3.bf16.msra.mxu1 %v5521_v38  ;;  %5037 = vmatpush3.bf16.msra.mxu0 %v5522_v46 }
 0xa40   : > { %5020 = vmatprep.subr.bf16.mxu1 %v5523_v48  ;;  %5038 = vmatprep.subr.bf16.mxu0 %v5524_v5 }
 0xa43   : > { %5021 = vmatpush3.bf16.msra.mxu1 %v5525_v49  ;;  %5039 = vmatpush3.bf16.msra.mxu0 %v5526_v18 }
 0xa44   : > { %5040 = vmatprep.subr.bf16.mxu0 %v5527_v50  ;;  %5050 = vmatprep.subr.bf16.mxu1 %v5528_v13 }
 0xa46   : > { %3966 = vmatmul.mubr.bf16.vlgmr.msra.gmra.mrb[28].mxu1 %v7512_v27  ;;  %v5538_v27 = vld [vmem:[%s7207_s3 + $0x380] sm:$0xff]  }
 0xa47   : > { %5041 = vmatpush3.bf16.msra.mxu0 %v5529_v23  ;;  %5051 = vmatpush3.bf16.msra.mxu1 %v5530_v34 }
 0xa48   : > { %4047 = vmatprep.mubr.bf16.mxu1 %v7534_v14  ;;  %5042 = vmatprep.subr.bf16.mxu0 %v5531_v51  ;;  %v5541_v14 = vld [vmem:[%s7207_s3 + $0x318] sm:$0xff]  }
 0xa49   : > { %5052 = vmatprep.subr.bf16.mxu1 %v5532_v52 }
 0xa4b   : > { %5043 = vmatpush3.bf16.msra.mxu0 %v5533_v35  ;;  %5053 = vmatpush3.bf16.msra.mxu1 %v5534_v53 }
 0xa4c   : > { %5054 = vmatprep.subr.bf16.mxu1 %v5535_v36  ;;  %5072 = vmatprep.subr.bf16.mxu0 %v5536_v47 }
 0xa4e   : > { %4007 = vmatmul.mubr.bf16.vlgmr.msra.gmra.mrb[44].mxu0 %v7547_v24  ;;  %v5546_v24 = vld [vmem:[%s7207_s3 + $0x390] sm:$0xff]  }
 0xa4f   : > { %5055 = vmatpush3.bf16.msra.mxu1 %v5537_v54  ;;  %5073 = vmatpush3.bf16.msra.mxu0 %v5538_v27 }
 0xa50   : > { %4088 = vmatprep.mubr.bf16.mxu0 %v7561_v9  ;;  %5056 = vmatprep.subr.bf16.mxu1 %v5539_v55  ;;  %v5556_v9 = vld [vmem:[%s7207_s3 + $0x3e8] sm:$0xff]  }
 0xa51   : > { %5074 = vmatprep.subr.bf16.mxu0 %v5540_v30 }
 0xa53   : > { %5057 = vmatpush3.bf16.msra.mxu1 %v5541_v14  ;;  %5075 = vmatpush3.bf16.msra.mxu0 %v5542_v32 }
 0xa54   : > { %5058 = vmatprep.subr.bf16.mxu1 %v5543_v61  ;;  %5076 = vmatprep.subr.bf16.mxu0 %v5544_v56 }
 0xa57   : > { %5059 = vmatpush3.bf16.msra.mxu1 %v5545_v19  ;;  %5077 = vmatpush3.bf16.msra.mxu0 %v5546_v24 }
 0xa58   : > { %5060 = vmatprep.subr.bf16.mxu1 %v5547_v57  ;;  %5078 = vmatprep.subr.bf16.mxu0 %v5548_v58 }
 0xa5b   : > { %5061 = vmatpush3.bf16.msra.mxu1 %v5549_v59  ;;  %5079 = vmatpush3.bf16.msra.mxu0 %v5550_v62 }
 0xa5c   : > { %5062 = vmatprep.subr.bf16.mxu1 %v5551_v63  ;;  %5080 = vmatprep.subr.bf16.mxu0 %v5552_v0 }
 0xa5f   : > { %5063 = vmatpush3.bf16.msra.mxu1 %v5553_v1  ;;  %5081 = vmatpush3.bf16.msra.mxu0 %v5554_v2 }
 0xa60   : > { %5064 = vmatprep.subr.bf16.mxu1 %v5555_v33  ;;  %5082 = vmatprep.subr.bf16.mxu0 %v5556_v9 }
 0xa63   : > { %5065 = vmatpush3.bf16.msra.mxu1 %v5557_v10  ;;  %5083 = vmatpush3.bf16.msra.mxu0 %v5558_v11 }
 0xa64   : > { %5084 = vmatprep.subr.bf16.mxu0 %v5559_v12 }
 0xa66   : > { %4048 = vmatmul.mubr.bf16.vlgmr.msra.gmra.mrb[32].mxu1 %v7532_v6 }
 0xa67   : > { %5085 = vmatpush3.bf16.msra.mxu0 %v5560_v16 }
 0xa68   : > { %5086 = vmatprep.subr.bf16.mxu0 %v5561_v3 }
 0xa6b   : > { %5087 = vmatpush3.bf16.msra.mxu0 %v5562_v22 }
 0xa6e   : > { %4089 = vmatmul.mubr.bf16.vlgmr.msra.gmra.mrb[48].mxu0 %v7559_v4 }
 0xad9   : > { %v4934_v20 = vpop.f32.mrb[20].mxu1 }
 0xada   : > { %v4935_v21 = vpop.f32.mrb[21].mxu1 }
 0xadb   : > { %v4936_v25 = vadd.f32 %v4935_v21, %v4934_v20  ;;  %v4937_v60 = vpop.f32.mrb[22].mxu1 }
 0xadc   : > { %v4938_v29 = vpop.f32.mrb[23].mxu1 }
 0xadd   : > { %v4939_v26 = vadd.f32 %v4938_v29, %v4937_v60  ;;  %v3804_v17 = vadd.f32 %v4936_v25, %v4721_v28 }
 0xadf   : > { %v3807_v15 = vadd.f32 %v4939_v26, %v4721_v28 }
 0xae1   : > { %v4956_v39 = vpop.f32.mrb[36].mxu0 }
 0xae2   : > { %v4957_v40 = vpop.f32.mrb[37].mxu0 }
 0xae3   : > { %v4958_v41 = vadd.f32 %v4957_v40, %v4956_v39  ;;  %v4959_v37 = vpop.f32.mrb[38].mxu0 }
 0xae4   : > { %v4960_v6 = vpop.f32.mrb[39].mxu0 }
 0xae5   : > { %v3845_v31 = vadd.f32 %v4958_v41, %v3804_v17  ;;  %v4961_v42 = vadd.f32 %v4960_v6, %v4959_v37 }
 0xae7   : > { %v3848_v43 = vadd.f32 %v4961_v42, %v3807_v15 }
 0xaf9   : > { %v4978_v44 = vpop.f32.mrb[24].mxu1 }
 0xafa   : > { %v4979_v4 = vpop.f32.mrb[25].mxu1 }
 0xafb   : > { %v4980_v45 = vadd.f32 %v4979_v4, %v4978_v44  ;;  %v4981_v38 = vpop.f32.mrb[26].mxu1 }
 0xafc   : > { %v4982_v46 = vpop.f32.mrb[27].mxu1 }
 0xafd   : > { %v3886_v48 = vadd.f32 %v4980_v45, %v3845_v31  ;;  %v4983_v5 = vadd.f32 %v4982_v46, %v4981_v38 }
 0xaff   : > { %v3889_v49 = vadd.f32 %v4983_v5, %v3848_v43 }
 0xb01   : > { %v5000_v18 = vpop.f32.mrb[40].mxu0 }
 0xb02   : > { %v5001_v50 = vpop.f32.mrb[41].mxu0 }
 0xb03   : > { %v5002_v13 = vadd.f32 %v5001_v50, %v5000_v18  ;;  %v5003_v23 = vpop.f32.mrb[42].mxu0  ;;  %v4851_v18 = vld [vmem:[%s7822_s17] ss:$0 sm:$0xff] }
 0xb04   : > { %v5004_v34 = vpop.f32.mrb[43].mxu0 }
 0xb05   : > { %v3927_v51 = vadd.f32 %v5002_v13, %v3886_v48  ;;  %v5005_v52 = vadd.f32 %v5004_v34, %v5003_v23  ;;  %v4850_v48 = vld [vmem:[%s1168_s0] ss:$0 sm:$0xff] }
 0xb07   : > { %v3930_v35 = vadd.f32 %v5005_v52, %v3889_v49 }
 0xb19   : > { %v5022_v53 = vpop.f32.mrb[28].mxu1 }
 0xb1a   : > { %v5023_v36 = vpop.f32.mrb[29].mxu1 }
 0xb1b   : > { %v5024_v47 = vadd.f32 %v5023_v36, %v5022_v53  ;;  %v5025_v54 = vpop.f32.mrb[30].mxu1 }
 0xb1c   : > { %v5026_v27 = vpop.f32.mrb[31].mxu1 }
 0xb1d   : > { %v3968_v55 = vadd.f32 %v5024_v47, %v3927_v51  ;;  %v5027_v30 = vadd.f32 %v5026_v27, %v5025_v54 }
 0xb1f   : > { %v3971_v14 = vadd.f32 %v5027_v30, %v3930_v35 }
 0xb21   : > { %v5044_v32 = vpop.f32.mrb[44].mxu0 }
 0xb22   : > { %v5045_v61 = vpop.f32.mrb[45].mxu0 }
 0xb23   : > { %v5046_v56 = vadd.f32 %v5045_v61, %v5044_v32  ;;  %v5047_v19 = vpop.f32.mrb[46].mxu0 }
 0xb24   : > { %v5048_v24 = vpop.f32.mrb[47].mxu0 }
 0xb25   : > { %v4009_v57 = vadd.f32 %v5046_v56, %v3968_v55  ;;  %v5049_v58 = vadd.f32 %v5048_v24, %v5047_v19 }
 0xb27   : > { %v4012_v59 = vadd.f32 %v5049_v58, %v3971_v14 }
 0xb39   : > { %v5066_v62 = vpop.f32.mrb[32].mxu1 }
 0xb3a   : > { %v5067_v63 = vpop.f32.mrb[33].mxu1 }
 0xb3b   : > { %v5068_v0 = vadd.f32 %v5067_v63, %v5066_v62  ;;  %v5069_v1 = vpop.f32.mrb[34].mxu1  ;;  %v4853_v63 = vld [vmem:[#allocation34] ss:$0 sm:$0xff] (!%p4852_p7) }
 0xb3c   : > { %v5070_v2 = vpop.f32.mrb[35].mxu1 }
 0xb3d   : > { %v4050_v33 = vadd.f32 %v5068_v0, %v4009_v57  ;;  %v5071_v9 = vadd.f32 %v5070_v2, %v5069_v1  ;;  %v4854_v1 = vld [vmem:[#allocation35] ss:$0 sm:$0xff] (!%p4852_p7) }
 0xb3f   : > { %v4053_v10 = vadd.f32 %v5071_v9, %v4012_v59 }
 0xb41   : > { %v5088_v11 = vpop.f32.mrb[48].mxu0 }
 0xb42   : > { %v5089_v12 = vpop.f32.mrb[49].mxu0 }
 0xb43   : > { %v5090_v16 = vadd.f32 %v5089_v12, %v5088_v11  ;;  %v5091_v3 = vpop.f32.mrb[50].mxu0 }
 0xb44   : > { %v5092_v22 = vpop.f32.mrb[51].mxu0 }
 0xb45   : > { %v4091_v20 = vadd.f32 %v5090_v16, %v4050_v33  ;;  %v5093_v21 = vadd.f32 %v5092_v22, %v5091_v3 }
 0xb47   : > { %v4094_v25 = vadd.f32 %v5093_v21, %v4053_v10  ;;  %v4097_v60 = vadd.f32 %v4091_v20, %v7393_v7 }
 0xb49   : > { %v4101_v29 = vsel %vm1349_vm2, %v4097_v60, 0.0  ;;  %v4098_v26 = vadd.f32 %v4094_v25, %v7395_v8 }
 0xb4a   : > { %4102 = vadd.xlane.f32.xlu0 %v4101_v29 }
 0xb4b   : > { %v4104_v28 = vsel %vm1349_vm2, %v4098_v26, 0.0 }
 0xb4c   : > { %4105 = vadd.xlane.f32.xlu1 %v4104_v28 }
 0xbd7   : > { %v4103_v39 = vpop.xlane.xlu0 %4102 }
 0xbd8   : > { %v4107_v40 = vmul.f32 0.03125, %v4103_v39 }
 0xbd9   : > { %v4106_v17 = vpop.xlane.xlu1 %4105 }
 0xbda   : > { %v4109_v41 = vsub.f32 %v4097_v60, %v4107_v40  ;;  %v4108_v37 = vmul.f32 0.03125, %v4106_v17 }
 0xbdc   : > { %v4110_v6 = vsub.f32 %v4098_v26, %v4108_v37  ;;  %v4111_v15 = vmul.f32 %v4109_v41, %v4109_v41 }
 0xbde   : > { %v4113_v31 = vsel %vm1349_vm2, %v4111_v15, 0.0  ;;  %v4112_v42 = vmul.f32 %v4110_v6, %v4110_v6 }
 0xbdf   : > { %4114 = vadd.xlane.f32.xlu0 %v4113_v31 }
 0xbe0   : > { %v4116_v7 = vsel %vm1349_vm2, %v4112_v42, 0.0 }
 0xbe1   : > { %4117 = vadd.xlane.f32.xlu1 %v4116_v7 }
 0xc6c   : > { %v4115_v8 = vpop.xlane.xlu0 %4114 }
 0xc6d   : > { %v4119_v43 = vmul.f32 0.03125, %v4115_v8 }
 0xc6e   : > { %v4118_v44 = vpop.xlane.xlu1 %4117 }
 0xc6f   : > { %v4121_v4 = vadd.f32 1e-05, %v4119_v43  ;;  %v4120_v45 = vmul.f32 0.03125, %v4118_v44 }
 0xc71   : > { %5575 = vrsqrt.f32 %v4121_v4  ;;  %v4122_v38 = vadd.f32 1e-05, %v4120_v45 }
 0xc73   : > { %5577 = vrsqrt.f32 %v4122_v38 }
 0xc7b   : > { %v5576_v46 = vpop.eup %5575 }
 0xc7c   : > { %v4125_v5 = vmul.f32 %v5576_v46, %v4109_v41 }
 0xc7d   : > { %v5578_v49 = vpop.eup %5577 }
 0xc7e   : > { %v4133_v50 = vmul.f32 %v4850_v48, %v4125_v5  ;;  %v4126_v13 = vmul.f32 %v5578_v49, %v4110_v6  ;;  %4148 = sbr.rel (%p4852_p7) target bundleno = 3520 (0xdc0), region = 208 }
 0xc80   : > { %v4141_v23 = vadd.f32 %v4851_v18, %v4133_v50  ;;  %v4134_v34 = vmul.f32 %v4850_v48, %v4126_v13 }
 0xc82   : > { %4143 = vst.msk [vmem:[#allocation2] sm:$0xff] %vm1349_vm2, %v4141_v23  ;;  %v4142_v51 = vadd.f32 %v4851_v18, %v4134_v34  ;;  %v4151_v52 = vsel (!%p4852_p7), %vm1349_vm2, %v4141_v23, 0.0 }
 0xc83   : > { %4152 = vadd.xlane.f32.xlu0 (!%p4852_p7), %v4151_v52 }
 0xc84   : > { %4144 = vst.msk [vmem:[#allocation2 + $0x8] sm:$0xff] %vm1349_vm2, %v4142_v51  ;;  %v4154_v35 = vsel (!%p4852_p7), %vm1349_vm2, %v4142_v51, 0.0 }
 0xc87   : > { %4155 = vadd.xlane.f32.xlu0 %v4154_v35 }
 0xd10   : > { %v4153_v53 = vpop.xlane.xlu0 %4152 }
 0xd11   : > { %v4157_v36 = vmul.f32 0.03125, %v4153_v53 }
 0xd13   : > { %v4159_v47 = vsub.f32 %v4141_v23, %v4157_v36 }
 0xd14   : > { %v4156_v54 = vpop.xlane.xlu0 %4155 }
 0xd15   : > { %v4158_v27 = vmul.f32 0.03125, %v4156_v54  ;;  %v4161_v55 = vmul.f32 %v4159_v47, %v4159_v47 }
 0xd17   : > { %v4160_v30 = vsub.f32 %v4142_v51, %v4158_v27  ;;  %v4163_v14 = vsel %vm1349_vm2, %v4161_v55, 0.0 }
 0xd18   : > { %4164 = vadd.xlane.f32.xlu1 %v4163_v14 }
 0xd19   : > { %v4162_v32 = vmul.f32 %v4160_v30, %v4160_v30 }
 0xd1b   : > { %v4166_v61 = vsel %vm1349_vm2, %v4162_v32, 0.0 }
 0xd1c   : > { %4167 = vadd.xlane.f32.xlu1 %v4166_v61 }
 0xda5   : > { %v4165_v56 = vpop.xlane.xlu1 %4164 }
 0xda6   : > { %v4169_v19 = vmul.f32 0.03125, %v4165_v56 }
 0xda8   : > { %v4171_v24 = vadd.f32 1e-05, %v4169_v19 }
 0xda9   : > { %v4168_v57 = vpop.xlane.xlu1 %4167 }
 0xdaa   : > { %5579 = vrsqrt.f32 %v4171_v24  ;;  %v4170_v58 = vmul.f32 0.03125, %v4168_v57 }
 0xdac   : > { %v4172_v59 = vadd.f32 1e-05, %v4170_v58 }
 0xdae   : > { %5581 = vrsqrt.f32 %v4172_v59 }
 0xdb4   : > { %v5580_v62 = vpop.eup %5579 }
 0xdb5   : > { %v4175_v0 = vmul.f32 %v5580_v62, %v4159_v47 }
 0xdb7   : > { %v4183_v2 = vmul.f32 %v4853_v63, %v4175_v0 }
 0xdb8   : > { %v5582_v33 = vpop.eup %5581 }
 0xdb9   : > { %v4191_v9 = vadd.f32 %v4854_v1, %v4183_v2  ;;  %v4176_v10 = vmul.f32 %v5582_v33, %v4160_v30 }
 0xdbb   : > { %4193 = vst.msk [vmem:[%s7824_s26] sm:$0xff] %vm1349_vm2, %v4191_v9  ;;  %v4184_v11 = vmul.f32 %v4853_v63, %v4176_v10 }
 0xdbd   : > { %v4192_v12 = vadd.f32 %v4854_v1, %v4184_v11 }
 0xdbf   : > { %4194 = vst.msk [vmem:[%s7824_s26 + $0x8] sm:$0xff] %vm1349_vm2, %v4192_v12 }
 0xdc0 PF: > { %s7825_s25 = sld [smem:[#allocation52_spill]]  ;;  %s7826_s4 = sld [smem:[#allocation50_spill]] }
 0xdc1   : > { %s7827_s5 = sld [smem:[#allocation53_spill]]  ;;  %s7828_s30 = smov %s6277_s24 }
 0xdc6   : > { %p58_p6 = scmp.ge.s32.totalorder %s7825_s25, 5  }
 0xdc7   : > { %s7829_s24 = smov %s7827_s5 }
 0xdc8   :  { %60 = sbr.rel (!%p58_p6) target bundleno = 38 (0x26), region = 356 }
 0xdcf   :  { %4206 = vsyncpa [#allocation4], 1 }
 0xdd0   :  { %4208 = vsyncpa [#allocation4 + $0x1], 1 }
 0xdd1   :  { %4209 = vsyncpa [#allocation6], 1 }
 0xdd2   :  { %4210 = vsyncpa [#allocation9], 1 }
 0xdd3   :  { %4211 = vsyncpa [#allocation12], 1 }
 0xdd4   :  { %4213 = vsyncpa [#allocation12 + $0x1], 1 }
 0xdd5   :  { %4214 = vsyncpa [#allocation15], 1 }
 0xdd6   :  { %4216 = vsyncpa [#allocation15 + $0x1], 1 }
 0xdd7   :  { %4217 = vsyncpa [#allocation18], 1 }
 0xdd8   :  { %4219 = vsyncpa [#allocation18 + $0x1], 1 }
 0xdd9   :  { %4220 = vsyncpa [#allocation21], 1 }
 0xdda   :  { %4222 = vsyncpa [#allocation21 + $0x1], 1 }
 0xddb   :  { %4223 = vsyncpa [#allocation24], 1 }
 0xddc   :  { %4225 = vsyncpa [#allocation24 + $0x1], 1 }
 0xddd   :  { %4226 = vsyncpa [#allocation27], 1 }
 0xdde   :  { %4228 = vsyncpa [#allocation27 + $0x1], 1 }
 0xddf   :  { %4229 = vsyncpa [#allocation30], 1 }
 0xde0   :  { %4231 = vsyncpa [#allocation30 + $0x1], 1 }
 0xde1   :  { %4232 = vsyncpa [#allocation33], 1 }
 0xde2   :  { %4234 = vsyncpa [#allocation33 + $0x1], 1 }
 0xde3   :  { %4235 = vsyncpa [#allocation36], 1 }

// kernel: _lambda_.3
= control target key start
LH: loop header
LB: loop body
LE: loop exit
PB: predicated region body
PF: predicated region fallthrough
CT: control target
= control target key end

     0   :  { %s6753_s6 = smov 1   ;;  %s6754_s10 = smov 2   ;;  %s7709_s0 = inlined_call_operand.smem [shape: u32[37], index: -1, kind: input, shape index: {}] }
   0x1   :  { %s6805_s5 = sld [smem:[%s7709_s0]]   ;;  %s6755_s14 = smov 3  }
   0x2   :  { %s6810_s9 = sld [smem:[%s7709_s0 + %s6753_s6]]   ;;  %s6756_s18 = smov 4  }
   0x3   :  { %s6815_s13 = sld [smem:[%s7709_s0 + %s6754_s10]]   ;;  %s6757_s22 = smov 5  }
   0x4   :  { %s6820_s17 = sld [smem:[%s7709_s0 + %s6755_s14]]   ;;  %s6758_s26 = smov 6  }
   0x5   :  { %s6825_s21 = sld [smem:[%s7709_s0 + %s6756_s18]]   ;;  %s6759_s30 = smov 7  }
   0x6   :  { %s6830_s25 = sld [smem:[%s7709_s0 + %s6757_s22]]   ;;  %s6760_s4 = smov 8  }
   0x7   :  { %7725 = sst [smem:[#allocation6_spill]] %s6805_s5  ;;  %s6761_s10 = smov 9  }
   0x8   :  { %7726 = sst [smem:[#allocation7_spill]] %s6810_s9  ;;  %s6762_s15 = smov 10  }
   0x9   :  { %7727 = sst [smem:[#allocation8_spill]] %s6815_s13  ;;  %s6763_s20 = smov 11  }
   0xa   :  { %7728 = sst [smem:[#allocation9_spill]] %s6820_s17  ;;  %s6765_s1 = smov 13  }
   0xb   :  { %7729 = sst [smem:[#allocation10_spill]] %s6825_s21  ;;  %s6766_s7 = smov 14  }
   0xc   :  { %7730 = sst [smem:[#allocation11_spill]] %s6830_s25  ;;  %s6768_s22 = smov 16  }
   0xd   :  { %s6835_s29 = sld [smem:[%s7709_s0 + %s6758_s26]]   ;;  %s6764_s26 = smov 12  }
   0xe   :  { %s6840_s3 = sld [smem:[%s7709_s0 + %s6759_s30]]   ;;  %s6769_s28 = smov 17  }
   0xf   :  { %s6845_s8 = sld [smem:[%s7709_s0 + %s6760_s4]]  }
  0x10   :  { %s6850_s14 = sld [smem:[%s7709_s0 + %s6761_s10]]  }
  0x11   :  { %s6855_s19 = sld [smem:[%s7709_s0 + %s6762_s15]]   ;;  %s6767_s15 = smov 15  }
  0x12   :  { %s6860_s24 = sld [smem:[%s7709_s0 + %s6763_s20]]  }
  0x13   :  { %7731 = sst [smem:[#allocation12_spill]] %s6835_s29 }
  0x14   :  { %7732 = sst [smem:[#allocation13_spill]] %s6840_s3 }
  0x15   :  { %7733 = sst [smem:[#allocation14_spill]] %s6845_s8 }
  0x16   :  { %7734 = sst [smem:[#allocation15_spill]] %s6850_s14 }
  0x17   :  { %7735 = sst [smem:[#allocation16_spill]] %s6855_s19 }
  0x18   :  { %s6865_s30 = sld [smem:[%s7709_s0 + %s6764_s26]]  }
  0x19   :  { %s6870_s6 = sld [smem:[%s7709_s0 + %s6765_s1]]  }
  0x1a   :  { %s6875_s12 = sld [smem:[%s7709_s0 + %s6766_s7]]   ;;  %s6770_s7 = smov 18  }
  0x1b   :  { %s6880_s20 = sld [smem:[%s7709_s0 + %s6767_s15]]   ;;  %s6771_s15 = smov 19  }
  0x1c   :  { %s6885_s27 = sld [smem:[%s7709_s0 + %s6768_s22]]   ;;  %s6772_s22 = smov 20  }
  0x1d   :  { %s6890_s4 = sld [smem:[%s7709_s0 + %s6769_s28]]   ;;  %s6773_s28 = smov 21  }
  0x1e   :  { %7736 = sst [smem:[#allocation17_spill]] %s6865_s30 }
  0x1f   :  { %7737 = sst [smem:[#allocation18_spill]] %s6870_s6 }
  0x20   :  { %7738 = sst [smem:[#allocation19_spill]] %s6875_s12 }
  0x21   :  { %7739 = sst [smem:[#allocation20_spill]] %s6880_s20 }
  0x22   :  { %7740 = sst [smem:[#allocation21_spill]] %s6885_s27 }
  0x23   :  { %7741 = sst [smem:[#allocation22_spill]] %s6890_s4 }
  0x24   :  { %s6895_s9 = sld [smem:[%s7709_s0 + %s6770_s7]]   ;;  %s6774_s7 = smov 22  }
  0x25   :  { %s6900_s21 = sld [smem:[%s7709_s0 + %s6771_s15]]   ;;  %s6775_s15 = smov 23  }
  0x26   :  { %s6905_s17 = sld [smem:[%s7709_s0 + %s6772_s22]]   ;;  %s6776_s22 = smov 24  }
  0x27   :  { %s6910_s25 = sld [smem:[%s7709_s0 + %s6773_s28]]   ;;  %s6777_s28 = smov 25  }
  0x28   :  { %s6915_s13 = sld [smem:[%s7709_s0 + %s6774_s7]]   ;;  %s6778_s7 = smov 26  }
  0x29   :  { %s6920_s5 = sld [smem:[%s7709_s0 + %s6775_s15]]   ;;  %s6779_s15 = smov 27  }
  0x2a   :  { %7742 = sst [smem:[#allocation23_spill]] %s6895_s9 }
  0x2c   :  { %7743 = sst [smem:[#allocation24_spill]] %s6905_s17 }
  0x2d   :  { %7744 = sst [smem:[#allocation25_spill]] %s6910_s25 }
  0x2e   :  { %7745 = sst [smem:[#allocation26_spill]] %s6915_s13 }
  0x2f   :  { %7746 = sst [smem:[#allocation27_spill]] %s6920_s5 }
  0x30   :  { %s6925_s17 = sld [smem:[%s7709_s0 + %s6776_s22]]   ;;  %s6780_s22 = smov 28  }
  0x31   :  { %s6930_s25 = sld [smem:[%s7709_s0 + %s6777_s28]]   ;;  %s6781_s28 = smov 29  }
  0x32   :  { %s6935_s13 = sld [smem:[%s7709_s0 + %s6778_s7]]   ;;  %s6782_s7 = smov 30  }
  0x33   :  { %s6940_s5 = sld [smem:[%s7709_s0 + %s6779_s15]]   ;;  %s6783_s15 = smov 31  }
  0x36   :  { %7747 = sst [smem:[#allocation28_spill]] %s6925_s17 }
  0x37   :  { %7748 = sst [smem:[#allocation29_spill]] %s6930_s25 }
  0x38   :  { %7749 = sst [smem:[#allocation30_spill]] %s6935_s13 }
  0x39   :  { %7750 = sst [smem:[#allocation31_spill]] %s6940_s5 }
  0x3a   :  { %s6945_s17 = sld [smem:[%s7709_s0 + %s6780_s22]]   ;;  %s6784_s22 = smov 32  }
  0x3b   :  { %s6950_s25 = sld [smem:[%s7709_s0 + %s6781_s28]]   ;;  %s6785_s28 = smov 33  }
  0x3c   :  { %s6955_s13 = sld [smem:[%s7709_s0 + %s6782_s7]]   ;;  %s6786_s7 = smov 34  }
  0x3d   :  { %s6960_s5 = sld [smem:[%s7709_s0 + %s6783_s15]]   ;;  %s6787_s15 = smov 35  }
  0x40   :  { %7751 = sst [smem:[#allocation32_spill]] %s6945_s17 }
  0x41   :  { %7752 = sst [smem:[#allocation33_spill]] %s6950_s25 }
  0x42   :  { %7753 = sst [smem:[#allocation34_spill]] %s6955_s13 }
  0x43   :  { %7754 = sst [smem:[#allocation35_spill]] %s6960_s5 }
  0x44   :  { %s6965_s17 = sld [smem:[%s7709_s0 + %s6784_s22]]   ;;  %s6788_s22 = smov 36  }
  0x45   :  { %s6970_s25 = sld [smem:[%s7709_s0 + %s6785_s28]]  }
  0x46   :  { %s6975_s13 = sld [smem:[%s7709_s0 + %s6786_s7]]  }
  0x47   :  { %s6980_s5 = sld [smem:[%s7709_s0 + %s6787_s15]]  }
  0x4a   :  { %7755 = sst [smem:[#allocation36_spill]] %s6965_s17 }
  0x4b   :  { %7756 = sst [smem:[#allocation37_spill]] %s6970_s25 }
  0x4c   :  { %7757 = sst [smem:[#allocation38_spill]] %s6975_s13 }
  0x4d   :  { %7758 = sst [smem:[#allocation39_spill]] %s6980_s5 }
  0x4e   :  { %s6985_s17 = sld [smem:[%s7709_s0 + %s6788_s22]]  }
  0x54   :  { %7759 = sst [smem:[#allocation40_spill]] %s6985_s17 }
  0x55   :  { %78 = vsyncpa [#allocation4], 0  ;;  %s6987_s28 = smov 0  }
  0x56 LB: > { %7760 = sst [smem:[#allocation41_spill]] %s6751_s28  ;;  %s6993_s1 = sadd.s32 4294967295, %s6751_s28   ;;  %s6751_s28 = sphi %s6987_s28, %s84_s28  }
  0x57   : > { %7761 = sst [smem:[#allocation42_spill]] %s6993_s1  ;;  %p5509_p0 = scmp.ge.s32.totalorder %s6751_s28, 1 }
  0x58   : > { %p1214_p1 = scmp.lt.s32.totalorder %s6751_s28, 7 }
  0x5a   : > { %p1215_p2 = pnand %p5509_p0, %p1214_p1 }
  0x5c   : > { %1218 = sbr.rel (%p1215_p2) target bundleno = 4866 (0x1302), region = 164 }
  0x63   : > { %s7763_s29 = sld [smem:[#allocation12_spill]]  ;;  %s7764_s8 = sld [smem:[#allocation14_spill]] }
  0x64   : > { %s7766_s19 = sld [smem:[#allocation16_spill]]  ;;  %s7767_s30 = sld [smem:[#allocation17_spill]] }
  0x65   : > { %s7771_s27 = sld [smem:[#allocation21_spill]]  ;;  %s7773_s9 = sld [smem:[#allocation23_spill]] }
  0x66   : > { %p1393_p3 = scmp.lt.s32.totalorder %s6993_s1, 5  ;;  %s7774_s2 = sld [smem:[#allocation24_spill]] }
  0x67   : > { %s7775_s10 = sld [smem:[#allocation25_spill]]  ;;  %s7776_s15 = sld [smem:[#allocation26_spill]] }
  0x68   : > { %s6999_s0 = scalar_select %p1393_p3, %s6993_s1, 5 }
  0x69   : > { %s7778_s18 = sld [smem:[#allocation27_spill]]  ;;  %s7780_s23 = sld [smem:[#allocation28_spill]] }
  0x6a   : > { %s5790_s7 = sshll.u32 %s6999_s0, 4  ;;  %s7781_s28 = sld [smem:[#allocation29_spill]] }
  0x6b   : > { %s7005_s16 = scalar_lea.vmem %s7763_s29, %s5790_s7  ;;  %s7008_s22 = scalar_lea.vmem %s7764_s8, %s5790_s7 }
  0x6c   : > { %7777 = sst [smem:[#allocation43_spill]] %s7005_s16  ;;  %s7013_s17 = scalar_lea.vmem %s7766_s19, %s5790_s7 }
  0x6d   : > { %7779 = sst [smem:[#allocation44_spill]] %s7008_s22  ;;  %s7783_s25 = sld [smem:[#allocation30_spill]] }
  0x6e   : > { %7782 = sst [smem:[#allocation45_spill]] %s7013_s17  ;;  %s7018_s13 = scalar_lea.vmem %s7767_s30, %s5790_s7 }
  0x6f   : > { %7784 = sst [smem:[#allocation46_spill]] %s7018_s13  ;;  %s7785_s11 = sld [smem:[#allocation31_spill]] }
  0x70   : > { %s7786_s16 = sld [smem:[#allocation33_spill]]  ;;  %s7787_s22 = sld [smem:[#allocation32_spill]] }
  0x71   : > { %s7027_s1 = scalar_lea.vmem %s7771_s27, %s5790_s7  ;;  %s7789_s26 = sld [smem:[#allocation34_spill]] }
  0x72   : > { %7788 = sst [smem:[#allocation47_spill]] %s7027_s1  ;;  %s7790_s19 = sld [smem:[#allocation35_spill]] }
  0x73   : > { %s7032_s17 = scalar_lea.vmem %s7773_s9, %s5790_s7  ;;  %s7037_s30 = scalar_lea.vmem %s7774_s2, %s5790_s7 }
  0x74   : > { %7791 = sst [smem:[#allocation48_spill]] %s7032_s17  ;;  %s1454_s13 = scalar_lea.vmem %s7775_s10, %s6999_s0 }
  0x75   : > { %s7042_s3 = scalar_lea.vmem %s7776_s15, %s5790_s7  ;;  %s1462_s29 = scalar_lea.vmem %s7778_s18, %s6999_s0 }
  0x76   : > { %s1465_s12 = scalar_lea.vmem %s7780_s23, %s6999_s0  ;;  %s1468_s6 = scalar_lea.vmem %s7781_s28, %s6999_s0 }
  0x77   : > { %s5798_s8 = sshll.u32 %s6999_s0, 8  ;;  %s7055_s27 = scalar_lea.vmem %s7785_s11, %s5790_s7 }
  0x78   : > { %s7052_s20 = scalar_lea.vmem %s7783_s25, %s5798_s8  ;;  %s5799_s1 = sshll.u32 %s6999_s0, 10 }
  0x79   : > { %s1485_s14 = scalar_lea.vmem %s7786_s16, %s6999_s0  ;;  %s7061_s4 = scalar_lea.vmem %s7787_s22, %s5799_s1 }
  0x7a   : > { %s1488_s9 = scalar_lea.vmem %s7789_s26, %s6999_s0  ;;  %s1491_s17 = scalar_lea.vmem %s7790_s19, %s6999_s0 }
  0x7b   : > { %s7792_s5 = sld [smem:[#allocation42_spill]] }
  0x81   : > { %p5531_p4 = scmp.ne.s32.totalorder %s7792_s5, 0 }
  0x82   : > { %s7793_s2 = sld [smem:[#allocation6_spill]] (!%p5531_p4)  ;;  %vm1499_vm0 = vcmask (!%p5531_p4), 261120  }
  0x83   : > { %1496 = sbr.rel (%p5531_p4) target bundleno = 138 (0x8a), region = 168 }
  0x88   : > { %v1497_v0 = vld [vmem:[%s7793_s2] sm:$0xff] (!%p5531_p4)  ;;  %v1498_v1 = vld [vmem:[%s7793_s2 + $0x8] sm:$0xff] (!%p5531_p4) }
  0x89   : > { %1500 = vst.msk [vmem:[#allocation2] sm:$0xff] (!%p5531_p4), %vm1499_vm0, %v1497_v0  ;;  %1501 = vst.msk [vmem:[#allocation2 + $0x8] sm:$0xff] (!%p5531_p4), %vm1499_vm0, %v1498_v1 }
  0x8a PF: > { %s7794_s25 = sld [smem:[#allocation44_spill]]  ;;  %s7795_s8 = sld [smem:[#allocation43_spill]]  ;;  %v6789_v3 = vmov 0.0   ;;  %vm6790_vm1 = vmmov 0   ;;  %vm1550_vm2 = vcmask 261120   ;;  %vm2048_vm4 = vcmask 64512  }
  0x8b   : > { %6095 = vmatprep.subr.bf16.mxu1 %v6789_v3  ;;  %6087 = vmatprep.subr.bf16.mxu0 %v6789_v3  ;;  %s7796_s5 = sld [smem:[#allocation45_spill]]  ;;  %s7797_s19 = sld [smem:[#allocation15_spill]]  ;;  %vm7161_vm3 = vmpackc.low %vm1550_vm2, %vm1550_vm2 }
  0x8c   : > { %6099 = vmatprep.mubr.msk.bf16.mxu1 %vm6790_vm1, %v6789_v3  ;;  %6091 = vmatprep.mubr.msk.bf16.mxu0 %vm6790_vm1, %v6789_v3  ;;  %s7798_s28 = sld [smem:[#allocation8_spill]]  ;;  %s7801_s10 = sld [smem:[#allocation13_spill]] }
  0x8d   : > { %s7805_s15 = scalar_lea.vmem %s6860_s24, %s6999_s0  ;;  %s7806_s16 = sld [smem:[#allocation11_spill]] }
  0x8e   : > { %s7807_s18 = sld [smem:[#allocation9_spill]]  ;;  %s7808_s22 = sld [smem:[#allocation10_spill]] }
  0x8f   : > { %s7809_s23 = sld [smem:[#allocation46_spill]]  ;;  %s7810_s26 = sld [smem:[#allocation18_spill]] }
  0x90   : > { %v6537_v2 = vld [vmem:[%s7794_s25] sm:$0xff]   ;;  %v6538_v4 = vld [vmem:[%s7794_s25 + $0x8] sm:$0xff]  }
  0x91   : > { %6096 = vmatpush3.bf16.msra.mxu1 %v6537_v2  ;;  %v7076_v5 = vld [vmem:[#allocation2] sm:$0xff]  ;;  %v7078_v6 = vld [vmem:[#allocation2 + $0x8] sm:$0xff]  ;;  %s7800_s7 = scalar_lea.vmem %s7797_s19, %s6999_s0  ;;  %s7814_s19 = sld [smem:[#allocation20_spill]] }
  0x92   : > { %6097 = vmatprep.subr.bf16.mxu1 %v6789_v3  ;;  %v6539_v7 = vld [vmem:[%s7795_s8] sm:$0xff]   ;;  %v6540_v8 = vld [vmem:[%s7795_s8 + $0x8] sm:$0xff]   ;;  %v1526_v9 = vpack.c.bf16 %v7078_v6, %v7076_v5  ;;  %s7799_s1 = smov %s7798_s28  ;;  %s7804_s11 = scalar_lea.vmem %s7801_s10, %s6999_s0 }
  0x93   : > { %6088 = vmatpush3.bf16.msra.mxu0 %v6539_v7  ;;  %v6541_v10 = vld [vmem:[%s7796_s5] sm:$0xff]   ;;  %v6542_v11 = vld [vmem:[%s7796_s5 + $0x8] sm:$0xff]   ;;  %v7104_v14 = vld [vmem:[%s7799_s1 + $0x10] sm:$0xff]  ;;  %s7812_s8 = sld [smem:[#allocation47_spill]]  ;;  %s7813_s5 = sld [smem:[#allocation19_spill]] }
  0x94   : > { %6089 = vmatprep.subr.bf16.mxu0 %v6789_v3  ;;  %v5536_v12 = vld [vmem:[%s7800_s7] ss:$0 sm:$0xff]  ;;  %v7110_v17 = vld [vmem:[%s7799_s1 + $0x8] sm:$0xff]  ;;  %v7113_v18 = vld [vmem:[%s7799_s1 + $0x30] sm:$0xff]  ;;  %s7816_s7 = sld [smem:[#allocation7_spill]] }
  0x95   : > { %6098 = vmatpush3.bf16.msra.mxu1 %v6538_v4  ;;  %v7101_v13 = vld [vmem:[%s7798_s28] sm:$0xff]  ;;  %v7119_v22 = vld [vmem:[%s7799_s1 + $0x18] sm:$0xff]  ;;  %v7122_v23 = vld [vmem:[%s7799_s1 + $0x50] sm:$0xff]  ;;  %s7811_s25 = scalar_lea.vmem %s7810_s26, %s6999_s0  ;;  %s7815_s28 = sld [smem:[#allocation48_spill]] }
  0x96   : > { %v7107_v15 = vld [vmem:[%s7799_s1 + $0x20] sm:$0xff]  ;;  %v7128_v26 = vld [vmem:[%s7799_s1 + $0x28] sm:$0xff]  ;;  %v7131_v27 = vld [vmem:[%s7799_s1 + $0x38] sm:$0xff] }
  0x97   : > { %6090 = vmatpush3.bf16.msra.mxu0 %v6540_v8  ;;  %v7116_v19 = vld [vmem:[%s7799_s1 + $0x40] sm:$0xff]  ;;  %v7134_v28 = vld [vmem:[%s7799_s1 + $0x48] sm:$0xff]  ;;  %v7140_v34 = vld [vmem:[%s7799_s1 + $0x58] sm:$0xff] }
  0x98   : > { %6100 = vmatmul.mubr.msk.bf16.vlgmr.msra.gmra.mrb[0].mxu1 %vm1550_vm2, %v1526_v9  ;;  %6103 = vmatprep.subr.bf16.mxu0 %v6789_v3  ;;  %v7125_v24 = vld [vmem:[%s7799_s1 + $0x60] sm:$0xff]  ;;  %v7143_v35 = vld [vmem:[%s7799_s1 + $0x68] sm:$0xff]  ;;  %v7146_v36 = vld [vmem:[%s7799_s1 + $0x70] sm:$0xff] }
  0x99   : > { %v7157_v47 = vld [vmem:[%s7799_s1 + $0x78] sm:$0xff]  ;;  %v5532_v54 = vld [vmem:[%s7804_s11] ss:$0 sm:$0xff]  ;;  %s7817_s10 = scalar_lea.vmem %s7813_s5, %s6999_s0  ;;  %s7818_s11 = scalar_lea.vmem %s7814_s19, %s6999_s0 }
  0x9a   : > { %6092 = vmatmul.mubr.msk.bf16.vlgmr.msra.gmra.mrb[0].mxu0 %vm1550_vm2, %v1526_v9  ;;  %v5540_v8 = vld [vmem:[%s7805_s15] ss:$0 sm:$0xff]  ;;  %s7819_s15 = sld [smem:[#allocation22_spill]] }
  0x9b   : > { %6107 = vmatprep.mubr.msk.bf16.mxu0 %vm6790_vm1, %v6789_v3  ;;  %6104 = vmatpush3.bf16.msra.mxu0 %v6541_v10 }
  0x9c   : > { %6105 = vmatprep.subr.bf16.mxu0 %v6789_v3 }
  0x9f   : > { %6106 = vmatpush3.bf16.msra.mxu0 %v6542_v11 }
  0xa2   : > { %6108 = vmatmul.mubr.msk.bf16.vlgmr.msra.gmra.mrb[4].mxu0 %vm1550_vm2, %v1526_v9 }
 0x16b   : > { %v1652_v16 = vpop.f32.mrb[0].mxu1 }
 0x16c   : > { %v1653_v20 = vadd.f32 %v5536_v12, %v1652_v16  ;;  %v6101_v21 = vpop.f32.mrb[1].mxu1 }
 0x16d   : > { %v1655_v25 = vpop.f32.mrb[2].mxu1  ;;  %v1588_v37 = vpop.f32.mrb[0].mxu0 }
 0x16e   : > { %v1656_v29 = vadd.f32 %v5536_v12, %v1655_v25  ;;  %v6102_v30 = vpop.f32.mrb[3].mxu1  ;;  %v1723_v31 = vmul.f32 %v1653_v20, %v7101_v13  ;;  %v1725_v32 = vmul.f32 %v1653_v20, %v7104_v14  ;;  %v1727_v33 = vmul.f32 %v1653_v20, %v7107_v15  ;;  %v6093_v42 = vpop.f32.mrb[1].mxu0 }
 0x16f   : > { %v1729_v38 = vmul.f32 %v1653_v20, %v7113_v18  ;;  %v1731_v39 = vmul.f32 %v1653_v20, %v7116_v19  ;;  %v1733_v40 = vmul.f32 %v1653_v20, %v7122_v23  ;;  %v1735_v41 = vmul.f32 %v1653_v20, %v7125_v24  ;;  %v1591_v48 = vpop.f32.mrb[2].mxu0 }
 0x170   : > { %v1724_v43 = vmul.f32 %v1656_v29, %v7110_v17  ;;  %v1726_v44 = vmul.f32 %v1656_v29, %v7119_v22  ;;  %v1728_v45 = vmul.f32 %v1656_v29, %v7128_v26  ;;  %v1730_v46 = vmul.f32 %v1656_v29, %v7131_v27  ;;  %v6094_v55 = vpop.f32.mrb[3].mxu0 }
 0x171   : > { %v1732_v50 = vmul.f32 %v1656_v29, %v7134_v28  ;;  %v1734_v51 = vmul.f32 %v1656_v29, %v7140_v34  ;;  %v1736_v52 = vmul.f32 %v1656_v29, %v7143_v35  ;;  %v1737_v53 = vmul.f32 %v1653_v20, %v7146_v36 }
 0x172   : > { %v6319_v56 = vpack.c.bf16 %v1724_v43, %v1723_v31  ;;  %v6325_v57 = vpack.c.bf16 %v1726_v44, %v1725_v32  ;;  %v6331_v58 = vpack.c.bf16 %v1728_v45, %v1727_v33  ;;  %v6337_v59 = vpack.c.bf16 %v1730_v46, %v1729_v38 }
 0x173   : > { %v6343_v60 = vpack.c.bf16 %v1732_v50, %v1731_v39  ;;  %v6349_v61 = vpack.c.bf16 %v1734_v51, %v1733_v40  ;;  %v6355_v62 = vpack.c.bf16 %v1736_v52, %v1735_v41  ;;  %v1738_v63 = vmul.f32 %v1656_v29, %v7157_v47 }
 0x174   : > { %6321 = vmatprep.subr.msk.bf16.mxu1 %vm7161_vm3, %v6319_v56  ;;  %v1589_v0 = vadd.f32 %v5532_v54, %v1588_v37  ;;  %v1592_v4 = vadd.f32 %v5532_v54, %v1591_v48 }
 0x175   : > { %6324 = vmatpush3.bf16.xpose.msk.msra.mxu1 %vm7161_vm3, %v6319_v56  ;;  %v6361_v1 = vpack.c.bf16 %v1738_v63, %v1737_v53  ;;  %v1716_v9 = vpop.f32.mrb[4].mxu0  ;;  %v7230_v56 = vld [vmem:[%s7806_s16] sm:$0xff] }
 0x176   : > { %6327 = vmatprep.subr.msk.bf16.mxu1 %vm7161_vm3, %v6325_v57  ;;  %v1755_v2 = vmul.f32 0.5, %v1589_v0  ;;  %v1756_v7 = vmul.f32 0.5, %v1592_v4  ;;  %v1717_v10 = vadd.f32 %v5540_v8, %v1716_v9  ;;  %v6109_v11 = vpop.f32.mrb[5].mxu0 }
 0x177   : > { %v1719_v12 = vpop.f32.mrb[6].mxu0 }
 0x178   : > { %6143 = vmatprep.mubr.msk.f32.mxu1 %vm1550_vm2, %v1755_v2  ;;  %v1720_v16 = vadd.f32 %v5540_v8, %v1719_v12  ;;  %v1739_v20 = vmul.f32 %v1717_v10, %v7101_v13  ;;  %v1741_v21 = vmul.f32 %v1717_v10, %v7104_v14  ;;  %v1743_v25 = vmul.f32 %v1717_v10, %v7107_v15  ;;  %v6110_v29 = vpop.f32.mrb[7].mxu0 }
 0x179   : > { %v1745_v30 = vmul.f32 %v1717_v10, %v7113_v18  ;;  %v1747_v31 = vmul.f32 %v1717_v10, %v7116_v19  ;;  %v1749_v32 = vmul.f32 %v1717_v10, %v7122_v23  ;;  %v1751_v33 = vmul.f32 %v1717_v10, %v7125_v24 }
 0x17a   : > { %v1740_v37 = vmul.f32 %v1720_v16, %v7110_v17  ;;  %v1742_v38 = vmul.f32 %v1720_v16, %v7119_v22  ;;  %v1744_v39 = vmul.f32 %v1720_v16, %v7128_v26  ;;  %v1746_v40 = vmul.f32 %v1720_v16, %v7131_v27 }
 0x17b   : > { %v1748_v41 = vmul.f32 %v1720_v16, %v7134_v28  ;;  %v1750_v42 = vmul.f32 %v1720_v16, %v7140_v34  ;;  %v1752_v43 = vmul.f32 %v1720_v16, %v7143_v35  ;;  %v1753_v44 = vmul.f32 %v1717_v10, %v7146_v36  ;;  %v7243_v10 = vld [vmem:[%s7808_s22] sm:$0xff]  ;;  %s7821_s22 = scalar_lea.vmem %s6900_s21, %s6999_s0 }
 0x17c   : > { %v6367_v45 = vpack.c.bf16 %v1740_v37, %v1739_v20  ;;  %v6371_v46 = vpack.c.bf16 %v1742_v38, %v1741_v21  ;;  %v6375_v48 = vpack.c.bf16 %v1744_v39, %v1743_v25  ;;  %v6379_v50 = vpack.c.bf16 %v1746_v40, %v1745_v30  ;;  %v6543_v21 = vld [vmem:[%s7809_s23] sm:$0xff]   ;;  %v6544_v30 = vld [vmem:[%s7809_s23 + $0x8] sm:$0xff]  }
 0x17d   : > { %6330 = vmatpush3.bf16.xpose.msk.msra.mxu1 %vm7161_vm3, %v6325_v57  ;;  %v6383_v51 = vpack.c.bf16 %v1748_v41, %v1747_v31  ;;  %v6387_v52 = vpack.c.bf16 %v1750_v42, %v1749_v32  ;;  %v6391_v53 = vpack.c.bf16 %v1752_v43, %v1751_v33  ;;  %v1754_v54 = vmul.f32 %v1720_v16, %v7157_v47  ;;  %v5564_v39 = vld [vmem:[%s7811_s25] ss:$0 sm:$0xff] }
 0x17e   : > { %6333 = vmatprep.subr.msk.bf16.mxu1 %vm7161_vm3, %v6331_v58  ;;  %6368 = vmatprep.subr.bf16.mxu0 %v6367_v45 }
 0x17f   : > { %6370 = vmatpush3.bf16.msra.mxu0 %v6367_v45  ;;  %v6395_v55 = vpack.c.bf16 %v1754_v54, %v1753_v44 }
 0x180   : > { %6372 = vmatprep.subr.bf16.mxu0 %v6371_v46 }
 0x183   : > { %6374 = vmatpush3.bf16.msra.mxu0 %v6371_v46 }
 0x184   : > { %6376 = vmatprep.subr.bf16.mxu0 %v6375_v48 }
 0x185   : > { %6336 = vmatpush3.bf16.xpose.msk.msra.mxu1 %vm7161_vm3, %v6331_v58 }
 0x186   : > { %6339 = vmatprep.subr.msk.bf16.mxu1 %vm7161_vm3, %v6337_v59 }
 0x187   : > { %6378 = vmatpush3.bf16.msra.mxu0 %v6375_v48 }
 0x188   : > { %6380 = vmatprep.subr.bf16.mxu0 %v6379_v50 }
 0x18b   : > { %6382 = vmatpush3.bf16.msra.mxu0 %v6379_v50 }
 0x18c   : > { %6384 = vmatprep.subr.bf16.mxu0 %v6383_v51 }
 0x18d   : > { %6342 = vmatpush3.bf16.xpose.msk.msra.mxu1 %vm7161_vm3, %v6337_v59 }
 0x18e   : > { %6345 = vmatprep.subr.msk.bf16.mxu1 %vm7161_vm3, %v6343_v60 }
 0x18f   : > { %6386 = vmatpush3.bf16.msra.mxu0 %v6383_v51 }
 0x190   : > { %6388 = vmatprep.subr.bf16.mxu0 %v6387_v52 }
 0x193   : > { %6390 = vmatpush3.bf16.msra.mxu0 %v6387_v52 }
 0x194   : > { %6392 = vmatprep.subr.bf16.mxu0 %v6391_v53 }
 0x195   : > { %6348 = vmatpush3.bf16.xpose.msk.msra.mxu1 %vm7161_vm3, %v6343_v60  ;;  %v7234_v60 = vld [vmem:[%s7806_s16 + $0x8] sm:$0xff] }
 0x196   : > { %6351 = vmatprep.subr.msk.bf16.mxu1 %vm7161_vm3, %v6349_v61 }
 0x197   : > { %6394 = vmatpush3.bf16.msra.mxu0 %v6391_v53 }
 0x198   : > { %6396 = vmatprep.subr.bf16.mxu0 %v6395_v55 }
 0x19b   : > { %6398 = vmatpush3.bf16.msra.mxu0 %v6395_v55 }
 0x19d   : > { %6354 = vmatpush3.bf16.xpose.msk.msra.mxu1 %vm7161_vm3, %v6349_v61 }
 0x19e   : > { %6357 = vmatprep.subr.msk.bf16.mxu1 %vm7161_vm3, %v6355_v62 }
 0x1a5   : > { %6360 = vmatpush3.bf16.xpose.msk.msra.mxu1 %vm7161_vm3, %v6355_v62  ;;  %v7238_v62 = vld [vmem:[%s7807_s18] sm:$0xff]  ;;  %s7820_s18 = scalar_lea.vmem %s7819_s15, %s6999_s0 }
 0x1a6   : > { %6363 = vmatprep.subr.msk.bf16.mxu1 %vm7161_vm3, %v6361_v1  ;;  %6181 = vmatprep.subr.mxu0 %v7238_v62 }
 0x1ad   : > { %6366 = vmatpush3.bf16.xpose.msk.msra.mxu1 %vm7161_vm3, %v6361_v1 }
 0x1ae   : > { %6215 = vmatprep.subr.bf16.mxu1 %v6789_v3 }
 0x1b4   : > { %6144 = vmatmul.mubr.msk.f32.vlgmr.msra.gmra.mrb[4].mxu1 %vm1550_vm2, %v1756_v7 }
 0x1b5   : > { %6219 = vmatprep.mubr.msk.bf16.mxu1 %vm6790_vm1, %v6789_v3 }
 0x287   : > { %v6145_v57 = vpop.f32.mrb[4].mxu1 }
 0x288   : > { %v1877_v58 = vpop.f32.mrb[5].mxu1  ;;  %v1883_v61 = vadd.f32 %v6145_v57, %v7234_v60 }
 0x289   : > { %v1878_v59 = vadd.f32 %v1877_v58, %v7230_v56 }
 0x28b   : > { %1886 = vmax.xlane.f32.xlu0 %v1878_v59 }
 0x28f   : > { %1888 = vmax.xlane.f32.xlu0 %v1883_v61 }
 0x318   : > { %v1887_v63 = vpop.xlane.xlu0 %1886 }
 0x319   : > { %v1890_v0 = vsub.f32 %v1878_v59, %v1887_v63 }
 0x31b   : > { %v1892_v1 = vmul.f32 1.442695, %v1890_v0  ;;  %v6546_v0 = vld [vmem:[%s7812_s8 + $0x8] sm:$0xff]  }
 0x31c   : > { %v1889_v2 = vpop.xlane.xlu0 %1888 }
 0x31d   : > { %6681 = vpow2.f32 %v1892_v1  ;;  %v1891_v4 = vsub.f32 %v1883_v61, %v1889_v2 }
 0x31f   : > { %v1894_v7 = vmul.f32 1.442695, %v1891_v4 }
 0x321   : > { %6683 = vpow2.f32 %v1894_v7 }
 0x327   : > { %v6682_v8 = vpop.eup %6681 }
 0x328   : > { %6178 = vmatprep.mubr.f32.mxu0 %v6682_v8 }
 0x32b   : > { %v6684_v9 = vpop.eup %6683 }
 0x32c   : > { %6179 = vmatmul.mubr.f32.vlgmr.msra.gmra.mrb[8].mxu0 %v6684_v9 }
 0x32d   : > { %6182 = vmatpush3.xpose.msra.mxu0 %v7238_v62  ;;  %6183 = vmatprep.mubr.f32.mxu0 %v6682_v8 }
 0x32e   : > { %6186 = vmatprep.subr.mxu0 %v7243_v10 }
 0x330   : > { %6184 = vmatmul.mubr.f32.vlgmr.msra.gmra.mrb[10].mxu0 %v6684_v9 }
 0x331   : > { %6187 = vmatpush3.msra.mxu0 %v7243_v10 }
 0x332   : > { %6191 = vmatprep.subr.bf16.mxu0 %v6789_v3 }
 0x3ff   : > { %v6180_v11 = vpop.f32.mrb[8].mxu0 }
 0x400   : > { %v1962_v12 = vpop.f32.mrb[9].mxu0 }
 0x403   : > { %v6185_v16 = vpop.f32.mrb[10].mxu0 }
 0x404   : > { %v2037_v20 = vpop.f32.mrb[11].mxu0 }
 0x405   : > { %6685 = vrcp.f32 %v2037_v20 }
 0x406   : > { %6687 = vrcp.f32 %v6185_v16  ;;  %v5568_v16 = vld [vmem:[%s7817_s10] ss:$0 sm:$0xff] }
 0x40f   : > { %v6686_v25 = vpop.eup %6685 }
 0x410   : > { %v6688_v29 = vpop.eup %6687  ;;  %6188 = vmatprep.mubr.msk.f32.mxu0 %vm2048_vm4, %v6686_v25 }
 0x411   : > { %6189 = vmatmul.mubr.msk.f32.vlgmr.msra.gmra.mrb[12].mxu0 %vm2048_vm4, %v6688_v29  ;;  %v5569_v29 = vld [vmem:[%s7818_s11] ss:$0 sm:$0xff] }
 0x412   : > { %6192 = vmatpush3.bf16.msra.mxu0 %v6543_v21  ;;  %6195 = vmatprep.mubr.msk.bf16.mxu0 %vm6790_vm1, %v6789_v3 }
 0x413   : > { %6193 = vmatprep.subr.bf16.mxu0 %v6789_v3 }
 0x416   : > { %6194 = vmatpush3.bf16.msra.mxu0 %v6544_v30 }
 0x417   : > { %6199 = vmatprep.subr.bf16.mxu0 %v6789_v3 }
 0x4e4   : > { %v6190_v31 = vpop.f32.mrb[12].mxu0 }
 0x4e5   : > { %v2131_v32 = vmul.f32 %v6190_v31, %v6180_v11  ;;  %v2121_v33 = vpop.f32.mrb[13].mxu0 }
 0x4e6   : > { %v2130_v37 = vmul.f32 %v2121_v33, %v1962_v12  ;;  %v6547_v33 = vld [vmem:[%s7815_s28] sm:$0xff]  }
 0x4e8   : > { %v2132_v38 = vpack.c.bf16 %v2131_v32, %v2130_v37 }
 0x4ea   : > { %6196 = vmatmul.mubr.msk.bf16.vlgmr.msra.gmra.mrb[16].mxu0 %vm1550_vm2, %v2132_v38  ;;  %v6548_v38 = vld [vmem:[%s7815_s28 + $0x8] sm:$0xff]  }
 0x4eb   : > { %6203 = vmatprep.mubr.msk.bf16.mxu0 %vm6790_vm1, %v6789_v3 }
 0x5bd   : > { %v2193_v40 = vpop.f32.mrb[16].mxu0 }
 0x5be   : > { %v2194_v41 = vadd.f32 %v5564_v39, %v2193_v40  ;;  %v6197_v42 = vpop.f32.mrb[17].mxu0  ;;  %v1505_v40 = vld [vmem:[%s7816_s7 + $0x8] sm:$0xff] }
 0x5bf   : > { %v2196_v43 = vpop.f32.mrb[18].mxu0  ;;  %v6549_v42 = vld [vmem:[%s7037_s30] sm:$0xff]  }
 0x5c0   : > { %v2197_v44 = vadd.f32 %v5564_v39, %v2196_v43  ;;  %v6198_v45 = vpop.f32.mrb[19].mxu0  ;;  %v2200_v46 = vadd.f32 %v2194_v41, %v7076_v5  ;;  %v1504_v39 = vld [vmem:[%s7816_s7] sm:$0xff]  ;;  %6216 = vmatpush3.bf16.msra.mxu1 %v6549_v42  ;;  %v6550_v43 = vld [vmem:[%s7037_s30 + $0x8] sm:$0xff]  }
 0x5c1   : > { %v2315_v41 = vpack.c.bf16 %v1505_v40, %v1504_v39  ;;  %6217 = vmatprep.subr.bf16.mxu1 %v6789_v3 }
 0x5c2   : > { %v2204_v48 = vsel %vm1550_vm2, %v2200_v46, 0.0  ;;  %v2201_v50 = vadd.f32 %v2197_v44, %v7078_v6  ;;  %v6545_v6 = vld [vmem:[%s7812_s8] sm:$0xff]  }
 0x5c3   : > { %2205 = vadd.xlane.f32.xlu1 %v2204_v48  ;;  %6200 = vmatpush3.bf16.msra.mxu0 %v6545_v6  ;;  %v5570_v44 = vld [vmem:[%s7820_s18] ss:$0 sm:$0xff] }
 0x5c4   : > { %v2207_v51 = vsel %vm1550_vm2, %v2201_v50, 0.0  ;;  %6201 = vmatprep.subr.bf16.mxu0 %v6789_v3  ;;  %6218 = vmatpush3.bf16.msra.mxu1 %v6550_v43 }
 0x5c7   : > { %2208 = vadd.xlane.f32.xlu1 %v2207_v51  ;;  %6202 = vmatpush3.bf16.msra.mxu0 %v6546_v0 }
 0x5c8   : > { %6207 = vmatprep.subr.bf16.mxu0 %v6789_v3  ;;  %6220 = vmatmul.mubr.msk.bf16.vlgmr.msra.gmra.mrb[8].mxu1 %vm1550_vm2, %v2315_v41 }
 0x650   : > { %v2206_v52 = vpop.xlane.xlu1 %2205 }
 0x651   : > { %v2211_v53 = vmul.f32 0.03125, %v2206_v52 }
 0x653   : > { %v2213_v54 = vsub.f32 %v2200_v46, %v2211_v53 }
 0x654   : > { %v2209_v55 = vpop.xlane.xlu1 %2208 }
 0x655   : > { %v2212_v57 = vmul.f32 0.03125, %v2209_v55  ;;  %v2215_v58 = vmul.f32 %v2213_v54, %v2213_v54 }
 0x657   : > { %v2214_v59 = vsub.f32 %v2201_v50, %v2212_v57  ;;  %v2217_v61 = vsel %vm1550_vm2, %v2215_v58, 0.0 }
 0x658   : > { %2218 = vadd.xlane.f32.xlu0 %v2217_v61 }
 0x659   : > { %v2216_v5 = vmul.f32 %v2214_v59, %v2214_v59 }
 0x65b   : > { %v2220_v63 = vsel %vm1550_vm2, %v2216_v5, 0.0 }
 0x65c   : > { %2221 = vadd.xlane.f32.xlu1 %v2220_v63 }
 0x6e5   : > { %v2219_v1 = vpop.xlane.xlu0 %2218 }
 0x6e6   : > { %v2223_v2 = vmul.f32 0.03125, %v2219_v1 }
 0x6e8   : > { %v2225_v4 = vadd.f32 1e-05, %v2223_v2 }
 0x6e9   : > { %v2222_v7 = vpop.xlane.xlu1 %2221 }
 0x6ea   : > { %6689 = vrsqrt.f32 %v2225_v4  ;;  %v2224_v8 = vmul.f32 0.03125, %v2222_v7 }
 0x6ec   : > { %v2226_v9 = vadd.f32 1e-05, %v2224_v8 }
 0x6ee   : > { %6691 = vrsqrt.f32 %v2226_v9 }
 0x6f4   : > { %v6690_v11 = vpop.eup %6689 }
 0x6f5   : > { %v2229_v12 = vmul.f32 %v6690_v11, %v2213_v54  ;;  %v5574_v54 = vld [vmem:[%s7821_s22] ss:$0 sm:$0xff] }
 0x6f7   : > { %v2237_v21 = vmul.f32 %v5568_v16, %v2229_v12 }
 0x6f8   : > { %v6692_v20 = vpop.eup %6691 }
 0x6f9   : > { %v2230_v25 = vmul.f32 %v6692_v20, %v2214_v59  ;;  %v7278_v31 = vadd.f32 %v5569_v29, %v2237_v21 }
 0x6fb   : > { %v2238_v30 = vmul.f32 %v5568_v16, %v2230_v25 }
 0x6fd   : > { %v7280_v32 = vadd.f32 %v5569_v29, %v2238_v30 }
 0x6ff   : > { %v2247_v37 = vpack.c.bf16 %v7280_v32, %v7278_v31 }
 0x701   : > { %6204 = vmatmul.mubr.msk.bf16.vlgmr.msra.gmra.mrb[20].mxu0 %vm1550_vm2, %v2247_v37 }
 0x702   : > { %6208 = vmatpush3.bf16.msra.mxu0 %v6547_v33  ;;  %6211 = vmatprep.mubr.msk.bf16.mxu0 %vm6790_vm1, %v6789_v3 }
 0x703   : > { %6209 = vmatprep.subr.bf16.mxu0 %v6789_v3 }
 0x706   : > { %6210 = vmatpush3.bf16.msra.mxu0 %v6548_v38 }
 0x709   : > { %6212 = vmatmul.mubr.msk.bf16.vlgmr.msra.gmra.mrb[24].mxu0 %vm1550_vm2, %v2315_v41 }
 0x7d4   : > { %v2308_v45 = vpop.f32.mrb[20].mxu0 }
 0x7d5   : > { %v2309_v46 = vadd.f32 %v5570_v44, %v2308_v45  ;;  %v6205_v48 = vpop.f32.mrb[21].mxu0  ;;  %v2440_v45 = vpop.f32.mrb[8].mxu1 }
 0x7d6   : > { %v2311_v50 = vpop.f32.mrb[22].mxu0  ;;  %v6221_v48 = vpop.f32.mrb[9].mxu1 }
 0x7d7   : > { %v2479_v51 = vmul.f32 0.5, %v2309_v46  ;;  %v2312_v52 = vadd.f32 %v5570_v44, %v2311_v50  ;;  %v6206_v53 = vpop.f32.mrb[23].mxu0  ;;  %v5578_v44 = vld [vmem:[%s1454_s13] ss:$0 sm:$0xff]  ;;  %v2443_v50 = vpop.f32.mrb[10].mxu1 }
 0x7d8   : > { %v2441_v46 = vadd.f32 %v5578_v44, %v2440_v45 }
 0x7d9   : > { %6255 = vmatprep.mubr.msk.f32.mxu0 %vm1550_vm2, %v2479_v51  ;;  %v2480_v43 = vmul.f32 0.5, %v2312_v52  ;;  %v2444_v51 = vadd.f32 %v5578_v44, %v2443_v50 }
 0x7da   : > { %v2463_v53 = vmul.f32 %v2441_v46, %v7101_v13  ;;  %v2469_v49 = vmul.f32 %v2441_v46, %v7113_v18  ;;  %v2471_v52 = vmul.f32 %v2441_v46, %v7116_v19 }
 0x7dc   : > { %v2376_v55 = vpop.f32.mrb[24].mxu0 }
 0x7dd   : > { %v2377_v57 = vadd.f32 %v5574_v54, %v2376_v55  ;;  %v6213_v58 = vpop.f32.mrb[25].mxu0  ;;  %v2467_v55 = vmul.f32 %v2441_v46, %v7107_v15 }
 0x7de   : > { %v2379_v59 = vpop.f32.mrb[26].mxu0  ;;  %v2473_v58 = vmul.f32 %v2441_v46, %v7122_v23 }
 0x7df   : > { %v2380_v61 = vadd.f32 %v5574_v54, %v2379_v59  ;;  %v6214_v5 = vpop.f32.mrb[27].mxu0  ;;  %v2447_v63 = vmul.f32 %v2377_v57, %v7101_v13  ;;  %v2449_v6 = vmul.f32 %v2377_v57, %v7104_v14  ;;  %v2451_v0 = vmul.f32 %v2377_v57, %v7107_v15 }
 0x7e0   : > { %v2453_v1 = vmul.f32 %v2377_v57, %v7113_v18  ;;  %v2455_v2 = vmul.f32 %v2377_v57, %v7116_v19  ;;  %v2457_v4 = vmul.f32 %v2377_v57, %v7122_v23  ;;  %v2459_v7 = vmul.f32 %v2377_v57, %v7125_v24 }
 0x7e1   : > { %v2448_v8 = vmul.f32 %v2380_v61, %v7110_v17  ;;  %v2450_v9 = vmul.f32 %v2380_v61, %v7119_v22  ;;  %v2452_v11 = vmul.f32 %v2380_v61, %v7128_v26  ;;  %v2454_v12 = vmul.f32 %v2380_v61, %v7131_v27 }
 0x7e2   : > { %v2456_v16 = vmul.f32 %v2380_v61, %v7134_v28  ;;  %v2458_v20 = vmul.f32 %v2380_v61, %v7140_v34  ;;  %v2460_v21 = vmul.f32 %v2380_v61, %v7143_v35  ;;  %v2461_v25 = vmul.f32 %v2377_v57, %v7146_v36  ;;  %v6222_v57 = vpop.f32.mrb[11].mxu1 }
 0x7e3   : > { %v6399_v29 = vpack.c.bf16 %v2448_v8, %v2447_v63  ;;  %v6405_v30 = vpack.c.bf16 %v2450_v9, %v2449_v6  ;;  %v6411_v33 = vpack.c.bf16 %v2452_v11, %v2451_v0  ;;  %v6417_v37 = vpack.c.bf16 %v2454_v12, %v2453_v1 }
 0x7e4   : > { %v6423_v38 = vpack.c.bf16 %v2456_v16, %v2455_v2  ;;  %v6429_v39 = vpack.c.bf16 %v2458_v20, %v2457_v4  ;;  %v6435_v40 = vpack.c.bf16 %v2460_v21, %v2459_v7  ;;  %v2462_v41 = vmul.f32 %v2380_v61, %v7157_v47  ;;  %v6551_v21 = vld [vmem:[%s7042_s3] sm:$0xff]  }
 0x7e5   : > { %6401 = vmatprep.subr.msk.bf16.mxu0 %vm7161_vm3, %v6399_v29  ;;  %v2465_v54 = vmul.f32 %v2441_v46, %v7104_v14  ;;  %v2475_v59 = vmul.f32 %v2441_v46, %v7125_v24  ;;  %v2464_v61 = vmul.f32 %v2444_v51, %v7110_v17  ;;  %v2466_v5 = vmul.f32 %v2444_v51, %v7119_v22 }
 0x7e6   : > { %6404 = vmatpush3.bf16.xpose.msk.msra.mxu0 %vm7161_vm3, %v6399_v29  ;;  %v6441_v42 = vpack.c.bf16 %v2462_v41, %v2461_v25  ;;  %v2468_v63 = vmul.f32 %v2444_v51, %v7128_v26  ;;  %v2470_v13 = vmul.f32 %v2444_v51, %v7131_v27  ;;  %v2472_v14 = vmul.f32 %v2444_v51, %v7134_v28 }
 0x7e7   : > { %6407 = vmatprep.subr.msk.bf16.mxu0 %vm7161_vm3, %v6405_v30  ;;  %v2474_v15 = vmul.f32 %v2444_v51, %v7140_v34  ;;  %v2476_v18 = vmul.f32 %v2444_v51, %v7143_v35  ;;  %v2477_v19 = vmul.f32 %v2441_v46, %v7146_v36  ;;  %v6447_v6 = vpack.c.bf16 %v2464_v61, %v2463_v53  ;;  %v2978_v61 = vld [vmem:[%s7052_s20 + $0x40] sm:$0xff] }
 0x7e8   : > { %v6451_v23 = vpack.c.bf16 %v2466_v5, %v2465_v54  ;;  %v6455_v0 = vpack.c.bf16 %v2468_v63, %v2467_v55  ;;  %v6459_v24 = vpack.c.bf16 %v2470_v13, %v2469_v49  ;;  %v6463_v1 = vpack.c.bf16 %v2472_v14, %v2471_v52  ;;  %v2972_v5 = vld [vmem:[%s7052_s20 + $0x10] sm:$0xff] }
 0x7e9   : > { %v6467_v17 = vpack.c.bf16 %v2474_v15, %v2473_v58  ;;  %v6471_v2 = vpack.c.bf16 %v2476_v18, %v2475_v59  ;;  %v2478_v22 = vmul.f32 %v2444_v51, %v7157_v47  ;;  %6448 = vmatprep.subr.bf16.mxu1 %v6447_v6  ;;  %v2970_v59 = vld [vmem:[%s7052_s20] sm:$0xff]  ;;  %v2980_v13 = vld [vmem:[%s7052_s20 + $0x50] sm:$0xff] }
 0x7ea   : > { %6450 = vmatpush3.bf16.msra.mxu1 %v6447_v6  ;;  %v5609_v63 = vcombine.high %v2970_v59, %v2978_v61  ;;  %v5608_v14 = vcombine.low %v2970_v59, %v2978_v61  ;;  %v5612_v15 = vcombine.low %v2972_v5, %v2980_v13  ;;  %v5613_v18 = vcombine.high %v2972_v5, %v2980_v13  ;;  %v2994_v6 = vld [vmem:[%s7052_s20 + $0xc0] sm:$0xff]  ;;  %v2975_v59 = vld [vmem:[%s7052_s20 + $0x28] sm:$0xff] }
 0x7eb   : > { %v6475_v26 = vpack.c.bf16 %v2478_v22, %v2477_v19  ;;  %6452 = vmatprep.subr.bf16.mxu1 %v6451_v23  ;;  %v2986_v19 = vld [vmem:[%s7052_s20 + $0x80] sm:$0xff]  ;;  %v2971_v22 = vld [vmem:[%s7052_s20 + $0x8] sm:$0xff] }
 0x7ec   : > { %v2983_v61 = vld [vmem:[%s7052_s20 + $0x68] sm:$0xff] }
 0x7ed   : > { %v5619_v13 = vcombine.high %v2975_v59, %v2983_v61 }
 0x7ee   : > { %6410 = vmatpush3.bf16.xpose.msk.msra.mxu0 %vm7161_vm3, %v6405_v30  ;;  %6454 = vmatpush3.bf16.msra.mxu1 %v6451_v23  ;;  %v2988_v23 = vld [vmem:[%s7052_s20 + $0x90] sm:$0xff] }
 0x7ef   : > { %6413 = vmatprep.subr.msk.bf16.mxu0 %vm7161_vm3, %v6411_v33  ;;  %6456 = vmatprep.subr.bf16.mxu1 %v6455_v0 }
 0x7f2   : > { %6458 = vmatpush3.bf16.msra.mxu1 %v6455_v0  ;;  %v5625_v0 = vcombine.high %v2986_v19, %v2994_v6 }
 0x7f3   : > { %6460 = vmatprep.subr.bf16.mxu1 %v6459_v24 }
 0x7f6   : > { %6416 = vmatpush3.bf16.xpose.msk.msra.mxu0 %vm7161_vm3, %v6411_v33  ;;  %6462 = vmatpush3.bf16.msra.mxu1 %v6459_v24  ;;  %v2996_v24 = vld [vmem:[%s7052_s20 + $0xd0] sm:$0xff] }
 0x7f7   : > { %6419 = vmatprep.subr.msk.bf16.mxu0 %vm7161_vm3, %v6417_v37  ;;  %6464 = vmatprep.subr.bf16.mxu1 %v6463_v1 }
 0x7fa   : > { %6466 = vmatpush3.bf16.msra.mxu1 %v6463_v1  ;;  %v5624_v1 = vcombine.low %v2986_v19, %v2994_v6  ;;  %v5618_v19 = vcombine.low %v2975_v59, %v2983_v61 }
 0x7fb   : > { %6468 = vmatprep.subr.bf16.mxu1 %v6467_v17 }
 0x7fe   : > { %6422 = vmatpush3.bf16.xpose.msk.msra.mxu0 %vm7161_vm3, %v6417_v37  ;;  %6470 = vmatpush3.bf16.msra.mxu1 %v6467_v17  ;;  %v5628_v17 = vcombine.low %v2988_v23, %v2996_v24 }
 0x7ff   : > { %6425 = vmatprep.subr.msk.bf16.mxu0 %vm7161_vm3, %v6423_v38  ;;  %6472 = vmatprep.subr.bf16.mxu1 %v6471_v2 }
 0x802   : > { %6474 = vmatpush3.bf16.msra.mxu1 %v6471_v2  ;;  %v5629_v2 = vcombine.high %v2988_v23, %v2996_v24  ;;  %v6554_v23 = vld [vmem:[%s7061_s4] sm:$0xff]   ;;  %v2985_v24 = vld [vmem:[%s7052_s20 + $0x78] sm:$0xff] }
 0x803   : > { %6476 = vmatprep.subr.bf16.mxu1 %v6475_v26 }
 0x806   : > { %6428 = vmatpush3.bf16.xpose.msk.msra.mxu0 %vm7161_vm3, %v6423_v38  ;;  %6478 = vmatpush3.bf16.msra.mxu1 %v6475_v26  ;;  %v2979_v26 = vld [vmem:[%s7052_s20 + $0x48] sm:$0xff] }
 0x807   : > { %6431 = vmatprep.subr.msk.bf16.mxu0 %vm7161_vm3, %v6429_v39  ;;  %6293 = vmatprep.subr.mxu1 %v7238_v62 }
 0x80e   : > { %6434 = vmatpush3.bf16.xpose.msk.msra.mxu0 %vm7161_vm3, %v6429_v39  ;;  %v5602_v39 = vld [vmem:[%s1462_s29] ss:$0 sm:$0xff] }
 0x80f   : > { %6437 = vmatprep.subr.msk.bf16.mxu0 %vm7161_vm3, %v6435_v40 }
 0x816   : > { %6440 = vmatpush3.bf16.xpose.msk.msra.mxu0 %vm7161_vm3, %v6435_v40 }
 0x817   : > { %6443 = vmatprep.subr.msk.bf16.mxu0 %vm7161_vm3, %v6441_v42 }
 0x81e   : > { %6446 = vmatpush3.bf16.xpose.msk.msra.mxu0 %vm7161_vm3, %v6441_v42 }
 0x81f   : > { %3335 = vmatprep.subr.bf16.mxu0 %v5613_v18  ;;  %v2999_v18 = vld [vmem:[%s7052_s20 + $0xe8] sm:$0xff] }
 0x825   : > { %6256 = vmatmul.mubr.msk.f32.vlgmr.msra.gmra.mrb[14].mxu0 %vm1550_vm2, %v2480_v43 }
 0x826   : > { %3336 = vmatpush1.bf16.msra.mxu0 %v5612_v15  ;;  %v2991_v15 = vld [vmem:[%s7052_s20 + $0xa8] sm:$0xff] }
 0x827   : > { %3337 = vmatprep.subr.bf16.mxu0 %v5629_v2  ;;  %v5635_v6 = vcombine.high %v2991_v15, %v2999_v18 }
 0x82a   : > { %3338 = vmatpush1.bf16.msra.mxu0 %v5628_v17  ;;  %v5634_v17 = vcombine.low %v2991_v15, %v2999_v18 }
 0x8f8   : > { %v6257_v27 = vpop.f32.mrb[14].mxu0 }
 0x8f9   : > { %v2607_v28 = vadd.f32 %v6257_v27, %v7234_v60  ;;  %v2601_v34 = vpop.f32.mrb[15].mxu0  ;;  %v6791_v27 = vmov 0  }
 0x8fa   : > { %v2602_v35 = vadd.f32 %v2601_v34, %v7230_v56  ;;  %v5611_v34 = vcombine.high %v2971_v22, %v2979_v26  ;;  %3367 = vmatprep.mubr.bf16.mxu0 %v6791_v27 }
 0x8fb   : > { %2612 = vmax.xlane.f32.xlu1 %v2607_v28 }
 0x8fc   : > { %2610 = vmax.xlane.f32.xlu0 %v2602_v35 }
 0x988   : > { %v2613_v36 = vpop.xlane.xlu1 %2612 }
 0x989   : > { %v2615_v47 = vsub.f32 %v2607_v28, %v2613_v36  ;;  %v2611_v4 = vpop.xlane.xlu0 %2610  ;;  %v5610_v28 = vcombine.low %v2971_v22, %v2979_v26  ;;  %v2982_v36 = vld [vmem:[%s7052_s20 + $0x60] sm:$0xff]  ;;  %v6556_v22 = vld [vmem:[%s7061_s4 + $0x8] sm:$0xff]   ;;  %v2993_v26 = vld [vmem:[%s7052_s20 + $0xb8] sm:$0xff] }
 0x98a   : > { %v2614_v7 = vsub.f32 %v2602_v35, %v2611_v4  ;;  %v2974_v35 = vld [vmem:[%s7052_s20 + $0x20] sm:$0xff] }
 0x98b   : > { %v2618_v8 = vmul.f32 1.442695, %v2615_v47  ;;  %v5616_v47 = vcombine.low %v2974_v35, %v2982_v36  ;;  %v5617_v4 = vcombine.high %v2974_v35, %v2982_v36 }
 0x98c   : > { %v2616_v9 = vmul.f32 1.442695, %v2614_v7 }
 0x98d   : > { %3421 = vmatprep.subr.bf16.mxu0 %v5617_v4  ;;  %v6561_v4 = vld [vmem:[%s7061_s4 + $0x58] sm:$0xff]  }
 0x98e   : > { %6693 = vpow2.f32 %v2616_v9 }
 0x98f   : > { %6695 = vpow2.f32 %v2618_v8 }
 0x998   : > { %v6694_v11 = vpop.eup %6693 }
 0x999   : > { %v6696_v12 = vpop.eup %6695  ;;  %6290 = vmatprep.mubr.f32.mxu1 %v6694_v11 }
 0x99a   : > { %6291 = vmatmul.mubr.f32.vlgmr.msra.gmra.mrb[6].mxu1 %v6696_v12 }
 0x99b   : > { %6294 = vmatpush3.xpose.msra.mxu1 %v7238_v62  ;;  %6295 = vmatprep.mubr.f32.mxu1 %v6694_v11 }
 0x99c   : > { %6298 = vmatprep.subr.mxu1 %v7243_v10 }
 0x99e   : > { %6296 = vmatmul.mubr.f32.vlgmr.msra.gmra.mrb[12].mxu1 %v6696_v12 }
 0x99f   : > { %6299 = vmatpush3.msra.mxu1 %v7243_v10  ;;  %v6552_v10 = vld [vmem:[%s7042_s3 + $0x8] sm:$0xff]  }
 0x9a0   : > { %6303 = vmatprep.subr.bf16.mxu1 %v6789_v3 }
 0xa6d   : > { %v6292_v56 = vpop.f32.mrb[6].mxu1 }
 0xa6e   : > { %v2686_v60 = vpop.f32.mrb[7].mxu1 }
 0xa71   : > { %v6297_v16 = vpop.f32.mrb[12].mxu1 }
 0xa72   : > { %v2761_v20 = vpop.f32.mrb[13].mxu1 }
 0xa73   : > { %6697 = vrcp.f32 %v2761_v20 }
 0xa74   : > { %6699 = vrcp.f32 %v6297_v16  ;;  %v5606_v16 = vld [vmem:[%s1465_s12] ss:$0 sm:$0xff] }
 0xa7d   : > { %v6698_v25 = vpop.eup %6697 }
 0xa7e   : > { %v6700_v62 = vpop.eup %6699  ;;  %6300 = vmatprep.mubr.msk.f32.mxu1 %vm2048_vm4, %v6698_v25 }
 0xa7f   : > { %6301 = vmatmul.mubr.msk.f32.vlgmr.msra.gmra.mrb[14].mxu1 %vm2048_vm4, %v6700_v62 }
 0xa80   : > { %6304 = vmatpush3.bf16.msra.mxu1 %v6551_v21  ;;  %6307 = vmatprep.mubr.msk.bf16.mxu1 %vm6790_vm1, %v6789_v3 }
 0xa81   : > { %6305 = vmatprep.subr.bf16.mxu1 %v6789_v3 }
 0xa84   : > { %6306 = vmatpush3.bf16.msra.mxu1 %v6552_v10  ;;  %v5607_v10 = vld [vmem:[%s1468_s6] ss:$0 sm:$0xff] }
 0xa85   : > { %3249 = vmatprep.subr.bf16.mxu1 %v5609_v63 }
 0xb52   : > { %v6302_v29 = vpop.f32.mrb[14].mxu1 }
 0xb53   : > { %v2854_v30 = vmul.f32 %v6302_v29, %v6292_v56  ;;  %v2844_v33 = vpop.f32.mrb[15].mxu1 }
 0xb54   : > { %v2853_v37 = vmul.f32 %v2844_v33, %v2686_v60  ;;  %v2995_v33 = vld [vmem:[%s7052_s20 + $0xc8] sm:$0xff] }
 0xb56   : > { %v2855_v38 = vpack.c.bf16 %v2854_v30, %v2853_v37  ;;  %v2987_v30 = vld [vmem:[%s7052_s20 + $0x88] sm:$0xff]  ;;  %v2990_v37 = vld [vmem:[%s7052_s20 + $0xa0] sm:$0xff] }
 0xb58   : > { %6308 = vmatmul.mubr.msk.bf16.vlgmr.msra.gmra.mrb[16].mxu1 %vm1550_vm2, %v2855_v38  ;;  %v2998_v38 = vld [vmem:[%s7052_s20 + $0xe0] sm:$0xff] }
 0xb59   : > { %3250 = vmatpush1.bf16.msra.mxu1 %v5608_v14  ;;  %3281 = vmatprep.mubr.bf16.mxu1 %v6791_v27  ;;  %v6553_v14 = vld [vmem:[%s7061_s4 + $0x40] sm:$0xff]  }
 0xb5a   : > { %3251 = vmatprep.subr.bf16.mxu1 %v5625_v0  ;;  %v2977_v0 = vld [vmem:[%s7052_s20 + $0x38] sm:$0xff] }
 0xb5b   : > { %v5623_v2 = vcombine.high %v2977_v0, %v2985_v24  ;;  %v5622_v35 = vcombine.low %v2977_v0, %v2985_v24 }
 0xb5d   : > { %3252 = vmatpush1.bf16.msra.mxu1 %v5624_v1  ;;  %v6555_v1 = vld [vmem:[%s7061_s4 + $0x48] sm:$0xff]  }
 0xb5e   : > { %3292 = vmatprep.subr.bf16.mxu1 %v5611_v34  ;;  %v6557_v34 = vld [vmem:[%s7061_s4 + $0x50] sm:$0xff]  }
 0xc2b   : > { %v2916_v40 = vpop.f32.mrb[16].mxu1 }
 0xc2c   : > { %v2917_v41 = vadd.f32 %v5602_v39, %v2916_v40  ;;  %v6309_v42 = vpop.f32.mrb[17].mxu1 }
 0xc2d   : > { %v2919_v43 = vpop.f32.mrb[18].mxu1  ;;  %v5627_v42 = vcombine.high %v2987_v30, %v2995_v33 }
 0xc2e   : > { %v2920_v44 = vadd.f32 %v5602_v39, %v2919_v43  ;;  %v6310_v45 = vpop.f32.mrb[19].mxu1  ;;  %v2923_v46 = vadd.f32 %v2917_v41, %v7278_v31  ;;  %v5633_v43 = vcombine.high %v2990_v37, %v2998_v38 }
 0xc2f   : > { %v2981_v45 = vld [vmem:[%s7052_s20 + $0x58] sm:$0xff] }
 0xc30   : > { %v2927_v3 = vsel %vm1550_vm2, %v2923_v46, 0.0  ;;  %v2924_v48 = vadd.f32 %v2920_v44, %v7280_v32  ;;  %v2973_v44 = vld [vmem:[%s7052_s20 + $0x18] sm:$0xff] }
 0xc31   : > { %2928 = vadd.xlane.f32.xlu0 %v2927_v3  ;;  %v2984_v3 = vld [vmem:[%s7052_s20 + $0x70] sm:$0xff] }
 0xc32   : > { %v2930_v50 = vsel %vm1550_vm2, %v2924_v48, 0.0 }
 0xc33   : > { %2931 = vadd.xlane.f32.xlu1 %v2930_v50  ;;  %v5632_v50 = vcombine.low %v2990_v37, %v2998_v38  ;;  %v6576_v37 = vld [vmem:[%s7061_s4 + $0xa0] sm:$0xff]   ;;  %v6577_v38 = vld [vmem:[%s7061_s4 + $0x78] sm:$0xff]  }
 0xcbe   : > { %v2929_v51 = vpop.xlane.xlu0 %2928 }
 0xcbf   : > { %v2933_v53 = vmul.f32 0.03125, %v2929_v51  ;;  %v5615_v51 = vcombine.high %v2973_v44, %v2981_v45 }
 0xcc0   : > { %v2932_v54 = vpop.xlane.xlu1 %2931 }
 0xcc1   : > { %v2935_v55 = vsub.f32 %v2923_v46, %v2933_v53  ;;  %v2934_v57 = vmul.f32 0.03125, %v2932_v54  ;;  %v2976_v46 = vld [vmem:[%s7052_s20 + $0x30] sm:$0xff]  ;;  %v2989_v54 = vld [vmem:[%s7052_s20 + $0x98] sm:$0xff] }
 0xcc2   : > { %v5621_v53 = vcombine.high %v2976_v46, %v2984_v3 }
 0xcc3   : > { %v2936_v49 = vsub.f32 %v2924_v48, %v2934_v57  ;;  %v2937_v52 = vmul.f32 %v2935_v55, %v2935_v55  ;;  %v5626_v48 = vcombine.low %v2987_v30, %v2995_v33  ;;  %v2992_v57 = vld [vmem:[%s7052_s20 + $0xb0] sm:$0xff]  ;;  %v6574_v30 = vld [vmem:[%s7061_s4 + $0xe0] sm:$0xff]  }
 0xcc4   : > { %v6575_v33 = vld [vmem:[%s7061_s4 + $0x30] sm:$0xff]  }
 0xcc5   : > { %v2939_v31 = vsel %vm1550_vm2, %v2937_v52, 0.0  ;;  %v2938_v58 = vmul.f32 %v2936_v49, %v2936_v49  ;;  %v5614_v52 = vcombine.low %v2973_v44, %v2981_v45  ;;  %v6581_v44 = vld [vmem:[%s7061_s4 + $0xf0] sm:$0xff]   ;;  %v6582_v45 = vld [vmem:[%s7061_s4 + $0x140] sm:$0xff]  }
 0xcc6   : > { %2940 = vadd.xlane.f32.xlu0 %v2939_v31  ;;  %v5620_v31 = vcombine.low %v2976_v46, %v2984_v3  ;;  %v6583_v46 = vld [vmem:[%s7061_s4 + $0xb0] sm:$0xff]   ;;  %v6585_v3 = vld [vmem:[%s7061_s4 + $0xf8] sm:$0xff]  }
 0xcc7   : > { %v2942_v32 = vsel %vm1550_vm2, %v2938_v58, 0.0 }
 0xcc8   : > { %2943 = vadd.xlane.f32.xlu1 %v2942_v32 }
 0xd53   : > { %v2941_v7 = vpop.xlane.xlu0 %2940 }
 0xd54   : > { %v2945_v8 = vmul.f32 0.03125, %v2941_v7 }
 0xd55   : > { %v2944_v9 = vpop.xlane.xlu1 %2943 }
 0xd56   : > { %v2947_v11 = vadd.f32 1e-05, %v2945_v8  ;;  %v2946_v12 = vmul.f32 0.03125, %v2944_v9  ;;  %v6558_v8 = vld [vmem:[%s7061_s4 + $0xc0] sm:$0xff]   ;;  %v6563_v9 = vld [vmem:[%s7061_s4 + $0x18] sm:$0xff]  }
 0xd58   : > { %6701 = vrsqrt.f32 %v2947_v11  ;;  %v2948_v56 = vadd.f32 1e-05, %v2946_v12  ;;  %v6565_v11 = vld [vmem:[%s7061_s4 + $0x60] sm:$0xff]  }
 0xd59   : > { %v6560_v12 = vld [vmem:[%s7061_s4 + $0x80] sm:$0xff]  }
 0xd5a   : > { %6703 = vrsqrt.f32 %v2948_v56  ;;  %v6562_v56 = vld [vmem:[%s7061_s4 + $0xc8] sm:$0xff]  }
 0xd62   : > { %v6702_v60 = vpop.eup %6701 }
 0xd63   : > { %v2951_v20 = vmul.f32 %v6702_v60, %v2935_v55  ;;  %v2997_v55 = vld [vmem:[%s7052_s20 + $0xd8] sm:$0xff]  ;;  %v6567_v60 = vld [vmem:[%s7061_s4 + $0x20] sm:$0xff]  }
 0xd64   : > { %v6704_v21 = vpop.eup %6703  ;;  %v5631_v58 = vcombine.high %v2989_v54, %v2997_v55  ;;  %v5630_v5 = vcombine.low %v2989_v54, %v2997_v55  ;;  %v7504_v55 = vld [vmem:[%s7055_s27 + $0x8] sm:$0xff] }
 0xd65   : > { %v2959_v25 = vmul.f32 %v5606_v16, %v2951_v20  ;;  %v2952_v62 = vmul.f32 %v6704_v21, %v2936_v49  ;;  %v3000_v49 = vld [vmem:[%s7052_s20 + $0xf0] sm:$0xff]  ;;  %v6571_v21 = vld [vmem:[%s7061_s4 + $0x28] sm:$0xff]  }
 0xd66   : > { %v5637_v32 = vcombine.high %v2992_v57, %v3000_v49  ;;  %v5636_v63 = vcombine.low %v2992_v57, %v3000_v49  ;;  %v6566_v20 = vld [vmem:[%s7061_s4 + $0xd0] sm:$0xff]  }
 0xd67   : > { %v2960_v29 = vmul.f32 %v5606_v16, %v2952_v62  ;;  %v7420_v39 = vadd.f32 %v5607_v10, %v2959_v25  ;;  %v6564_v16 = vld [vmem:[%s7061_s4 + $0x88] sm:$0xff]   ;;  %v6568_v25 = vld [vmem:[%s7061_s4 + $0x90] sm:$0xff]   ;;  %v6570_v62 = vld [vmem:[%s7061_s4 + $0xd8] sm:$0xff]  }
 0xd69   : > { %v7422_v40 = vadd.f32 %v5607_v10, %v2960_v29  ;;  %v6572_v10 = vld [vmem:[%s7061_s4 + $0x98] sm:$0xff]   ;;  %v6573_v29 = vld [vmem:[%s7061_s4 + $0x70] sm:$0xff]  }
 0xd6b   : > { %v7426_v41 = vpack.c.bf16 %v7422_v40, %v7420_v39 }
 0xd6d   : > { %5640 = vmatmul.mubr.msk.bf16.vlgmr.msra.gmra.mrb[20].mxu1 %vm1550_vm2, %v7426_v41  ;;  %5642 = vmatmul.mubr.msk.bf16.vlgmr.msra.gmra.mrb[28].mxu0 %vm1550_vm2, %v7426_v41 }
 0xd6e   : > { %3293 = vmatpush1.bf16.msra.mxu1 %v5610_v28  ;;  %3422 = vmatpush1.bf16.msra.mxu0 %v5616_v47  ;;  %v3001_v28 = vld [vmem:[%s7052_s20 + $0xf8] sm:$0xff]  ;;  %v6559_v47 = vld [vmem:[%s7061_s4 + $0x10] sm:$0xff]   ;;  %s7829_s20 = sld [smem:[#allocation42_spill]] }
 0xd6f   : > { %3294 = vmatprep.subr.bf16.mxu1 %v5627_v42  ;;  %3423 = vmatprep.subr.bf16.mxu0 %v5633_v43  ;;  %v5639_v36 = vcombine.high %v2993_v26, %v3001_v28  ;;  %v5638_v7 = vcombine.low %v2993_v26, %v3001_v28  ;;  %v6579_v42 = vld [vmem:[%s7061_s4 + $0x38] sm:$0xff]   ;;  %v6580_v43 = vld [vmem:[%s7061_s4 + $0xa8] sm:$0xff]  }
 0xd70   : > { %3324 = vmatprep.mubr.bf16.mxu1 %v6791_v27  ;;  %3453 = vmatprep.mubr.bf16.mxu0 %v6791_v27 }
 0xd72   : > { %3295 = vmatpush1.bf16.msra.mxu1 %v5626_v48  ;;  %3424 = vmatpush1.bf16.msra.mxu0 %v5632_v50  ;;  %v6587_v48 = vld [vmem:[%s7061_s4 + $0xb8] sm:$0xff]   ;;  %v6590_v50 = vld [vmem:[%s7061_s4 + $0x1c0] sm:$0xff]  }
 0xd73   : > { %3378 = vmatprep.subr.bf16.mxu1 %v5615_v51  ;;  %3507 = vmatprep.subr.bf16.mxu0 %v5621_v53  ;;  %v3006_v51 = vlaneseq }
 0xd74   : > { %p5779_p5 = scmp.ne.s32.totalorder %s7829_s20, 5 }
 0xd75   : > { %5641 = vmatmul.mubr.msk.bf16.vlgmr.msra.gmra.mrb[24].mxu1 %vm1550_vm2, %v7426_v41  ;;  %5644 = vmatmul.mubr.msk.bf16.vlgmr.msra.gmra.mrb[32].mxu0 %vm1550_vm2, %v7426_v41  ;;  %v7500_v53 = vshrl.u32 %v3006_v51, 7  ;;  %vm6793_vm5 = vmmov (!%p5779_p5), 0   ;;  %vm5164_vm6 = vcmask (!%p5779_p5), 130048  }
 0xd76   : > { %3379 = vmatpush1.bf16.msra.mxu1 %v5614_v52  ;;  %3508 = vmatpush1.bf16.msra.mxu0 %v5620_v31  ;;  %v3002_v31 = vld [vmem:[%s7055_s27] sm:$0xff]  ;;  %s7830_s27 = sld [smem:[#allocation38_spill]] (!%p5779_p5) }
 0xd77   : > { %3380 = vmatprep.subr.bf16.mxu1 %v5631_v58  ;;  %3509 = vmatprep.subr.bf16.mxu0 %v5637_v32  ;;  %v3032_v54 = vsub.s32 6, %v7500_v53  ;;  %v3008_v49 = vsub.s32 0, %v7500_v53  ;;  %v3024_v52 = vsub.s32 4, %v7500_v53  ;;  %v3012_v58 = vsub.s32 1, %v7500_v53 }
 0xd78   : > { %3410 = vmatprep.mubr.bf16.mxu1 %v6791_v27  ;;  %3539 = vmatprep.mubr.bf16.mxu0 %v6791_v27  ;;  %v3028_v32 = vsub.s32 5, %v7500_v53  ;;  %v3020_v18 = vsub.s32 3, %v7500_v53 }
 0xd79   : > { %v7507_v57 = vrot.slane %v7504_v55, %v3032_v54  ;;  %v3009_v59 = vrot.slane %v3002_v31, %v3008_v49  ;;  %v3025_v61 = vrot.slane %v3002_v31, %v3024_v52 }
 0xd7a   : > { %3381 = vmatpush1.bf16.msra.mxu1 %v5630_v5  ;;  %3510 = vmatpush1.bf16.msra.mxu0 %v5636_v63  ;;  %v3013_v5 = vrot.slane %v3002_v31, %v3012_v58  ;;  %v3029_v63 = vrot.slane %v3002_v31, %v3028_v32 }
 0xd7b   : > { %3464 = vmatprep.subr.bf16.mxu1 %v5619_v13  ;;  %5908 = vmatprep.subr.bf16.mxu0 %v6553_v14  ;;  %v3016_v13 = vsub.s32 2, %v7500_v53 }
 0xd7d   : > { %5643 = vmatmul.mubr.msk.bf16.vlgmr.msra.gmra.mrb[28].mxu1 %vm1550_vm2, %v7426_v41  ;;  %5646 = vmatmul.mubr.msk.bf16.vlgmr.msra.gmra.mrb[36].mxu0 %vm1550_vm2, %v7426_v41 }
 0xd7e   : > { %3465 = vmatpush1.bf16.msra.mxu1 %v5618_v19  ;;  %3496 = vmatprep.mubr.bf16.mxu1 %v6791_v27 }
 0xd7f   : > { %3466 = vmatprep.subr.bf16.mxu1 %v5635_v6  ;;  %5909 = vmatpush3.bf16.msra.mxu0 %v6554_v23 }
 0xd80   : > { %5910 = vmatprep.subr.bf16.mxu0 %v6555_v1 }
 0xd82   : > { %3467 = vmatpush1.bf16.msra.mxu1 %v5634_v17 }
 0xd83   : > { %3550 = vmatprep.subr.bf16.mxu1 %v5623_v2  ;;  %5911 = vmatpush3.bf16.msra.mxu0 %v6556_v22 }
 0xd84   : > { %5912 = vmatprep.subr.bf16.mxu0 %v6557_v34 }
 0xd85   : > { %5645 = vmatmul.mubr.msk.bf16.vlgmr.msra.gmra.mrb[32].mxu1 %vm1550_vm2, %v7426_v41 }
 0xd86   : > { %3551 = vmatpush1.bf16.msra.mxu1 %v5622_v35  ;;  %3582 = vmatprep.mubr.bf16.mxu1 %v6791_v27  ;;  %v6569_v27 = vld [vmem:[%s7061_s4 + $0x68] sm:$0xff]   ;;  %v3017_v35 = vrot.slane %v3002_v31, %v3016_v13 }
 0xd87   : > { %3552 = vmatprep.subr.bf16.mxu1 %v5639_v36  ;;  %5913 = vmatpush3.bf16.msra.mxu0 %v6559_v47  ;;  %v3041_v36 = vrot.slane %v7504_v55, %v3008_v49 }
 0xd88   : > { %5914 = vmatprep.subr.bf16.mxu0 %v6561_v4 }
 0xd8a   : > { %3553 = vmatpush1.bf16.msra.mxu1 %v5638_v7  ;;  %v3021_v7 = vrot.slane %v3002_v31, %v3020_v18 }
 0xd8b   : > { %5930 = vmatprep.subr.bf16.mxu1 %v6558_v8  ;;  %5915 = vmatpush3.bf16.msra.mxu0 %v6563_v9  ;;  %v3045_v8 = vrot.slane %v7504_v55, %v3012_v58 }
 0xd8c   : > { %5916 = vmatprep.subr.bf16.mxu0 %v6565_v11 }
 0xd8d   : > { %5647 = vmatmul.mubr.msk.bf16.vlgmr.msra.gmra.mrb[36].mxu1 %vm1550_vm2, %v7426_v41  ;;  %v6578_v41 = vld [vmem:[%s7061_s4 + $0xe8] sm:$0xff]  }
 0xd8e   : > { %5931 = vmatpush3.bf16.msra.mxu1 %v6560_v12 }
 0xd8f   : > { %5932 = vmatprep.subr.bf16.mxu1 %v6562_v56  ;;  %5917 = vmatpush3.bf16.msra.mxu0 %v6567_v60 }
 0xd90   : > { %5918 = vmatprep.subr.bf16.mxu0 %v6569_v27 }
 0xd92   : > { %5933 = vmatpush3.bf16.msra.mxu1 %v6564_v16 }
 0xd93   : > { %5934 = vmatprep.subr.bf16.mxu1 %v6566_v20  ;;  %5919 = vmatpush3.bf16.msra.mxu0 %v6571_v21 }
 0xd94   : > { %5920 = vmatprep.subr.bf16.mxu0 %v6573_v29 }
 0xd96   : > { %5935 = vmatpush3.bf16.msra.mxu1 %v6568_v25 }
 0xd97   : > { %5936 = vmatprep.subr.bf16.mxu1 %v6570_v62  ;;  %5921 = vmatpush3.bf16.msra.mxu0 %v6575_v33  ;;  %v3036_v62 = vsub.s32 7, %v7500_v53  ;;  %v6610_v53 = vld [vmem:[%s7061_s4 + $0x1e8] sm:$0xff]  }
 0xd98   : > { %5922 = vmatprep.subr.bf16.mxu0 %v6577_v38 }
 0xd9a   : > { %5937 = vmatpush3.bf16.msra.mxu1 %v6572_v10 }
 0xd9b   : > { %5938 = vmatprep.subr.bf16.mxu1 %v6574_v30  ;;  %5923 = vmatpush3.bf16.msra.mxu0 %v6579_v42 }
 0xd9c   : > { %5952 = vmatprep.subr.bf16.mxu0 %v6582_v45 }
 0xd9e   : > { %5939 = vmatpush3.bf16.msra.mxu1 %v6576_v37  ;;  %v6584_v37 = vld [vmem:[%s7061_s4 + $0x100] sm:$0xff]  }
 0xd9f   : > { %5940 = vmatprep.subr.bf16.mxu1 %v6578_v41 }
 0xda2   : > { %5941 = vmatpush3.bf16.msra.mxu1 %v6580_v43 }
 0xda3   : > { %5942 = vmatprep.subr.bf16.mxu1 %v6581_v44  ;;  %v6586_v44 = vld [vmem:[%s7061_s4 + $0x148] sm:$0xff]  }
 0xda6   : > { %5943 = vmatpush3.bf16.msra.mxu1 %v6583_v46 }
 0xda7   : > { %5944 = vmatprep.subr.bf16.mxu1 %v6585_v3 }
 0xdaa   : > { %5945 = vmatpush3.bf16.msra.mxu1 %v6587_v48 }
 0xdab   : > { %5974 = vmatprep.subr.bf16.mxu1 %v6590_v50  ;;  %v3033_v50 = vrot.slane %v3002_v31, %v3032_v54  ;;  %v3061_v54 = vrot.slane %v7504_v55, %v3028_v32 }
 0xe40   : > { %v3283_v14 = vpop.f32.mrb[20].mxu1  ;;  %v3369_v15 = vpop.f32.mrb[28].mxu0 }
 0xe41   : > { %v3284_v19 = vadd.f32 %v3283_v14, %v3009_v59  ;;  %v3370_v6 = vadd.f32 %v3369_v15, %v3025_v61  ;;  %v3285_v23 = vpop.f32.mrb[21].mxu1  ;;  %v3371_v0 = vpop.f32.mrb[29].mxu0  ;;  %v6588_v15 = vld [vmem:[%s7061_s4 + $0x108] sm:$0xff]  }
 0xe42   : > { %v3286_v24 = vadd.f32 %v3285_v23, %v3013_v5  ;;  %v3372_v1 = vadd.f32 %v3371_v0, %v3029_v63  ;;  %v3287_v17 = vpop.f32.mrb[22].mxu1  ;;  %v3373_v2 = vpop.f32.mrb[30].mxu0 }
 0xe43   : > { %v3288_v22 = vadd.f32 %v3287_v17, %v3009_v59  ;;  %v3374_v26 = vadd.f32 %v3373_v2, %v3025_v61  ;;  %v3289_v28 = vpop.f32.mrb[23].mxu1  ;;  %v3375_v34 = vpop.f32.mrb[31].mxu0  ;;  %v3593_v9 = vmax.f32 %v3284_v19, 0.0  ;;  %v3597_v11 = vmax.f32 %v3370_v6, 0.0 }
 0xe44   : > { %v3290_v47 = vadd.f32 %v3289_v28, %v3013_v5  ;;  %v3376_v4 = vadd.f32 %v3375_v34, %v3029_v63  ;;  %v3594_v60 = vmax.f32 %v3286_v24, 0.0  ;;  %v3598_v27 = vmax.f32 %v3372_v1, 0.0 }
 0xe45   : > { %v3609_v12 = vmax.f32 %v3288_v22, 0.0  ;;  %v3613_v56 = vmax.f32 %v3374_v26, 0.0  ;;  %v3057_v61 = vrot.slane %v7504_v55, %v3024_v52  ;;  %v3037_v5 = vrot.slane %v3002_v31, %v3036_v62  ;;  %v6589_v52 = vld [vmem:[%s7061_s4 + $0x150] sm:$0xff]  }
 0xe46   : > { %v3610_v16 = vmax.f32 %v3290_v47, 0.0  ;;  %v3614_v20 = vmax.f32 %v3376_v4, 0.0 }
 0xe47   : > { %v3625_v21 = vpack.c.bf16 %v3609_v12, %v3593_v9  ;;  %v7524_v25 = vpack.c.bf16 %v3613_v56, %v3597_v11  ;;  %v6593_v9 = vld [vmem:[%s7061_s4 + $0x158] sm:$0xff]   ;;  %v6594_v11 = vld [vmem:[%s7061_s4 + $0x1c8] sm:$0xff]  }
 0xe48   : > { %v3626_v10 = vpack.c.bf16 %v3610_v16, %v3594_v60  ;;  %v3630_v29 = vpack.c.bf16 %v3614_v20, %v3598_v27  ;;  %v3326_v30 = vpop.f32.mrb[24].mxu1  ;;  %v3455_v33 = vpop.f32.mrb[32].mxu0 }
 0xe49   : > { %v3327_v38 = vadd.f32 %v3326_v30, %v3017_v35  ;;  %v3456_v41 = vadd.f32 %v3455_v33, %v3041_v36  ;;  %v3328_v42 = vpop.f32.mrb[25].mxu1  ;;  %v3457_v43 = vpop.f32.mrb[33].mxu0 }
 0xe4a   : > { %v3329_v45 = vadd.f32 %v3328_v42, %v3021_v7  ;;  %v3458_v46 = vadd.f32 %v3457_v43, %v3045_v8  ;;  %v3330_v3 = vpop.f32.mrb[26].mxu1  ;;  %v3459_v48 = vpop.f32.mrb[34].mxu0  ;;  %4704 = vmatprep.mubr.bf16.mxu0 %v3626_v10 }
 0xe4b   : > { %v3331_v51 = vadd.f32 %v3330_v3, %v3017_v35  ;;  %v3460_v49 = vadd.f32 %v3459_v48, %v3041_v36  ;;  %v3332_v58 = vpop.f32.mrb[27].mxu1  ;;  %v3461_v59 = vpop.f32.mrb[35].mxu0  ;;  %4705 = vmatmul.mubr.bf16.vlgmr.msra.gmra.mrb[40].mxu0 %v3625_v21  ;;  %v3595_v19 = vmax.f32 %v3327_v38, 0.0  ;;  %v3601_v6 = vmax.f32 %v3456_v41, 0.0  ;;  %v6591_v35 = vld [vmem:[%s7061_s4 + $0x110] sm:$0xff]   ;;  %v6592_v36 = vld [vmem:[%s7061_s4 + $0x180] sm:$0xff]  }
 0xe4c   : > { %v3333_v63 = vadd.f32 %v3332_v58, %v3021_v7  ;;  %v3462_v14 = vadd.f32 %v3461_v59, %v3045_v8  ;;  %5953 = vmatpush3.bf16.msra.mxu0 %v6584_v37  ;;  %4786 = vmatprep.mubr.bf16.mxu0 %v3630_v29  ;;  %v3596_v24 = vmax.f32 %v3329_v45, 0.0  ;;  %v3602_v1 = vmax.f32 %v3458_v46, 0.0  ;;  %v6595_v37 = vld [vmem:[%s7061_s4 + $0x118] sm:$0xff]   ;;  %v6596_v38 = vld [vmem:[%s7061_s4 + $0x188] sm:$0xff]   ;;  %v6597_v46 = vld [vmem:[%s7061_s4 + $0x160] sm:$0xff]  }
 0xe4d   : > { %v3611_v23 = vmax.f32 %v3331_v51, 0.0  ;;  %v3617_v0 = vmax.f32 %v3460_v49, 0.0  ;;  %5954 = vmatprep.subr.bf16.mxu0 %v6586_v44  ;;  %v3049_v29 = vrot.slane %v7504_v55, %v3016_v13  ;;  %v3053_v41 = vrot.slane %v7504_v55, %v3020_v18  ;;  %v6598_v13 = vld [vmem:[%s7061_s4 + $0x1d0] sm:$0xff]  }
 0xe4e   : > { %v3612_v31 = vmax.f32 %v3333_v63, 0.0  ;;  %v3618_v17 = vmax.f32 %v3462_v14, 0.0  ;;  %v6600_v63 = vld [vmem:[%s7061_s4 + $0x190] sm:$0xff]  }
 0xe4f   : > { %v3627_v2 = vpack.c.bf16 %v3611_v23, %v3595_v19  ;;  %v7537_v22 = vpack.c.bf16 %v3617_v0, %v3601_v6  ;;  %v6602_v19 = vld [vmem:[%s7061_s4 + $0x1d8] sm:$0xff]  }
 0xe50   : > { %v3628_v26 = vpack.c.bf16 %v3612_v31, %v3596_v24  ;;  %v7539_v28 = vpack.c.bf16 %v3618_v17, %v3602_v1  ;;  %5955 = vmatpush3.bf16.msra.mxu0 %v6588_v15  ;;  %v3412_v32 = vpop.f32.mrb[28].mxu1  ;;  %v3541_v34 = vpop.f32.mrb[36].mxu0  ;;  %v6603_v1 = vld [vmem:[%s7061_s4 + $0x128] sm:$0xff]   ;;  %v6604_v31 = vld [vmem:[%s7061_s4 + $0x198] sm:$0xff]  }
 0xe51   : > { %v3413_v47 = vadd.f32 %v3412_v32, %v3033_v50  ;;  %v3542_v4 = vadd.f32 %v3541_v34, %v3057_v61  ;;  %v3414_v7 = vpop.f32.mrb[29].mxu1  ;;  %v3543_v8 = vpop.f32.mrb[37].mxu0  ;;  %5956 = vmatprep.subr.bf16.mxu0 %v6589_v52  ;;  %v6606_v32 = vld [vmem:[%s7061_s4 + $0x1e0] sm:$0xff]  }
 0xe52   : > { %v3415_v12 = vadd.f32 %v3414_v7, %v3037_v5  ;;  %v3544_v56 = vadd.f32 %v3543_v8, %v3061_v54  ;;  %v3416_v60 = vpop.f32.mrb[30].mxu1  ;;  %v3545_v27 = vpop.f32.mrb[38].mxu0  ;;  %4745 = vmatprep.mubr.bf16.mxu1 %v3628_v26  ;;  %v6605_v26 = vld [vmem:[%s7061_s4 + $0x170] sm:$0xff]  }
 0xe53   : > { %v3417_v16 = vadd.f32 %v3416_v60, %v3033_v50  ;;  %v3546_v20 = vadd.f32 %v3545_v27, %v3057_v61  ;;  %v3418_v21 = vpop.f32.mrb[31].mxu1  ;;  %v3547_v10 = vpop.f32.mrb[39].mxu0  ;;  %4746 = vmatmul.mubr.bf16.vlgmr.msra.gmra.mrb[40].mxu1 %v3627_v2  ;;  %v3599_v42 = vmax.f32 %v3413_v47, 0.0  ;;  %v3605_v43 = vmax.f32 %v3542_v4, 0.0  ;;  %v6607_v8 = vld [vmem:[%s7061_s4 + $0x130] sm:$0xff]  }
 0xe54   : > { %v3419_v30 = vadd.f32 %v3418_v21, %v3037_v5  ;;  %v3548_v33 = vadd.f32 %v3547_v10, %v3061_v54  ;;  %5957 = vmatpush3.bf16.msra.mxu0 %v6591_v35  ;;  %5975 = vmatpush3.bf16.msra.mxu1 %v6592_v36  ;;  %v3600_v3 = vmax.f32 %v3415_v12, 0.0  ;;  %v3606_v48 = vmax.f32 %v3544_v56, 0.0  ;;  %v6599_v5 = vld [vmem:[%s7061_s4 + $0x120] sm:$0xff]   ;;  %v6601_v54 = vld [vmem:[%s7061_s4 + $0x168] sm:$0xff]   ;;  %v6609_v56 = vld [vmem:[%s7061_s4 + $0x178] sm:$0xff]  }
 0xe55   : > { %v3615_v44 = vmax.f32 %v3417_v16, 0.0  ;;  %v3621_v45 = vmax.f32 %v3546_v20, 0.0  ;;  %5958 = vmatprep.subr.bf16.mxu0 %v6593_v9  ;;  %5976 = vmatprep.subr.bf16.mxu1 %v6594_v11  ;;  %v3069_v36 = vrot.slane %v7504_v55, %v3036_v62  ;;  %v6608_v9 = vld [vmem:[%s7061_s4 + $0x1a0] sm:$0xff]   ;;  %v6611_v20 = vld [vmem:[%s7061_s4 + $0x138] sm:$0xff]   ;;  %v6612_v21 = vld [vmem:[%s7061_s4 + $0x1a8] sm:$0xff]  }
 0xe56   : > { %v3616_v50 = vmax.f32 %v3419_v30, 0.0  ;;  %v3622_v51 = vmax.f32 %v3548_v33, 0.0  ;;  %v6613_v30 = vld [vmem:[%s7061_s4 + $0x1f0] sm:$0xff]   ;;  %v6614_v33 = vld [vmem:[%s7061_s4 + $0x240] sm:$0xff]  }
 0xe57   : > { %v7555_v49 = vpack.c.bf16 %v3615_v44, %v3599_v42  ;;  %v7557_v58 = vpack.c.bf16 %v3621_v45, %v3605_v43  ;;  %v6615_v42 = vld [vmem:[%s7061_s4 + $0x1b0] sm:$0xff]   ;;  %v6616_v43 = vld [vmem:[%s7061_s4 + $0x200] sm:$0xff]   ;;  %v6617_v44 = vld [vmem:[%s7061_s4 + $0x1f8] sm:$0xff]  }
 0xe58   : > { %v3632_v18 = vpack.c.bf16 %v3616_v50, %v3600_v3  ;;  %v7559_v59 = vpack.c.bf16 %v3622_v51, %v3606_v48  ;;  %5959 = vmatpush3.bf16.msra.mxu0 %v6595_v37  ;;  %5977 = vmatpush3.bf16.msra.mxu1 %v6596_v38  ;;  %v3498_v61 = vpop.f32.mrb[32].mxu1  ;;  %v6618_v45 = vld [vmem:[%s7061_s4 + $0x248] sm:$0xff]   ;;  %v6621_v3 = vld [vmem:[%s7061_s4 + $0x250] sm:$0xff]   ;;  %v6622_v48 = vld [vmem:[%s7061_s4 + $0x2c0] sm:$0xff]  }
 0xe59   : > { %v3499_v14 = vadd.f32 %v3498_v61, %v3049_v29  ;;  %v3500_v15 = vpop.f32.mrb[33].mxu1  ;;  %5960 = vmatprep.subr.bf16.mxu0 %v6597_v46  ;;  %5978 = vmatprep.subr.bf16.mxu1 %v6598_v13  ;;  %v6619_v46 = vld [vmem:[%s7061_s4 + $0x1b8] sm:$0xff]   ;;  %v6620_v13 = vld [vmem:[%s7061_s4 + $0x208] sm:$0xff]   ;;  %v6623_v50 = vld [vmem:[%s7061_s4 + $0x210] sm:$0xff]  }
 0xe5a   : > { %v3501_v6 = vadd.f32 %v3500_v15, %v3053_v41  ;;  %v3502_v23 = vpop.f32.mrb[34].mxu1  ;;  %4827 = vmatprep.mubr.bf16.mxu1 %v3632_v18  ;;  %v6625_v51 = vld [vmem:[%s7061_s4 + $0x258] sm:$0xff]   ;;  %v6626_v18 = vld [vmem:[%s7061_s4 + $0x2c8] sm:$0xff]  }
 0xe5b   : > { %v3503_v0 = vadd.f32 %v3502_v23, %v3049_v29  ;;  %v3504_v52 = vpop.f32.mrb[35].mxu1  ;;  %v3603_v17 = vmax.f32 %v3499_v14, 0.0  ;;  %v6628_v61 = vld [vmem:[%s7061_s4 + $0x288] sm:$0xff]   ;;  %v6631_v14 = vld [vmem:[%s7061_s4 + $0x220] sm:$0xff]   ;;  %v6637_v23 = vld [vmem:[%s7061_s4 + $0x270] sm:$0xff]  }
 0xe5c   : > { %v3505_v24 = vadd.f32 %v3504_v52, %v3053_v41  ;;  %5961 = vmatpush3.bf16.msra.mxu0 %v6599_v5  ;;  %5979 = vmatpush3.bf16.msra.mxu1 %v6600_v63  ;;  %v3604_v34 = vmax.f32 %v3501_v6, 0.0  ;;  %v6629_v5 = vld [vmem:[%s7061_s4 + $0x260] sm:$0xff]   ;;  %v6630_v63 = vld [vmem:[%s7061_s4 + $0x2d0] sm:$0xff]   ;;  %v6633_v15 = vld [vmem:[%s7061_s4 + $0x268] sm:$0xff]  }
 0xe5d   : > { %v3619_v2 = vmax.f32 %v3503_v0, 0.0  ;;  %5962 = vmatprep.subr.bf16.mxu0 %v6601_v54  ;;  %5980 = vmatprep.subr.bf16.mxu1 %v6602_v19  ;;  %v6634_v54 = vld [vmem:[%s7061_s4 + $0x2d8] sm:$0xff]   ;;  %v6635_v19 = vld [vmem:[%s7061_s4 + $0x228] sm:$0xff]   ;;  %v6638_v0 = vld [vmem:[%s7061_s4 + $0x2e0] sm:$0xff]  }
 0xe5e   : > { %v3620_v35 = vmax.f32 %v3505_v24, 0.0  ;;  %v6636_v6 = vld [vmem:[%s7061_s4 + $0x298] sm:$0xff]   ;;  %v6639_v52 = vld [vmem:[%s7061_s4 + $0x230] sm:$0xff]   ;;  %v6640_v24 = vld [vmem:[%s7061_s4 + $0x2a0] sm:$0xff]  }
 0xe5f   : > { %v7572_v47 = vpack.c.bf16 %v3619_v2, %v3603_v17  ;;  %v6643_v17 = vld [vmem:[%s7061_s4 + $0x238] sm:$0xff]   ;;  %v6644_v2 = vld [vmem:[%s7061_s4 + $0x2a8] sm:$0xff]  }
 0xe60   : > { %v3636_v4 = vpack.c.bf16 %v3620_v35, %v3604_v34  ;;  %5963 = vmatpush3.bf16.msra.mxu0 %v6603_v1  ;;  %5981 = vmatpush3.bf16.msra.mxu1 %v6604_v31  ;;  %v3584_v7 = vpop.f32.mrb[36].mxu1  ;;  %v6641_v1 = vld [vmem:[%s7061_s4 + $0x278] sm:$0xff]   ;;  %v6642_v31 = vld [vmem:[%s7061_s4 + $0x2e8] sm:$0xff]   ;;  %v6647_v34 = vld [vmem:[%s7061_s4 + $0x2b0] sm:$0xff]  }
 0xe61   : > { %v3585_v11 = vadd.f32 %v3584_v7, %v7507_v57  ;;  %v3586_v12 = vpop.f32.mrb[37].mxu1  ;;  %5964 = vmatprep.subr.bf16.mxu0 %v6605_v26  ;;  %5982 = vmatprep.subr.bf16.mxu1 %v6606_v32  ;;  %v6645_v26 = vld [vmem:[%s7061_s4 + $0x2f0] sm:$0xff]   ;;  %v6646_v32 = vld [vmem:[%s7061_s4 + $0x340] sm:$0xff]   ;;  %v6651_v7 = vld [vmem:[%s7061_s4 + $0x2b8] sm:$0xff]  }
 0xe62   : > { %v3587_v55 = vadd.f32 %v3586_v12, %v3069_v36  ;;  %v3588_v62 = vpop.f32.mrb[38].mxu1  ;;  %v6648_v35 = vld [vmem:[%s7061_s4 + $0x300] sm:$0xff]   ;;  %v6655_v12 = vld [vmem:[%s7061_s4 + $0x310] sm:$0xff]  }
 0xe63   : > { %v3589_v60 = vadd.f32 %v3588_v62, %v7507_v57  ;;  %v3590_v27 = vpop.f32.mrb[39].mxu1  ;;  %v3607_v10 = vmax.f32 %v3585_v11, 0.0  ;;  %v6654_v11 = vld [vmem:[%s7061_s4 + $0x3c0] sm:$0xff]  }
 0xe64   : > { %v3591_v16 = vadd.f32 %v3590_v27, %v3069_v36  ;;  %5965 = vmatpush3.bf16.msra.mxu0 %v6607_v8  ;;  %5983 = vmatpush3.bf16.msra.mxu1 %v6608_v9  ;;  %v3608_v37 = vmax.f32 %v3587_v55, 0.0  ;;  %v6649_v36 = vld [vmem:[%s7061_s4 + $0x2f8] sm:$0xff]   ;;  %v6652_v8 = vld [vmem:[%s7061_s4 + $0x308] sm:$0xff]   ;;  %v6653_v9 = vld [vmem:[%s7061_s4 + $0x350] sm:$0xff]  }
 0xe65   : > { %v3623_v29 = vmax.f32 %v3589_v60, 0.0  ;;  %5966 = vmatprep.subr.bf16.mxu0 %v6609_v56  ;;  %5984 = vmatprep.subr.bf16.mxu1 %v6610_v53  ;;  %v6657_v56 = vld [vmem:[%s7061_s4 + $0x358] sm:$0xff]   ;;  %v6658_v53 = vld [vmem:[%s7061_s4 + $0x3c8] sm:$0xff]   ;;  %v6661_v62 = vld [vmem:[%s7061_s4 + $0x360] sm:$0xff]  }
 0xe66   : > { %v3624_v57 = vmax.f32 %v3591_v16, 0.0  ;;  %v6660_v55 = vld [vmem:[%s7061_s4 + $0x388] sm:$0xff]   ;;  %v6662_v60 = vld [vmem:[%s7061_s4 + $0x3d0] sm:$0xff]   ;;  %v6663_v27 = vld [vmem:[%s7061_s4 + $0x320] sm:$0xff]  }
 0xe67   : > { %v7584_v38 = vpack.c.bf16 %v3623_v29, %v3607_v10  ;;  %v6665_v16 = vld [vmem:[%s7061_s4 + $0x368] sm:$0xff]   ;;  %v6668_v10 = vld [vmem:[%s7061_s4 + $0x398] sm:$0xff]   ;;  %v6669_v29 = vld [vmem:[%s7061_s4 + $0x370] sm:$0xff]  }
 0xe68   : > { %v7586_v41 = vpack.c.bf16 %v3624_v57, %v3608_v37  ;;  %5967 = vmatpush3.bf16.msra.mxu0 %v6611_v20  ;;  %5985 = vmatpush3.bf16.msra.mxu1 %v6612_v21  ;;  %v6666_v20 = vld [vmem:[%s7061_s4 + $0x3d8] sm:$0xff]   ;;  %v6667_v21 = vld [vmem:[%s7061_s4 + $0x328] sm:$0xff]   ;;  %v6672_v37 = vld [vmem:[%s7061_s4 + $0x3a0] sm:$0xff]  }
 0xe69   : > { %5986 = vmatprep.subr.bf16.mxu1 %v6613_v30  ;;  %5996 = vmatprep.subr.bf16.mxu0 %v6614_v33  ;;  %v6670_v30 = vld [vmem:[%s7061_s4 + $0x3e0] sm:$0xff]   ;;  %v6671_v33 = vld [vmem:[%s7061_s4 + $0x330] sm:$0xff]   ;;  %v6673_v57 = vld [vmem:[%s7061_s4 + $0x378] sm:$0xff]  }
 0xe6b   : > { %4787 = vmatmul.mubr.bf16.vlgmr.msra.gmra.mrb[44].mxu0 %v7524_v25  ;;  %v6624_v25 = vld [vmem:[%s7061_s4 + $0x280] sm:$0xff]  }
 0xe6c   : > { %5987 = vmatpush3.bf16.msra.mxu1 %v6615_v42  ;;  %5997 = vmatpush3.bf16.msra.mxu0 %v6616_v43  ;;  %v6675_v42 = vld [vmem:[%s7061_s4 + $0x338] sm:$0xff]   ;;  %v6676_v43 = vld [vmem:[%s7061_s4 + $0x3a8] sm:$0xff]  }
 0xe6d   : > { %4868 = vmatprep.mubr.bf16.mxu0 %v7539_v28  ;;  %5988 = vmatprep.subr.bf16.mxu1 %v6617_v44  ;;  %v6627_v28 = vld [vmem:[%s7061_s4 + $0x218] sm:$0xff]   ;;  %v6677_v44 = vld [vmem:[%s7061_s4 + $0x3f0] sm:$0xff]  }
 0xe6e   : > { %5998 = vmatprep.subr.bf16.mxu0 %v6618_v45  ;;  %v6678_v45 = vld [vmem:[%s7061_s4 + $0x3b0] sm:$0xff]  }
 0xe70   : > { %5989 = vmatpush3.bf16.msra.mxu1 %v6619_v46  ;;  %5999 = vmatpush3.bf16.msra.mxu0 %v6620_v13  ;;  %v6679_v46 = vld [vmem:[%s7061_s4 + $0x3f8] sm:$0xff]  }
 0xe71   : > { %6000 = vmatprep.subr.bf16.mxu0 %v6621_v3  ;;  %6018 = vmatprep.subr.bf16.mxu1 %v6622_v48  ;;  %v6680_v13 = vld [vmem:[%s7061_s4 + $0x3b8] sm:$0xff]  }
 0xe73   : > { %4828 = vmatmul.mubr.bf16.vlgmr.msra.gmra.mrb[44].mxu1 %v7555_v49  ;;  %v6632_v49 = vld [vmem:[%s7061_s4 + $0x290] sm:$0xff]  }
 0xe74   : > { %6001 = vmatpush3.bf16.msra.mxu0 %v6623_v50  ;;  %6019 = vmatpush3.bf16.msra.mxu1 %v6624_v25 }
 0xe75   : > { %4909 = vmatprep.mubr.bf16.mxu1 %v3636_v4  ;;  %6002 = vmatprep.subr.bf16.mxu0 %v6625_v51  ;;  %v6650_v4 = vld [vmem:[%s7061_s4 + $0x348] sm:$0xff]  }
 0xe76   : > { %6020 = vmatprep.subr.bf16.mxu1 %v6626_v18 }
 0xe78   : > { %6003 = vmatpush3.bf16.msra.mxu0 %v6627_v28  ;;  %6021 = vmatpush3.bf16.msra.mxu1 %v6628_v61  ;;  %v5648_v28 = vld [vmem:[%s1485_s14] ss:$0 sm:$0xff] }
 0xe79   : > { %6004 = vmatprep.subr.bf16.mxu0 %v6629_v5  ;;  %6022 = vmatprep.subr.bf16.mxu1 %v6630_v63 }
 0xe7c   : > { %6005 = vmatpush3.bf16.msra.mxu0 %v6631_v14  ;;  %6023 = vmatpush3.bf16.msra.mxu1 %v6632_v49 }
 0xe7d   : > { %6006 = vmatprep.subr.bf16.mxu0 %v6633_v15  ;;  %6024 = vmatprep.subr.bf16.mxu1 %v6634_v54 }
 0xe80   : > { %6007 = vmatpush3.bf16.msra.mxu0 %v6635_v19  ;;  %6025 = vmatpush3.bf16.msra.mxu1 %v6636_v6 }
 0xe81   : > { %6008 = vmatprep.subr.bf16.mxu0 %v6637_v23  ;;  %6026 = vmatprep.subr.bf16.mxu1 %v6638_v0 }
 0xe84   : > { %6009 = vmatpush3.bf16.msra.mxu0 %v6639_v52  ;;  %6027 = vmatpush3.bf16.msra.mxu1 %v6640_v24 }
 0xe85   : > { %6010 = vmatprep.subr.bf16.mxu0 %v6641_v1  ;;  %6028 = vmatprep.subr.bf16.mxu1 %v6642_v31 }
 0xe88   : > { %6011 = vmatpush3.bf16.msra.mxu0 %v6643_v17  ;;  %6029 = vmatpush3.bf16.msra.mxu1 %v6644_v2 }
 0xe89   : > { %6030 = vmatprep.subr.bf16.mxu1 %v6645_v26  ;;  %6040 = vmatprep.subr.bf16.mxu0 %v6646_v32 }
 0xe8b   : > { %4869 = vmatmul.mubr.bf16.vlgmr.msra.gmra.mrb[48].mxu0 %v7537_v22  ;;  %v6656_v22 = vld [vmem:[%s7061_s4 + $0x380] sm:$0xff]  }
 0xe8c   : > { %6031 = vmatpush3.bf16.msra.mxu1 %v6647_v34  ;;  %6041 = vmatpush3.bf16.msra.mxu0 %v6648_v35 }
 0xe8d   : > { %4950 = vmatprep.mubr.bf16.mxu0 %v7559_v59  ;;  %6032 = vmatprep.subr.bf16.mxu1 %v6649_v36  ;;  %v6659_v59 = vld [vmem:[%s7061_s4 + $0x318] sm:$0xff]  }
 0xe8e   : > { %6042 = vmatprep.subr.bf16.mxu0 %v6650_v4 }
 0xe90   : > { %6033 = vmatpush3.bf16.msra.mxu1 %v6651_v7  ;;  %6043 = vmatpush3.bf16.msra.mxu0 %v6652_v8 }
 0xe91   : > { %6044 = vmatprep.subr.bf16.mxu0 %v6653_v9  ;;  %6062 = vmatprep.subr.bf16.mxu1 %v6654_v11 }
 0xe93   : > { %4910 = vmatmul.mubr.bf16.vlgmr.msra.gmra.mrb[48].mxu1 %v7572_v47  ;;  %v6664_v47 = vld [vmem:[%s7061_s4 + $0x390] sm:$0xff]  }
 0xe94   : > { %6045 = vmatpush3.bf16.msra.mxu0 %v6655_v12  ;;  %6063 = vmatpush3.bf16.msra.mxu1 %v6656_v22 }
 0xe95   : > { %4991 = vmatprep.mubr.bf16.mxu1 %v7586_v41  ;;  %6046 = vmatprep.subr.bf16.mxu0 %v6657_v56  ;;  %v6674_v41 = vld [vmem:[%s7061_s4 + $0x3e8] sm:$0xff]   ;;  %s7833_s4 = sld [smem:[#allocation39_spill]] (!%p5779_p5) }
 0xe96   : > { %6064 = vmatprep.subr.bf16.mxu1 %v6658_v53 }
 0xe98   : > { %6047 = vmatpush3.bf16.msra.mxu0 %v6659_v59  ;;  %6065 = vmatpush3.bf16.msra.mxu1 %v6660_v55 }
 0xe99   : > { %6048 = vmatprep.subr.bf16.mxu0 %v6661_v62  ;;  %6066 = vmatprep.subr.bf16.mxu1 %v6662_v60 }
 0xe9c   : > { %6049 = vmatpush3.bf16.msra.mxu0 %v6663_v27  ;;  %6067 = vmatpush3.bf16.msra.mxu1 %v6664_v47 }
 0xe9d   : > { %6050 = vmatprep.subr.bf16.mxu0 %v6665_v16  ;;  %6068 = vmatprep.subr.bf16.mxu1 %v6666_v20 }
 0xea0   : > { %6051 = vmatpush3.bf16.msra.mxu0 %v6667_v21  ;;  %6069 = vmatpush3.bf16.msra.mxu1 %v6668_v10 }
 0xea1   : > { %6052 = vmatprep.subr.bf16.mxu0 %v6669_v29  ;;  %6070 = vmatprep.subr.bf16.mxu1 %v6670_v30 }
 0xea4   : > { %6053 = vmatpush3.bf16.msra.mxu0 %v6671_v33  ;;  %6071 = vmatpush3.bf16.msra.mxu1 %v6672_v37 }
 0xea5   : > { %6054 = vmatprep.subr.bf16.mxu0 %v6673_v57  ;;  %6072 = vmatprep.subr.bf16.mxu1 %v6674_v41 }
 0xea8   : > { %6055 = vmatpush3.bf16.msra.mxu0 %v6675_v42  ;;  %6073 = vmatpush3.bf16.msra.mxu1 %v6676_v43 }
 0xea9   : > { %6074 = vmatprep.subr.bf16.mxu1 %v6677_v44 }
 0xeab   : > { %4951 = vmatmul.mubr.bf16.vlgmr.msra.gmra.mrb[52].mxu0 %v7557_v58 }
 0xeac   : > { %6075 = vmatpush3.bf16.msra.mxu1 %v6678_v45 }
 0xead   : > { %6076 = vmatprep.subr.bf16.mxu1 %v6679_v46 }
 0xeb0   : > { %6077 = vmatpush3.bf16.msra.mxu1 %v6680_v13 }
 0xeb3   : > { %4992 = vmatmul.mubr.bf16.vlgmr.msra.gmra.mrb[52].mxu1 %v7584_v38 }
 0xf1e   : > { %v5924_v3 = vpop.f32.mrb[40].mxu0 }
 0xf1f   : > { %v5925_v48 = vpop.f32.mrb[41].mxu0 }
 0xf20   : > { %v5926_v50 = vadd.f32 %v5925_v48, %v5924_v3  ;;  %v5927_v25 = vpop.f32.mrb[42].mxu0 }
 0xf21   : > { %v5928_v51 = vpop.f32.mrb[43].mxu0 }
 0xf22   : > { %v5929_v18 = vadd.f32 %v5928_v51, %v5927_v25  ;;  %v4707_v63 = vadd.f32 %v5926_v50, %v5648_v28 }
 0xf24   : > { %v4710_v15 = vadd.f32 %v5929_v18, %v5648_v28 }
 0xf26   : > { %v5946_v61 = vpop.f32.mrb[40].mxu1 }
 0xf27   : > { %v5947_v5 = vpop.f32.mrb[41].mxu1 }
 0xf28   : > { %v5948_v14 = vadd.f32 %v5947_v5, %v5946_v61  ;;  %v5949_v49 = vpop.f32.mrb[42].mxu1 }
 0xf29   : > { %v5950_v58 = vpop.f32.mrb[43].mxu1 }
 0xf2a   : > { %v4748_v54 = vadd.f32 %v5948_v14, %v4707_v63  ;;  %v5951_v19 = vadd.f32 %v5950_v58, %v5949_v49 }
 0xf2c   : > { %v4751_v6 = vadd.f32 %v5951_v19, %v4710_v15 }
 0xf3e   : > { %v5968_v23 = vpop.f32.mrb[44].mxu0 }
 0xf3f   : > { %v5969_v38 = vpop.f32.mrb[45].mxu0 }
 0xf40   : > { %v5970_v0 = vadd.f32 %v5969_v38, %v5968_v23  ;;  %v5971_v52 = vpop.f32.mrb[46].mxu0 }
 0xf41   : > { %v5972_v24 = vpop.f32.mrb[47].mxu0 }
 0xf42   : > { %v4789_v1 = vadd.f32 %v5970_v0, %v4748_v54  ;;  %v5973_v31 = vadd.f32 %v5972_v24, %v5971_v52 }
 0xf44   : > { %v4792_v17 = vadd.f32 %v5973_v31, %v4751_v6 }
 0xf46   : > { %v5990_v2 = vpop.f32.mrb[44].mxu1 }
 0xf47   : > { %v5991_v26 = vpop.f32.mrb[45].mxu1 }
 0xf48   : > { %v5992_v32 = vadd.f32 %v5991_v26, %v5990_v2  ;;  %v5993_v34 = vpop.f32.mrb[46].mxu1  ;;  %v5778_v2 = vld [vmem:[%s1491_s17] ss:$0 sm:$0xff]  ;;  %s7832_s17 = sld [smem:[#allocation37_spill]] (!%p5779_p5) }
 0xf49   : > { %v5994_v35 = vpop.f32.mrb[47].mxu1 }
 0xf4a   : > { %v4830_v36 = vadd.f32 %v5992_v32, %v4789_v1  ;;  %v5995_v4 = vadd.f32 %v5994_v35, %v5993_v34  ;;  %v5777_v1 = vld [vmem:[%s1488_s9] ss:$0 sm:$0xff]  ;;  %s7831_s9 = sld [smem:[#allocation36_spill]] (!%p5779_p5) }
 0xf4c   : > { %v4833_v7 = vadd.f32 %v5995_v4, %v4792_v17 }
 0xf5e   : > { %v6012_v8 = vpop.f32.mrb[48].mxu0 }
 0xf5f   : > { %v6013_v9 = vpop.f32.mrb[49].mxu0 }
 0xf60   : > { %v6014_v11 = vadd.f32 %v6013_v9, %v6012_v8  ;;  %v6015_v12 = vpop.f32.mrb[50].mxu0 }
 0xf61   : > { %v6016_v22 = vpop.f32.mrb[51].mxu0 }
 0xf62   : > { %v4871_v56 = vadd.f32 %v6014_v11, %v4830_v36  ;;  %v6017_v53 = vadd.f32 %v6016_v22, %v6015_v12 }
 0xf64   : > { %v4874_v59 = vadd.f32 %v6017_v53, %v4833_v7 }
 0xf66   : > { %v6034_v55 = vpop.f32.mrb[48].mxu1 }
 0xf67   : > { %v6035_v62 = vpop.f32.mrb[49].mxu1 }
 0xf68   : > { %v6036_v60 = vadd.f32 %v6035_v62, %v6034_v55  ;;  %v6037_v27 = vpop.f32.mrb[50].mxu1 }
 0xf69   : > { %v6038_v47 = vpop.f32.mrb[51].mxu1 }
 0xf6a   : > { %v4912_v16 = vadd.f32 %v6036_v60, %v4871_v56  ;;  %v6039_v20 = vadd.f32 %v6038_v47, %v6037_v27  ;;  %v6709_v60 = vld [vmem:[%s7830_s27] sm:$0xff] (!%p5779_p5)   ;;  %v6792_v27 = vmov (!%p5779_p5), 0.0   ;;  %v6710_v47 = vld [vmem:[%s7830_s27 + $0x8] sm:$0xff] (!%p5779_p5)  }
 0xf6b   : > { %6311 = vmatprep.subr.bf16.mxu0 (!%p5779_p5), %v6792_v27  ;;  %6315 = vmatprep.mubr.msk.bf16.mxu0 (!%p5779_p5), %vm6793_vm5, %v6792_v27 }
 0xf6c   : > { %v4915_v21 = vadd.f32 %v6039_v20, %v4874_v59  ;;  %6312 = vmatpush3.bf16.msra.mxu0 (!%p5779_p5), %v6709_v60 }
 0xf6d   : > { %6313 = vmatprep.subr.bf16.mxu0 (!%p5779_p5), %v6792_v27 }
 0xf70   : > { %6314 = vmatpush3.bf16.msra.mxu0 (!%p5779_p5), %v6710_v47 }
 0xf7e   : > { %v6056_v10 = vpop.f32.mrb[52].mxu0 }
 0xf7f   : > { %v6057_v29 = vpop.f32.mrb[53].mxu0 }
 0xf80   : > { %v6058_v30 = vadd.f32 %v6057_v29, %v6056_v10  ;;  %v6059_v33 = vpop.f32.mrb[54].mxu0 }
 0xf81   : > { %v6060_v37 = vpop.f32.mrb[55].mxu0 }
 0xf82   : > { %v4953_v57 = vadd.f32 %v6058_v30, %v4912_v16  ;;  %v6061_v41 = vadd.f32 %v6060_v37, %v6059_v33 }
 0xf84   : > { %v4956_v42 = vadd.f32 %v6061_v41, %v4915_v21 }
 0xf86   : > { %v6078_v43 = vpop.f32.mrb[52].mxu1 }
 0xf87   : > { %v6079_v44 = vpop.f32.mrb[53].mxu1 }
 0xf88   : > { %v6080_v45 = vadd.f32 %v6079_v44, %v6078_v43  ;;  %v6081_v46 = vpop.f32.mrb[54].mxu1  ;;  %v5781_v44 = vld [vmem:[%s7832_s17] ss:$0 sm:$0xff] (!%p5779_p5) }
 0xf89   : > { %v6082_v13 = vpop.f32.mrb[55].mxu1 }
 0xf8a   : > { %v4994_v3 = vadd.f32 %v6080_v45, %v4953_v57  ;;  %v6083_v48 = vadd.f32 %v6082_v13, %v6081_v46  ;;  %v5780_v57 = vld [vmem:[%s7831_s9] ss:$0 sm:$0xff] (!%p5779_p5) }
 0xf8c   : > { %v4997_v50 = vadd.f32 %v6083_v48, %v4956_v42  ;;  %v5000_v25 = vadd.f32 %v4994_v3, %v7420_v39  ;;  %v5782_v48 = vld [vmem:[%s7833_s4] ss:$0 sm:$0xff] (!%p5779_p5) }
 0xf8e   : > { %v5004_v51 = vsel %vm1550_vm2, %v5000_v25, 0.0  ;;  %v5001_v18 = vadd.f32 %v4997_v50, %v7422_v40 }
 0xf8f   : > { %5005 = vadd.xlane.f32.xlu0 %v5004_v51 }
 0xf90   : > { %v5007_v28 = vsel %vm1550_vm2, %v5001_v18, 0.0 }
 0xf91   : > { %5008 = vadd.xlane.f32.xlu1 %v5007_v28 }
0x101c   : > { %v5006_v61 = vpop.xlane.xlu0 %5005 }
0x101d   : > { %v5010_v5 = vmul.f32 0.03125, %v5006_v61 }
0x101e   : > { %v5009_v63 = vpop.xlane.xlu1 %5008 }
0x101f   : > { %v5012_v14 = vsub.f32 %v5000_v25, %v5010_v5  ;;  %v5011_v49 = vmul.f32 0.03125, %v5009_v63 }
0x1021   : > { %v5013_v58 = vsub.f32 %v5001_v18, %v5011_v49  ;;  %v5014_v15 = vmul.f32 %v5012_v14, %v5012_v14 }
0x1023   : > { %v5016_v54 = vsel %vm1550_vm2, %v5014_v15, 0.0  ;;  %v5015_v39 = vmul.f32 %v5013_v58, %v5013_v58 }
0x1024   : > { %5017 = vadd.xlane.f32.xlu0 %v5016_v54 }
0x1025   : > { %v5019_v40 = vsel %vm1550_vm2, %v5015_v39, 0.0 }
0x1026   : > { %5020 = vadd.xlane.f32.xlu1 %v5019_v40 }
0x10b1   : > { %v5018_v19 = vpop.xlane.xlu0 %5017 }
0x10b2   : > { %v5022_v6 = vmul.f32 0.03125, %v5018_v19 }
0x10b3   : > { %v5021_v23 = vpop.xlane.xlu1 %5020 }
0x10b4   : > { %v5024_v38 = vadd.f32 1e-05, %v5022_v6  ;;  %v5023_v0 = vmul.f32 0.03125, %v5021_v23 }
0x10b6   : > { %6705 = vrsqrt.f32 %v5024_v38  ;;  %v5025_v52 = vadd.f32 1e-05, %v5023_v0 }
0x10b8   : > { %6707 = vrsqrt.f32 %v5025_v52 }
0x10c0   : > { %v6706_v24 = vpop.eup %6705 }
0x10c1   : > { %v5028_v31 = vmul.f32 %v6706_v24, %v5012_v14 }
0x10c2   : > { %v6708_v17 = vpop.eup %6707 }
0x10c3   : > { %v5036_v26 = vmul.f32 %v5777_v1, %v5028_v31  ;;  %v5029_v32 = vmul.f32 %v6708_v17, %v5013_v58  ;;  %5051 = sbr.rel (%p5779_p5) target bundleno = 4831 (0x12df), region = 172 }
0x10c5   : > { %v5044_v34 = vadd.f32 %v5778_v2, %v5036_v26  ;;  %v5037_v35 = vmul.f32 %v5777_v1, %v5029_v32 }
0x10c7   : > { %5046 = vst.msk [vmem:[#allocation2] sm:$0xff] %vm1550_vm2, %v5044_v34  ;;  %v5045_v36 = vadd.f32 %v5778_v2, %v5037_v35  ;;  %v5054_v4 = vsel (!%p5779_p5), %vm1550_vm2, %v5044_v34, 0.0 }
0x10c8   : > { %5055 = vadd.xlane.f32.xlu0 (!%p5779_p5), %v5054_v4 }
0x10c9   : > { %5047 = vst.msk [vmem:[#allocation2 + $0x8] sm:$0xff] %vm1550_vm2, %v5045_v36  ;;  %v5057_v7 = vsel (!%p5779_p5), %vm1550_vm2, %v5045_v36, 0.0 }
0x10cc   : > { %5058 = vadd.xlane.f32.xlu0 %v5057_v7 }
0x1155   : > { %v5056_v8 = vpop.xlane.xlu0 %5055 }
0x1156   : > { %v5060_v9 = vmul.f32 0.03125, %v5056_v8 }
0x1158   : > { %v5062_v11 = vsub.f32 %v5044_v34, %v5060_v9 }
0x1159   : > { %v5059_v12 = vpop.xlane.xlu0 %5058 }
0x115a   : > { %v5061_v22 = vmul.f32 0.03125, %v5059_v12  ;;  %v5064_v56 = vmul.f32 %v5062_v11, %v5062_v11 }
0x115c   : > { %v5063_v53 = vsub.f32 %v5045_v36, %v5061_v22  ;;  %v5066_v59 = vsel %vm1550_vm2, %v5064_v56, 0.0 }
0x115d   : > { %5067 = vadd.xlane.f32.xlu1 %v5066_v59 }
0x115e   : > { %v5065_v55 = vmul.f32 %v5063_v53, %v5063_v53 }
0x1160   : > { %v5069_v62 = vsel %vm1550_vm2, %v5065_v55, 0.0 }
0x1161   : > { %5070 = vadd.xlane.f32.xlu1 %v5069_v62 }
0x11ea   : > { %v5068_v16 = vpop.xlane.xlu1 %5067 }
0x11eb   : > { %v5072_v20 = vmul.f32 0.03125, %v5068_v16 }
0x11ed   : > { %v5074_v21 = vadd.f32 1e-05, %v5072_v20 }
0x11ee   : > { %v5071_v10 = vpop.xlane.xlu1 %5070 }
0x11ef   : > { %6711 = vrsqrt.f32 %v5074_v21  ;;  %v5073_v29 = vmul.f32 0.03125, %v5071_v10 }
0x11f1   : > { %v5075_v30 = vadd.f32 1e-05, %v5073_v29 }
0x11f3   : > { %6713 = vrsqrt.f32 %v5075_v30 }
0x11f9   : > { %v6712_v33 = vpop.eup %6711 }
0x11fa   : > { %v5078_v37 = vmul.f32 %v6712_v33, %v5062_v11 }
0x11fc   : > { %v5086_v43 = vmul.f32 %v5780_v57, %v5078_v37 }
0x11fd   : > { %v6714_v41 = vpop.eup %6713 }
0x11fe   : > { %v5079_v42 = vmul.f32 %v6714_v41, %v5063_v53  ;;  %v5094_v46 = vadd.f32 %v5781_v44, %v5086_v43 }
0x1200   : > { %v5087_v45 = vmul.f32 %v5780_v57, %v5079_v42 }
0x1202   : > { %v5095_v13 = vadd.f32 %v5781_v44, %v5087_v45 }
0x1204   : > { %v5096_v3 = vpack.c.bf16 %v5095_v13, %v5094_v46 }
0x1206   : > { %6316 = vmatmul.mubr.msk.bf16.vlgmr.msra.gmra.mrb[0].mxu0 %vm1550_vm2, %v5096_v3 }
0x12d9   : > { %v5157_v50 = vpop.f32.mrb[0].mxu0 }
0x12da   : > { %v5158_v25 = vadd.f32 %v5782_v48, %v5157_v50  ;;  %v6317_v51 = vpop.f32.mrb[1].mxu0 }
0x12db   : > { %v5160_v18 = vpop.f32.mrb[2].mxu0 }
0x12dc   : > { %5165 = vst.msk [vmem:[#allocation3] sm:$0xff] %vm5164_vm6, %v5158_v25  ;;  %v5161_v28 = vadd.f32 %v5782_v48, %v5160_v18  ;;  %v6318_v61 = vpop.f32.mrb[3].mxu0 }
0x12de   : > { %5166 = vst.msk [vmem:[#allocation3 + $0x8] sm:$0xff] %vm5164_vm6, %v5161_v28 }
0x12df PF: > { %s7834_s0 = sld [smem:[#allocation42_spill]]  ;;  %s6794_s23 = smov [#allocation3]  }
0x12e0   : > { %s5173_s26 = sshll.u32 %s6794_s23, 4  ;;  %s5174_s26 = int_to_ptr.vmem [resolvable:$true] %s5173_s26 }
0x12e1   : > { %s6715_s25 = scalar_lea.vmem %s5174_s26, 256  ;;  %p6722_p10 = scmp.lt.s32.totalorder %s5174_s26, %s5174_s26 }
0x12e2   : > { %p6716_p7 = scmp.ne.s32.totalorder %s5174_s26, %s6715_s25  ;;  %p6723_p11 = scmp.lt.s32.totalorder %s6715_s25, %s6715_s25 }
0x12e4   : > { %p6724_p12 = por %p6723_p11, %p6722_p10 }
0x12e5   : > { %p6483_p6 = scmp.eq.s32.totalorder %s7834_s0, 5 }
0x12e7   : > { %p6717_p8 = pnand %p6716_p7, %p6483_p6 }
0x12e9   : > { %p6718_p9 = pneg %p6717_p8 }
0x12eb   : > { %p6725_p13 = pnand %p6724_p12, %p6718_p9 }
0x12ed   : > { %6728 = shalt.err (!%p6725_p13)
}
0x12ee   : > { %s7835_s8 = sld [smem:[#allocation40_spill]] }
0x12f4   : > { %s6729_s5 = scalar_lea.hbm %s7835_s8, 256 }
0x12f5   : > { %p6730_p0 = scmp.ne.s32.totalorder %s7835_s8, %s6729_s5  ;;  %p6735_p3 = scmp.lt.u32.totalorder %s6729_s5, %s7835_s8 }
0x12f7   : > { %p6731_p1 = pnand %p6730_p0, %p6483_p6 }
0x12f9   : > { %p6732_p2 = pneg %p6731_p1 }
0x12fb   : > { %p6737_p4 = pnand %p6735_p3, %p6732_p2 }
0x12fd   : > { %6740 = shalt.err (!%p6737_p4)
}
0x12fe   : > { %s6795_s19 = smov 128   ;;  %s6796_s28 = smov 8  }
0x12ff   : > { %6480 = dma.vmem_to_hbm [thread:$0]  (%p6483_p6), %s5174_s26, 256, %s7835_s8, [#allocation4], %s6795_s19, %s6795_s19, %s6796_s28  }
0x1300   : > { %6746 = dma.done.wait (%p6483_p6), [#allocation4], 256  }
0x1301   : > { %6748 = vsyncadd (%p6483_p6), [#allocation4], 4294967040 }
0x1302 PF: > { %s7836_s10 = sld [smem:[#allocation41_spill]] }
0x1308   : > { %s84_s28 = sadd.s32 1, %s7836_s10  }
0x1309   : > { %p81_p5 = scmp.ge.s32.totalorder %s84_s28, 8  }
0x130b   :  { %83 = sbr.rel (!%p81_p5) target bundleno = 86 (0x56), region = 310 }
0x1312   :  { %5189 = vsyncpa [#allocation4], 1 }
0x1313   :  { %5191 = vsyncpa [#allocation4 + $0x1], 1 }

</bundles_post_ra>
